<compile_context>
chip_gen: v6e
topology: v6e:2x2x1
jax: 0.10.0
libtpu: 0.0.40
codegen_flags: <defaults>
</compile_context>

<pallas_src>
import jax
import jax.numpy as jnp
import numpy as np
from jax.experimental import pallas as pl
from jax.experimental.pallas import tpu as pltpu


def _round_up(x, m):
    return ((x + m - 1) // m) * m


# ---------------------------------------------------------------------------
# Fused kernel: num_conv x (conv3x3 'same' + ReLU) -> maxpool 2x2
# ---------------------------------------------------------------------------

def _vgg_block_kernel(x_ref, w_ref, b_ref, o_ref, buf_a, buf_b, pool_buf):
    # x_ref    : (1, H, W, Cin)          bf16  one batch element, compact channels
    # w_ref    : (num_conv, 9, CP, CP)   bf16  per-layer, per-tap weights
    # b_ref    : (num_conv, CP)          f32   per-layer bias
    # o_ref    : (1, H/2, W/2, CP)       f32   pooled output (lane-dense CP)
    # buf_a/b  : (H+2, W+2, CP)          bf16  padded activation ping-pong scratch
    # pool_buf : (H/2 * W, CP)           f32   small staging buffer for the pool
    H, W, Cin = x_ref.shape[1], x_ref.shape[2], x_ref.shape[3]
    CP = o_ref.shape[3]
    num_conv = w_ref.shape[0]
    H2, W2 = H // 2, W // 2

    # buf_a: interior lanes >= Cin must be zero for layer 0 (scratch VMEM is
    # uninitialized and could hold NaNs), so zero it fully (bf16 => cheap),
    # then drop the compact input into the first Cin lanes of the interior.
    buf_a[...] = jnp.zeros_like(buf_a)
    buf_a[1:H + 1, 1:W + 1, 0:Cin] = x_ref[0]

    # buf_b: only the 1-pixel halo ring has to be zero ('same' padding); its
    # interior is fully overwritten by every layer that writes into it.
    if num_conv > 1:
        zrow = jnp.zeros((1, W + 2, CP), jnp.bfloat16)
        zcol = jnp.zeros((H + 2, 1, CP), jnp.bfloat16)
        buf_b[0:1, :, :] = zrow
        buf_b[H + 1:H + 2, :, :] = zrow
        buf_b[:, 0:1, :] = zcol
        buf_b[:, W + 1:W + 2, :] = zcol

    bufs = (buf_a, buf_b)
    for i in range(num_conv):                       # static Python unroll
        src = bufs[i % 2]
        dst = bufs[(i + 1) % 2]

        # 9 shifted-slice matmuls (K = CP) accumulated in f32 — no im2col slab.
        acc = None
        for ky in range(3):
            for kx in range(3):
                tap = src[ky:ky + H, kx:kx + W, :].reshape(H * W, CP)   # bf16
                part = jnp.dot(tap, w_ref[i, ky * 3 + kx, :, :],
                               preferred_element_type=jnp.float32)
                acc = part if acc is None else acc + part

        y = jnp.maximum(acc + b_ref[i:i + 1, :], 0.0)   # bias + ReLU in f32

        if i + 1 < num_conv:
            # Next layer's input: overwrite the interior of the other buffer
            # directly in bf16 (that's the precision the MXU sees anyway).
            dst[1:H + 1, 1:W + 1, :] = y.reshape(H, W, CP).astype(jnp.bfloat16)
        else:
            # Fused 2x2 max-pool epilogue.
            # Row pairs: (H*W, CP) -> (H2, 2W, CP) is layout-preserving
            # (W % 8 == 0); the two half-slices are sublane-aligned.
            y2 = y.reshape(H2, 2 * W, CP)
            rmax = jnp.maximum(y2[:, :W, :], y2[:, W:, :])      # (H2, W, CP)
            # Column pairs: stage only the (already row-reduced) half-size
            # result, then strided sublane reads straight into o_ref.
            pool_buf[...] = rmax.reshape(H2 * W, CP)
            c0 = pool_buf[pl.ds(0, H2 * W2, stride=2), :]
            c1 = pool_buf[pl.ds(1, H2 * W2, stride=2), :]
            o_ref[0] = jnp.maximum(c0, c1).reshape(H2, W2, CP)


# ---------------------------------------------------------------------------
# Wrapper (public I/O is NCHW / float32, like the PyTorch module)
# ---------------------------------------------------------------------------

def vgg_block_forward(x_nchw, params):
    """Matches VGGBlock.forward: num_conv x (conv3x3 same + ReLU) then MaxPool2d(2,2)."""
    N, Cin, H, W = x_nchw.shape
    num_conv = len(params)
    Cout = params[0][0].shape[-1]
    assert H % 2 == 0 and W % 2 == 0, "MaxPool2d(2,2) needs even H and W"

    CP = _round_up(max(Cin, Cout), 128)      # lane-dense channel padding
    H2, W2 = H // 2, W // 2

    # NCHW -> NHWC, bf16 activations for the MXU.  Channels stay compact (Cin)
    # in HBM — the kernel pads lanes when staging into VMEM scratch.
    x = jnp.transpose(x_nchw, (0, 2, 3, 1)).astype(jnp.bfloat16)

    # Per-layer weights: HWIO, channel-padded to CP, split per tap -> (9, CP, CP).
    ws, bs = [], []
    cin = Cin
    for (w, b) in params:                    # w: (3,3,cin,Cout), b: (Cout,)
        w_p = jnp.pad(w, ((0, 0), (0, 0), (0, CP - cin), (0, CP - Cout)))
        ws.append(w_p.reshape(9, CP, CP).astype(jnp.bfloat16))
        bs.append(jnp.pad(b, (0, CP - Cout)).astype(jnp.float32))
        cin = Cout
    w_all = jnp.stack(ws)                    # (num_conv, 9, CP, CP) bf16
    b_all = jnp.stack(bs)                    # (num_conv, CP)        f32

    # VMEM budget: scratch + double-buffered operand blocks, with headroom and
    # an explicit cap below v7x's 64 MiB physical per-core VMEM.
    bf16, f32 = 2, 4
    scratch_bytes = 2 * (H + 2) * (W + 2) * CP * bf16 + (H2 * W) * CP * f32
    block_bytes = (H * W * Cin * bf16
                   + num_conv * 9 * CP * CP * bf16
                   + num_conv * CP * f32
                   + H2 * W2 * CP * f32)
    est = scratch_bytes + 2 * block_bytes
    if est > 48 * 2**20:
        # TODO(synk): H-strip tiling (strip + num_conv-row halo) for real VGG sizes.
        raise ValueError(f"VGGBlock Pallas kernel would need ~{est} B of VMEM; "
                         "add H-strip tiling before using these shapes")
    vmem_limit = int(min(max(32 * 2**20, est + 8 * 2**20), 48 * 2**20))

    out = pl.pallas_call(
        _vgg_block_kernel,
        out_shape=jax.ShapeDtypeStruct((N, H2, W2, CP), jnp.float32),
        grid=(N,),
        in_specs=[
            pl.BlockSpec((1, H, W, Cin), lambda n: (n, 0, 0, 0)),
            pl.BlockSpec((num_conv, 9, CP, CP), lambda n: (0, 0, 0, 0)),
            pl.BlockSpec((num_conv, CP), lambda n: (0, 0)),
        ],
        out_specs=pl.BlockSpec((1, H2, W2, CP), lambda n: (n, 0, 0, 0)),
        scratch_shapes=[
            pltpu.VMEM((H + 2, W + 2, CP), jnp.bfloat16),
            pltpu.VMEM((H + 2, W + 2, CP), jnp.bfloat16),
            pltpu.VMEM((H2 * W, CP), jnp.float32),
        ],
        compiler_params=pltpu.CompilerParams(
            dimension_semantics=("parallel",),
            vmem_limit_bytes=vmem_limit,
        ),
    )(x, w_all, b_all)

    out = out[:, :, :, :Cout]                # drop channel padding
    return jnp.transpose(out, (0, 3, 1, 2))  # NHWC -> NCHW


# ---------------------------------------------------------------------------
# Parameters + pure-JAX reference (same precision policy as the kernel)
# ---------------------------------------------------------------------------

def init_vgg_block_params(key, in_channels, out_channels, num_conv):
    """Deterministic init matching nn.Conv2d default (uniform +-1/sqrt(fan_in))."""
    params = []
    cin = in_channels
    for _ in range(num_conv):
        key, kw, kb = jax.random.split(key, 3)
        fan_in = cin * 3 * 3
        bound = 1.0 / np.sqrt(fan_in)
        w = jax.random.uniform(kw, (3, 3, cin, out_channels), jnp.float32,
                               minval=-bound, maxval=bound)   # HWIO
        b = jax.random.uniform(kb, (out_channels,), jnp.float32,
                               minval=-bound, maxval=bound)
        params.append((w, b))
        cin = out_channels
    return params


def vgg_block_reference(x_nchw, params):
    """XLA reference with the same precision policy (bf16 matmul inputs, f32 accum)."""
    y = jnp.transpose(x_nchw, (0, 2, 3, 1))
    for w, b in params:
        y = jax.lax.conv_general_dilated(
            y.astype(jnp.bfloat16), w.astype(jnp.bfloat16),
            window_strides=(1, 1), padding="SAME",
            dimension_numbers=("NHWC", "HWIO", "NHWC"),
            preferred_element_type=jnp.float32)
        y = jnp.maximum(y + b, 0.0)
    y = jax.lax.reduce_window(y, -jnp.inf, jax.lax.max,
                              (1, 2, 2, 1), (1, 2, 2, 1), "VALID")
    return jnp.transpose(y, (0, 3, 1, 2))


if __name__ == "__main__":
    key = jax.random.PRNGKey(0)
    k_in, k_param = jax.random.split(key)

    N, Cin, Cout, H, W, num_conv = 2, 4, 8, 16, 16, 2
    x = jax.random.normal(k_in, (N, Cin, H, W), jnp.float32)      # NCHW input
    params = init_vgg_block_params(k_param, Cin, Cout, num_conv)

    out = jax.block_until_ready(vgg_block_forward(x, params))
    assert out.shape == (N, Cout, H // 2, W // 2), out.shape

    ref = jax.block_until_ready(vgg_block_reference(x, params))
    # Both paths round activations to bf16 at each conv input and accumulate
    # in f32; remaining diffs are summation-order / bf16-rounding level.
    np.testing.assert_allclose(np.asarray(out), np.asarray(ref),
                               atol=1e-3, rtol=1e-3)

    print("KERNEL_OK")
</pallas_src>

<mosaic_0001>
module attributes {stable_mosaic.version = 11 : i64} {
  func.func @_vgg_block_kernel(%arg0: i32, %arg1: memref<1x16x16x4xbf16, #tpu.memory_space<vmem>>, %arg2: memref<2x9x128x128xbf16, #tpu.memory_space<vmem>>, %arg3: memref<2x128xf32, #tpu.memory_space<vmem>>, %arg4: memref<1x8x8x128xf32, #tpu.memory_space<vmem>>, %arg5: memref<18x18x128xbf16, #tpu.memory_space<vmem>>, %arg6: memref<18x18x128xbf16, #tpu.memory_space<vmem>>, %arg7: memref<128x128xf32, #tpu.memory_space<vmem>>) attributes {dimension_semantics = [#tpu.dimension_semantics<parallel>], iteration_bounds = array<i64: 2>, scalar_prefetch = 0 : i64, scratch_operands = 3 : i64, tpu.core_type = #tpu.core_type<tc>, window_params = [{transform_indices = @transform_0, window_bounds = array<i64: 1, 16, 16, 4>}, {pipeline_mode = #tpu.pipeline_mode<synchronous>, transform_indices = @transform_1, window_bounds = array<i64: 2, 9, 128, 128>}, {pipeline_mode = #tpu.pipeline_mode<synchronous>, transform_indices = @transform_2, window_bounds = array<i64: 2, 128>}, {transform_indices = @transform_3, window_bounds = array<i64: 1, 8, 8, 128>}]} {
    %cst = arith.constant 0.000000e+00 : bf16
    %0 = vector.broadcast %cst : bf16 to vector<18x18x128xbf16>
    %c0 = arith.constant 0 : index
    %c0_0 = arith.constant 0 : index
    %c0_1 = arith.constant 0 : index
    %1 = vector.load %arg5[%c0, %c0_0, %c0_1] : memref<18x18x128xbf16, #tpu.memory_space<vmem>>, vector<18x18x128xbf16>
    tpu.vector_store %arg5[%c0, %c0_0, %c0_1], %0 {strides = array<i32>} : memref<18x18x128xbf16, #tpu.memory_space<vmem>>, vector<18x18x128xbf16>,
    %c0_2 = arith.constant 0 : index
    %c0_3 = arith.constant 0 : index
    %c0_4 = arith.constant 0 : index
    %c0_5 = arith.constant 0 : index
    %2 = vector.load %arg1[%c0_2, %c0_3, %c0_4, %c0_5] : memref<1x16x16x4xbf16, #tpu.memory_space<vmem>>, vector<1x16x16x4xbf16>
    %3 = vector.shape_cast %2 : vector<1x16x16x4xbf16> to vector<16x16x4xbf16>
    %c1 = arith.constant 1 : index
    %c1_6 = arith.constant 1 : index
    %c0_7 = arith.constant 0 : index
    %4 = vector.load %arg5[%c1, %c1_6, %c0_7] : memref<18x18x128xbf16, #tpu.memory_space<vmem>>, vector<16x16x4xbf16>
    tpu.vector_store %arg5[%c1, %c1_6, %c0_7], %3 {strides = array<i32>} : memref<18x18x128xbf16, #tpu.memory_space<vmem>>, vector<16x16x4xbf16>,
    %cst_8 = arith.constant 0.000000e+00 : bf16
    %5 = vector.broadcast %cst_8 : bf16 to vector<1x18x128xbf16>
    %cst_9 = arith.constant 0.000000e+00 : bf16
    %6 = vector.broadcast %cst_9 : bf16 to vector<18x1x128xbf16>
    %c0_10 = arith.constant 0 : index
    %c0_11 = arith.constant 0 : index
    %c0_12 = arith.constant 0 : index
    %7 = vector.load %arg6[%c0_10, %c0_11, %c0_12] : memref<18x18x128xbf16, #tpu.memory_space<vmem>>, vector<1x18x128xbf16>
    tpu.vector_store %arg6[%c0_10, %c0_11, %c0_12], %5 {strides = array<i32>} : memref<18x18x128xbf16, #tpu.memory_space<vmem>>, vector<1x18x128xbf16>,
    %c17 = arith.constant 17 : index
    %c0_13 = arith.constant 0 : index
    %c0_14 = arith.constant 0 : index
    %8 = vector.load %arg6[%c17, %c0_13, %c0_14] : memref<18x18x128xbf16, #tpu.memory_space<vmem>>, vector<1x18x128xbf16>
    tpu.vector_store %arg6[%c17, %c0_13, %c0_14], %5 {strides = array<i32>} : memref<18x18x128xbf16, #tpu.memory_space<vmem>>, vector<1x18x128xbf16>,
    %c0_15 = arith.constant 0 : index
    %c0_16 = arith.constant 0 : index
    %c0_17 = arith.constant 0 : index
    %9 = vector.load %arg6[%c0_15, %c0_16, %c0_17] : memref<18x18x128xbf16, #tpu.memory_space<vmem>>, vector<18x1x128xbf16>
    tpu.vector_store %arg6[%c0_15, %c0_16, %c0_17], %6 {strides = array<i32>} : memref<18x18x128xbf16, #tpu.memory_space<vmem>>, vector<18x1x128xbf16>,
    %c0_18 = arith.constant 0 : index
    %c17_19 = arith.constant 17 : index
    %c0_20 = arith.constant 0 : index
    %10 = vector.load %arg6[%c0_18, %c17_19, %c0_20] : memref<18x18x128xbf16, #tpu.memory_space<vmem>>, vector<18x1x128xbf16>
    tpu.vector_store %arg6[%c0_18, %c17_19, %c0_20], %6 {strides = array<i32>} : memref<18x18x128xbf16, #tpu.memory_space<vmem>>, vector<18x1x128xbf16>,
    %c0_21 = arith.constant 0 : index
    %c0_22 = arith.constant 0 : index
    %c0_23 = arith.constant 0 : index
    %11 = vector.load %arg5[%c0_21, %c0_22, %c0_23] : memref<18x18x128xbf16, #tpu.memory_space<vmem>>, vector<16x16x128xbf16>
    %12 = vector.shape_cast %11 : vector<16x16x128xbf16> to vector<256x128xbf16>
    %c0_24 = arith.constant 0 : index
    %c0_25 = arith.constant 0 : index
    %c0_26 = arith.constant 0 : index
    %c0_27 = arith.constant 0 : index
    %13 = vector.load %arg2[%c0_24, %c0_25, %c0_26, %c0_27] : memref<2x9x128x128xbf16, #tpu.memory_space<vmem>>, vector<1x1x128x128xbf16>
    %14 = vector.shape_cast %13 : vector<1x1x128x128xbf16> to vector<128x128xbf16>
    %cst_28 = arith.constant dense<0.000000e+00> : vector<256x128xf32>
    %15 = tpu.matmul %12, %14, %cst_28 {dimension_numbers = #tpu.dot_dimension_numbers<[1], [0], [0], [1], [0, 0, 1, 1], [], []>} : vector<256x128xbf16>, vector<128x128xbf16>, vector<256x128xf32> -> vector<256x128xf32>
    %c0_29 = arith.constant 0 : index
    %c1_30 = arith.constant 1 : index
    %c0_31 = arith.constant 0 : index
    %16 = vector.load %arg5[%c0_29, %c1_30, %c0_31] : memref<18x18x128xbf16, #tpu.memory_space<vmem>>, vector<16x16x128xbf16>
    %17 = vector.shape_cast %16 : vector<16x16x128xbf16> to vector<256x128xbf16>
    %c0_32 = arith.constant 0 : index
    %c1_33 = arith.constant 1 : index
    %c0_34 = arith.constant 0 : index
    %c0_35 = arith.constant 0 : index
    %18 = vector.load %arg2[%c0_32, %c1_33, %c0_34, %c0_35] : memref<2x9x128x128xbf16, #tpu.memory_space<vmem>>, vector<1x1x128x128xbf16>
    %19 = vector.shape_cast %18 : vector<1x1x128x128xbf16> to vector<128x128xbf16>
    %cst_36 = arith.constant dense<0.000000e+00> : vector<256x128xf32>
    %20 = tpu.matmul %17, %19, %cst_36 {dimension_numbers = #tpu.dot_dimension_numbers<[1], [0], [0], [1], [0, 0, 1, 1], [], []>} : vector<256x128xbf16>, vector<128x128xbf16>, vector<256x128xf32> -> vector<256x128xf32>
    %21 = arith.addf %15, %20 : vector<256x128xf32>
    %c0_37 = arith.constant 0 : index
    %c2 = arith.constant 2 : index
    %c0_38 = arith.constant 0 : index
    %22 = vector.load %arg5[%c0_37, %c2, %c0_38] : memref<18x18x128xbf16, #tpu.memory_space<vmem>>, vector<16x16x128xbf16>
    %23 = vector.shape_cast %22 : vector<16x16x128xbf16> to vector<256x128xbf16>
    %c0_39 = arith.constant 0 : index
    %c2_40 = arith.constant 2 : index
    %c0_41 = arith.constant 0 : index
    %c0_42 = arith.constant 0 : index
    %24 = vector.load %arg2[%c0_39, %c2_40, %c0_41, %c0_42] : memref<2x9x128x128xbf16, #tpu.memory_space<vmem>>, vector<1x1x128x128xbf16>
    %25 = vector.shape_cast %24 : vector<1x1x128x128xbf16> to vector<128x128xbf16>
    %cst_43 = arith.constant dense<0.000000e+00> : vector<256x128xf32>
    %26 = tpu.matmul %23, %25, %cst_43 {dimension_numbers = #tpu.dot_dimension_numbers<[1], [0], [0], [1], [0, 0, 1, 1], [], []>} : vector<256x128xbf16>, vector<128x128xbf16>, vector<256x128xf32> -> vector<256x128xf32>
    %27 = arith.addf %21, %26 : vector<256x128xf32>
    %c1_44 = arith.constant 1 : index
    %c0_45 = arith.constant 0 : index
    %c0_46 = arith.constant 0 : index
    %28 = vector.load %arg5[%c1_44, %c0_45, %c0_46] : memref<18x18x128xbf16, #tpu.memory_space<vmem>>, vector<16x16x128xbf16>
    %29 = vector.shape_cast %28 : vector<16x16x128xbf16> to vector<256x128xbf16>
    %c0_47 = arith.constant 0 : index
    %c3 = arith.constant 3 : index
    %c0_48 = arith.constant 0 : index
    %c0_49 = arith.constant 0 : index
    %30 = vector.load %arg2[%c0_47, %c3, %c0_48, %c0_49] : memref<2x9x128x128xbf16, #tpu.memory_space<vmem>>, vector<1x1x128x128xbf16>
    %31 = vector.shape_cast %30 : vector<1x1x128x128xbf16> to vector<128x128xbf16>
    %cst_50 = arith.constant dense<0.000000e+00> : vector<256x128xf32>
    %32 = tpu.matmul %29, %31, %cst_50 {dimension_numbers = #tpu.dot_dimension_numbers<[1], [0], [0], [1], [0, 0, 1, 1], [], []>} : vector<256x128xbf16>, vector<128x128xbf16>, vector<256x128xf32> -> vector<256x128xf32>
    %33 = arith.addf %27, %32 : vector<256x128xf32>
    %c1_51 = arith.constant 1 : index
    %c1_52 = arith.constant 1 : index
    %c0_53 = arith.constant 0 : index
    %34 = vector.load %arg5[%c1_51, %c1_52, %c0_53] : memref<18x18x128xbf16, #tpu.memory_space<vmem>>, vector<16x16x128xbf16>
    %35 = vector.shape_cast %34 : vector<16x16x128xbf16> to vector<256x128xbf16>
    %c0_54 = arith.constant 0 : index
    %c4 = arith.constant 4 : index
    %c0_55 = arith.constant 0 : index
    %c0_56 = arith.constant 0 : index
    %36 = vector.load %arg2[%c0_54, %c4, %c0_55, %c0_56] : memref<2x9x128x128xbf16, #tpu.memory_space<vmem>>, vector<1x1x128x128xbf16>
    %37 = vector.shape_cast %36 : vector<1x1x128x128xbf16> to vector<128x128xbf16>
    %cst_57 = arith.constant dense<0.000000e+00> : vector<256x128xf32>
    %38 = tpu.matmul %35, %37, %cst_57 {dimension_numbers = #tpu.dot_dimension_numbers<[1], [0], [0], [1], [0, 0, 1, 1], [], []>} : vector<256x128xbf16>, vector<128x128xbf16>, vector<256x128xf32> -> vector<256x128xf32>
    %39 = arith.addf %33, %38 : vector<256x128xf32>
    %c1_58 = arith.constant 1 : index
    %c2_59 = arith.constant 2 : index
    %c0_60 = arith.constant 0 : index
    %40 = vector.load %arg5[%c1_58, %c2_59, %c0_60] : memref<18x18x128xbf16, #tpu.memory_space<vmem>>, vector<16x16x128xbf16>
    %41 = vector.shape_cast %40 : vector<16x16x128xbf16> to vector<256x128xbf16>
    %c0_61 = arith.constant 0 : index
    %c5 = arith.constant 5 : index
    %c0_62 = arith.constant 0 : index
    %c0_63 = arith.constant 0 : index
    %42 = vector.load %arg2[%c0_61, %c5, %c0_62, %c0_63] : memref<2x9x128x128xbf16, #tpu.memory_space<vmem>>, vector<1x1x128x128xbf16>
    %43 = vector.shape_cast %42 : vector<1x1x128x128xbf16> to vector<128x128xbf16>
    %cst_64 = arith.constant dense<0.000000e+00> : vector<256x128xf32>
    %44 = tpu.matmul %41, %43, %cst_64 {dimension_numbers = #tpu.dot_dimension_numbers<[1], [0], [0], [1], [0, 0, 1, 1], [], []>} : vector<256x128xbf16>, vector<128x128xbf16>, vector<256x128xf32> -> vector<256x128xf32>
    %45 = arith.addf %39, %44 : vector<256x128xf32>
    %c2_65 = arith.constant 2 : index
    %c0_66 = arith.constant 0 : index
    %c0_67 = arith.constant 0 : index
    %46 = vector.load %arg5[%c2_65, %c0_66, %c0_67] : memref<18x18x128xbf16, #tpu.memory_space<vmem>>, vector<16x16x128xbf16>
    %47 = vector.shape_cast %46 : vector<16x16x128xbf16> to vector<256x128xbf16>
    %c0_68 = arith.constant 0 : index
    %c6 = arith.constant 6 : index
    %c0_69 = arith.constant 0 : index
    %c0_70 = arith.constant 0 : index
    %48 = vector.load %arg2[%c0_68, %c6, %c0_69, %c0_70] : memref<2x9x128x128xbf16, #tpu.memory_space<vmem>>, vector<1x1x128x128xbf16>
    %49 = vector.shape_cast %48 : vector<1x1x128x128xbf16> to vector<128x128xbf16>
    %cst_71 = arith.constant dense<0.000000e+00> : vector<256x128xf32>
    %50 = tpu.matmul %47, %49, %cst_71 {dimension_numbers = #tpu.dot_dimension_numbers<[1], [0], [0], [1], [0, 0, 1, 1], [], []>} : vector<256x128xbf16>, vector<128x128xbf16>, vector<256x128xf32> -> vector<256x128xf32>
    %51 = arith.addf %45, %50 : vector<256x128xf32>
    %c2_72 = arith.constant 2 : index
    %c1_73 = arith.constant 1 : index
    %c0_74 = arith.constant 0 : index
    %52 = vector.load %arg5[%c2_72, %c1_73, %c0_74] : memref<18x18x128xbf16, #tpu.memory_space<vmem>>, vector<16x16x128xbf16>
    %53 = vector.shape_cast %52 : vector<16x16x128xbf16> to vector<256x128xbf16>
    %c0_75 = arith.constant 0 : index
    %c7 = arith.constant 7 : index
    %c0_76 = arith.constant 0 : index
    %c0_77 = arith.constant 0 : index
    %54 = vector.load %arg2[%c0_75, %c7, %c0_76, %c0_77] : memref<2x9x128x128xbf16, #tpu.memory_space<vmem>>, vector<1x1x128x128xbf16>
    %55 = vector.shape_cast %54 : vector<1x1x128x128xbf16> to vector<128x128xbf16>
    %cst_78 = arith.constant dense<0.000000e+00> : vector<256x128xf32>
    %56 = tpu.matmul %53, %55, %cst_78 {dimension_numbers = #tpu.dot_dimension_numbers<[1], [0], [0], [1], [0, 0, 1, 1], [], []>} : vector<256x128xbf16>, vector<128x128xbf16>, vector<256x128xf32> -> vector<256x128xf32>
    %57 = arith.addf %51, %56 : vector<256x128xf32>
    %c2_79 = arith.constant 2 : index
    %c2_80 = arith.constant 2 : index
    %c0_81 = arith.constant 0 : index
    %58 = vector.load %arg5[%c2_79, %c2_80, %c0_81] : memref<18x18x128xbf16, #tpu.memory_space<vmem>>, vector<16x16x128xbf16>
    %59 = vector.shape_cast %58 : vector<16x16x128xbf16> to vector<256x128xbf16>
    %c0_82 = arith.constant 0 : index
    %c8 = arith.constant 8 : index
    %c0_83 = arith.constant 0 : index
    %c0_84 = arith.constant 0 : index
    %60 = vector.load %arg2[%c0_82, %c8, %c0_83, %c0_84] : memref<2x9x128x128xbf16, #tpu.memory_space<vmem>>, vector<1x1x128x128xbf16>
    %61 = vector.shape_cast %60 : vector<1x1x128x128xbf16> to vector<128x128xbf16>
    %cst_85 = arith.constant dense<0.000000e+00> : vector<256x128xf32>
    %62 = tpu.matmul %59, %61, %cst_85 {dimension_numbers = #tpu.dot_dimension_numbers<[1], [0], [0], [1], [0, 0, 1, 1], [], []>} : vector<256x128xbf16>, vector<128x128xbf16>, vector<256x128xf32> -> vector<256x128xf32>
    %63 = arith.addf %57, %62 : vector<256x128xf32>
    %c0_86 = arith.constant 0 : index
    %c0_87 = arith.constant 0 : index
    %64 = vector.load %arg3[%c0_86, %c0_87] : memref<2x128xf32, #tpu.memory_space<vmem>>, vector<1x128xf32>
    %65 = vector.broadcast %64 : vector<1x128xf32> to vector<256x128xf32>
    %66 = arith.addf %63, %65 : vector<256x128xf32>
    %cst_88 = arith.constant 0.000000e+00 : f32
    %67 = vector.broadcast %cst_88 : f32 to vector<256x128xf32>
    %68 = arith.maximumf %66, %67 : vector<256x128xf32>
    %69 = vector.shape_cast %68 : vector<256x128xf32> to vector<16x16x128xf32>
    %70 = arith.truncf %69 : vector<16x16x128xf32> to vector<16x16x128xbf16>
    %c1_89 = arith.constant 1 : index
    %c1_90 = arith.constant 1 : index
    %c0_91 = arith.constant 0 : index
    %71 = vector.load %arg6[%c1_89, %c1_90, %c0_91] : memref<18x18x128xbf16, #tpu.memory_space<vmem>>, vector<16x16x128xbf16>
    tpu.vector_store %arg6[%c1_89, %c1_90, %c0_91], %70 {strides = array<i32>} : memref<18x18x128xbf16, #tpu.memory_space<vmem>>, vector<16x16x128xbf16>,
    %c0_92 = arith.constant 0 : index
    %c0_93 = arith.constant 0 : index
    %c0_94 = arith.constant 0 : index
    %72 = vector.load %arg6[%c0_92, %c0_93, %c0_94] : memref<18x18x128xbf16, #tpu.memory_space<vmem>>, vector<16x16x128xbf16>
    %73 = vector.shape_cast %72 : vector<16x16x128xbf16> to vector<256x128xbf16>
    %c1_95 = arith.constant 1 : index
    %c0_96 = arith.constant 0 : index
    %c0_97 = arith.constant 0 : index
    %c0_98 = arith.constant 0 : index
    %74 = vector.load %arg2[%c1_95, %c0_96, %c0_97, %c0_98] : memref<2x9x128x128xbf16, #tpu.memory_space<vmem>>, vector<1x1x128x128xbf16>
    %75 = vector.shape_cast %74 : vector<1x1x128x128xbf16> to vector<128x128xbf16>
    %cst_99 = arith.constant dense<0.000000e+00> : vector<256x128xf32>
    %76 = tpu.matmul %73, %75, %cst_99 {dimension_numbers = #tpu.dot_dimension_numbers<[1], [0], [0], [1], [0, 0, 1, 1], [], []>} : vector<256x128xbf16>, vector<128x128xbf16>, vector<256x128xf32> -> vector<256x128xf32>
    %c0_100 = arith.constant 0 : index
    %c1_101 = arith.constant 1 : index
    %c0_102 = arith.constant 0 : index
    %77 = vector.load %arg6[%c0_100, %c1_101, %c0_102] : memref<18x18x128xbf16, #tpu.memory_space<vmem>>, vector<16x16x128xbf16>
    %78 = vector.shape_cast %77 : vector<16x16x128xbf16> to vector<256x128xbf16>
    %c1_103 = arith.constant 1 : index
    %c1_104 = arith.constant 1 : index
    %c0_105 = arith.constant 0 : index
    %c0_106 = arith.constant 0 : index
    %79 = vector.load %arg2[%c1_103, %c1_104, %c0_105, %c0_106] : memref<2x9x128x128xbf16, #tpu.memory_space<vmem>>, vector<1x1x128x128xbf16>
    %80 = vector.shape_cast %79 : vector<1x1x128x128xbf16> to vector<128x128xbf16>
    %cst_107 = arith.constant dense<0.000000e+00> : vector<256x128xf32>
    %81 = tpu.matmul %78, %80, %cst_107 {dimension_numbers = #tpu.dot_dimension_numbers<[1], [0], [0], [1], [0, 0, 1, 1], [], []>} : vector<256x128xbf16>, vector<128x128xbf16>, vector<256x128xf32> -> vector<256x128xf32>
    %82 = arith.addf %76, %81 : vector<256x128xf32>
    %c0_108 = arith.constant 0 : index
    %c2_109 = arith.constant 2 : index
    %c0_110 = arith.constant 0 : index
    %83 = vector.load %arg6[%c0_108, %c2_109, %c0_110] : memref<18x18x128xbf16, #tpu.memory_space<vmem>>, vector<16x16x128xbf16>
    %84 = vector.shape_cast %83 : vector<16x16x128xbf16> to vector<256x128xbf16>
    %c1_111 = arith.constant 1 : index
    %c2_112 = arith.constant 2 : index
    %c0_113 = arith.constant 0 : index
    %c0_114 = arith.constant 0 : index
    %85 = vector.load %arg2[%c1_111, %c2_112, %c0_113, %c0_114] : memref<2x9x128x128xbf16, #tpu.memory_space<vmem>>, vector<1x1x128x128xbf16>
    %86 = vector.shape_cast %85 : vector<1x1x128x128xbf16> to vector<128x128xbf16>
    %cst_115 = arith.constant dense<0.000000e+00> : vector<256x128xf32>
    %87 = tpu.matmul %84, %86, %cst_115 {dimension_numbers = #tpu.dot_dimension_numbers<[1], [0], [0], [1], [0, 0, 1, 1], [], []>} : vector<256x128xbf16>, vector<128x128xbf16>, vector<256x128xf32> -> vector<256x128xf32>
    %88 = arith.addf %82, %87 : vector<256x128xf32>
    %c1_116 = arith.constant 1 : index
    %c0_117 = arith.constant 0 : index
    %c0_118 = arith.constant 0 : index
    %89 = vector.load %arg6[%c1_116, %c0_117, %c0_118] : memref<18x18x128xbf16, #tpu.memory_space<vmem>>, vector<16x16x128xbf16>
    %90 = vector.shape_cast %89 : vector<16x16x128xbf16> to vector<256x128xbf16>
    %c1_119 = arith.constant 1 : index
    %c3_120 = arith.constant 3 : index
    %c0_121 = arith.constant 0 : index
    %c0_122 = arith.constant 0 : index
    %91 = vector.load %arg2[%c1_119, %c3_120, %c0_121, %c0_122] : memref<2x9x128x128xbf16, #tpu.memory_space<vmem>>, vector<1x1x128x128xbf16>
    %92 = vector.shape_cast %91 : vector<1x1x128x128xbf16> to vector<128x128xbf16>
    %cst_123 = arith.constant dense<0.000000e+00> : vector<256x128xf32>
    %93 = tpu.matmul %90, %92, %cst_123 {dimension_numbers = #tpu.dot_dimension_numbers<[1], [0], [0], [1], [0, 0, 1, 1], [], []>} : vector<256x128xbf16>, vector<128x128xbf16>, vector<256x128xf32> -> vector<256x128xf32>
    %94 = arith.addf %88, %93 : vector<256x128xf32>
    %c1_124 = arith.constant 1 : index
    %c1_125 = arith.constant 1 : index
    %c0_126 = arith.constant 0 : index
    %95 = vector.load %arg6[%c1_124, %c1_125, %c0_126] : memref<18x18x128xbf16, #tpu.memory_space<vmem>>, vector<16x16x128xbf16>
    %96 = vector.shape_cast %95 : vector<16x16x128xbf16> to vector<256x128xbf16>
    %c1_127 = arith.constant 1 : index
    %c4_128 = arith.constant 4 : index
    %c0_129 = arith.constant 0 : index
    %c0_130 = arith.constant 0 : index
    %97 = vector.load %arg2[%c1_127, %c4_128, %c0_129, %c0_130] : memref<2x9x128x128xbf16, #tpu.memory_space<vmem>>, vector<1x1x128x128xbf16>
    %98 = vector.shape_cast %97 : vector<1x1x128x128xbf16> to vector<128x128xbf16>
    %cst_131 = arith.constant dense<0.000000e+00> : vector<256x128xf32>
    %99 = tpu.matmul %96, %98, %cst_131 {dimension_numbers = #tpu.dot_dimension_numbers<[1], [0], [0], [1], [0, 0, 1, 1], [], []>} : vector<256x128xbf16>, vector<128x128xbf16>, vector<256x128xf32> -> vector<256x128xf32>
    %100 = arith.addf %94, %99 : vector<256x128xf32>
    %c1_132 = arith.constant 1 : index
    %c2_133 = arith.constant 2 : index
    %c0_134 = arith.constant 0 : index
    %101 = vector.load %arg6[%c1_132, %c2_133, %c0_134] : memref<18x18x128xbf16, #tpu.memory_space<vmem>>, vector<16x16x128xbf16>
    %102 = vector.shape_cast %101 : vector<16x16x128xbf16> to vector<256x128xbf16>
    %c1_135 = arith.constant 1 : index
    %c5_136 = arith.constant 5 : index
    %c0_137 = arith.constant 0 : index
    %c0_138 = arith.constant 0 : index
    %103 = vector.load %arg2[%c1_135, %c5_136, %c0_137, %c0_138] : memref<2x9x128x128xbf16, #tpu.memory_space<vmem>>, vector<1x1x128x128xbf16>
    %104 = vector.shape_cast %103 : vector<1x1x128x128xbf16> to vector<128x128xbf16>
    %cst_139 = arith.constant dense<0.000000e+00> : vector<256x128xf32>
    %105 = tpu.matmul %102, %104, %cst_139 {dimension_numbers = #tpu.dot_dimension_numbers<[1], [0], [0], [1], [0, 0, 1, 1], [], []>} : vector<256x128xbf16>, vector<128x128xbf16>, vector<256x128xf32> -> vector<256x128xf32>
    %106 = arith.addf %100, %105 : vector<256x128xf32>
    %c2_140 = arith.constant 2 : index
    %c0_141 = arith.constant 0 : index
    %c0_142 = arith.constant 0 : index
    %107 = vector.load %arg6[%c2_140, %c0_141, %c0_142] : memref<18x18x128xbf16, #tpu.memory_space<vmem>>, vector<16x16x128xbf16>
    %108 = vector.shape_cast %107 : vector<16x16x128xbf16> to vector<256x128xbf16>
    %c1_143 = arith.constant 1 : index
    %c6_144 = arith.constant 6 : index
    %c0_145 = arith.constant 0 : index
    %c0_146 = arith.constant 0 : index
    %109 = vector.load %arg2[%c1_143, %c6_144, %c0_145, %c0_146] : memref<2x9x128x128xbf16, #tpu.memory_space<vmem>>, vector<1x1x128x128xbf16>
    %110 = vector.shape_cast %109 : vector<1x1x128x128xbf16> to vector<128x128xbf16>
    %cst_147 = arith.constant dense<0.000000e+00> : vector<256x128xf32>
    %111 = tpu.matmul %108, %110, %cst_147 {dimension_numbers = #tpu.dot_dimension_numbers<[1], [0], [0], [1], [0, 0, 1, 1], [], []>} : vector<256x128xbf16>, vector<128x128xbf16>, vector<256x128xf32> -> vector<256x128xf32>
    %112 = arith.addf %106, %111 : vector<256x128xf32>
    %c2_148 = arith.constant 2 : index
    %c1_149 = arith.constant 1 : index
    %c0_150 = arith.constant 0 : index
    %113 = vector.load %arg6[%c2_148, %c1_149, %c0_150] : memref<18x18x128xbf16, #tpu.memory_space<vmem>>, vector<16x16x128xbf16>
    %114 = vector.shape_cast %113 : vector<16x16x128xbf16> to vector<256x128xbf16>
    %c1_151 = arith.constant 1 : index
    %c7_152 = arith.constant 7 : index
    %c0_153 = arith.constant 0 : index
    %c0_154 = arith.constant 0 : index
    %115 = vector.load %arg2[%c1_151, %c7_152, %c0_153, %c0_154] : memref<2x9x128x128xbf16, #tpu.memory_space<vmem>>, vector<1x1x128x128xbf16>
    %116 = vector.shape_cast %115 : vector<1x1x128x128xbf16> to vector<128x128xbf16>
    %cst_155 = arith.constant dense<0.000000e+00> : vector<256x128xf32>
    %117 = tpu.matmul %114, %116, %cst_155 {dimension_numbers = #tpu.dot_dimension_numbers<[1], [0], [0], [1], [0, 0, 1, 1], [], []>} : vector<256x128xbf16>, vector<128x128xbf16>, vector<256x128xf32> -> vector<256x128xf32>
    %118 = arith.addf %112, %117 : vector<256x128xf32>
    %c2_156 = arith.constant 2 : index
    %c2_157 = arith.constant 2 : index
    %c0_158 = arith.constant 0 : index
    %119 = vector.load %arg6[%c2_156, %c2_157, %c0_158] : memref<18x18x128xbf16, #tpu.memory_space<vmem>>, vector<16x16x128xbf16>
    %120 = vector.shape_cast %119 : vector<16x16x128xbf16> to vector<256x128xbf16>
    %c1_159 = arith.constant 1 : index
    %c8_160 = arith.constant 8 : index
    %c0_161 = arith.constant 0 : index
    %c0_162 = arith.constant 0 : index
    %121 = vector.load %arg2[%c1_159, %c8_160, %c0_161, %c0_162] : memref<2x9x128x128xbf16, #tpu.memory_space<vmem>>, vector<1x1x128x128xbf16>
    %122 = vector.shape_cast %121 : vector<1x1x128x128xbf16> to vector<128x128xbf16>
    %cst_163 = arith.constant dense<0.000000e+00> : vector<256x128xf32>
    %123 = tpu.matmul %120, %122, %cst_163 {dimension_numbers = #tpu.dot_dimension_numbers<[1], [0], [0], [1], [0, 0, 1, 1], [], []>} : vector<256x128xbf16>, vector<128x128xbf16>, vector<256x128xf32> -> vector<256x128xf32>
    %124 = arith.addf %118, %123 : vector<256x128xf32>
    %c1_164 = arith.constant 1 : index
    %c0_165 = arith.constant 0 : index
    %125 = vector.load %arg3[%c1_164, %c0_165] : memref<2x128xf32, #tpu.memory_space<vmem>>, vector<1x128xf32>
    %126 = vector.broadcast %125 : vector<1x128xf32> to vector<256x128xf32>
    %127 = arith.addf %124, %126 : vector<256x128xf32>
    %cst_166 = arith.constant 0.000000e+00 : f32
    %128 = vector.broadcast %cst_166 : f32 to vector<256x128xf32>
    %129 = arith.maximumf %127, %128 : vector<256x128xf32>
    %130 = vector.shape_cast %129 : vector<256x128xf32> to vector<8x32x128xf32>
    %131 = vector.extract_strided_slice %130 {offsets = [0, 0, 0], sizes = [8, 16, 128], strides = [1, 1, 1]} : vector<8x32x128xf32> to vector<8x16x128xf32>
    %132 = vector.extract_strided_slice %130 {offsets = [0, 16, 0], sizes = [8, 16, 128], strides = [1, 1, 1]} : vector<8x32x128xf32> to vector<8x16x128xf32>
    %133 = arith.maximumf %131, %132 : vector<8x16x128xf32>
    %134 = vector.shape_cast %133 : vector<8x16x128xf32> to vector<128x128xf32>
    %c0_167 = arith.constant 0 : index
    %c0_168 = arith.constant 0 : index
    %135 = vector.load %arg7[%c0_167, %c0_168] : memref<128x128xf32, #tpu.memory_space<vmem>>, vector<128x128xf32>
    tpu.vector_store %arg7[%c0_167, %c0_168], %134 {strides = array<i32>} : memref<128x128xf32, #tpu.memory_space<vmem>>, vector<128x128xf32>,
    %c0_169 = arith.constant 0 : index
    %c0_170 = arith.constant 0 : index
    %136 = tpu.strided_load %arg7[%c0_169, %c0_170] {strides = array<i32: 2, 1>} : memref<128x128xf32, #tpu.memory_space<vmem>>, vector<64x128xf32>
    %c1_171 = arith.constant 1 : index
    %c0_172 = arith.constant 0 : index
    %137 = tpu.strided_load %arg7[%c1_171, %c0_172] {strides = array<i32: 2, 1>} : memref<128x128xf32, #tpu.memory_space<vmem>>, vector<64x128xf32>
    %138 = arith.maximumf %136, %137 : vector<64x128xf32>
    %139 = vector.shape_cast %138 : vector<64x128xf32> to vector<8x8x128xf32>
    %c0_173 = arith.constant 0 : index
    %c0_174 = arith.constant 0 : index
    %c0_175 = arith.constant 0 : index
    %c0_176 = arith.constant 0 : index
    %140 = vector.load %arg4[%c0_173, %c0_174, %c0_175, %c0_176] : memref<1x8x8x128xf32, #tpu.memory_space<vmem>>, vector<1x8x8x128xf32>
    %141 = vector.shape_cast %140 : vector<1x8x8x128xf32> to vector<8x8x128xf32>
    %142 = vector.shape_cast %139 : vector<8x8x128xf32> to vector<1x8x8x128xf32>
    tpu.vector_store %arg4[%c0_173, %c0_174, %c0_175, %c0_176], %142 {strides = array<i32>} : memref<1x8x8x128xf32, #tpu.memory_space<vmem>>, vector<1x8x8x128xf32>,
    return
  }
  func.func @transform_0(%arg0: i32) -> (i32, i32, i32, i32) {
    %c0_i32 = arith.constant 0 : i32
    %c0_i32_0 = arith.constant 0 : i32
    %c0_i32_1 = arith.constant 0 : i32
    %c0_i32_2 = arith.constant 0 : i32
    return %arg0, %c0_i32, %c0_i32_0, %c0_i32_1 : i32, i32, i32, i32
  }
  func.func @transform_1(%arg0: i32) -> (i32, i32, i32, i32) {
    %c0_i32 = arith.constant 0 : i32
    %c0_i32_0 = arith.constant 0 : i32
    %c0_i32_1 = arith.constant 0 : i32
    %c0_i32_2 = arith.constant 0 : i32
    %c0_i32_3 = arith.constant 0 : i32
    return %c0_i32, %c0_i32_0, %c0_i32_1, %c0_i32_2 : i32, i32, i32, i32
  }
  func.func @transform_2(%arg0: i32) -> (i32, i32) {
    %c0_i32 = arith.constant 0 : i32
    %c0_i32_0 = arith.constant 0 : i32
    %c0_i32_1 = arith.constant 0 : i32
    return %c0_i32, %c0_i32_0 : i32, i32
  }
  func.func @transform_3(%arg0: i32) -> (i32, i32, i32, i32) {
    %c0_i32 = arith.constant 0 : i32
    %c0_i32_0 = arith.constant 0 : i32
    %c0_i32_1 = arith.constant 0 : i32
    %c0_i32_2 = arith.constant 0 : i32
    return %arg0, %c0_i32, %c0_i32_0, %c0_i32_1 : i32, i32, i32, i32
  }
}

</mosaic_0001>

<bundles_post_ra>
// kernel: tpu_custom_call.1
= control target key start
LH: loop header
LB: loop body
LE: loop exit
PB: predicated region body
PF: predicated region fallthrough
CT: control target
= control target key end

     0   :  { %8 = vsyncpa [#allocation6], 0  ;;  %s18164_s0 = inlined_call_operand.vmem [shape: bf16[2,16,16,4], index: 0, kind: input, shape index: {}]   ;;  %s18165_s1 = inlined_call_operand.hbm [shape: bf16[2,9,128,128], index: 1, kind: input, shape index: {}]   ;;  %s18166_s2 = inlined_call_operand.vmem [shape: f32[2,128], index: 2, kind: input, shape index: {}]   ;;  %s18167_s3 = inlined_call_operand.hbm [shape: f32[2,8,8,128], index: 3, kind: output, shape index: {}]  }
   0x1   :  { %9 = vsyncpa [#allocation7], 0 }
   0x2   :  { %11 = vsyncpa [#allocation7 + $0x1], 0  ;;  %s13624_s12 = smov 0   ;;  %s13626_s13 = smov 0  }
   0x3   :  { %s13628_s14 = smov 0   ;;  %s13630_s15 = smov 0  }
   0x4 LB: > { %s13645_s16 = sadd.s32 4294967295, %s13595_s15   ;;  %s11278_s17 = sadd.s32 4294967294, %s13595_s15   ;;  %s13595_s15 = sphi %s13630_s15, %s18591_s15   ;;  %s13591_s14 = sphi %s13628_s14, %s18590_s14   ;;  %s13587_s13 = sphi %s13626_s13, %s18589_s13   ;;  %s13583_s12 = sphi %s13624_s12, %s18588_s12  }
   0x5   : > { %s13649_s18 = sadd.s32 1, %s13595_s15   ;;  %s92_s19 = sadd.s32 1, %s13591_s14 }
   0x6   : > { %s89_s20 = ssub.s32 %s13595_s15, %s13649_s18  ;;  %p102_p0 = scmp.ne.s32.totalorder %s13591_s14, %s13587_s13 }
   0x7   : > { %p90_p1 = scmp.eq.s32.totalorder %s89_s20, 0  ;;  %p103_p2 = scmp.eq.s32.totalorder %s13645_s16, 1 }
   0x8   : > { %p108_p3 = scmp.ne.s32.totalorder %s13587_s13, %s13583_s12  ;;  %p109_p4 = scmp.eq.s32.totalorder %s11278_s17, 1 }
   0x9   : > { %s13660_s21 = scalar_select %p90_p1, %s13591_s14, %s92_s19  }
   0xa   : > { %p13662_p5 = por %p103_p2, %p102_p0  ;;  %p13666_p6 = por %p109_p4, %p108_p3 }
   0xb   : > { %p11279_p7 = scmp.ge.s32.totalorder %s13595_s15, 1  ;;  %p116_p8 = scmp.lt.s32.totalorder %s13595_s15, 3 }
   0xc   : > { %s18194_s23 = scalar_select %p13666_p6, 1, 0 }
   0xd   : > { %p13198_p9 = scmp.eq.s32.totalorder %s13645_s16, 0  ;;  %p13673_p10 = pnand %p11279_p7, %p116_p8 }
   0xe   : > { %s13597_s25 = smov [#allocation5]  }
   0xf   : > { %s128_s26 = sshll.u32 %s13597_s25, 4  ;;  %p13190_p11 = pneg %p13673_p10  ;;  %s129_s26 = int_to_ptr.vmem [resolvable:$true] %s128_s26 }
  0x10   : > { %s13516_s27 = scalar_lea.vmem %s129_s26, 18432  ;;  %p13524_p3 = scmp.lt.s32.totalorder %s129_s26, %s129_s26 }
  0x11   : > { %p13191_p12 = pnand %p13198_p9, %p13190_p11  ;;  %p13517_p0 = scmp.ne.s32.totalorder %s129_s26, %s13516_s27 }
  0x12   : > { %p13525_p4 = scmp.lt.s32.totalorder %s13516_s27, %s13516_s27 }
  0x13   : > { %p13507_p13 = pneg %p13191_p12 }
  0x14   : > { %p13526_p6 = por %p13525_p4, %p13524_p3 }
  0x15   : > { %p13519_p1 = pnand %p13517_p0, %p13507_p13 }
  0x17   : > { %p13520_p2 = pneg %p13519_p1 }
  0x19   : > { %p13527_p7 = pnand %p13526_p6, %p13520_p2 }
  0x1b   : > { %13530 = shalt.err (!%p13527_p7)
}
  0x1c   : > { %s13598_s28 = smov 64   ;;  %s13599_s29 = smov 4  }
  0x1d   : > { %13193 = dma.hbm_to_vmem [thread:$0]  (!%p13191_p12), %s18165_s1, 18432, %s129_s26, [#allocation6], %s13598_s28, %s13598_s28, %s13599_s29  }
  0x1e   : > { %155 = sbr.rel (%p13673_p10) target bundleno = 1248 (0x4e0), region = 32 }
  0x23   : > { %13574 = dma.done.wait (%p13198_p9), [#allocation6], 18432  }
  0x24   : > { %13576 = vsyncadd (%p13198_p9), [#allocation6], 4294948864  ;;  %v13600_v0 = vmov 0   ;;  %v13239_v1 = vld [vmem:[#allocation5 + $0x78] sm:$0xff]   ;;  %v13241_v3 = vld [vmem:[#allocation5 + $0x70] sm:$0xff]   ;;  %p179_p6 = scmp.lt.s32.totalorder %s13645_s16, 1 }
  0x25   : > { %185 = vst [vmem:[#allocation2] sm:$0xf] %v13600_v0  ;;  %186 = vst [vmem:[#allocation2 + $0x4] sm:$0xf] %v13600_v0  ;;  %v13240_v2 = vld [vmem:[#allocation5 + $0x38] sm:$0xff]   ;;  %12320 = vmatprep.subr.bf16.mxu0 %v13239_v1  ;;  %v13242_v4 = vld [vmem:[#allocation5 + $0x30] sm:$0xff]  }
  0x26   : > { %187 = vst [vmem:[#allocation2 + $0x8] sm:$0x1] %v13600_v0  ;;  %188 = vst [vmem:[#allocation2 + $0xc] sm:$0xf] %v13600_v0  ;;  %12368 = vmatprep.subr.bf16.mxu1 %v13240_v2  ;;  %12321 = vmatpush3.bf16.msra.mxu0 %v13239_v1  ;;  %v13243_v5 = vld [vmem:[#allocation5 + $0x68] sm:$0xff]   ;;  %s180_s5 = scalar_select %p179_p6, %s13645_s16, 1 }
  0x27   : > { %189 = vst [vmem:[#allocation2 + $0x10] sm:$0xf] %v13600_v0  ;;  %190 = vst [vmem:[#allocation2 + $0x14] sm:$0x1] %v13600_v0  ;;  %12369 = vmatpush3.bf16.msra.mxu1 %v13240_v2  ;;  %12322 = vmatprep.subr.bf16.mxu0 %v13241_v3  ;;  %v13244_v6 = vld [vmem:[#allocation5 + $0x28] sm:$0xff]   ;;  %v13245_v7 = vld [vmem:[#allocation5 + $0x60] sm:$0xff]  }
  0x28   : > { %191 = vst [vmem:[#allocation2 + $0x18] sm:$0xf] %v13600_v0  ;;  %192 = vst [vmem:[#allocation2 + $0x1c] sm:$0xf] %v13600_v0  ;;  %12370 = vmatprep.subr.bf16.mxu1 %v13242_v4  ;;  %v13246_v8 = vld [vmem:[#allocation5 + $0x20] sm:$0xff]   ;;  %s11854_s6 = sshll.u32 %s180_s5, 7 }
  0x29   : > { %193 = vst [vmem:[#allocation2 + $0x20] sm:$0x1] %v13600_v0  ;;  %194 = vst [vmem:[#allocation2 + $0x24] sm:$0xf] %v13600_v0  ;;  %vm895_vm0 = vsmask.f32 3328  ;;  %s13695_s9 = scalar_lea.vmem %s18164_s0, %s11854_s6 }
  0x2a   : > { %195 = vst [vmem:[#allocation2 + $0x28] sm:$0xf] %v13600_v0  ;;  %196 = vst [vmem:[#allocation2 + $0x2c] sm:$0x1] %v13600_v0  ;;  %12323 = vmatpush3.bf16.msra.mxu0 %v13241_v3  ;;  %vm896_vm1 = vsmask.f32 7440 }
  0x2b   : > { %197 = vst [vmem:[#allocation2 + $0x30] sm:$0xf] %v13600_v0  ;;  %198 = vst [vmem:[#allocation2 + $0x34] sm:$0xf] %v13600_v0  ;;  %12371 = vmatpush3.bf16.msra.mxu1 %v13242_v4  ;;  %12324 = vmatprep.subr.bf16.mxu0 %v13243_v5  ;;  %vm596_vm2 = vsmask.f32 7938 }
  0x2c   : > { %199 = vst [vmem:[#allocation2 + $0x38] sm:$0x1] %v13600_v0  ;;  %200 = vst [vmem:[#allocation2 + $0x3c] sm:$0xf] %v13600_v0  ;;  %12372 = vmatprep.subr.bf16.mxu1 %v13244_v6  ;;  %vm271_vm3 = vsmask.f32 256 }
  0x2d   : > { %201 = vst [vmem:[#allocation2 + $0x40] sm:$0xf] %v13600_v0  ;;  %202 = vst [vmem:[#allocation2 + $0x44] sm:$0x1] %v13600_v0  ;;  %vm272_vm4 = vsmask.f32 4368 }
  0x2e   : > { %203 = vst [vmem:[#allocation2 + $0x48] sm:$0xf] %v13600_v0  ;;  %204 = vst [vmem:[#allocation2 + $0x4c] sm:$0xf] %v13600_v0  ;;  %12325 = vmatpush3.bf16.msra.mxu0 %v13243_v5  ;;  %v13247_v9 = vld [vmem:[#allocation5 + $0x58] sm:$0xff]   ;;  %v13249_v11 = vld [vmem:[#allocation5 + $0x50] sm:$0xff]  }
  0x2f   : > { %205 = vst [vmem:[#allocation2 + $0x50] sm:$0x1] %v13600_v0  ;;  %206 = vst [vmem:[#allocation2 + $0x54] sm:$0xf] %v13600_v0  ;;  %12373 = vmatpush3.bf16.msra.mxu1 %v13244_v6  ;;  %12326 = vmatprep.subr.bf16.mxu0 %v13245_v7  ;;  %v13248_v10 = vld [vmem:[#allocation5 + $0x18] sm:$0xff]   ;;  %v13250_v12 = vld [vmem:[#allocation5 + $0x10] sm:$0xff]  }
  0x30   : > { %207 = vst [vmem:[#allocation2 + $0x58] sm:$0xf] %v13600_v0  ;;  %208 = vst [vmem:[#allocation2 + $0x5c] sm:$0x1] %v13600_v0  ;;  %12374 = vmatprep.subr.bf16.mxu1 %v13246_v8  ;;  %vm595_vm5 = vcmask 27648   ;;  %vm603_vm6 = vcmask 24576  }
  0x31   : > { %209 = vst [vmem:[#allocation2 + $0x60] sm:$0xf] %v13600_v0  ;;  %210 = vst [vmem:[#allocation2 + $0x64] sm:$0xf] %v13600_v0  ;;  %v831_v13 = vld [vmem:[#allocation2] sm:$0xf] }
  0x32   : > { %211 = vst [vmem:[#allocation2 + $0x68] sm:$0x1] %v13600_v0  ;;  %212 = vst [vmem:[#allocation2 + $0x6c] sm:$0xf] %v13600_v0  ;;  %12327 = vmatpush3.bf16.msra.mxu0 %v13245_v7  ;;  %v832_v14 = vld [vmem:[#allocation2 + $0x4] sm:$0xf] }
  0x33   : > { %213 = vst [vmem:[#allocation2 + $0x70] sm:$0xf] %v13600_v0  ;;  %214 = vst [vmem:[#allocation2 + $0x74] sm:$0x1] %v13600_v0  ;;  %12375 = vmatpush3.bf16.msra.mxu1 %v13246_v8  ;;  %12328 = vmatprep.subr.bf16.mxu0 %v13247_v9  ;;  %v13697_v15 = vld [vmem:[#allocation2 + $0x8] sm:$0x1]  ;;  %v11311_v22 = vcombine.low %v831_v13, %v832_v14 }
  0x34   : > { %215 = vst [vmem:[#allocation2 + $0x78] sm:$0xf] %v13600_v0  ;;  %216 = vst [vmem:[#allocation2 + $0x7c] sm:$0xf] %v13600_v0  ;;  %12376 = vmatprep.subr.bf16.mxu1 %v13248_v10  ;;  %v899_v16 = vshrl.u32 %v831_v13, 16  ;;  %v902_v17 = vshll.u32 %v831_v13, 16 }
  0x35   : > { %217 = vst [vmem:[#allocation2 + $0x80] sm:$0x1] %v13600_v0  ;;  %218 = vst [vmem:[#allocation2 + $0x84] sm:$0xf] %v13600_v0  ;;  %v908_v18 = vshll.u32 %v832_v14, 16  ;;  %v912_v19 = vshrl.u32 %v832_v14, 16  ;;  %12384 = vmatprep.mubr.bf16.mxu1 %v11311_v22 }
  0x36   : > { %219 = vst [vmem:[#allocation2 + $0x88] sm:$0xf] %v13600_v0  ;;  %220 = vst [vmem:[#allocation2 + $0x8c] sm:$0x1] %v13600_v0  ;;  %v239_v20 = vld [vmem:[%s13695_s9] sm:$0xf]  ;;  %12329 = vmatpush3.bf16.msra.mxu0 %v13247_v9 }
  0x37   : > { %221 = vst [vmem:[#allocation2 + $0x90] sm:$0xf] %v13600_v0  ;;  %222 = vst [vmem:[#allocation2 + $0x94] sm:$0xf] %v13600_v0  ;;  %v918_v21 = vshll.u32 %v13697_v15, 16  ;;  %v275_v24 = vshrl.u32 %v239_v20, 16  ;;  %12377 = vmatpush3.bf16.msra.mxu1 %v13248_v10  ;;  %12330 = vmatprep.subr.bf16.mxu0 %v13249_v11 }
  0x38   : > { %223 = vst [vmem:[#allocation2 + $0x98] sm:$0x1] %v13600_v0  ;;  %224 = vst [vmem:[#allocation2 + $0x9c] sm:$0xf] %v13600_v0  ;;  %v240_v23 = vld [vmem:[%s13695_s9 + $0x4] sm:$0xf]  ;;  %12378 = vmatprep.subr.bf16.mxu1 %v13250_v12 }
  0x39   : > { %225 = vst [vmem:[#allocation2 + $0xa0] sm:$0xf] %v13600_v0  ;;  %226 = vst [vmem:[#allocation2 + $0xa4] sm:$0x1] %v13600_v0  ;;  %v13251_v25 = vld [vmem:[#allocation5 + $0x48] sm:$0xff]   ;;  %v901_v26 = vrot.slane %v899_v16, 4 }
  0x3a   : > { %227 = vst [vmem:[#allocation2 + $0xa8] sm:$0xf] %v13600_v0  ;;  %228 = vst [vmem:[#allocation2 + $0xac] sm:$0xf] %v13600_v0  ;;  %v904_v27 = vrot.slane %v902_v17, 5  ;;  %v910_v28 = vrot.slane %v908_v18, 5  ;;  %12331 = vmatpush3.bf16.msra.mxu0 %v13249_v11 }
  0x3b   : > { %229 = vst [vmem:[#allocation2 + $0xb0] sm:$0x1] %v13600_v0  ;;  %230 = vst [vmem:[#allocation2 + $0xb4] sm:$0xf] %v13600_v0  ;;  %v914_v29 = vrot.slane %v912_v19, 4  ;;  %v13252_v30 = vld [vmem:[#allocation5 + $0x8] sm:$0xff]   ;;  %12379 = vmatpush3.bf16.msra.mxu1 %v13250_v12  ;;  %12332 = vmatprep.subr.bf16.mxu0 %v13251_v25 }
  0x3c   : > { %231 = vst [vmem:[#allocation2 + $0xb8] sm:$0xf] %v13600_v0  ;;  %232 = vst [vmem:[#allocation2 + $0xbc] sm:$0x1] %v13600_v0  ;;  %v18196_v31 = vmov 0  ;;  %v277_v32 = vrot.slane %v275_v24, 7  ;;  %v905_v36 = vor.u32 %v904_v27, %v901_v26  ;;  %12380 = vmatprep.subr.bf16.mxu1 %v13252_v30 }
  0x3d   : > { %233 = vst [vmem:[#allocation2 + $0xc0] sm:$0xf] %v13600_v0  ;;  %234 = vst [vmem:[#allocation2 + $0xc4] sm:$0xf] %v13600_v0  ;;  %v278_v33 = vshll.u32 %v239_v20, 16  ;;  %v283_v34 = vshrl.u32 %v240_v23, 16  ;;  %v915_v37 = vor.u32 %v914_v29, %v910_v28 }
  0x3e   : > { %235 = vst [vmem:[#allocation2 + $0xc8] sm:$0x1] %v13600_v0  ;;  %236 = vst [vmem:[#allocation2 + $0xcc] sm:$0xf] %v13600_v0  ;;  %v598_v35 = vld [vmem:[#allocation2 + $0xc] sm:$0xf]  ;;  %12333 = vmatpush3.bf16.msra.mxu0 %v13251_v25 }
  0x3f   : > { %237 = vst [vmem:[#allocation2 + $0xd0] sm:$0xf] %v13600_v0  ;;  %238 = vst [vmem:[#allocation2 + $0xd4] sm:$0x1] %v13600_v0  ;;  %v920_v38 = vrot.slane %v918_v21, 5  ;;  %v286_v39 = vshll.u32 %v240_v23, 16  ;;  %v280_v42 = vor.u32 %v278_v33, %v277_v32  ;;  %12381 = vmatpush3.bf16.msra.mxu1 %v13252_v30 }
  0x40   : > { %713 = vst [vmem:[#allocation3] sm:$0xf] %v13600_v0  ;;  %714 = vst [vmem:[#allocation3 + $0x4] sm:$0xf] %v13600_v0  ;;  %v18201_v41 = vmov 0  ;;  %v281_v43 = vrot.slane %v277_v32, 4 }
  0x41   : > { %715 = vst [vmem:[#allocation3 + $0x8] sm:$0x1] %v13600_v0  ;;  %717 = vst [vmem:[#allocation3 + $0xcc] sm:$0xf] %v13600_v0  ;;  %v285_v44 = vrot.slane %v283_v34, 7  ;;  %v906_v47 = vrot.slane %v905_v36, 4 }
  0x42   : > { %718 = vst [vmem:[#allocation3 + $0xd0] sm:$0xf] %v13600_v0  ;;  %719 = vst [vmem:[#allocation3 + $0xd4] sm:$0x1] %v13600_v0  ;;  %v241_v45 = vld [vmem:[%s13695_s9 + $0x8] sm:$0xf] }
  0x43   : > { %vm13704_vm7 = vmor %vm895_vm0, %vm896_vm1  ;;  %v242_v46 = vld [vmem:[%s13695_s9 + $0xc] sm:$0xf]  ;;  %v916_v48 = vrot.slane %v915_v37, 4  ;;  %v605_v50 = vld [vmem:[#allocation2 + $0x14] sm:$0x1]  ;;  %v292_v51 = vshrl.u32 %v241_v45, 16  ;;  %v288_v55 = vor.u32 %v286_v39, %v285_v44 }
  0x44   : > { %v18197_v31 = vsel %vm13704_vm7, 4294967295, %v18196_v31  ;;  %vm13710_vm8 = vmand %vm595_vm5, %vm596_vm2  ;;  %v295_v52 = vshll.u32 %v241_v45, 16  ;;  %v13253_v53 = vld [vmem:[#allocation5 + $0x40] sm:$0xff]   ;;  %v290_v56 = vrot.slane %v285_v44, 4  ;;  %v300_v58 = vshrl.u32 %v242_v46, 16  ;;  %v13741_v11 = vld [vmem:[#allocation5 + $0xb8] sm:$0xff]  }
  0x45   : > { %18198 = vst [vmem:[#allocation11_spill] sm:$0xff] %v18197_v31  ;;  %vm13716_vm9 = vmor %vm271_vm3, %vm272_vm4  ;;  %v13254_v54 = vld [vmem:[#allocation5] sm:$0xff]   ;;  %v599_v57 = vsel %vm13710_vm8, %v280_v42, %v598_v35  ;;  %v911_v60 = vsel %vm13704_vm7, %v906_v47, %v910_v28  ;;  %v921_v61 = vsel %vm13704_vm7, %v916_v48, %v920_v38  ;;  %v294_v62 = vrot.slane %v292_v51, 7  ;;  %v608_v0 = vld [vmem:[#allocation2 + $0x18] sm:$0xf]  ;;  %12334 = vmatprep.subr.bf16.mxu0 %v13253_v53  ;;  %s176_s25 = sand.u32 1, %s13587_s13  }
  0x46   : > { %v18202_v41 = vsel %vm13716_vm9, 4294967295, %v18201_v41  ;;  %vm13724_vm10 = vmand %vm603_vm6, %vm271_vm3  ;;  %v243_v59 = vld [vmem:[%s13695_s9 + $0x10] sm:$0xf]  ;;  %600 = vst [vmem:[#allocation2 + $0xc] sm:$0xf] %v599_v57  ;;  %v303_v63 = vshll.u32 %v242_v46, 16  ;;  %v11287_v2 = vcombine.low %v911_v60, %v921_v61  ;;  %v289_v3 = vsel %vm13716_vm9, %v281_v43, %v288_v55  ;;  %12382 = vmatprep.subr.bf16.mxu1 %v13254_v54  ;;  %12335 = vmatpush3.bf16.msra.mxu0 %v13253_v53 }
  0x47   : > { %18203 = vst [vmem:[#allocation12_spill] sm:$0xff] %v18202_v41  ;;  %v244_v1 = vld [vmem:[%s13695_s9 + $0x14] sm:$0xf]  ;;  %v606_v4 = vsel %vm13724_vm10, %v290_v56, %v605_v50  ;;  %v302_v5 = vrot.slane %v300_v58, 7  ;;  %v612_v6 = vld [vmem:[#allocation2 + $0x20] sm:$0x1]  ;;  %v297_v7 = vor.u32 %v295_v52, %v294_v62  ;;  %12383 = vmatpush3.bf16.msra.mxu1 %v13254_v54  ;;  %12416 = vmatprep.subr.bf16.mxu0 %v13741_v11 }
  0x48   : > { %602 = vst.msk [vmem:[#allocation2 + $0x10] sm:$0xf] %vm595_vm5, %v289_v3  ;;  %607 = vst [vmem:[#allocation2 + $0x14] sm:$0x1] %v606_v4  ;;  %v298_v8 = vrot.slane %v294_v62, 4  ;;  %v309_v9 = vshrl.u32 %v243_v59, 16  ;;  %12336 = vmatprep.mubr.bf16.mxu0 %v11287_v2 }
  0x49   : > { %v312_v10 = vshll.u32 %v243_v59, 16  ;;  %v305_v12 = vor.u32 %v303_v63, %v302_v5  ;;  %v307_v13 = vrot.slane %v302_v5, 4  ;;  %v317_v14 = vshrl.u32 %v244_v1, 16  ;;  %v245_v17 = vld [vmem:[%s13695_s9 + $0x18] sm:$0xf]  ;;  %v13270_v23 = vld [vmem:[#allocation5 + $0xf8] sm:$0xff]  }
  0x4a   : > { %v320_v16 = vshll.u32 %v244_v1, 16  ;;  %v609_v18 = vsel %vm13710_vm8, %v297_v7, %v608_v0  ;;  %v311_v19 = vrot.slane %v309_v9, 7  ;;  %v246_v20 = vld [vmem:[%s13695_s9 + $0x1c] sm:$0xf]  ;;  %v326_v21 = vshrl.u32 %v245_v17, 16  ;;  %12464 = vmatprep.subr.bf16.mxu1 %v13270_v23  ;;  %v13271_v61 = vld [vmem:[#allocation5 + $0xf0] sm:$0xff]  }
  0x4b   : > { %v329_v22 = vshll.u32 %v245_v17, 16  ;;  %v306_v24 = vsel %vm13716_vm9, %v298_v8, %v305_v12  ;;  %610 = vst [vmem:[#allocation2 + $0x18] sm:$0xf] %v609_v18  ;;  %v613_v25 = vsel %vm13724_vm10, %v307_v13, %v612_v6  ;;  %v319_v26 = vrot.slane %v317_v14, 7  ;;  %v615_v27 = vld [vmem:[#allocation2 + $0x24] sm:$0xf] }
  0x4c   : > { %v334_v28 = vshrl.u32 %v246_v20, 16  ;;  %611 = vst.msk [vmem:[#allocation2 + $0x1c] sm:$0xf] %vm595_vm5, %v306_v24  ;;  %614 = vst [vmem:[#allocation2 + $0x20] sm:$0x1] %v613_v25  ;;  %v314_v29 = vor.u32 %v312_v10, %v311_v19  ;;  %v315_v30 = vrot.slane %v311_v19, 4 }
  0x4d   : > { %v619_v32 = vld [vmem:[#allocation2 + $0x2c] sm:$0x1]  ;;  %v328_v33 = vrot.slane %v326_v21, 7  ;;  %v337_v34 = vshll.u32 %v246_v20, 16  ;;  %v322_v36 = vor.u32 %v320_v16, %v319_v26  ;;  %v324_v37 = vrot.slane %v319_v26, 4  ;;  %v13275_v19 = vld [vmem:[#allocation5 + $0xe8] sm:$0xff]  }
  0x4e   : > { %v833_v35 = vld [vmem:[#allocation2 + $0xc] sm:$0xf]  ;;  %v336_v38 = vrot.slane %v334_v28, 7  ;;  %v616_v43 = vsel %vm13710_vm8, %v314_v29, %v615_v27  ;;  %v622_v45 = vld [vmem:[#allocation2 + $0x30] sm:$0xf]  ;;  %v1933_v57 = vrot.slane %v13697_v15, 5 }
  0x4f   : > { %v923_v39 = vshrl.u32 %v833_v35, 16  ;;  %v926_v42 = vshll.u32 %v833_v35, 16  ;;  %v331_v44 = vor.u32 %v329_v22, %v328_v33  ;;  %v834_v46 = vld [vmem:[#allocation2 + $0x10] sm:$0xf]  ;;  %v13755_v47 = vld [vmem:[#allocation2 + $0x14] sm:$0x1]  ;;  %v323_v48 = vsel %vm13716_vm9, %v315_v30, %v322_v36 }
  0x50   : > { %617 = vst [vmem:[#allocation2 + $0x24] sm:$0xf] %v616_v43  ;;  %v620_v50 = vsel %vm13724_vm10, %v324_v37, %v619_v32  ;;  %v332_v51 = vrot.slane %v328_v33, 4  ;;  %v339_v52 = vor.u32 %v337_v34, %v336_v38  ;;  %v932_v55 = vshll.u32 %v834_v46, 16  ;;  %618 = vst.msk [vmem:[#allocation2 + $0x28] sm:$0xf] %vm595_vm5, %v323_v48 }
  0x51   : > { %v925_v53 = vrot.slane %v923_v39, 4  ;;  %v928_v54 = vrot.slane %v926_v42, 5  ;;  %v936_v56 = vshrl.u32 %v834_v46, 16  ;;  %621 = vst [vmem:[#allocation2 + $0x2c] sm:$0x1] %v620_v50  ;;  %v942_v58 = vshll.u32 %v13755_v47, 16 }
  0x52   : > { %v11312_v59 = vcombine.low %v833_v35, %v834_v46  ;;  %v340_v60 = vsel %vm13716_vm9, %v332_v51, %v339_v52  ;;  %v934_v63 = vrot.slane %v932_v55, 5  ;;  %v835_v1 = vld [vmem:[#allocation2 + $0x18] sm:$0xf]  ;;  %v341_v2 = vrot.slane %v336_v38, 4  ;;  %v13260_v39 = vld [vmem:[#allocation5 + $0xb0] sm:$0xff]   ;;  %v13276_v42 = vld [vmem:[#allocation5 + $0xe0] sm:$0xff]  }
  0x53   : > { %v929_v62 = vor.u32 %v928_v54, %v925_v53  ;;  %v938_v0 = vrot.slane %v936_v56, 4  ;;  %625 = vst.msk [vmem:[#allocation2 + $0x34] sm:$0xf] %vm595_vm5, %v340_v60  ;;  %v944_v3 = vrot.slane %v942_v58, 5  ;;  %v836_v4 = vld [vmem:[#allocation2 + $0x1c] sm:$0xf]  ;;  %v623_v7 = vsel %vm13710_vm8, %v331_v44, %v622_v45 }
  0x54   : > { %12385 = vmatmul.mubr.bf16.vlgmr.msra.gmra.mxu1 %v11312_v59  ;;  %v881_v5 = vld [vmem:[#allocation2 + $0x20] sm:$0x1]  ;;  %v947_v6 = vshrl.u32 %v835_v1, 16  ;;  %v950_v10 = vshll.u32 %v835_v1, 16  ;;  %v956_v12 = vshll.u32 %v836_v4, 16  ;;  %v960_v16 = vshrl.u32 %v836_v4, 16 }
  0x55   : > { %v930_v8 = vrot.slane %v929_v62, 4  ;;  %v939_v9 = vor.u32 %v938_v0, %v934_v63  ;;  %624 = vst [vmem:[#allocation2 + $0x30] sm:$0xf] %v623_v7  ;;  %v626_v13 = vld [vmem:[#allocation2 + $0x38] sm:$0x1]  ;;  %12465 = vmatpush3.bf16.msra.mxu1 %v13270_v23  ;;  %v966_v17 = vshll.u32 %v881_v5, 16  ;;  %v11313_v18 = vcombine.low %v835_v1, %v836_v4 }
  0x56   : > { %v949_v14 = vrot.slane %v947_v6, 4  ;;  %12466 = vmatprep.subr.bf16.mxu1 %v13271_v61  ;;  %v952_v22 = vrot.slane %v950_v10, 5  ;;  %v958_v24 = vrot.slane %v956_v12, 5  ;;  %v962_v26 = vrot.slane %v960_v16, 4  ;;  %v13263_v60 = vld [vmem:[#allocation5 + $0xa8] sm:$0xff]   ;;  %v13280_v12 = vld [vmem:[#allocation5 + $0xd8] sm:$0xff]  }
  0x57   : > { %v935_v20 = vsel %vm13704_vm7, %v930_v8, %v934_v63  ;;  %v940_v21 = vrot.slane %v939_v9, 4  ;;  %v837_v25 = vld [vmem:[#allocation2 + $0x24] sm:$0xf]  ;;  %v968_v27 = vrot.slane %v966_v17, 5  ;;  %12388 = vmatprep.mubr.bf16.mxu1 %v11313_v18  ;;  %v838_v28 = vld [vmem:[#allocation2 + $0x28] sm:$0xf]  ;;  %v627_v23 = vsel %vm13724_vm10, %v341_v2, %v626_v13 }
  0x58   : > { %v882_v29 = vld [vmem:[#allocation2 + $0x2c] sm:$0x1]  ;;  %v953_v32 = vor.u32 %v952_v22, %v949_v14  ;;  %v971_v33 = vshrl.u32 %v837_v25, 16  ;;  %v974_v34 = vshll.u32 %v837_v25, 16  ;;  %628 = vst [vmem:[#allocation2 + $0x38] sm:$0x1] %v627_v23  ;;  %v963_v36 = vor.u32 %v962_v26, %v958_v24 }
  0x59   : > { %v945_v30 = vsel %vm13704_vm7, %v940_v21, %v944_v3  ;;  %12467 = vmatpush3.bf16.msra.mxu1 %v13271_v61  ;;  %v980_v37 = vshll.u32 %v838_v28, 16  ;;  %v984_v38 = vshrl.u32 %v838_v28, 16  ;;  %v990_v46 = vshll.u32 %v882_v29, 16  ;;  %v247_v1 = vld [vmem:[%s13695_s9 + $0x20] sm:$0xf]  ;;  %v13318_v40 = vld [vmem:[#allocation5 + $0x140] sm:$0xff]  }
  0x5a   : > { %v11288_v35 = vcombine.low %v935_v20, %v945_v30  ;;  %12468 = vmatprep.subr.bf16.mxu1 %v13275_v19  ;;  %v954_v43 = vrot.slane %v953_v32, 4  ;;  %v973_v44 = vrot.slane %v971_v33, 4  ;;  %v976_v45 = vrot.slane %v974_v34, 5  ;;  %v840_v48 = vld [vmem:[#allocation2 + $0x34] sm:$0xf]  ;;  %s11284_s26 = sshll.u32 %s176_s25, 6 }
  0x5b   : > { %v964_v50 = vrot.slane %v963_v36, 4  ;;  %v982_v51 = vrot.slane %v980_v37, 5  ;;  %v986_v52 = vrot.slane %v984_v38, 4  ;;  %v11314_v53 = vcombine.low %v837_v25, %v838_v28  ;;  %v248_v5 = vld [vmem:[%s13695_s9 + $0x24] sm:$0xf]  ;;  %v13266_v25 = vld [vmem:[#allocation5 + $0xa0] sm:$0xff]  }
  0x5c   : > { %12337 = vmatmul.mubr.bf16.vlgmr.msra.gmra.mxu0 %v11288_v35  ;;  %v839_v54 = vld [vmem:[#allocation2 + $0x30] sm:$0xf]  ;;  %v959_v55 = vsel %vm13704_vm7, %v954_v43, %v958_v24  ;;  %v977_v56 = vor.u32 %v976_v45, %v973_v44  ;;  %v992_v58 = vrot.slane %v990_v46, 5  ;;  %v1004_v0 = vshll.u32 %v840_v48, 16  ;;  %v249_v18 = vld [vmem:[%s13695_s9 + $0x28] sm:$0xf] }
  0x5d   : > { %12417 = vmatpush3.bf16.msra.mxu0 %v13741_v11  ;;  %v995_v59 = vshrl.u32 %v839_v54, 16  ;;  %12469 = vmatpush3.bf16.msra.mxu1 %v13275_v19  ;;  %v969_v61 = vsel %vm13704_vm7, %v964_v50, %v968_v27  ;;  %v987_v62 = vor.u32 %v986_v52, %v982_v51  ;;  %v998_v63 = vshll.u32 %v839_v54, 16  ;;  %v629_v24 = vld [vmem:[#allocation2 + $0x3c] sm:$0xf]  ;;  %v633_v23 = vld [vmem:[#allocation2 + $0x44] sm:$0x1] }
  0x5e   : > { %12389 = vmatmul.mubr.bf16.gmra.mxu1 %v11314_v53  ;;  %12418 = vmatprep.subr.bf16.mxu0 %v13260_v39  ;;  %v11289_v2 = vcombine.low %v959_v55, %v969_v61  ;;  %v978_v11 = vrot.slane %v977_v56, 4  ;;  %v1008_v4 = vshrl.u32 %v840_v48, 16  ;;  %v1006_v9 = vrot.slane %v1004_v0, 5  ;;  %v250_v30 = vld [vmem:[%s13695_s9 + $0x2c] sm:$0xf]  ;;  %v13281_v37 = vld [vmem:[#allocation5 + $0xd0] sm:$0xff]  }
  0x5f   : > { %v997_v3 = vrot.slane %v995_v59, 4  ;;  %12470 = vmatprep.subr.bf16.mxu1 %v13276_v42  ;;  %v988_v6 = vrot.slane %v987_v62, 4  ;;  %v883_v7 = vld [vmem:[#allocation2 + $0x38] sm:$0x1]  ;;  %v1000_v8 = vrot.slane %v998_v63, 5  ;;  %v11315_v10 = vcombine.low %v839_v54, %v840_v48  ;;  %v13269_v50 = vld [vmem:[#allocation5 + $0x98] sm:$0xff]  }
  0x60   : > { %12340 = vmatprep.mubr.bf16.mxu0 %v11289_v2  ;;  %v983_v13 = vsel %vm13704_vm7, %v978_v11, %v982_v51  ;;  %v1010_v14 = vrot.slane %v1008_v4, 4  ;;  %v1014_v16 = vshll.u32 %v883_v7, 16  ;;  %v343_v17 = vshrl.u32 %v247_v1, 16  ;;  %v13789_v36 = vld [vmem:[%s13695_s9 + $0x30] sm:$0xf]  ;;  %v13285_v63 = vld [vmem:[#allocation5 + $0xc8] sm:$0xff]  }
  0x61   : > { %12419 = vmatpush3.bf16.msra.mxu0 %v13260_v39  ;;  %v993_v19 = vsel %vm13704_vm7, %v988_v6, %v992_v58  ;;  %v1001_v20 = vor.u32 %v1000_v8, %v997_v3  ;;  %12392 = vmatprep.mubr.bf16.mxu1 %v11315_v10  ;;  %v346_v21 = vshll.u32 %v247_v1, 16  ;;  %v351_v22 = vshrl.u32 %v248_v5, 16  ;;  %v636_v45 = vld [vmem:[#allocation2 + $0x48] sm:$0xf]  ;;  %v252_v46 = vld [vmem:[%s13695_s9 + $0x34] sm:$0xf] }
  0x62   : > { %12420 = vmatprep.subr.bf16.mxu0 %v13263_v60  ;;  %v11290_v26 = vcombine.low %v983_v13, %v993_v19  ;;  %v1011_v27 = vor.u32 %v1010_v14, %v1006_v9  ;;  %v1016_v28 = vrot.slane %v1014_v16, 5  ;;  %v345_v29 = vrot.slane %v343_v17, 7  ;;  %12471 = vmatpush3.bf16.msra.mxu1 %v13276_v42  ;;  %v253_v48 = vld [vmem:[%s13695_s9 + $0x38] sm:$0xf]  ;;  %v13807_v3 = vld [vmem:[%s13695_s9 + $0x3c] sm:$0xf] }
  0x63   : > { %v1002_v32 = vrot.slane %v1001_v20, 4  ;;  %v353_v33 = vrot.slane %v351_v22, 7  ;;  %v354_v34 = vshll.u32 %v248_v5, 16  ;;  %v360_v35 = vshrl.u32 %v249_v18, 16  ;;  %12472 = vmatprep.subr.bf16.mxu1 %v13280_v12  ;;  %v640_v5 = vld [vmem:[#allocation2 + $0x50] sm:$0x1] }
  0x64   : > { %12341 = vmatmul.mubr.bf16.gmra.mxu0 %v11290_v26  ;;  %v1012_v38 = vrot.slane %v1011_v27, 4  ;;  %v348_v39 = vor.u32 %v346_v21, %v345_v29  ;;  %v349_v43 = vrot.slane %v345_v29, 4  ;;  %v363_v44 = vshll.u32 %v249_v18, 16  ;;  %v643_v14 = vld [vmem:[#allocation2 + $0x54] sm:$0xf]  ;;  %s18017_s27 = scalar_lea.vmem [#allocation8], %s11284_s26 }
  0x65   : > { %v1007_v42 = vsel %vm13704_vm7, %v1002_v32, %v1006_v9  ;;  %v356_v51 = vor.u32 %v354_v34, %v353_v33  ;;  %v358_v52 = vrot.slane %v353_v33, 4  ;;  %12421 = vmatpush3.bf16.msra.mxu0 %v13263_v60  ;;  %v362_v53 = vrot.slane %v360_v35, 7  ;;  %v13274_v9 = vld [vmem:[#allocation5 + $0x90] sm:$0xff]   ;;  %v13286_v17 = vld [vmem:[#allocation5 + $0xc0] sm:$0xff]   ;;  %s11887_s28 = sshll.u32 %s13645_s16, 10  ;;  %s11204_s29 = sshll.u32 %s18017_s27, 4  ;;  %s18119_s29 = int_to_ptr.vmem [resolvable:$true] %s11204_s29 }
  0x66   : > { %v1017_v54 = vsel %vm13704_vm7, %v1012_v38, %v1016_v28  ;;  %v630_v55 = vsel %vm13710_vm8, %v348_v39, %v629_v24  ;;  %v368_v56 = vshrl.u32 %v250_v30, 16  ;;  %v371_v58 = vshll.u32 %v250_v30, 16  ;;  %12422 = vmatprep.subr.bf16.mxu0 %v13266_v25  ;;  %12473 = vmatpush3.bf16.msra.mxu1 %v13280_v12  ;;  %v13814_v22 = vld [vmem:[%s13695_s9 + $0x40] sm:$0xf]  ;;  %v647_v28 = vld [vmem:[#allocation2 + $0x5c] sm:$0x1]  ;;  %s18117_s5 = scalar_lea.hbm %s18167_s3, %s11887_s28 }
  0x67   : > { %v11291_v59 = vcombine.low %v1007_v42, %v1017_v54  ;;  %v357_v61 = vsel %vm13716_vm9, %v349_v43, %v356_v51  ;;  %631 = vst [vmem:[#allocation2 + $0x3c] sm:$0xf] %v630_v55  ;;  %v634_v60 = vsel %vm13724_vm10, %v358_v52, %v633_v23  ;;  %v365_v62 = vor.u32 %v363_v44, %v362_v53  ;;  %v13279_v39 = vld [vmem:[#allocation5 + $0x88] sm:$0xff]   ;;  %v654_v42 = vld [vmem:[#allocation2 + $0x68] sm:$0x1]  ;;  %s18124_s6 = scalar_lea.sflag [#allocation7], %s176_s25 }
  0x68   : > { %12474 = vmatprep.subr.bf16.mxu1 %v13281_v37  ;;  %632 = vst.msk [vmem:[#allocation2 + $0x40] sm:$0xf] %vm595_vm5, %v357_v61  ;;  %635 = vst [vmem:[#allocation2 + $0x44] sm:$0x1] %v634_v60  ;;  %v366_v0 = vrot.slane %v362_v53, 4  ;;  %v370_v1 = vrot.slane %v368_v56, 7 }
  0x69   : > { %v377_v2 = vshrl.u32 %v13789_v36, 16  ;;  %v380_v11 = vshll.u32 %v13789_v36, 16  ;;  %12344 = vmatprep.mubr.bf16.mxu0 %v11291_v59  ;;  %v637_v4 = vsel %vm13710_vm8, %v365_v62, %v636_v45  ;;  %v385_v6 = vshrl.u32 %v252_v46, 16  ;;  %12423 = vmatpush3.bf16.msra.mxu0 %v13266_v25  ;;  %v650_v36 = vld [vmem:[#allocation2 + $0x60] sm:$0xf]  ;;  %v13284_v60 = vld [vmem:[#allocation5 + $0x80] sm:$0xff]  }
  0x6a   : > { %v388_v7 = vshll.u32 %v252_v46, 16  ;;  %v394_v8 = vshrl.u32 %v253_v48, 16  ;;  %v373_v10 = vor.u32 %v371_v58, %v370_v1  ;;  %v375_v12 = vrot.slane %v370_v1, 4  ;;  %638 = vst [vmem:[#allocation2 + $0x48] sm:$0xf] %v637_v4  ;;  %12424 = vmatprep.subr.bf16.mxu0 %v13269_v50  ;;  %12475 = vmatpush3.bf16.msra.mxu1 %v13281_v37  ;;  %s13531_s7 = scalar_lea.vmem %s18119_s29, 1024 }
  0x6b   : > { %v379_v13 = vrot.slane %v377_v2, 7  ;;  %v397_v16 = vshll.u32 %v253_v48, 16  ;;  %v387_v18 = vrot.slane %v385_v6, 7  ;;  %v402_v20 = vshrl.u32 %v13807_v3, 16  ;;  %12476 = vmatprep.subr.bf16.mxu1 %v13285_v63  ;;  %p13532_p8 = scmp.ne.s32.totalorder %s18119_s29, %s13531_s7  ;;  %s13601_s16 = smov [#allocation8]  }
  0x6c   : > { %v396_v19 = vrot.slane %v394_v8, 7  ;;  %v405_v21 = vshll.u32 %v13807_v3, 16  ;;  %v374_v24 = vsel %vm13716_vm9, %v366_v0, %v373_v10  ;;  %v641_v25 = vsel %vm13724_vm10, %v375_v12, %v640_v5  ;;  %s13535_s8 = sshll.u32 %s13601_s16, 4  ;;  %s13536_s8 = int_to_ptr.vmem [resolvable:$false] %s13535_s8 }
  0x6d   : > { %v382_v26 = vor.u32 %v380_v11, %v379_v13  ;;  %v383_v27 = vrot.slane %v379_v13, 4  ;;  %639 = vst.msk [vmem:[#allocation2 + $0x4c] sm:$0xf] %vm595_vm5, %v374_v24  ;;  %642 = vst [vmem:[#allocation2 + $0x50] sm:$0x1] %v641_v25  ;;  %v390_v29 = vor.u32 %v388_v7, %v387_v18  ;;  %v392_v23 = vrot.slane %v387_v18, 4  ;;  %12425 = vmatpush3.bf16.msra.mxu0 %v13269_v50  ;;  %p13533_p9 = pnand %p13532_p8, %p13662_p5  ;;  %p13538_p11 = scmp.lt.s32.totalorder %s18119_s29, %s13536_s8 }
  0x6e   : > { %v399_v30 = vor.u32 %v397_v16, %v396_v19  ;;  %v400_v32 = vrot.slane %v396_v19, 4  ;;  %v841_v33 = vld [vmem:[#allocation2 + $0x3c] sm:$0xf]  ;;  %v404_v35 = vrot.slane %v402_v20, 7  ;;  %v411_v37 = vshrl.u32 %v13814_v22, 16  ;;  %12426 = vmatprep.subr.bf16.mxu0 %v13274_v9  ;;  %12477 = vmatpush3.bf16.msra.mxu1 %v13285_v63 }
  0x6f   : > { %v644_v34 = vsel %vm13710_vm8, %v382_v26, %v643_v14  ;;  %v414_v38 = vshll.u32 %v13814_v22, 16  ;;  %v842_v43 = vld [vmem:[#allocation2 + $0x40] sm:$0xf]  ;;  %v884_v44 = vld [vmem:[#allocation2 + $0x44] sm:$0x1]  ;;  %v1019_v45 = vshrl.u32 %v841_v33, 16  ;;  %v391_v48 = vsel %vm13716_vm9, %v383_v27, %v390_v29  ;;  %12478 = vmatprep.subr.bf16.mxu1 %v13286_v17  ;;  %p13534_p10 = pneg %p13533_p9 }
  0x70   : > { %v1022_v46 = vshll.u32 %v841_v33, 16  ;;  %645 = vst [vmem:[#allocation2 + $0x54] sm:$0xf] %v644_v34  ;;  %v648_v50 = vsel %vm13724_vm10, %v392_v23, %v647_v28  ;;  %v1028_v51 = vshll.u32 %v842_v43, 16  ;;  %v1032_v52 = vshrl.u32 %v842_v43, 16  ;;  %v13287_v22 = vld [vmem:[#allocation5 + $0x138] sm:$0xff]  }
  0x71   : > { %v1038_v53 = vshll.u32 %v884_v44, 16  ;;  %v11316_v54 = vcombine.low %v841_v33, %v842_v43  ;;  %646 = vst.msk [vmem:[#allocation2 + $0x58] sm:$0xf] %vm595_vm5, %v391_v48  ;;  %649 = vst [vmem:[#allocation2 + $0x5c] sm:$0x1] %v648_v50  ;;  %v1021_v55 = vrot.slane %v1019_v45, 4  ;;  %v407_v59 = vor.u32 %v405_v21, %v404_v35  ;;  %12427 = vmatpush3.bf16.msra.mxu0 %v13274_v9 }
  0x72   : > { %v1024_v56 = vrot.slane %v1022_v46, 5  ;;  %v843_v58 = vld [vmem:[#allocation2 + $0x48] sm:$0xf]  ;;  %v409_v61 = vrot.slane %v404_v35, 4  ;;  %v1030_v62 = vrot.slane %v1028_v51, 5  ;;  %v1034_v63 = vrot.slane %v1032_v52, 4  ;;  %12428 = vmatprep.subr.bf16.mxu0 %v13279_v39  ;;  %12479 = vmatpush3.bf16.msra.mxu1 %v13286_v17 }
  0x73   : > { %v1040_v0 = vrot.slane %v1038_v53, 5  ;;  %12393 = vmatmul.mubr.bf16.gmra.mxu1 %v11316_v54  ;;  %v1043_v1 = vshrl.u32 %v843_v58, 16  ;;  %v1046_v11 = vshll.u32 %v843_v58, 16  ;;  %v408_v3 = vsel %vm13716_vm9, %v400_v32, %v407_v59 }
  0x74   : > { %v1025_v2 = vor.u32 %v1024_v56, %v1021_v55  ;;  %v651_v4 = vsel %vm13710_vm8, %v399_v30, %v650_v36  ;;  %v1035_v5 = vor.u32 %v1034_v63, %v1030_v62  ;;  %v13834_v6 = vld [vmem:[#allocation2 + $0x4c] sm:$0xf]  ;;  %v13836_v7 = vld [vmem:[#allocation2 + $0x50] sm:$0x1]  ;;  %653 = vst.msk [vmem:[#allocation2 + $0x64] sm:$0xf] %vm595_vm5, %v408_v3  ;;  %v655_v9 = vsel %vm13724_vm10, %v409_v61, %v654_v42 }
  0x75   : > { %v1045_v8 = vrot.slane %v1043_v1, 4  ;;  %652 = vst [vmem:[#allocation2 + $0x60] sm:$0xf] %v651_v4  ;;  %v13841_v10 = vrot.slane %v411_v37, 7  ;;  %v1048_v13 = vrot.slane %v1046_v11, 5  ;;  %v1052_v14 = vshll.u32 %v13834_v6, 16  ;;  %12429 = vmatpush3.bf16.msra.mxu0 %v13279_v39 }
  0x76   : > { %v1026_v12 = vrot.slane %v1025_v2, 4  ;;  %v1056_v16 = vshrl.u32 %v13834_v6, 16  ;;  %656 = vst [vmem:[#allocation2 + $0x68] sm:$0x1] %v655_v9  ;;  %v1036_v17 = vrot.slane %v1035_v5, 4  ;;  %v1062_v18 = vshll.u32 %v13836_v7, 16  ;;  %12430 = vmatprep.subr.bf16.mxu0 %v13284_v60 }
  0x77   : > { %v11317_v19 = vcombine.low %v843_v58, %v13834_v6  ;;  %v845_v20 = vld [vmem:[#allocation2 + $0x54] sm:$0xf]  ;;  %v13848_v21 = vor.u32 %v414_v38, %v13841_v10  ;;  %v1049_v25 = vor.u32 %v1048_v13, %v1045_v8  ;;  %v1054_v26 = vrot.slane %v1052_v14, 5  ;;  %v256_v58 = vld [vmem:[%s13695_s9 + $0x44] sm:$0xf] }
  0x78   : > { %v1031_v24 = vsel %vm13704_vm7, %v1026_v12, %v1030_v62  ;;  %v1058_v27 = vrot.slane %v1056_v16, 4  ;;  %v13852_v28 = vld [vmem:[#allocation2 + $0x58] sm:$0xf]  ;;  %v13854_v29 = vld [vmem:[#allocation2 + $0x5c] sm:$0x1]  ;;  %v1041_v23 = vsel %vm13704_vm7, %v1036_v17, %v1040_v0  ;;  %v1064_v30 = vrot.slane %v1062_v18, 5 }
  0x79   : > { %12396 = vmatprep.mubr.bf16.mxu1 %v11317_v19  ;;  %v1067_v32 = vshrl.u32 %v845_v20, 16  ;;  %v1070_v33 = vshll.u32 %v845_v20, 16  ;;  %v11292_v34 = vcombine.low %v1031_v24, %v1041_v23  ;;  %v1050_v35 = vrot.slane %v1049_v25, 4  ;;  %12431 = vmatpush3.bf16.msra.mxu0 %v13284_v60  ;;  %v657_v63 = vld [vmem:[#allocation2 + $0x6c] sm:$0xf] }
  0x7a   : > { %v1059_v36 = vor.u32 %v1058_v27, %v1054_v26  ;;  %v1076_v37 = vshll.u32 %v13852_v28, 16  ;;  %v1080_v43 = vshrl.u32 %v13852_v28, 16  ;;  %v1086_v44 = vshll.u32 %v13854_v29, 16  ;;  %12512 = vmatprep.subr.bf16.mxu0 %v13287_v22  ;;  %v257_v3 = vld [vmem:[%s13695_s9 + $0x48] sm:$0xf] }
  0x7b   : > { %v1069_v38 = vrot.slane %v1067_v32, 4  ;;  %v1072_v39 = vrot.slane %v1070_v33, 5  ;;  %12345 = vmatmul.mubr.bf16.gmra.mxu0 %v11292_v34  ;;  %v1055_v45 = vsel %vm13704_vm7, %v1050_v35, %v1054_v26  ;;  %v11318_v50 = vcombine.low %v845_v20, %v13852_v28  ;;  %v13864_v51 = vld [vmem:[#allocation2 + $0x64] sm:$0xf]  ;;  %v258_v12 = vld [vmem:[%s13695_s9 + $0x4c] sm:$0xf] }
  0x7c   : > { %v1060_v46 = vrot.slane %v1059_v36, 4  ;;  %v1078_v48 = vrot.slane %v1076_v37, 5  ;;  %v847_v42 = vld [vmem:[#allocation2 + $0x60] sm:$0xf]  ;;  %v1082_v53 = vrot.slane %v1080_v43, 4  ;;  %v1088_v54 = vrot.slane %v1086_v44, 5 }
  0x7d   : > { %v1073_v52 = vor.u32 %v1072_v39, %v1069_v38  ;;  %v13866_v55 = vld [vmem:[#allocation2 + $0x68] sm:$0x1]  ;;  %v1091_v56 = vshrl.u32 %v847_v42, 16  ;;  %12397 = vmatmul.mubr.bf16.gmra.mxu1 %v11318_v50  ;;  %v1094_v61 = vshll.u32 %v847_v42, 16  ;;  %v1100_v60 = vshll.u32 %v13864_v51, 16 }
  0x7e   : > { %v1065_v59 = vsel %vm13704_vm7, %v1060_v46, %v1064_v30  ;;  %v1104_v62 = vshrl.u32 %v13864_v51, 16  ;;  %v1083_v2 = vor.u32 %v1082_v53, %v1078_v48  ;;  %v1110_v9 = vshll.u32 %v13866_v55, 16  ;;  %v661_v27 = vld [vmem:[#allocation2 + $0x74] sm:$0x1]  ;;  %v664_v34 = vld [vmem:[#allocation2 + $0x78] sm:$0xf] }
  0x7f   : > { %v11293_v0 = vcombine.low %v1055_v45, %v1065_v59  ;;  %v1074_v1 = vrot.slane %v1073_v52, 4  ;;  %v1093_v11 = vrot.slane %v1091_v56, 4  ;;  %v1096_v4 = vrot.slane %v1094_v61, 5  ;;  %v259_v39 = vld [vmem:[%s13695_s9 + $0x50] sm:$0xf] }
  0x80   : > { %v1102_v5 = vrot.slane %v1100_v60, 5  ;;  %v1106_v8 = vrot.slane %v1104_v62, 4  ;;  %v1084_v14 = vrot.slane %v1083_v2, 4  ;;  %v11319_v16 = vcombine.low %v847_v42, %v13864_v51  ;;  %v668_v46 = vld [vmem:[#allocation2 + $0x80] sm:$0x1] }
  0x81   : > { %12348 = vmatprep.mubr.bf16.mxu0 %v11293_v0  ;;  %v1079_v13 = vsel %vm13704_vm7, %v1074_v1, %v1078_v48  ;;  %v417_v17 = vrot.slane %v13841_v10, 4  ;;  %v1097_v18 = vor.u32 %v1096_v4, %v1093_v11  ;;  %v1112_v20 = vrot.slane %v1110_v9, 5  ;;  %v260_v48 = vld [vmem:[%s13695_s9 + $0x54] sm:$0xf]  ;;  %v262_v56 = vld [vmem:[%s13695_s9 + $0x5c] sm:$0xf] }
  0x82   : > { %v1107_v19 = vor.u32 %v1106_v8, %v1102_v5  ;;  %v419_v22 = vshrl.u32 %v256_v58, 16  ;;  %v1089_v24 = vsel %vm13704_vm7, %v1084_v14, %v1088_v54  ;;  %12400 = vmatprep.mubr.bf16.mxu1 %v11319_v16  ;;  %v422_v25 = vshll.u32 %v256_v58, 16  ;;  %v261_v54 = vld [vmem:[%s13695_s9 + $0x58] sm:$0xf]  ;;  %v671_v2 = vld [vmem:[#allocation2 + $0x84] sm:$0xf] }
  0x83   : > { %v658_v26 = vsel %vm13710_vm8, %v13848_v21, %v657_v63  ;;  %v428_v23 = vshrl.u32 %v257_v3, 16  ;;  %v11294_v30 = vcombine.low %v1079_v13, %v1089_v24  ;;  %v1098_v32 = vrot.slane %v1097_v18, 4 }
  0x84   : > { %v1108_v10 = vrot.slane %v1107_v19, 4  ;;  %v421_v33 = vrot.slane %v419_v22, 7  ;;  %659 = vst [vmem:[#allocation2 + $0x6c] sm:$0xf] %v658_v26  ;;  %v431_v36 = vshll.u32 %v257_v3, 16  ;;  %v436_v37 = vshrl.u32 %v258_v12, 16 }
  0x85   : > { %v430_v35 = vrot.slane %v428_v23, 7  ;;  %v439_v38 = vshll.u32 %v258_v12, 16  ;;  %12349 = vmatmul.mubr.bf16.gmra.mxu0 %v11294_v30  ;;  %v1103_v21 = vsel %vm13704_vm7, %v1098_v32, %v1102_v5  ;;  %v445_v61 = vshrl.u32 %v259_v39, 16  ;;  %v13905_v22 = vld [vmem:[#allocation5 + $0x178] sm:$0xff]   ;;  %v13908_v23 = vld [vmem:[%s13695_s9 + $0x60] sm:$0xf] }
  0x86   : > { %v1113_v43 = vsel %vm13704_vm7, %v1108_v10, %v1112_v20  ;;  %v424_v44 = vor.u32 %v422_v25, %v421_v33  ;;  %v426_v45 = vrot.slane %v421_v33, 4  ;;  %v438_v53 = vrot.slane %v436_v37, 7  ;;  %v675_v20 = vld [vmem:[#allocation2 + $0x8c] sm:$0x1]  ;;  %12560 = vmatprep.subr.bf16.mxu1 %v13905_v22 }
  0x87   : > { %v11295_v50 = vcombine.low %v1103_v21, %v1113_v43  ;;  %v433_v42 = vor.u32 %v431_v36, %v430_v35  ;;  %v434_v52 = vrot.slane %v430_v35, 4  ;;  %v448_v60 = vshll.u32 %v259_v39, 16 }
  0x88   : > { %v425_v58 = vsel %vm13716_vm9, %v417_v17, %v424_v44  ;;  %v662_v59 = vsel %vm13724_vm10, %v426_v45, %v661_v27  ;;  %v441_v62 = vor.u32 %v439_v38, %v438_v53  ;;  %v443_v63 = vrot.slane %v438_v53, 4 }
  0x89   : > { %12352 = vmatprep.mubr.bf16.mxu0 %v11295_v50  ;;  %660 = vst.msk [vmem:[#allocation2 + $0x70] sm:$0xf] %vm595_vm5, %v425_v58  ;;  %663 = vst [vmem:[#allocation2 + $0x74] sm:$0x1] %v662_v59  ;;  %v665_v0 = vsel %vm13710_vm8, %v433_v42, %v664_v34  ;;  %v453_v1 = vshrl.u32 %v260_v48, 16  ;;  %v447_v11 = vrot.slane %v445_v61, 7 }
  0x8a   : > { %666 = vst [vmem:[#allocation2 + $0x78] sm:$0xf] %v665_v0  ;;  %v456_v3 = vshll.u32 %v260_v48, 16  ;;  %v462_v4 = vshrl.u32 %v261_v54, 16  ;;  %v465_v5 = vshll.u32 %v261_v54, 16  ;;  %v442_v9 = vsel %vm13716_vm9, %v434_v52, %v441_v62 }
  0x8b   : > { %v849_v8 = vld [vmem:[#allocation2 + $0x6c] sm:$0xf]  ;;  %v669_v12 = vsel %vm13724_vm10, %v443_v63, %v668_v46  ;;  %v455_v13 = vrot.slane %v453_v1, 7  ;;  %v470_v14 = vshrl.u32 %v262_v56, 16  ;;  %667 = vst.msk [vmem:[#allocation2 + $0x7c] sm:$0xf] %vm595_vm5, %v442_v9  ;;  %v450_v18 = vor.u32 %v448_v60, %v447_v11 }
  0x8c   : > { %v1115_v16 = vshrl.u32 %v849_v8, 16  ;;  %v1118_v17 = vshll.u32 %v849_v8, 16  ;;  %670 = vst [vmem:[#allocation2 + $0x80] sm:$0x1] %v669_v12  ;;  %v451_v19 = vrot.slane %v447_v11, 4  ;;  %v464_v26 = vrot.slane %v462_v4, 7 }
  0x8d   : > { %v458_v24 = vor.u32 %v456_v3, %v455_v13  ;;  %v460_v25 = vrot.slane %v455_v13, 4  ;;  %v472_v27 = vrot.slane %v470_v14, 7  ;;  %v672_v10 = vsel %vm13710_vm8, %v450_v18, %v671_v2  ;;  %v678_v34 = vld [vmem:[#allocation2 + $0x90] sm:$0xf]  ;;  %v682_v54 = vld [vmem:[#allocation2 + $0x98] sm:$0x1] }
  0x8e   : > { %v1117_v30 = vrot.slane %v1115_v16, 4  ;;  %v1120_v32 = vrot.slane %v1118_v17, 5  ;;  %v473_v33 = vshll.u32 %v262_v56, 16  ;;  %673 = vst [vmem:[#allocation2 + $0x84] sm:$0xf] %v672_v10  ;;  %v467_v37 = vor.u32 %v465_v5, %v464_v26 }
  0x8f   : > { %v459_v35 = vsel %vm13716_vm9, %v451_v19, %v458_v24  ;;  %v676_v36 = vsel %vm13724_vm10, %v460_v25, %v675_v20  ;;  %v468_v38 = vrot.slane %v464_v26, 4  ;;  %v1940_v39 = vrot.slane %v13755_v47, 5 }
  0x90   : > { %v13918_v21 = vld [vmem:[#allocation2 + $0x70] sm:$0xf]  ;;  %v13920_v43 = vld [vmem:[#allocation2 + $0x74] sm:$0x1]  ;;  %v1121_v44 = vor.u32 %v1120_v32, %v1117_v30  ;;  %674 = vst.msk [vmem:[#allocation2 + $0x88] sm:$0xf] %vm595_vm5, %v459_v35  ;;  %v475_v45 = vor.u32 %v473_v33, %v472_v27  ;;  %v679_v1 = vsel %vm13710_vm8, %v467_v37, %v678_v34 }
  0x91   : > { %677 = vst [vmem:[#allocation2 + $0x8c] sm:$0x1] %v676_v36  ;;  %v477_v46 = vrot.slane %v472_v27, 4  ;;  %v1124_v48 = vshll.u32 %v13918_v21, 16  ;;  %v1128_v50 = vshrl.u32 %v13918_v21, 16  ;;  %v1134_v42 = vshll.u32 %v13920_v43, 16 }
  0x92   : > { %v11320_v52 = vcombine.low %v849_v8, %v13918_v21  ;;  %v851_v53 = vld [vmem:[#allocation2 + $0x78] sm:$0xf]  ;;  %v476_v59 = vsel %vm13716_vm9, %v468_v38, %v475_v45  ;;  %v479_v61 = vshrl.u32 %v13908_v23, 16  ;;  %v1122_v60 = vrot.slane %v1121_v44, 4  ;;  %v13930_v0 = vld [vmem:[#allocation2 + $0x7c] sm:$0xf] }
  0x93   : > { %v1139_v56 = vshrl.u32 %v851_v53, 16  ;;  %v1142_v58 = vshll.u32 %v851_v53, 16  ;;  %v1126_v62 = vrot.slane %v1124_v48, 5  ;;  %v1130_v63 = vrot.slane %v1128_v50, 4  ;;  %681 = vst.msk [vmem:[#allocation2 + $0x94] sm:$0xf] %vm595_vm5, %v476_v59 }
  0x94   : > { %12401 = vmatmul.mubr.bf16.gmra.mxu1 %v11320_v52  ;;  %v13935_v2 = vld [vmem:[#allocation2 + $0x80] sm:$0x1]  ;;  %v1148_v4 = vshll.u32 %v13930_v0, 16  ;;  %v1152_v5 = vshrl.u32 %v13930_v0, 16  ;;  %680 = vst [vmem:[#allocation2 + $0x90] sm:$0xf] %v679_v1  ;;  %v11321_v13 = vcombine.low %v851_v53, %v13930_v0  ;;  %v683_v19 = vsel %vm13724_vm10, %v477_v46, %v682_v54 }
  0x95   : > { %v1141_v11 = vrot.slane %v1139_v56, 4  ;;  %v1144_v3 = vrot.slane %v1142_v58, 5  ;;  %v1131_v8 = vor.u32 %v1130_v63, %v1126_v62  ;;  %v1136_v9 = vrot.slane %v1134_v42, 5  ;;  %v853_v18 = vld [vmem:[#allocation2 + $0x84] sm:$0xf] }
  0x96   : > { %v1158_v12 = vshll.u32 %v13935_v2, 16  ;;  %v1150_v16 = vrot.slane %v1148_v4, 5  ;;  %v1154_v17 = vrot.slane %v1152_v5, 4  ;;  %v1127_v20 = vsel %vm13704_vm7, %v1122_v60, %v1126_v62  ;;  %12404 = vmatprep.mubr.bf16.mxu1 %v11321_v13  ;;  %684 = vst [vmem:[#allocation2 + $0x98] sm:$0x1] %v683_v19 }
  0x97   : > { %v1145_v14 = vor.u32 %v1144_v3, %v1141_v11  ;;  %v1132_v24 = vrot.slane %v1131_v8, 4  ;;  %v13945_v26 = vld [vmem:[#allocation2 + $0x88] sm:$0xf]  ;;  %v1163_v10 = vshrl.u32 %v853_v18, 16  ;;  %v1166_v33 = vshll.u32 %v853_v18, 16 }
  0x98   : > { %v1160_v25 = vrot.slane %v1158_v12, 5  ;;  %v13947_v27 = vld [vmem:[#allocation2 + $0x8c] sm:$0x1]  ;;  %v1155_v32 = vor.u32 %v1154_v17, %v1150_v16  ;;  %v1172_v35 = vshll.u32 %v13945_v26, 16  ;;  %v1176_v36 = vshrl.u32 %v13945_v26, 16 }
  0x99   : > { %v1146_v30 = vrot.slane %v1145_v14, 4  ;;  %v1137_v34 = vsel %vm13704_vm7, %v1132_v24, %v1136_v9  ;;  %v1182_v37 = vshll.u32 %v13947_v27, 16  ;;  %v1165_v46 = vrot.slane %v1163_v10, 4  ;;  %v264_v62 = vld [vmem:[%s13695_s9 + $0x64] sm:$0xf] }
  0x9a   : > { %v11296_v38 = vcombine.low %v1127_v20, %v1137_v34  ;;  %v1156_v45 = vrot.slane %v1155_v32, 4  ;;  %v13956_v48 = vld [vmem:[#allocation2 + $0x94] sm:$0xf]  ;;  %v1168_v50 = vrot.slane %v1166_v33, 5  ;;  %v1174_v42 = vrot.slane %v1172_v35, 5 }
  0x9b   : > { %v1151_v44 = vsel %vm13704_vm7, %v1146_v30, %v1150_v16  ;;  %v1178_v52 = vrot.slane %v1176_v36, 4  ;;  %v1184_v53 = vrot.slane %v1182_v37, 5  ;;  %v855_v54 = vld [vmem:[#allocation2 + $0x90] sm:$0xf]  ;;  %v11322_v58 = vcombine.low %v853_v18, %v13945_v26  ;;  %v685_v18 = vld [vmem:[#allocation2 + $0x9c] sm:$0xf] }
  0x9c   : > { %12353 = vmatmul.mubr.bf16.gmra.mxu0 %v11296_v38  ;;  %v1161_v56 = vsel %vm13704_vm7, %v1156_v45, %v1160_v25  ;;  %v1187_v59 = vshrl.u32 %v855_v54, 16  ;;  %v1190_v60 = vshll.u32 %v855_v54, 16  ;;  %v1169_v1 = vor.u32 %v1168_v50, %v1165_v46  ;;  %v265_v19 = vld [vmem:[%s13695_s9 + $0x68] sm:$0xf]  ;;  %v266_v32 = vld [vmem:[%s13695_s9 + $0x6c] sm:$0xf] }
  0x9d   : > { %v11297_v63 = vcombine.low %v1151_v44, %v1161_v56  ;;  %v1179_v11 = vor.u32 %v1178_v52, %v1174_v42  ;;  %v1196_v3 = vshll.u32 %v13956_v48, 16  ;;  %12405 = vmatmul.mubr.bf16.gmra.mxu1 %v11322_v58  ;;  %v13963_v4 = vld [vmem:[#allocation2 + $0x98] sm:$0x1]  ;;  %v1200_v9 = vshrl.u32 %v13956_v48, 16  ;;  %v267_v36 = vld [vmem:[%s13695_s9 + $0x70] sm:$0xf] }
  0x9e   : > { %v1189_v5 = vrot.slane %v1187_v59, 4  ;;  %v1192_v8 = vrot.slane %v1190_v60, 5  ;;  %v11323_v12 = vcombine.low %v855_v54, %v13956_v48  ;;  %v1170_v13 = vrot.slane %v1169_v1, 4  ;;  %v689_v46 = vld [vmem:[#allocation2 + $0xa4] sm:$0x1] }
  0x9f   : > { %12356 = vmatprep.mubr.bf16.mxu0 %v11297_v63  ;;  %v1180_v14 = vrot.slane %v1179_v11, 4  ;;  %v1198_v16 = vrot.slane %v1196_v3, 5  ;;  %v1206_v17 = vshll.u32 %v13963_v4, 16  ;;  %v1202_v24 = vrot.slane %v1200_v9, 4  ;;  %v692_v58 = vld [vmem:[#allocation2 + $0xa8] sm:$0xf] }
  0xa0   : > { %v1193_v20 = vor.u32 %v1192_v8, %v1189_v5  ;;  %12408 = vmatprep.mubr.bf16.mxu1 %v11323_v12  ;;  %v481_v25 = vrot.slane %v479_v61, 7  ;;  %v482_v30 = vshll.u32 %v13908_v23, 16  ;;  %v1175_v10 = vsel %vm13704_vm7, %v1170_v13, %v1174_v42  ;;  %v268_v11 = vld [vmem:[%s13695_s9 + $0x74] sm:$0xf]  ;;  %v13985_v9 = vld [vmem:[#allocation2] sm:$0xe] }
  0xa1   : > { %v1185_v33 = vsel %vm13704_vm7, %v1180_v14, %v1184_v53  ;;  %v1208_v34 = vrot.slane %v1206_v17, 5  ;;  %v487_v35 = vshrl.u32 %v264_v62, 16  ;;  %v1203_v44 = vor.u32 %v1202_v24, %v1198_v16  ;;  %v13987_v12 = vld [vmem:[#allocation2 + $0xc] sm:$0xe] }
  0xa2   : > { %v11298_v37 = vcombine.low %v1175_v10, %v1185_v33  ;;  %v1194_v38 = vrot.slane %v1193_v20, 4  ;;  %v484_v45 = vor.u32 %v482_v30, %v481_v25  ;;  %v485_v50 = vrot.slane %v481_v25, 4 }
  0xa3   : > { %v489_v61 = vrot.slane %v487_v35, 7  ;;  %v490_v52 = vshll.u32 %v264_v62, 16  ;;  %v496_v23 = vshrl.u32 %v265_v19, 16  ;;  %v1204_v54 = vrot.slane %v1203_v44, 4 }
  0xa4   : > { %12357 = vmatmul.mubr.bf16.gmra.mxu0 %v11298_v37  ;;  %v1199_v42 = vsel %vm13704_vm7, %v1194_v38, %v1198_v16  ;;  %v686_v53 = vsel %vm13710_vm8, %v484_v45, %v685_v18  ;;  %v499_v56 = vshll.u32 %v265_v19, 16  ;;  %v504_v1 = vshrl.u32 %v266_v32, 16  ;;  %v696_v18 = vld [vmem:[#allocation2 + $0xb0] sm:$0x1]  ;;  %v699_v19 = vld [vmem:[#allocation2 + $0xb4] sm:$0xf] }
  0xa5   : > { %v492_v59 = vor.u32 %v490_v52, %v489_v61  ;;  %v494_v60 = vrot.slane %v489_v61, 4  ;;  %687 = vst [vmem:[#allocation2 + $0x9c] sm:$0xf] %v686_v53  ;;  %v498_v63 = vrot.slane %v496_v23, 7  ;;  %v1209_v62 = vsel %vm13704_vm7, %v1204_v54, %v1208_v34  ;;  %v703_v37 = vld [vmem:[#allocation2 + $0xbc] sm:$0x1] }
  0xa6   : > { %v507_v3 = vshll.u32 %v266_v32, 16  ;;  %v513_v5 = vshrl.u32 %v267_v36, 16  ;;  %v516_v8 = vshll.u32 %v267_v36, 16  ;;  %v11299_v13 = vcombine.low %v1199_v42, %v1209_v62  ;;  %v13479_v45 = vld [vmem:[#allocation2 + $0x4] sm:$0xf] }
  0xa7   : > { %v493_v14 = vsel %vm13716_vm9, %v485_v50, %v492_v59  ;;  %v690_v16 = vsel %vm13724_vm10, %v494_v60, %v689_v46  ;;  %v501_v17 = vor.u32 %v499_v56, %v498_v63  ;;  %v502_v20 = vrot.slane %v498_v63, 4  ;;  %v13480_v54 = vld [vmem:[#allocation2 + $0x10] sm:$0xf]  ;;  %v1879_v56 = vld [vmem:[#allocation2 + $0x18] sm:$0xe] }
  0xa8   : > { %688 = vst.msk [vmem:[#allocation2 + $0xa0] sm:$0xf] %vm595_vm5, %v493_v14  ;;  %691 = vst [vmem:[#allocation2 + $0xa4] sm:$0x1] %v690_v16  ;;  %v506_v24 = vrot.slane %v504_v1, 7  ;;  %v515_v25 = vrot.slane %v513_v5, 7  ;;  %12360 = vmatprep.mubr.bf16.mxu0 %v11299_v13 }
  0xa9   : > { %v521_v30 = vshrl.u32 %v268_v11, 16  ;;  %v693_v32 = vsel %vm13710_vm8, %v501_v17, %v692_v58  ;;  %v524_v10 = vshll.u32 %v268_v11, 16  ;;  %vm1925_vm11 = vcmask 1042432  }
  0xaa   : > { %vm1926_vm12 = vcmask 1046532   ;;  %v509_v33 = vor.u32 %v507_v3, %v506_v24  ;;  %v511_v34 = vrot.slane %v506_v24, 4  ;;  %694 = vst [vmem:[#allocation2 + $0xa8] sm:$0xf] %v693_v32  ;;  %v518_v35 = vor.u32 %v516_v8, %v515_v25 }
  0xab   : > { %v519_v36 = vrot.slane %v515_v25, 4  ;;  %v523_v38 = vrot.slane %v521_v30, 7  ;;  %v11335_v44 = vrot.slane %v13985_v9, 9  ;;  %v1930_v46 = vrot.slane %v13479_v45, 5  ;;  %vm14007_vm13 = vmor %vm1925_vm11, %vm1926_vm12 }
  0xac   : > { %v11336_v50 = vrot.slane %v13987_v12, 9  ;;  %v857_v61 = vld [vmem:[#allocation2 + $0x9c] sm:$0xf]  ;;  %v510_v52 = vsel %vm13716_vm9, %v502_v20, %v509_v33  ;;  %v697_v23 = vsel %vm13724_vm10, %v511_v34, %v696_v18  ;;  %v700_v42 = vsel %vm13710_vm8, %v518_v35, %v699_v19 }
  0xad   : > { %v1937_v53 = vrot.slane %v13480_v54, 5  ;;  %v1211_v58 = vshrl.u32 %v857_v61, 16  ;;  %v1214_v59 = vshll.u32 %v857_v61, 16  ;;  %695 = vst.msk [vmem:[#allocation2 + $0xac] sm:$0xf] %vm595_vm5, %v510_v52  ;;  %v526_v60 = vor.u32 %v524_v10, %v523_v38 }
  0xae   : > { %698 = vst [vmem:[#allocation2 + $0xb0] sm:$0x1] %v697_v23  ;;  %v528_v63 = vrot.slane %v523_v38, 4  ;;  %701 = vst [vmem:[#allocation2 + $0xb4] sm:$0xf] %v700_v42  ;;  %v18206_v1 = vmov 0  ;;  %v14026_v24 = vsel %vm14007_vm13, %v11335_v44, %v1930_v46 }
  0xaf   : > { %v18207_v1 = vsel %vm14007_vm13, 4294967295, %v18206_v1  ;;  %v1932_v11 = vrot.slane %v1930_v46, 4  ;;  %v1939_v62 = vrot.slane %v1937_v53, 4  ;;  %v14011_v3 = vld [vmem:[#allocation2 + $0xa0] sm:$0xf]  ;;  %v1213_v8 = vrot.slane %v1211_v58, 4 }
  0xb0   : > { %18208 = vst [vmem:[#allocation13_spill] sm:$0xff] %v18207_v1  ;;  %v14013_v5 = vld [vmem:[#allocation2 + $0xa4] sm:$0x1]  ;;  %v1216_v9 = vrot.slane %v1214_v59, 5  ;;  %v527_v12 = vsel %vm13716_vm9, %v519_v36, %v526_v60  ;;  %v704_v13 = vsel %vm13724_vm10, %v528_v63, %v703_v37  ;;  %v1220_v14 = vshll.u32 %v14011_v3, 16 }
  0xb1   : > { %v1224_v16 = vshrl.u32 %v14011_v3, 16  ;;  %v1230_v17 = vshll.u32 %v14013_v5, 16  ;;  %v11324_v18 = vcombine.low %v857_v61, %v14011_v3  ;;  %702 = vst.msk [vmem:[#allocation2 + $0xb8] sm:$0xf] %vm595_vm5, %v527_v12  ;;  %705 = vst [vmem:[#allocation2 + $0xbc] sm:$0x1] %v704_v13  ;;  %v14032_v25 = vsel %vm14007_vm13, %v1932_v11, %v1933_v57 }
  0xb2   : > { %v1217_v19 = vor.u32 %v1216_v9, %v1213_v8  ;;  %v859_v20 = vld [vmem:[#allocation2 + $0xa8] sm:$0xf]  ;;  %v11337_v30 = vrot.slane %v1879_v56, 9  ;;  %v1222_v32 = vrot.slane %v1220_v14, 5  ;;  %v14036_v37 = vsel %vm14007_vm13, %v11336_v50, %v1937_v53  ;;  %v13481_v61 = vld [vmem:[#allocation2 + $0x1c] sm:$0xf] }
  0xb3   : > { %v1226_v10 = vrot.slane %v1224_v16, 4  ;;  %v1232_v33 = vrot.slane %v1230_v17, 5  ;;  %12409 = vmatmul.mubr.bf16.gmra.mxu1 %v11324_v18  ;;  %v1235_v34 = vshrl.u32 %v859_v20, 16  ;;  %v1238_v36 = vshll.u32 %v859_v20, 16  ;;  %v13288_v16 = vld [vmem:[#allocation2 + $0xc] sm:$0xff]  }
  0xb4   : > { %v1218_v35 = vrot.slane %v1217_v19, 4  ;;  %v14042_v15 = vsel %vm14007_vm13, %v1939_v62, %v1940_v39  ;;  %v14044_v38 = vld [vmem:[#allocation2 + $0xac] sm:$0xf]  ;;  %v11351_v46 = vcombine.low %v14026_v24, %v14032_v25  ;;  %v1944_v52 = vrot.slane %v13481_v61, 5  ;;  %v1880_v17 = vld [vmem:[#allocation2 + $0x24] sm:$0xe] }
  0xb5   : > { %v1227_v57 = vor.u32 %v1226_v10, %v1222_v32  ;;  %v14046_v44 = vld [vmem:[#allocation2 + $0xb0] sm:$0x1]  ;;  %v1237_v45 = vrot.slane %v1235_v34, 4  ;;  %v1240_v23 = vrot.slane %v1238_v36, 5  ;;  %v1244_v47 = vshll.u32 %v14044_v38, 16 }
  0xb6   : > { %v1223_v50 = vsel %vm13704_vm7, %v1218_v35, %v1222_v32  ;;  %v1248_v39 = vshrl.u32 %v14044_v38, 16  ;;  %v861_v42 = vld [vmem:[#allocation2 + $0xb4] sm:$0xf]  ;;  %v1254_v53 = vshll.u32 %v14046_v44, 16  ;;  %v11325_v56 = vcombine.low %v859_v20, %v14044_v38  ;;  %v1881_v36 = vld [vmem:[#allocation2 + $0x30] sm:$0xe] }
  0xb7   : > { %v1228_v54 = vrot.slane %v1227_v57, 4  ;;  %v1259_v58 = vshrl.u32 %v861_v42, 16  ;;  %v1241_v59 = vor.u32 %v1240_v23, %v1237_v45  ;;  %v1246_v60 = vrot.slane %v1244_v47, 5 }
  0xb8   : > { %v1250_v63 = vrot.slane %v1248_v39, 4  ;;  %v14056_v11 = vld [vmem:[#allocation2 + $0xb8] sm:$0xf]  ;;  %v14058_v62 = vld [vmem:[#allocation2 + $0xbc] sm:$0x1]  ;;  %v14062_v8 = vsel %vm14007_vm13, %v11337_v30, %v1944_v52  ;;  %v1256_v12 = vrot.slane %v1254_v53, 5  ;;  %12412 = vmatprep.mubr.bf16.mxu1 %v11325_v56 }
  0xb9   : > { %v1233_v9 = vsel %vm13704_vm7, %v1228_v54, %v1232_v33  ;;  %v1261_v13 = vrot.slane %v1259_v58, 4  ;;  %v1262_v14 = vshll.u32 %v861_v42, 16  ;;  %v1242_v19 = vrot.slane %v1241_v59, 4  ;;  %v13482_v39 = vld [vmem:[#allocation2 + $0x20] sm:$0x1] }
  0xba   : > { %v11300_v18 = vcombine.low %v1223_v50, %v1233_v9  ;;  %v1251_v20 = vor.u32 %v1250_v63, %v1246_v60  ;;  %v1268_v32 = vshll.u32 %v14056_v11, 16  ;;  %v1272_v34 = vshrl.u32 %v14056_v11, 16  ;;  %v1882_v53 = vld [vmem:[#allocation2 + $0x3c] sm:$0xe]  ;;  %v13483_v58 = vld [vmem:[#allocation2 + $0x28] sm:$0xf] }
  0xbb   : > { %v1264_v10 = vrot.slane %v1262_v14, 5  ;;  %v1278_v30 = vshll.u32 %v14058_v62, 16  ;;  %v11326_v35 = vcombine.low %v861_v42, %v14056_v11  ;;  %v1247_v33 = vsel %vm13704_vm7, %v1242_v19, %v1246_v60  ;;  %v13484_v63 = vld [vmem:[#allocation2 + $0x2c] sm:$0x1] }
  0xbc   : > { %12361 = vmatmul.mubr.bf16.gmra.mxu0 %v11300_v18  ;;  %v1252_v57 = vrot.slane %v1251_v20, 4  ;;  %v1270_v45 = vrot.slane %v1268_v32, 5  ;;  %v1946_v61 = vrot.slane %v1944_v52, 4  ;;  %v1274_v23 = vrot.slane %v1272_v34, 4  ;;  %v13289_v52 = vld [vmem:[#allocation2 + $0x18] sm:$0xff]  }
  0xbd   : > { %v1265_v50 = vor.u32 %v1264_v10, %v1261_v13  ;;  %v1280_v47 = vrot.slane %v1278_v30, 5  ;;  %12413 = vmatmul.mubr.bf16.gmra.mxu1 %v11326_v35  ;;  %v1947_v54 = vrot.slane %v13482_v39, 5  ;;  %v11338_v42 = vrot.slane %v1880_v17, 9  ;;  %v13291_v10 = vld [vmem:[#allocation2 + $0x24] sm:$0xff]   ;;  %v13485_v34 = vld [vmem:[#allocation2 + $0x34] sm:$0xf] }
  0xbe   : > { %v1257_v56 = vsel %vm13704_vm7, %v1252_v57, %v1256_v12  ;;  %12480 = vmatprep.mubr.bf16.mxu1 %v13288_v16  ;;  %v1951_v59 = vrot.slane %v13483_v58, 5  ;;  %v1954_v9 = vrot.slane %v13484_v63, 5  ;;  %v1275_v18 = vor.u32 %v1274_v23, %v1270_v45  ;;  %v13486_v35 = vld [vmem:[#allocation2 + $0x38] sm:$0x1]  ;;  %v1883_v57 = vld [vmem:[#allocation2 + $0x48] sm:$0xe] }
  0xbf   : > { %v11301_v60 = vcombine.low %v1247_v33, %v1257_v56  ;;  %v1266_v14 = vrot.slane %v1265_v50, 4  ;;  %v14076_v13 = vsel %vm14007_vm13, %v1946_v61, %v1947_v54  ;;  %v11352_v19 = vcombine.low %v14036_v37, %v14042_v15  ;;  %v1884_v54 = vld [vmem:[#allocation2 + $0x54] sm:$0xe]  ;;  %v1885_v56 = vld [vmem:[#allocation2 + $0x60] sm:$0xe] }
  0xc0   : > { %v14082_v12 = vsel %vm14007_vm13, %v11338_v42, %v1951_v59  ;;  %v1953_v16 = vrot.slane %v1951_v59, 4  ;;  %v11339_v17 = vrot.slane %v1881_v36, 9  ;;  %v1276_v32 = vrot.slane %v1275_v18, 4  ;;  %v13487_v36 = vld [vmem:[#allocation2 + $0x40] sm:$0xf] }
  0xc1   : > { %12364 = vmatprep.mubr.bf16.mxu0 %v11301_v60  ;;  %v1271_v20 = vsel %vm13704_vm7, %v1266_v14, %v1270_v45  ;;  %v1958_v30 = vrot.slane %v13485_v34, 5  ;;  %v1961_v33 = vrot.slane %v13486_v35, 5  ;;  %v11353_v61 = vcombine.low %v14062_v8, %v14076_v13  ;;  %v13303_v45 = vld [vmem:[#allocation5 + $0x170] sm:$0xff]  }
  0xc2   : > { %v14090_v50 = vsel %vm14007_vm13, %v1953_v16, %v1954_v9  ;;  %v11340_v23 = vrot.slane %v1882_v53, 9  ;;  %v1965_v39 = vrot.slane %v13487_v36, 5  ;;  %v1281_v42 = vsel %vm13704_vm7, %v1276_v32, %v1280_v47  ;;  %v13488_v63 = vld [vmem:[#allocation2 + $0x44] sm:$0x1]  ;;  %v1886_v16 = vld [vmem:[#allocation2 + $0x6c] sm:$0xe] }
  0xc3   : > { %v14096_v58 = vsel %vm14007_vm13, %v11339_v17, %v1958_v30  ;;  %v1960_v59 = vrot.slane %v1958_v30, 4  ;;  %v1968_v60 = vrot.slane %v13488_v63, 5  ;;  %v11302_v14 = vcombine.low %v1271_v20, %v1281_v42  ;;  %v13290_v42 = vld [vmem:[#allocation5 + $0x130] sm:$0xff]  }
  0xc4   : > { %v11354_v9 = vcombine.low %v14082_v12, %v14090_v50  ;;  %v1967_v53 = vrot.slane %v1965_v39, 4  ;;  %v11341_v18 = vrot.slane %v1883_v57, 9  ;;  %v1972_v47 = vrot.slane %v13834_v6, 5 }
  0xc5   : > { %12481 = vmatmul.mubr.bf16.vlgmr.msra.gmra.mxu1 %v13289_v52  ;;  %v14102_v34 = vsel %vm14007_vm13, %v1960_v59, %v1961_v33  ;;  %v1975_v17 = vrot.slane %v13836_v7, 5  ;;  %v11342_v32 = vrot.slane %v1884_v54, 9  ;;  %12365 = vmatmul.mubr.bf16.gmra.mxu0 %v11302_v14  ;;  %v14110_v30 = vsel %vm14007_vm13, %v11340_v23, %v1965_v39  ;;  %v1887_v33 = vld [vmem:[#allocation2 + $0x78] sm:$0xe]  ;;  %v13292_v23 = vld [vmem:[#allocation2 + $0x30] sm:$0xff]  }
  0xc6   : > { %12484 = vmatprep.mubr.bf16.mxu1 %v13291_v10  ;;  %v11355_v20 = vcombine.low %v14096_v58, %v14102_v34  ;;  %v1979_v52 = vrot.slane %v13852_v28, 5  ;;  %v1982_v35 = vrot.slane %v13854_v29, 5  ;;  %12432 = vmatprep.mubr.bf16.mxu0 %v11351_v46  ;;  %v14119_v6 = vsel %vm14007_vm13, %v1967_v53, %v1968_v60  ;;  %v13307_v46 = vld [vmem:[#allocation5 + $0x168] sm:$0xff]   ;;  %v1889_v14 = vld [vmem:[#allocation2 + $0x90] sm:$0xe] }
  0xc7   : > { %v14123_v7 = vsel %vm14007_vm13, %v11341_v18, %v1972_v47  ;;  %v1974_v10 = vrot.slane %v1972_v47, 4  ;;  %v11343_v57 = vrot.slane %v1885_v56, 9  ;;  %12561 = vmatpush3.bf16.msra.mxu1 %v13905_v22  ;;  %v1986_v24 = vrot.slane %v13864_v51, 5  ;;  %v1888_v56 = vld [vmem:[#allocation2 + $0x84] sm:$0xe]  ;;  %v13294_v51 = vld [vmem:[#allocation2 + $0x3c] sm:$0xff]  }
  0xc8   : > { %v14128_v28 = vsel %vm14007_vm13, %v11342_v32, %v1979_v52  ;;  %v1981_v29 = vrot.slane %v1979_v52, 4  ;;  %v1989_v25 = vrot.slane %v13866_v55, 5  ;;  %12562 = vmatprep.subr.bf16.mxu1 %v13303_v45  ;;  %v11344_v39 = vrot.slane %v1886_v16, 9  ;;  %v13308_v52 = vld [vmem:[#allocation5 + $0x160] sm:$0xff]  }
  0xc9   : > { %v14134_v36 = vsel %vm14007_vm13, %v1974_v10, %v1975_v17  ;;  %v1993_v54 = vrot.slane %v13918_v21, 5  ;;  %v1996_v22 = vrot.slane %v13920_v43, 5  ;;  %v11356_v59 = vcombine.low %v14110_v30, %v14119_v6 }
  0xca   : > { %v11357_v55 = vcombine.low %v14123_v7, %v14134_v36  ;;  %v14144_v63 = vsel %vm14007_vm13, %v1981_v29, %v1982_v35  ;;  %v1988_v60 = vrot.slane %v1986_v24, 4  ;;  %v14148_v21 = vsel %vm14007_vm13, %v11343_v57, %v1986_v24  ;;  %v1890_v57 = vld [vmem:[#allocation2 + $0x9c] sm:$0xe]  ;;  %v2754_v7 = vld [vmem:[#allocation2 + $0x24] sm:$0xf] }
  0xcb   : > { %v14152_v43 = vsel %vm14007_vm13, %v11344_v39, %v1993_v54  ;;  %v1995_v53 = vrot.slane %v1993_v54, 4  ;;  %v11345_v18 = vrot.slane %v1887_v33, 9  ;;  %12563 = vmatpush3.bf16.msra.mxu1 %v13303_v45  ;;  %v11358_v16 = vcombine.low %v14128_v28, %v14144_v63  ;;  %v13293_v39 = vld [vmem:[#allocation5 + $0x128] sm:$0xff]   ;;  %v13305_v36 = vld [vmem:[#allocation2 + $0x84] sm:$0xff]  }
  0xcc   : > { %v2000_v47 = vrot.slane %v13930_v0, 5  ;;  %v2003_v17 = vrot.slane %v13935_v2, 5  ;;  %v11346_v32 = vrot.slane %v1888_v56, 9  ;;  %12564 = vmatprep.subr.bf16.mxu1 %v13307_v46  ;;  %v14160_v35 = vsel %vm14007_vm13, %v1988_v60, %v1989_v25  ;;  %v1891_v0 = vld [vmem:[#allocation2 + $0xa8] sm:$0xe]  ;;  %v13297_v60 = vld [vmem:[#allocation2 + $0x54] sm:$0xff]  }
  0xcd   : > { %12485 = vmatmul.mubr.bf16.gmra.mxu1 %v13292_v23  ;;  %v14164_v10 = vsel %vm14007_vm13, %v1995_v53, %v1996_v22  ;;  %v2007_v45 = vrot.slane %v13945_v26, 5  ;;  %v2010_v33 = vrot.slane %v13947_v27, 5  ;;  %12433 = vmatmul.mubr.bf16.vlgmr.msra.gmra.mxu0 %v11352_v19  ;;  %v11347_v25 = vrot.slane %v1889_v14, 9  ;;  %v1892_v23 = vld [vmem:[#allocation2 + $0xb4] sm:$0xe]  ;;  %v13489_v26 = vld [vmem:[#allocation5 + $0x138] sm:$0xff]  }
  0xce   : > { %12488 = vmatprep.mubr.bf16.mxu1 %v13294_v51  ;;  %v11360_v2 = vcombine.low %v14152_v43, %v14164_v10  ;;  %v14175_v29 = vsel %vm14007_vm13, %v11345_v18, %v2000_v47  ;;  %v2002_v24 = vrot.slane %v2000_v47, 4  ;;  %12513 = vmatpush3.bf16.msra.mxu0 %v13489_v26  ;;  %v2014_v15 = vrot.slane %v13956_v48, 5  ;;  %v13312_v51 = vld [vmem:[#allocation5 + $0x158] sm:$0xff]   ;;  %v269_v18 = vld [vmem:[%s13695_s9 + $0x78] sm:$0xf] }
  0xcf   : > { %12436 = vmatprep.mubr.bf16.mxu0 %v11353_v61  ;;  %v14182_v27 = vsel %vm14007_vm13, %v11346_v32, %v2007_v45  ;;  %v2009_v37 = vrot.slane %v2007_v45, 4  ;;  %v2017_v19 = vrot.slane %v13963_v4, 5  ;;  %12514 = vmatprep.subr.bf16.mxu0 %v13290_v42  ;;  %v11348_v22 = vrot.slane %v1890_v57, 9  ;;  %v13295_v61 = vld [vmem:[#allocation2 + $0x48] sm:$0xff]   ;;  %v13296_v57 = vld [vmem:[#allocation5 + $0x120] sm:$0xff]  }
  0xd0   : > { %v14188_v54 = vsel %vm14007_vm13, %v2002_v24, %v2003_v17  ;;  %12565 = vmatpush3.bf16.msra.mxu1 %v13307_v46  ;;  %v2021_v8 = vrot.slane %v14011_v3, 5  ;;  %v2024_v13 = vrot.slane %v14013_v5, 5  ;;  %v14200_v4 = vsel %vm14007_vm13, %v11347_v25, %v2014_v15 }
  0xd1   : > { %v11361_v56 = vcombine.low %v14175_v29, %v14188_v54  ;;  %v14196_v48 = vsel %vm14007_vm13, %v2009_v37, %v2010_v33  ;;  %12566 = vmatprep.subr.bf16.mxu1 %v13308_v52  ;;  %v2016_v46 = vrot.slane %v2014_v15, 4  ;;  %v11349_v53 = vrot.slane %v1891_v0, 9  ;;  %v270_v33 = vld [vmem:[%s13695_s9 + $0x7c] sm:$0xf]  ;;  %s13537_s9 = scalar_lea.vmem %s13536_s8, 2048 }
  0xd2   : > { %v11362_v3 = vcombine.low %v14182_v27, %v14196_v48  ;;  %v14206_v5 = vsel %vm14007_vm13, %v11348_v22, %v2021_v8  ;;  %v2023_v14 = vrot.slane %v2021_v8, 4  ;;  %12515 = vmatpush3.bf16.msra.mxu0 %v13290_v42  ;;  %v2028_v17 = vrot.slane %v14044_v38, 5  ;;  %v13313_v42 = vld [vmem:[#allocation5 + $0x150] sm:$0xff]   ;;  %v2748_v38 = vld [vmem:[#allocation2 + $0xc] sm:$0xf]  ;;  %p13539_p12 = scmp.lt.s32.totalorder %s13537_s9, %s13531_s7 }
  0xd3   : > { %v14211_v47 = vsel %vm14007_vm13, %v2016_v46, %v2017_v19  ;;  %v2031_v32 = vrot.slane %v14046_v44, 5  ;;  %v11350_v45 = vrot.slane %v1892_v23, 9  ;;  %12516 = vmatprep.subr.bf16.mxu0 %v13293_v39  ;;  %v2035_v25 = vrot.slane %v14056_v11, 5  ;;  %v706_v22 = vld [vmem:[#allocation2 + $0xc0] sm:$0xf]  ;;  %v13299_v8 = vld [vmem:[#allocation5 + $0x118] sm:$0xff]  }
  0xd4   : > { %12567 = vmatpush3.bf16.msra.mxu1 %v13308_v52  ;;  %v14220_v0 = vsel %vm14007_vm13, %v2023_v14, %v2024_v13  ;;  %v2038_v26 = vrot.slane %v14058_v62, 5  ;;  %v14228_v23 = vsel %vm14007_vm13, %v11349_v53, %v2028_v17  ;;  %v2030_v52 = vrot.slane %v2028_v17, 4  ;;  %v13298_v14 = vld [vmem:[#allocation2 + $0x60] sm:$0xff]   ;;  %v13300_v53 = vld [vmem:[#allocation2 + $0x6c] sm:$0xff]   ;;  %p13540_p13 = por %p13539_p12, %p13538_p11 }
  0xd5   : > { %12489 = vmatmul.mubr.bf16.gmra.mxu1 %v13295_v61  ;;  %12568 = vmatprep.subr.bf16.mxu1 %v13312_v51  ;;  %v530_v37 = vshrl.u32 %v269_v18, 16  ;;  %v14235_v11 = vsel %vm14007_vm13, %v11350_v45, %v2035_v25  ;;  %v2037_v62 = vrot.slane %v2035_v25, 4  ;;  %v533_v15 = vshll.u32 %v269_v18, 16  ;;  %v3502_v18 = vld [vmem:[#allocation2 + $0xc] sm:$0xe] }
  0xd6   : > { %12437 = vmatmul.mubr.bf16.gmra.mxu0 %v11354_v9  ;;  %12492 = vmatprep.mubr.bf16.mxu1 %v13297_v60  ;;  %v538_v19 = vshrl.u32 %v270_v33, 16  ;;  %v14242_v13 = vsel %vm14007_vm13, %v2030_v52, %v2031_v32  ;;  %v541_v50 = vshll.u32 %v270_v33, 16  ;;  %v14244_v9 = vld [vmem:[#allocation2 + $0x10] sm:$0xf]  ;;  %v2797_v61 = vshrl.u32 %v2748_v38, 16  ;;  %v13317_v32 = vld [vmem:[#allocation5 + $0x148] sm:$0xff]   ;;  %p13541_p0 = pnand %p13540_p13, %p13534_p10 }
  0xd7   : > { %12440 = vmatprep.mubr.bf16.mxu0 %v11355_v20  ;;  %12517 = vmatpush3.bf16.msra.mxu0 %v13293_v39  ;;  %v532_v12 = vrot.slane %v530_v37, 7  ;;  %v14250_v58 = vsel %vm14007_vm13, %v2037_v62, %v2038_v26  ;;  %v14254_v20 = vld [vmem:[#allocation2 + $0x14] sm:$0x1]  ;;  %v2800_v39 = vshll.u32 %v2748_v38, 16  ;;  %v2751_v60 = vld [vmem:[#allocation2 + $0x18] sm:$0xf]  ;;  %v11359_v33 = vcombine.low %v14148_v21, %v14160_v35 }
  0xd8   : > { %12518 = vmatprep.subr.bf16.mxu0 %v13296_v57  ;;  %12569 = vmatpush3.bf16.msra.mxu1 %v13312_v51  ;;  %v14252_v34 = vrot.slane %v538_v19, 7  ;;  %v2799_v45 = vrot.slane %v2797_v61, 4  ;;  %v2806_v52 = vshll.u32 %v14244_v9, 16  ;;  %v14262_v38 = vld [vmem:[#allocation2 + $0x1c] sm:$0xf]  ;;  %v13304_v62 = vld [vmem:[#allocation5 + $0x110] sm:$0xff]  }
  0xd9   : > { %12570 = vmatprep.subr.bf16.mxu1 %v13313_v42  ;;  %v535_v51 = vor.u32 %v533_v15, %v532_v12  ;;  %v536_v17 = vrot.slane %v532_v12, 4  ;;  %v2802_v26 = vrot.slane %v2800_v39, 5  ;;  %v14264_v37 = vld [vmem:[#allocation2 + $0x20] sm:$0x1]  ;;  %v2810_v19 = vshrl.u32 %v14244_v9, 16 }
  0xda   : > { %v543_v25 = vor.u32 %v541_v50, %v14252_v34  ;;  %v2816_v12 = vshll.u32 %v14254_v20, 16  ;;  %v2821_v61 = vshrl.u32 %v2751_v60, 16  ;;  %v2808_v46 = vrot.slane %v2806_v52, 5 }
  0xdb   : > { %12519 = vmatpush3.bf16.msra.mxu0 %v13296_v57  ;;  %v707_v15 = vsel %vm13710_vm8, %v535_v51, %v706_v22  ;;  %v2803_v39 = vor.u32 %v2802_v26, %v2799_v45  ;;  %v2824_v44 = vshll.u32 %v2751_v60, 16  ;;  %v2812_v57 = vrot.slane %v2810_v19, 4  ;;  %v3503_v19 = vld [vmem:[#allocation2 + $0x18] sm:$0xe] }
  0xdc   : > { %12520 = vmatprep.subr.bf16.mxu0 %v13299_v8  ;;  %12571 = vmatpush3.bf16.msra.mxu1 %v13313_v42  ;;  %v544_v50 = vsel %vm13716_vm9, %v536_v17, %v543_v25  ;;  %708 = vst [vmem:[#allocation2 + $0xc0] sm:$0xf] %v707_v15  ;;  %v2818_v22 = vrot.slane %v2816_v12, 5  ;;  %v2823_v51 = vrot.slane %v2821_v61, 4  ;;  %v2830_v24 = vshll.u32 %v14262_v38, 16  ;;  %v13309_v25 = vld [vmem:[#allocation5 + $0x108] sm:$0xff]  }
  0xdd   : > { %12493 = vmatmul.mubr.bf16.gmra.mxu1 %v13298_v14  ;;  %709 = vst.msk [vmem:[#allocation2 + $0xc4] sm:$0xf] %vm595_vm5, %v544_v50  ;;  %12572 = vmatprep.subr.bf16.mxu1 %v13317_v32  ;;  %v2804_v42 = vrot.slane %v2803_v39, 4  ;;  %v2826_v17 = vrot.slane %v2824_v44, 5  ;;  %v2834_v45 = vshrl.u32 %v14262_v38, 16  ;;  %v2840_v60 = vshll.u32 %v14264_v37, 16 }
  0xde   : > { %12441 = vmatmul.mubr.bf16.gmra.mxu0 %v11356_v59  ;;  %12496 = vmatprep.mubr.bf16.mxu1 %v13300_v53  ;;  %v13301_v14 = vld [vmem:[#allocation2 + $0x78] sm:$0xff]   ;;  %v2813_v26 = vor.u32 %v2812_v57, %v2808_v46  ;;  %v2832_v52 = vrot.slane %v2830_v24, 5  ;;  %v11423_v15 = vrot.slane %v3502_v18, 9  ;;  %v3568_v30 = vrot.slane %v14244_v9, 5  ;;  %v14287_v18 = vld [vmem:[#allocation5 + $0x1f8] sm:$0xff]   ;;  %v13314_v9 = vld [vmem:[#allocation5 + $0x100] sm:$0xff]  }
  0xdf   : > { %12444 = vmatprep.mubr.bf16.mxu0 %v11357_v55  ;;  %12521 = vmatpush3.bf16.msra.mxu0 %v13299_v8  ;;  %v545_v6 = vrot.slane %v14252_v34, 4  ;;  %v2809_v59 = vsel %vm13704_vm7, %v2804_v42, %v2808_v46  ;;  %v2827_v44 = vor.u32 %v2826_v17, %v2823_v51  ;;  %v2836_v53 = vrot.slane %v2834_v45, 4  ;;  %v14294_v39 = vld [vmem:[#allocation2 + $0x28] sm:$0xf]  ;;  %v14296_v57 = vld [vmem:[#allocation2 + $0x2c] sm:$0x1] }
  0xe0   : > { %12522 = vmatprep.subr.bf16.mxu0 %v13304_v62  ;;  %12573 = vmatpush3.bf16.msra.mxu1 %v13317_v32  ;;  %v2814_v55 = vrot.slane %v2813_v26, 4  ;;  %v2842_v8 = vrot.slane %v2840_v60, 5  ;;  %v3570_v12 = vrot.slane %v3568_v30, 4  ;;  %v3571_v24 = vrot.slane %v14254_v20, 5  ;;  %v2757_v45 = vld [vmem:[#allocation2 + $0x30] sm:$0xf] }
  0xe1   : > { %12574 = vmatprep.subr.bf16.mxu1 %v13318_v40  ;;  %v2828_v61 = vrot.slane %v2827_v44, 4  ;;  %v2837_v50 = vor.u32 %v2836_v53, %v2832_v52  ;;  %v14291_v32 = vsel %vm14007_vm13, %v11423_v15, %v3568_v30  ;;  %v3575_v46 = vrot.slane %v14262_v38, 5 }
  0xe2   : > { %v2819_v51 = vsel %vm13704_vm7, %v2814_v55, %v2818_v22  ;;  %v14302_v20 = vsel %vm14007_vm13, %v3570_v12, %v3571_v24  ;;  %v11424_v42 = vrot.slane %v3503_v19, 9  ;;  %v2845_v17 = vshrl.u32 %v2754_v7, 16 }
  0xe3   : > { %12523 = vmatpush3.bf16.msra.mxu0 %v13304_v62  ;;  %v14304_v60 = vcombine.low %v2809_v59, %v2819_v51  ;;  %v2833_v38 = vsel %vm13704_vm7, %v2828_v61, %v2832_v52  ;;  %v2838_v26 = vrot.slane %v2837_v50, 4  ;;  %v3578_v62 = vrot.slane %v14264_v37, 5  ;;  %v14320_v59 = vld [vmem:[#allocation2 + $0x34] sm:$0xf]  ;;  %v13310_v50 = vld [vmem:[#allocation2 + $0x9c] sm:$0xff]  }
  0xe4   : > { %12524 = vmatprep.subr.bf16.mxu0 %v13309_v25  ;;  %12575 = vmatpush3.bf16.msra.mxu1 %v13318_v40  ;;  %v11439_v22 = vcombine.low %v14291_v32, %v14302_v20  ;;  %v3577_v15 = vrot.slane %v3575_v46, 4  ;;  %v2847_v30 = vrot.slane %v2845_v17, 4  ;;  %v2848_v44 = vshll.u32 %v2754_v7, 16  ;;  %v3504_v7 = vld [vmem:[#allocation2 + $0x24] sm:$0xe] }
  0xe5   : > { %12497 = vmatmul.mubr.bf16.gmra.mxu1 %v13301_v14  ;;  %12656 = vmatprep.subr.bf16.mxu1 %v14287_v18  ;;  %v2843_v40 = vsel %vm13704_vm7, %v2838_v26, %v2842_v8  ;;  %v2854_v52 = vshll.u32 %v14294_v39, 16  ;;  %v2858_v37 = vshrl.u32 %v14294_v39, 16  ;;  %v2864_v14 = vshll.u32 %v14296_v57, 16  ;;  %v13316_v48 = vld [vmem:[#allocation2 + $0xc0] sm:$0xff]  }
  0xe6   : > { %12445 = vmatmul.mubr.bf16.gmra.mxu0 %v11358_v16  ;;  %12500 = vmatprep.mubr.bf16.mxu1 %v13305_v36  ;;  %v14325_v53 = vcombine.low %v2833_v38, %v2843_v40  ;;  %v14329_v28 = vsel %vm14007_vm13, %v11424_v42, %v3575_v46  ;;  %v2850_v63 = vrot.slane %v2848_v44, 5  ;;  %v14331_v16 = vld [vmem:[#allocation2 + $0x38] sm:$0x1]  ;;  %v2869_v19 = vshrl.u32 %v2757_v45, 16  ;;  %v14333_v36 = vld [vmem:[#allocation5 + $0x1b8] sm:$0xff]  }
  0xe7   : > { %12448 = vmatprep.mubr.bf16.mxu0 %v11359_v33  ;;  %12525 = vmatpush3.bf16.msra.mxu0 %v13309_v25  ;;  %v14337_v55 = vsel %vm14007_vm13, %v3577_v15, %v3578_v62  ;;  %v2856_v21 = vrot.slane %v2854_v52, 5  ;;  %v2860_v35 = vrot.slane %v2858_v37, 4  ;;  %v2866_v33 = vrot.slane %v2864_v14, 5  ;;  %v13306_v25 = vld [vmem:[#allocation2 + $0x90] sm:$0xff]  }
  0xe8   : > { %12526 = vmatprep.subr.bf16.mxu0 %v13314_v9  ;;  %v2851_v8 = vor.u32 %v2850_v63, %v2847_v30  ;;  %v2871_v12 = vrot.slane %v2869_v19, 4  ;;  %v2872_v24 = vshll.u32 %v2757_v45, 16  ;;  %v2878_v61 = vshll.u32 %v14320_v59, 16  ;;  %v3505_v44 = vld [vmem:[#allocation2 + $0x30] sm:$0xe] }
  0xe9   : > { %v2861_v46 = vor.u32 %v2860_v35, %v2856_v21  ;;  %v2882_v51 = vshrl.u32 %v14320_v59, 16  ;;  %v2888_v42 = vshll.u32 %v14331_v16, 16  ;;  %v11425_v17 = vrot.slane %v3504_v7, 9  ;;  %v2760_v35 = vld [vmem:[#allocation2 + $0x3c] sm:$0xf] }
  0xea   : > { %v2852_v38 = vrot.slane %v2851_v8, 4  ;;  %v2874_v26 = vrot.slane %v2872_v24, 5  ;;  %v2880_v62 = vrot.slane %v2878_v61, 5  ;;  %v3582_v15 = vrot.slane %v14294_v39, 5  ;;  %v13315_v24 = vld [vmem:[#allocation2 + $0xb4] sm:$0xff]  }
  0xeb   : > { %12527 = vmatpush3.bf16.msra.mxu0 %v13314_v9  ;;  %v2862_v30 = vrot.slane %v2861_v46, 4  ;;  %v2884_v45 = vrot.slane %v2882_v51, 4  ;;  %v2890_v40 = vrot.slane %v2888_v42, 5  ;;  %v3585_v52 = vrot.slane %v14296_v57, 5 }
  0xec   : > { %12608 = vmatprep.subr.bf16.mxu0 %v14333_v36  ;;  %v2857_v37 = vsel %vm13704_vm7, %v2852_v38, %v2856_v21  ;;  %v2875_v14 = vor.u32 %v2874_v26, %v2871_v12  ;;  %v14349_v9 = vsel %vm14007_vm13, %v11425_v17, %v3582_v15  ;;  %v3584_v63 = vrot.slane %v3582_v15, 4  ;;  %v14357_v21 = vld [vmem:[#allocation2 + $0x40] sm:$0xf]  ;;  %v14388_v15 = vld [vmem:[#allocation2 + $0x50] sm:$0x1] }
  0xed   : > { %12501 = vmatmul.mubr.bf16.gmra.mxu1 %v13306_v25  ;;  %v2867_v39 = vsel %vm13704_vm7, %v2862_v30, %v2866_v33  ;;  %v2885_v19 = vor.u32 %v2884_v45, %v2880_v62  ;;  %v11426_v57 = vrot.slane %v3505_v44, 9  ;;  %v3589_v7 = vrot.slane %v14320_v59, 5  ;;  %v14369_v33 = vld [vmem:[#allocation2 + $0x44] sm:$0x1]  ;;  %v13311_v59 = vld [vmem:[#allocation2 + $0xa8] sm:$0xff]  }
  0xee   : > { %12449 = vmatmul.mubr.bf16.gmra.mxu0 %v11360_v2  ;;  %12504 = vmatprep.mubr.bf16.mxu1 %v13310_v50  ;;  %v11440_v25 = vcombine.low %v14329_v28, %v14337_v55  ;;  %v2876_v43 = vrot.slane %v2875_v14, 4  ;;  %v14366_v10 = vsel %vm14007_vm13, %v3584_v63, %v3585_v52  ;;  %v3592_v2 = vrot.slane %v14331_v16, 5  ;;  %v14378_v16 = vld [vmem:[#allocation2 + $0x4c] sm:$0xf]  ;;  %v3506_v52 = vld [vmem:[#allocation2 + $0x3c] sm:$0xe] }
  0xef   : > { %12452 = vmatprep.mubr.bf16.mxu0 %v11361_v56  ;;  %v14371_v8 = vcombine.low %v2857_v37, %v2867_v39  ;;  %v2886_v12 = vrot.slane %v2885_v19, 4  ;;  %v11441_v29 = vcombine.low %v14349_v9, %v14366_v10  ;;  %v3591_v54 = vrot.slane %v3589_v7, 4  ;;  %v2763_v56 = vld [vmem:[#allocation2 + $0x48] sm:$0xf] }
  0xf0   : > { %v2881_v61 = vsel %vm13704_vm7, %v2876_v43, %v2880_v62  ;;  %v2893_v50 = vshrl.u32 %v2760_v35, 16  ;;  %v2896_v46 = vshll.u32 %v2760_v35, 16  ;;  %v2902_v51 = vshll.u32 %v14357_v21, 16  ;;  %v3507_v39 = vld [vmem:[#allocation2 + $0x48] sm:$0xe] }
  0xf1   : > { %v2891_v42 = vsel %vm13704_vm7, %v2886_v12, %v2890_v40  ;;  %v14384_v17 = vsel %vm14007_vm13, %v11426_v57, %v3589_v7  ;;  %v2906_v38 = vshrl.u32 %v14357_v21, 16  ;;  %v2912_v26 = vshll.u32 %v14369_v33, 16 }
  0xf2   : > { %v14390_v62 = vcombine.low %v2881_v61, %v2891_v42  ;;  %v14394_v44 = vsel %vm14007_vm13, %v3591_v54, %v3592_v2  ;;  %v2895_v30 = vrot.slane %v2893_v50, 4  ;;  %v2898_v45 = vrot.slane %v2896_v46, 5 }
  0xf3   : > { %v2904_v40 = vrot.slane %v2902_v51, 5  ;;  %v2908_v37 = vrot.slane %v2906_v38, 4  ;;  %v2914_v14 = vrot.slane %v2912_v26, 5  ;;  %v2917_v63 = vshrl.u32 %v2763_v56, 16 }
  0xf4   : > { %v2899_v19 = vor.u32 %v2898_v45, %v2895_v30  ;;  %v2920_v57 = vshll.u32 %v2763_v56, 16  ;;  %v2926_v7 = vshll.u32 %v14378_v16, 16  ;;  %v2930_v35 = vshrl.u32 %v14378_v16, 16  ;;  %v2766_v45 = vld [vmem:[#allocation2 + $0x54] sm:$0xf] }
  0xf5   : > { %12505 = vmatmul.mubr.bf16.gmra.mxu1 %v13311_v59  ;;  %v2909_v43 = vor.u32 %v2908_v37, %v2904_v40  ;;  %v2919_v2 = vrot.slane %v2917_v63, 4  ;;  %v2936_v12 = vshll.u32 %v14388_v15, 16  ;;  %v11427_v54 = vrot.slane %v3506_v52, 9 }
  0xf6   : > { %12453 = vmatmul.mubr.bf16.gmra.mxu0 %v11362_v3  ;;  %12508 = vmatprep.mubr.bf16.mxu1 %v13315_v24  ;;  %v18209_v61 = vcombine.low %v14200_v4, %v14211_v47  ;;  %v2900_v59 = vrot.slane %v2899_v19, 4  ;;  %v2922_v56 = vrot.slane %v2920_v57, 5  ;;  %v2928_v50 = vrot.slane %v2926_v7, 5  ;;  %v2769_v57 = vld [vmem:[#allocation2 + $0x60] sm:$0xf] }
  0xf7   : > { %v2932_v46 = vrot.slane %v2930_v35, 4  ;;  %v2910_v51 = vrot.slane %v2909_v43, 4  ;;  %v2938_v42 = vrot.slane %v2936_v12, 5  ;;  %v3596_v38 = vrot.slane %v14357_v21, 5  ;;  %v14414_v21 = vld [vmem:[#allocation2 + $0x58] sm:$0xf] }
  0xf8   : > { %12456 = vmatprep.mubr.bf16.mxu0 %v18209_v61  ;;  %v3599_v27 = vrot.slane %v14369_v33, 5  ;;  %v2905_v3 = vsel %vm13704_vm7, %v2900_v59, %v2904_v40  ;;  %v2923_v24 = vor.u32 %v2922_v56, %v2919_v2  ;;  %v11428_v30 = vrot.slane %v3507_v39, 9  ;;  %v14416_v33 = vld [vmem:[#allocation2 + $0x5c] sm:$0x1]  ;;  %v14429_v43 = vld [vmem:[#allocation2 + $0x64] sm:$0xf] }
  0xf9   : > { %v2933_v26 = vor.u32 %v2932_v46, %v2928_v50  ;;  %v11442_v4 = vcombine.low %v14384_v17, %v14394_v44  ;;  %v2915_v47 = vsel %vm13704_vm7, %v2910_v51, %v2914_v14  ;;  %v3598_v52 = vrot.slane %v3596_v38, 4  ;;  %v14439_v61 = vld [vmem:[#allocation2 + $0x68] sm:$0x1]  ;;  %v13321_v17 = vld [vmem:[#allocation5 + $0x1a8] sm:$0xff]  }
  0xfa   : > { %v3603_v37 = vrot.slane %v14378_v16, 5  ;;  %v2924_v63 = vrot.slane %v2923_v24, 4  ;;  %v14420_v40 = vsel %vm14007_vm13, %v11427_v54, %v3596_v38  ;;  %v3606_v39 = vrot.slane %v14388_v15, 5 }
  0xfb   : > { %v2934_v19 = vrot.slane %v2933_v26, 4  ;;  %v14423_v7 = vcombine.low %v2905_v3, %v2915_v47  ;;  %v14427_v14 = vsel %vm14007_vm13, %v3598_v52, %v3599_v27  ;;  %v2941_v35 = vshrl.u32 %v2766_v45, 16 }
  0xfc   : > { %v3605_v16 = vrot.slane %v3603_v37, 4  ;;  %v2929_v2 = vsel %vm13704_vm7, %v2924_v63, %v2928_v50  ;;  %v14437_v15 = vsel %vm14007_vm13, %v11428_v30, %v3603_v37  ;;  %v2944_v54 = vshll.u32 %v2766_v45, 16  ;;  %v3509_v37 = vld [vmem:[#allocation2 + $0x60] sm:$0xe] }
  0xfd   : > { %12509 = vmatmul.mubr.bf16.gmra.mxu1 %v13316_v48  ;;  %v2939_v12 = vsel %vm13704_vm7, %v2934_v19, %v2938_v42  ;;  %v18210_v59 = vcombine.low %v14206_v5, %v14220_v0  ;;  %v11443_v50 = vcombine.low %v14420_v40, %v14427_v14  ;;  %v2943_v46 = vrot.slane %v2941_v35, 4  ;;  %v3508_v42 = vld [vmem:[#allocation2 + $0x54] sm:$0xe] }
  0xfe   : > { %12576 = vmatprep.mubr.bf16.mxu1 %v11439_v22  ;;  %v14447_v56 = vcombine.low %v2929_v2, %v2939_v12  ;;  %v2950_v51 = vshll.u32 %v14414_v21, 16  ;;  %v18211_v38 = vcombine.low %v14228_v23, %v14242_v13  ;;  %v14457_v5 = vsel %vm14007_vm13, %v3605_v16, %v3606_v39 }
  0xff   : > { %12457 = vmatmul.mubr.bf16.gmra.mxu0 %v18210_v59  ;;  %v2946_v0 = vrot.slane %v2944_v54, 5  ;;  %v2954_v32 = vshrl.u32 %v14414_v21, 16  ;;  %v2960_v20 = vshll.u32 %v14416_v33, 16  ;;  %v2965_v27 = vshrl.u32 %v2769_v57, 16  ;;  %v2772_v54 = vld [vmem:[#allocation2 + $0x6c] sm:$0xf] }
 0x100   : > { %12460 = vmatprep.mubr.bf16.mxu0 %v18211_v38  ;;  %v2952_v22 = vrot.slane %v2950_v51, 5  ;;  %v2968_v48 = vshll.u32 %v2769_v57, 16  ;;  %v2974_v3 = vshll.u32 %v14429_v43, 16  ;;  %v2978_v23 = vshrl.u32 %v14429_v43, 16  ;;  %v13325_v59 = vld [vmem:[#allocation5 + $0x1f0] sm:$0xff]  }
 0x101   : > { %v2947_v24 = vor.u32 %v2946_v0, %v2943_v46  ;;  %v2956_v26 = vrot.slane %v2954_v32, 4  ;;  %v2962_v30 = vrot.slane %v2960_v20, 5  ;;  %v2967_v13 = vrot.slane %v2965_v27, 4  ;;  %v14471_v32 = vld [vmem:[#allocation2 + $0x70] sm:$0xf] }
 0x102   : > { %v2970_v45 = vrot.slane %v2968_v48, 5  ;;  %v2976_v47 = vrot.slane %v2974_v3, 5  ;;  %v2984_v52 = vshll.u32 %v14439_v61, 16  ;;  %v2980_v39 = vrot.slane %v2978_v23, 4  ;;  %v14501_v27 = vld [vmem:[#allocation2 + $0x7c] sm:$0xf] }
 0x103   : > { %v2948_v63 = vrot.slane %v2947_v24, 4  ;;  %v2957_v19 = vor.u32 %v2956_v26, %v2952_v22  ;;  %v11429_v16 = vrot.slane %v3508_v42, 9  ;;  %v3610_v57 = vrot.slane %v14414_v21, 5  ;;  %v13327_v48 = vld [vmem:[#allocation5 + $0x1e8] sm:$0xff]  }
 0x104   : > { %v2971_v35 = vor.u32 %v2970_v45, %v2967_v13  ;;  %v2986_v2 = vrot.slane %v2984_v52, 5  ;;  %v3613_v12 = vrot.slane %v14416_v33, 5  ;;  %v2981_v38 = vor.u32 %v2980_v39, %v2976_v47  ;;  %v14484_v33 = vld [vmem:[#allocation2 + $0x74] sm:$0x1] }
 0x105   : > { %12577 = vmatmul.mubr.bf16.vlgmr.msra.gmra.mxu1 %v11440_v25  ;;  %v2953_v46 = vsel %vm13704_vm7, %v2948_v63, %v2952_v22  ;;  %v2958_v51 = vrot.slane %v2957_v19, 4  ;;  %v11430_v0 = vrot.slane %v3509_v37, 9  ;;  %v18212_v42 = vcombine.low %v14235_v11, %v14250_v58  ;;  %v13320_v19 = vld [vmem:[#allocation5 + $0x1b0] sm:$0xff]  }
 0x106   : > { %12580 = vmatprep.mubr.bf16.mxu1 %v11441_v29  ;;  %v2972_v21 = vrot.slane %v2971_v35, 4  ;;  %v14481_v28 = vsel %vm14007_vm13, %v11429_v16, %v3610_v57  ;;  %v3612_v55 = vrot.slane %v3610_v57, 4  ;;  %v3617_v25 = vrot.slane %v14429_v43, 5  ;;  %v2775_v29 = vld [vmem:[#allocation2 + $0x78] sm:$0xf]  ;;  %12657 = vmatpush3.bf16.msra.mxu1 %v14287_v18 }
 0x107   : > { %12461 = vmatmul.mubr.bf16.gmra.mxu0 %v18212_v42  ;;  %v11444_v11 = vcombine.low %v14437_v15, %v14457_v5  ;;  %v2963_v58 = vsel %vm13704_vm7, %v2958_v51, %v2962_v30  ;;  %v2982_v9 = vrot.slane %v2981_v38, 4  ;;  %v2989_v10 = vshrl.u32 %v2772_v54, 16  ;;  %12658 = vmatprep.subr.bf16.mxu1 %v13325_v59  ;;  %v14511_v30 = vld [vmem:[#allocation2 + $0x80] sm:$0x1]  ;;  %v3510_v57 = vld [vmem:[#allocation2 + $0x6c] sm:$0xe] }
 0x108   : > { %12528 = vmatprep.mubr.bf16.mxu0 %v14304_v60  ;;  %v14492_v20 = vcombine.low %v2953_v46, %v2963_v58  ;;  %v2977_v43 = vsel %vm13704_vm7, %v2972_v21, %v2976_v47  ;;  %v14498_v22 = vsel %vm14007_vm13, %v3612_v55, %v3613_v12  ;;  %v3620_v60 = vrot.slane %v14439_v61, 5 }
 0x109   : > { %v2987_v3 = vsel %vm13704_vm7, %v2982_v9, %v2986_v2  ;;  %v11445_v18 = vcombine.low %v14481_v28, %v14498_v22  ;;  %v14509_v24 = vsel %vm14007_vm13, %v11430_v0, %v3617_v25  ;;  %v3619_v26 = vrot.slane %v3617_v25, 4  ;;  %v3511_v25 = vld [vmem:[#allocation2 + $0x78] sm:$0xe]  ;;  %v2778_v9 = vld [vmem:[#allocation2 + $0x84] sm:$0xf]  ;;  %v13323_v22 = vld [vmem:[#allocation5 + $0x198] sm:$0xff]  }
 0x10a   : > { %v2991_v23 = vrot.slane %v2989_v10, 4  ;;  %v2992_v13 = vshll.u32 %v2772_v54, 16  ;;  %v2998_v61 = vshll.u32 %v14471_v32, 16  ;;  %v3002_v45 = vshrl.u32 %v14471_v32, 16  ;;  %12659 = vmatpush3.bf16.msra.mxu1 %v13325_v59  ;;  %v13328_v59 = vld [vmem:[#allocation5 + $0x1e0] sm:$0xff]   ;;  %v13330_v10 = vld [vmem:[#allocation5 + $0x1d8] sm:$0xff]  }
 0x10b   : > { %v14515_v47 = vcombine.low %v2977_v43, %v2987_v3  ;;  %v3008_v52 = vshll.u32 %v14484_v33, 16  ;;  %v3013_v37 = vshrl.u32 %v2775_v29, 16  ;;  %v3016_v63 = vshll.u32 %v2775_v29, 16  ;;  %12660 = vmatprep.subr.bf16.mxu1 %v13327_v48 }
 0x10c   : > { %v14520_v39 = vsel %vm14007_vm13, %v3619_v26, %v3620_v60  ;;  %v2994_v16 = vrot.slane %v2992_v13, 5  ;;  %v3000_v35 = vrot.slane %v2998_v61, 5  ;;  %v3004_v2 = vrot.slane %v3002_v45, 4 }
 0x10d   : > { %12581 = vmatmul.mubr.bf16.gmra.mxu1 %v11442_v4  ;;  %v3010_v12 = vrot.slane %v3008_v52, 5  ;;  %v3015_v54 = vrot.slane %v3013_v37, 4  ;;  %v3018_v46 = vrot.slane %v3016_v63, 5  ;;  %v3022_v51 = vshll.u32 %v14501_v27, 16  ;;  %v2781_v52 = vld [vmem:[#allocation2 + $0x90] sm:$0xf] }
 0x10e   : > { %12584 = vmatprep.mubr.bf16.mxu1 %v11443_v50  ;;  %v2995_v38 = vor.u32 %v2994_v16, %v2991_v23  ;;  %v3005_v0 = vor.u32 %v3004_v2, %v3000_v35  ;;  %v3026_v42 = vshrl.u32 %v14501_v27, 16  ;;  %v3032_v21 = vshll.u32 %v14511_v30, 16  ;;  %12661 = vmatpush3.bf16.msra.mxu1 %v13327_v48  ;;  %v14546_v23 = vld [vmem:[#allocation2 + $0x88] sm:$0xf]  ;;  %v14548_v48 = vld [vmem:[#allocation2 + $0x8c] sm:$0x1] }
 0x10f   : > { %12529 = vmatmul.mubr.bf16.vlgmr.msra.gmra.mxu0 %v14325_v53  ;;  %v3019_v44 = vor.u32 %v3018_v46, %v3015_v54  ;;  %v3024_v4 = vrot.slane %v3022_v51, 5  ;;  %v11431_v55 = vrot.slane %v3510_v57, 9  ;;  %v3624_v53 = vrot.slane %v14471_v32, 5  ;;  %12662 = vmatprep.subr.bf16.mxu1 %v13328_v59  ;;  %v13322_v37 = vld [vmem:[#allocation5 + $0x1a0] sm:$0xff]   ;;  %v14568_v46 = vld [vmem:[#allocation2 + $0x98] sm:$0x1] }
 0x110   : > { %12609 = vmatpush3.bf16.msra.mxu0 %v14333_v36  ;;  %12532 = vmatprep.mubr.bf16.mxu0 %v14371_v8  ;;  %v11446_v40 = vcombine.low %v14509_v24, %v14520_v39  ;;  %v2996_v14 = vrot.slane %v2995_v38, 4  ;;  %v3006_v50 = vrot.slane %v3005_v0, 4  ;;  %v3028_v58 = vrot.slane %v3026_v42, 4  ;;  %v14570_v51 = vld [vmem:[#allocation2 + $0x84] sm:$0xe] }
 0x111   : > { %12610 = vmatprep.subr.bf16.mxu0 %v13320_v19  ;;  %v3020_v36 = vrot.slane %v3019_v44, 4  ;;  %v3034_v29 = vrot.slane %v3032_v21, 5  ;;  %v3626_v8 = vrot.slane %v3624_v53, 4  ;;  %v3627_v43 = vrot.slane %v14484_v33, 5 }
 0x112   : > { %v3001_v32 = vsel %vm13704_vm7, %v2996_v14, %v3000_v35  ;;  %v3011_v60 = vsel %vm13704_vm7, %v3006_v50, %v3010_v12  ;;  %v3029_v3 = vor.u32 %v3028_v58, %v3024_v4  ;;  %v14544_v26 = vsel %vm14007_vm13, %v11431_v55, %v3624_v53  ;;  %12663 = vmatpush3.bf16.msra.mxu1 %v13328_v59  ;;  %v13333_v50 = vld [vmem:[#allocation5 + $0x1c8] sm:$0xff]  }
 0x113   : > { %v14550_v13 = vcombine.low %v3001_v32, %v3011_v60  ;;  %v14554_v33 = vsel %vm14007_vm13, %v3626_v8, %v3627_v43  ;;  %v11432_v61 = vrot.slane %v3511_v25, 9  ;;  %v3631_v45 = vrot.slane %v14501_v27, 5  ;;  %12664 = vmatprep.subr.bf16.mxu1 %v13330_v10 }
 0x114   : > { %12611 = vmatpush3.bf16.msra.mxu0 %v13320_v19  ;;  %v3025_v63 = vsel %vm13704_vm7, %v3020_v36, %v3024_v4  ;;  %v3030_v16 = vrot.slane %v3029_v3, 4  ;;  %v3634_v35 = vrot.slane %v14511_v30, 5  ;;  %v3037_v2 = vshrl.u32 %v2778_v9, 16  ;;  %v14560_v19 = vld [vmem:[#allocation2 + $0x94] sm:$0xf]  ;;  %v13331_v30 = vld [vmem:[#allocation5 + $0x1d0] sm:$0xff]   ;;  %v14572_v38 = vpop.f32.mrf.mxu1 }
 0x115   : > { %12612 = vmatprep.subr.bf16.mxu0 %v13321_v17  ;;  %12585 = vmatmul.mubr.bf16.gmra.mxu1 %v11444_v11  ;;  %v11447_v27 = vcombine.low %v14544_v26, %v14554_v33  ;;  %v3633_v57 = vrot.slane %v3631_v45, 4  ;;  %v3040_v12 = vshll.u32 %v2778_v9, 16  ;;  %v3046_v54 = vshll.u32 %v14546_v23, 16  ;;  %v13326_v26 = vld [vmem:[#allocation5 + $0x190] sm:$0xff]  }
 0x116   : > { %12588 = vmatprep.mubr.bf16.mxu1 %v11445_v18  ;;  %v3035_v15 = vsel %vm13704_vm7, %v3030_v16, %v3034_v29  ;;  %v3039_v5 = vrot.slane %v3037_v2, 4  ;;  %v3050_v11 = vshrl.u32 %v14546_v23, 16  ;;  %v3056_v59 = vshll.u32 %v14548_v48, 16  ;;  %12665 = vmatpush3.bf16.msra.mxu1 %v13330_v10  ;;  %v13334_v2 = vld [vmem:[#allocation5 + $0x1c0] sm:$0xff]  }
 0x117   : > { %12533 = vmatmul.mubr.bf16.gmra.mxu0 %v14390_v62  ;;  %v14583_v0 = vcombine.low %v3025_v63, %v3035_v15  ;;  %v14587_v62 = vsel %vm14007_vm13, %v11432_v61, %v3631_v45  ;;  %v3042_v42 = vrot.slane %v3040_v12, 5  ;;  %v14589_v28 = vrot.slane %v3046_v54, 5  ;;  %12666 = vmatprep.subr.bf16.mxu1 %v13331_v30  ;;  %v14627_v12 = vld [vmem:[#allocation2 + $0xa4] sm:$0x1]  ;;  %v14637_v15 = vld [vmem:[#allocation2 + $0xac] sm:$0xf] }
 0x118   : > { %12536 = vmatprep.mubr.bf16.mxu0 %v14423_v7  ;;  %12613 = vmatpush3.bf16.msra.mxu0 %v13321_v17  ;;  %v14593_v18 = vsel %vm14007_vm13, %v3633_v57, %v3634_v35  ;;  %v3052_v21 = vrot.slane %v3050_v11, 4  ;;  %v3058_v44 = vrot.slane %v3056_v59, 5  ;;  %v3061_v4 = vshrl.u32 %v2781_v52, 16  ;;  %v3513_v7 = vld [vmem:[#allocation2 + $0x90] sm:$0xe]  ;;  %v14595_v17 = vpop.f32.mrf.mxu1 }
 0x119   : > { %12614 = vmatprep.subr.bf16.mxu0 %v13322_v37  ;;  %v3043_v55 = vor.u32 %v3042_v42, %v3039_v5  ;;  %v3064_v53 = vshll.u32 %v2781_v52, 16  ;;  %v3070_v25 = vshll.u32 %v14560_v19, 16  ;;  %v3074_v14 = vshrl.u32 %v14560_v19, 16  ;;  %v2784_v35 = vld [vmem:[#allocation2 + $0x9c] sm:$0xf] }
 0x11a   : > { %v3053_v58 = vor.u32 %v3052_v21, %v14589_v28  ;;  %v3063_v9 = vrot.slane %v3061_v4, 4  ;;  %v3080_v36 = vshll.u32 %v14568_v46, 16  ;;  %v11433_v29 = vrot.slane %v14570_v51, 9  ;;  %12667 = vmatpush3.bf16.msra.mxu1 %v13331_v30  ;;  %v14608_v45 = vpop.f32.mrf.mxu1  ;;  %v2787_v30 = vld [vmem:[#allocation2 + $0xa8] sm:$0xf] }
 0x11b   : > { %v3044_v8 = vrot.slane %v3043_v55, 4  ;;  %v3066_v10 = vrot.slane %v3064_v53, 5  ;;  %v14602_v43 = vrot.slane %v3070_v25, 5  ;;  %v3076_v32 = vrot.slane %v3074_v14, 4  ;;  %12668 = vmatprep.subr.bf16.mxu1 %v13333_v50 }
 0x11c   : > { %12615 = vmatpush3.bf16.msra.mxu0 %v13322_v37  ;;  %v11448_v60 = vcombine.low %v14587_v62, %v14593_v18  ;;  %v3054_v3 = vrot.slane %v3053_v58, 4  ;;  %v3638_v33 = vrot.slane %v14546_v23, 5  ;;  %v3641_v61 = vrot.slane %v14548_v48, 5  ;;  %v14616_v57 = vpop.f32.mrf.mxu0  ;;  %v14625_v48 = vld [vmem:[#allocation2 + $0xa0] sm:$0xf]  ;;  %v14645_v42 = vpop.f32.mrf.mxu1 }
 0x11d   : > { %12616 = vmatprep.subr.bf16.mxu0 %v13323_v22  ;;  %12589 = vmatmul.mubr.bf16.gmra.mxu1 %v11446_v40  ;;  %v3067_v52 = vor.u32 %v3066_v10, %v3063_v9  ;;  %v3077_v37 = vor.u32 %v3076_v32, %v14602_v43  ;;  %v14614_v63 = vrot.slane %v3080_v36, 5  ;;  %v11434_v16 = vrot.slane %v3513_v7, 9  ;;  %18213 = vst [vmem:[#allocation14_spill] sm:$0xff] %v14645_v42  ;;  %v14668_v9 = vld [vmem:[#allocation2 + $0xb0] sm:$0x1] }
 0x11e   : > { %12592 = vmatprep.mubr.bf16.mxu1 %v11447_v27  ;;  %v3049_v23 = vsel %vm13704_vm7, %v3044_v8, %v14589_v28  ;;  %v3059_v24 = vsel %vm13704_vm7, %v3054_v3, %v3058_v44  ;;  %v3640_v39 = vrot.slane %v3638_v33, 4  ;;  %v3645_v40 = vrot.slane %v14560_v19, 5  ;;  %v13329_v19 = vld [vmem:[#allocation5 + $0x188] sm:$0xff]   ;;  %12669 = vmatpush3.bf16.msra.mxu1 %v13333_v50  ;;  %v14657_v44 = vpop.f32.mrf.mxu0  ;;  %v13332_v36 = vld [vmem:[#allocation5 + $0x180] sm:$0xff]  }
 0x11f   : > { %12537 = vmatmul.mubr.bf16.gmra.mxu0 %v14447_v56  ;;  %v14630_v54 = vrot.slane %v3067_v52, 4  ;;  %v14632_v56 = vrot.slane %v3077_v37, 4  ;;  %v3639_v27 = vsel %vm14007_vm13, %v11433_v29, %v3638_v33  ;;  %v3648_v51 = vrot.slane %v14568_v46, 5  ;;  %12670 = vmatprep.subr.bf16.mxu1 %v13334_v2  ;;  %v3514_v3 = vld [vmem:[#allocation2 + $0x9c] sm:$0xe] }
 0x120   : > { %12540 = vmatprep.mubr.bf16.mxu0 %v14492_v20  ;;  %12617 = vmatpush3.bf16.msra.mxu0 %v13323_v22  ;;  %v3642_v5 = vsel %vm14007_vm13, %v3640_v39, %v3641_v61  ;;  %v14643_v20 = vsel %vm14007_vm13, %v11434_v16, %v3645_v40  ;;  %v3647_v11 = vrot.slane %v3645_v40, 4  ;;  %v3085_v59 = vshrl.u32 %v2784_v35, 16  ;;  %v14677_v16 = vpop.f32.mrf.mxu0  ;;  %v3515_v39 = vld [vmem:[#allocation2 + $0xa8] sm:$0xe] }
 0x121   : > { %12618 = vmatprep.subr.bf16.mxu0 %v13326_v26  ;;  %v14647_v28 = vcombine.low %v3049_v23, %v3059_v24  ;;  %v3073_v46 = vsel %vm13704_vm7, %v14630_v54, %v14602_v43  ;;  %v3083_v22 = vsel %vm13704_vm7, %v14632_v56, %v14614_v63  ;;  %v3088_v21 = vshll.u32 %v2784_v35, 16 }
 0x122   : > { %v11449_v4 = vcombine.low %v3639_v27, %v3642_v5  ;;  %v14661_v7 = vsel %vm14007_vm13, %v3647_v11, %v3648_v51  ;;  %v3087_v55 = vrot.slane %v3085_v59, 4  ;;  %v3094_v53 = vshll.u32 %v14625_v48, 16  ;;  %12671 = vmatpush3.bf16.msra.mxu1 %v13334_v2  ;;  %v2790_v5 = vld [vmem:[#allocation2 + $0xb4] sm:$0xf]  ;;  %v14688_v11 = vld [vmem:[#allocation5 + $0x238] sm:$0xff]  }
 0x123   : > { %v11450_v25 = vcombine.low %v14643_v20, %v14661_v7  ;;  %v3090_v14 = vrot.slane %v3088_v21, 5  ;;  %v3098_v50 = vshrl.u32 %v14625_v48, 16  ;;  %v3104_v58 = vshll.u32 %v14627_v12, 16  ;;  %v2794_v7 = vld [vmem:[#allocation2 + $0xc4] sm:$0xf] }
 0x124   : > { %12619 = vmatpush3.bf16.msra.mxu0 %v13326_v26  ;;  %v3096_v29 = vrot.slane %v3094_v53, 5  ;;  %v3109_v8 = vshrl.u32 %v2787_v30, 16  ;;  %v3112_v10 = vshll.u32 %v2787_v30, 16  ;;  %v3118_v32 = vshll.u32 %v14637_v15, 16  ;;  %v14671_v26 = vpop.f32.mrf.mxu1  ;;  %v14697_v53 = vpop.f32.mrf.mxu0 }
 0x125   : > { %12620 = vmatprep.subr.bf16.mxu0 %v13329_v19  ;;  %12593 = vmatmul.mubr.bf16.gmra.mxu1 %v11448_v60  ;;  %v3091_v33 = vor.u32 %v3090_v14, %v3087_v55  ;;  %v3100_v61 = vrot.slane %v3098_v50, 4  ;;  %v3106_v52 = vrot.slane %v3104_v58, 5  ;;  %v3122_v37 = vshrl.u32 %v14637_v15, 16  ;;  %v14695_v55 = vld [vmem:[#allocation2 + $0xb8] sm:$0xf]  ;;  %18214 = vst [vmem:[#allocation15_spill] sm:$0xff] %v14697_v53 }
 0x126   : > { %12596 = vmatprep.mubr.bf16.mxu1 %v11449_v4  ;;  %v3111_v35 = vrot.slane %v3109_v8, 4  ;;  %v3114_v23 = vrot.slane %v3112_v10, 5  ;;  %v14680_v24 = vrot.slane %v3118_v32, 5  ;;  %v3128_v2 = vshll.u32 %v14668_v9, 16  ;;  %v14690_v59 = vpop.f32.mrf.mxu1  ;;  %v14704_v58 = vld [vmem:[#allocation2 + $0xbc] sm:$0x1] }
 0x127   : > { %12541 = vmatmul.mubr.bf16.gmra.mxu0 %v14515_v47  ;;  %v3092_v62 = vrot.slane %v3091_v33, 4  ;;  %v3101_v18 = vor.u32 %v3100_v61, %v3096_v29  ;;  %v3124_v60 = vrot.slane %v3122_v37, 4  ;;  %v11435_v40 = vrot.slane %v3514_v3, 9  ;;  %v710_v8 = vld [vmem:[#allocation2 + $0xc8] sm:$0x1] }
 0x128   : > { %12544 = vmatprep.mubr.bf16.mxu0 %v14550_v13  ;;  %12621 = vmatpush3.bf16.msra.mxu0 %v13329_v19  ;;  %v3115_v27 = vor.u32 %v3114_v23, %v3111_v35  ;;  %v14684_v51 = vrot.slane %v3128_v2, 5  ;;  %v3652_v47 = vrot.slane %v14625_v48, 5  ;;  %v3655_v30 = vrot.slane %v14627_v12, 5 }
 0x129   : > { %12622 = vmatprep.subr.bf16.mxu0 %v13332_v36  ;;  %v3097_v13 = vsel %vm13704_vm7, %v3092_v62, %v3096_v29  ;;  %v3102_v21 = vrot.slane %v3101_v18, 4  ;;  %v3125_v4 = vor.u32 %v3124_v60, %v14680_v24  ;;  %v11436_v19 = vrot.slane %v3515_v39, 9  ;;  %v3516_v39 = vld [vmem:[#allocation2 + $0xb4] sm:$0xe]  ;;  %v3517_v62 = vld [vmem:[#allocation2 + $0xc0] sm:$0xe] }
 0x12a   : > { %v14699_v48 = vrot.slane %v3115_v27, 4  ;;  %v3653_v12 = vsel %vm14007_vm13, %v11435_v40, %v3652_v47  ;;  %v3654_v14 = vrot.slane %v3652_v47, 4  ;;  %v3659_v50 = vrot.slane %v14637_v15, 5 }
 0x12b   : > { %v3107_v29 = vsel %vm13704_vm7, %v3102_v21, %v3106_v52  ;;  %v14708_v10 = vrot.slane %v3125_v4, 4  ;;  %v3662_v32 = vrot.slane %v14668_v9, 5  ;;  %v3133_v3 = vshrl.u32 %v2790_v5, 16  ;;  %v14728_v52 = vpop.f32.mrf.mxu1 }
 0x12c   : > { %12623 = vmatpush3.bf16.msra.mxu0 %v13332_v36  ;;  %v11410_v15 = vcombine.low %v3073_v46, %v3083_v22  ;;  %v11411_v33 = vcombine.low %v3097_v13, %v3107_v29  ;;  %v3121_v61 = vsel %vm13704_vm7, %v14699_v48, %v14680_v24  ;;  %v3656_v9 = vsel %vm14007_vm13, %v3654_v14, %v3655_v30  ;;  %v2793_v36 = vld [vmem:[#allocation2 + $0xc0] sm:$0xf]  ;;  %v14739_v46 = vpop.f32.mrf.mxu0 }
 0x12d   : > { %12704 = vmatprep.subr.bf16.mxu0 %v14688_v11  ;;  %12597 = vmatmul.mubr.bf16.gmra.mxu1 %v11450_v25  ;;  %v3131_v43 = vsel %vm13704_vm7, %v14708_v10, %v14684_v51  ;;  %v11451_v63 = vcombine.low %v3653_v12, %v3656_v9  ;;  %v3660_v54 = vsel %vm14007_vm13, %v11436_v19, %v3659_v50  ;;  %v3661_v56 = vrot.slane %v3659_v50, 4 }
 0x12e   : > { %v3135_v22 = vrot.slane %v3133_v3, 4  ;;  %v3136_v37 = vshll.u32 %v2790_v5, 16  ;;  %v3142_v35 = vshll.u32 %v14695_v55, 16  ;;  %v3146_v20 = vshrl.u32 %v14695_v55, 16  ;;  %v14754_v13 = vpop.f32.mrf.mxu0 }
 0x12f   : > { %12545 = vmatmul.mubr.bf16.gmra.mxu0 %v14583_v0  ;;  %12600 = vmatprep.mubr.bf16.mxu1 %v11451_v63  ;;  %v3663_v25 = vsel %vm14007_vm13, %v3661_v56, %v3662_v32  ;;  %v3152_v23 = vshll.u32 %v14704_v58, 16  ;;  %v711_v0 = vsel %vm13724_vm10, %v545_v6, %v710_v8  ;;  %v3157_v2 = vshrl.u32 %v2793_v36, 16 }
 0x130   : > { %12548 = vmatprep.mubr.bf16.mxu0 %v14647_v28  ;;  %v11452_v18 = vcombine.low %v3660_v54, %v3663_v25  ;;  %v3138_v60 = vrot.slane %v3136_v37, 5  ;;  %v3144_v40 = vrot.slane %v3142_v35, 5  ;;  %v3148_v27 = vrot.slane %v3146_v20, 4  ;;  %712 = vst [vmem:[#allocation2 + $0xc8] sm:$0x1] %v711_v0  ;;  %v14752_v28 = vpop.f32.mrf.mxu1  ;;  %v14764_v54 = vpop.f32.mrf.mxu0 }
 0x131   : > { %v3154_v51 = vrot.slane %v3152_v23, 5  ;;  %v3159_v47 = vrot.slane %v3157_v2, 4  ;;  %v3160_v30 = vshll.u32 %v2793_v36, 16  ;;  %v3166_v5 = vshll.u32 %v2794_v7, 16  ;;  %v4387_v37 = vld [vmem:[#allocation2 + $0x18] sm:$0xf] }
 0x132   : > { %v3139_v34 = vor.u32 %v3138_v60, %v3135_v22  ;;  %v3149_v21 = vor.u32 %v3148_v27, %v3144_v40  ;;  %v3170_v49 = vshrl.u32 %v2794_v7, 16  ;;  %v11437_v6 = vrot.slane %v3516_v39, 9  ;;  %v4388_v35 = vld [vmem:[#allocation2 + $0x1c] sm:$0xf]  ;;  %v4389_v0 = vld [vmem:[#allocation2 + $0x20] sm:$0x1] }
 0x133   : > { %v3162_v4 = vrot.slane %v3160_v30, 5  ;;  %v14756_v19 = vrot.slane %v3166_v5, 5  ;;  %v3666_v12 = vrot.slane %v14695_v55, 5  ;;  %v3669_v14 = vrot.slane %v14704_v58, 5  ;;  %v14760_v32 = vpop.f32.mrf.mxu1 }
 0x134   : > { %v3140_v50 = vrot.slane %v3139_v34, 4  ;;  %v3150_v8 = vrot.slane %v3149_v21, 4  ;;  %v3172_v29 = vrot.slane %v3170_v49, 4  ;;  %v11438_v10 = vrot.slane %v3517_v62, 9 }
 0x135   : > { %12601 = vmatmul.mubr.bf16.gmra.mxu1 %v11452_v18  ;;  %v3163_v3 = vor.u32 %v3162_v4, %v3159_v47  ;;  %v3667_v9 = vsel %vm14007_vm13, %v11437_v6, %v3666_v12  ;;  %v3668_v36 = vrot.slane %v3666_v12, 4  ;;  %v3673_v63 = vrot.slane %v2794_v7, 5  ;;  %v14784_v62 = vpop.f32.mrf.mxu1  ;;  %v14796_v12 = vld [vmem:[#allocation2 + $0x2c] sm:$0x1] }
 0x136   : > { %v3145_v55 = vsel %vm13704_vm7, %v3140_v50, %v3144_v40  ;;  %v3155_v58 = vsel %vm13704_vm7, %v3150_v8, %v3154_v51  ;;  %v3173_v56 = vor.u32 %v3172_v29, %v14756_v19  ;;  %v14773_v22 = vadd.f32 %v14572_v38, %v14616_v57 }
 0x137   : > { %12549 = vmatmul.mubr.bf16.gmra.mxu0 %v11410_v15  ;;  %v11412_v15 = vcombine.low %v3121_v61, %v3131_v43  ;;  %v11413_v20 = vcombine.low %v3145_v55, %v3155_v58  ;;  %v2795_v7 = vld [vmem:[#allocation2 + $0xc8] sm:$0x1]  ;;  %v3164_v25 = vrot.slane %v3163_v3, 4  ;;  %v3670_v23 = vsel %vm14007_vm13, %v3668_v36, %v3669_v14  ;;  %v14788_v43 = vpop.f32.mrf.mxu0  ;;  %v14798_v14 = vpop.f32.mrf.mxu1 }
 0x138   : > { %12552 = vmatprep.mubr.bf16.mxu0 %v11411_v33  ;;  %v3176_v2 = vshll.u32 %v2795_v7, 16  ;;  %v11453_v39 = vcombine.low %v3667_v9, %v3670_v23  ;;  %v3674_v38 = vsel %vm14007_vm13, %v11438_v10, %v3673_v63  ;;  %v3675_v57 = vrot.slane %v3673_v63, 4  ;;  %v4390_v33 = vld [vmem:[#allocation2 + $0x24] sm:$0xf]  ;;  %v14786_v61 = vld [vmem:[#allocation2 + $0x28] sm:$0xf] }
 0x139   : > { %v3174_v18 = vrot.slane %v3173_v56, 4  ;;  %v3676_v60 = vrot.slane %v2795_v7, 5  ;;  %v4436_v24 = vshrl.u32 %v4387_v37, 16  ;;  %v4439_v48 = vshll.u32 %v4387_v37, 16  ;;  %v4393_v63 = vld [vmem:[#allocation2 + $0x30] sm:$0xf] }
 0x13a   : > { %v3178_v40 = vrot.slane %v3176_v2, 5  ;;  %12604 = vmatprep.mubr.bf16.mxu1 %v11453_v39  ;;  %v4445_v27 = vshll.u32 %v4388_v35, 16  ;;  %v4449_v51 = vshrl.u32 %v4388_v35, 16  ;;  %v4455_v47 = vshll.u32 %v4389_v0, 16  ;;  %v4394_v37 = vld [vmem:[#allocation2 + $0x34] sm:$0xf]  ;;  %v14810_v0 = vpop.f32.mrf.mxu1 }
 0x13b   : > { %v3677_v30 = vsel %vm14007_vm13, %v3675_v57, %v3676_v60  ;;  %v4438_v5 = vrot.slane %v4436_v24, 4  ;;  %v4441_v34 = vrot.slane %v4439_v48, 5  ;;  %v14794_v21 = vadd.f32 %v14595_v17, %v14657_v44  ;;  %v14803_v3 = vpop.f32.mrf.mxu0  ;;  %v4395_v23 = vld [vmem:[#allocation2 + $0x38] sm:$0x1]  ;;  %18215 = vst [vmem:[#allocation16_spill] sm:$0xff] %v14810_v0 }
 0x13c   : > { %v11454_v49 = vcombine.low %v3674_v38, %v3677_v30  ;;  %v4447_v6 = vrot.slane %v4445_v27, 5  ;;  %v4451_v4 = vrot.slane %v4449_v51, 4  ;;  %v3169_v50 = vsel %vm13704_vm7, %v3164_v25, %v14756_v19  ;;  %v13335_v24 = vld [vmem:[#allocation2 + $0x18] sm:$0xff]  }
 0x13d   : > { %v4442_v8 = vor.u32 %v4441_v34, %v4438_v5  ;;  %v4457_v29 = vrot.slane %v4455_v47, 5  ;;  %v4460_v10 = vshrl.u32 %v4390_v33, 16  ;;  %v4463_v44 = vshll.u32 %v4390_v33, 16  ;;  %v14818_v38 = vpop.f32.mrf.mxu0  ;;  %v4396_v5 = vld [vmem:[#allocation2 + $0x3c] sm:$0xf]  ;;  %v14826_v34 = vpop.f32.mrf.mxu1 }
 0x13e   : > { %12605 = vmatmul.mubr.bf16.gmra.mxu1 %v11454_v49  ;;  %v4452_v17 = vor.u32 %v4451_v4, %v4447_v6  ;;  %v4469_v9 = vshll.u32 %v14786_v61, 16  ;;  %v4473_v36 = vshrl.u32 %v14786_v61, 16  ;;  %v3179_v55 = vsel %vm13704_vm7, %v3174_v18, %v3178_v40 }
 0x13f   : > { %12553 = vmatmul.mubr.bf16.gmra.mxu0 %v11412_v15  ;;  %v4443_v58 = vrot.slane %v4442_v8, 4  ;;  %v4462_v19 = vrot.slane %v4460_v10, 4  ;;  %v4479_v56 = vshll.u32 %v14796_v12, 16  ;;  %v4465_v7 = vrot.slane %v4463_v44, 5  ;;  %v14832_v8 = vld [vmem:[#allocation2 + $0x40] sm:$0xf] }
 0x140   : > { %12556 = vmatprep.mubr.bf16.mxu0 %v11413_v20  ;;  %v4453_v35 = vrot.slane %v4452_v17, 4  ;;  %v4471_v15 = vrot.slane %v4469_v9, 5  ;;  %v4475_v25 = vrot.slane %v4473_v36, 4  ;;  %v14816_v20 = vadd.f32 %v14608_v45, %v14677_v16  ;;  %v14840_v44 = vld [vmem:[#allocation2 + $0x44] sm:$0x1] }
 0x141   : > { %v4448_v2 = vsel %vm13704_vm7, %v4443_v58, %v4447_v6  ;;  %v4481_v39 = vrot.slane %v4479_v56, 5  ;;  %v11414_v57 = vcombine.low %v3169_v50, %v3179_v55  ;;  %v4466_v18 = vor.u32 %v4465_v7, %v4462_v19  ;;  %v4399_v56 = vld [vmem:[#allocation2 + $0x48] sm:$0xf] }
 0x142   : > { %v4458_v33 = vsel %vm13704_vm7, %v4453_v35, %v4457_v29  ;;  %v4476_v60 = vor.u32 %v4475_v25, %v4471_v15  ;;  %v14824_v40 = vadd.f32 %v14671_v26, %v14739_v46  ;;  %v4484_v27 = vshrl.u32 %v4393_v63, 16  ;;  %v14834_v26 = vpop.f32.mrf.mxu0  ;;  %v14846_v35 = vpop.f32.mrf.mxu1  ;;  %v13336_v7 = vld [vmem:[#allocation2 + $0x24] sm:$0xff]  }
 0x143   : > { %v11487_v48 = vcombine.low %v4448_v2, %v4458_v33  ;;  %v4487_v51 = vshll.u32 %v4393_v63, 16  ;;  %v4467_v47 = vrot.slane %v4466_v18, 4  ;;  %v4493_v45 = vshll.u32 %v4394_v37, 16  ;;  %v14849_v2 = vld [vmem:[#allocation2 + $0x50] sm:$0x1] }
 0x144   : > { %v4477_v30 = vrot.slane %v4476_v60, 4  ;;  %v4497_v16 = vshrl.u32 %v4394_v37, 16  ;;  %v4486_v49 = vrot.slane %v4484_v27, 4  ;;  %v4503_v4 = vshll.u32 %v4395_v23, 16  ;;  %v14844_v37 = vld [vmem:[#allocation2 + $0x4c] sm:$0xf] }
 0x145   : > { %12672 = vmatprep.mubr.bf16.mxu1 %v11487_v48  ;;  %v4489_v6 = vrot.slane %v4487_v51, 5  ;;  %v14830_v50 = vadd.f32 %v14690_v59, %v14754_v13  ;;  %v4472_v46 = vsel %vm13704_vm7, %v4467_v47, %v4471_v15  ;;  %v4495_v10 = vrot.slane %v4493_v45, 5  ;;  %v13340_v47 = vld [vmem:[#allocation5 + $0x230] sm:$0xff]  }
 0x146   : > { %v4482_v29 = vsel %vm13704_vm7, %v4477_v30, %v4481_v39  ;;  %v4499_v17 = vrot.slane %v4497_v16, 4  ;;  %v4505_v59 = vrot.slane %v4503_v4, 5  ;;  %v4508_v13 = vshrl.u32 %v4396_v5, 16  ;;  %v14851_v39 = vpop.f32.mrf.mxu0 }
 0x147   : > { %12557 = vmatmul.mubr.bf16.gmra.mxu0 %v11414_v57  ;;  %v11488_v9 = vcombine.low %v4472_v46, %v4482_v29  ;;  %v4490_v36 = vor.u32 %v4489_v6, %v4486_v49  ;;  %v4511_v55 = vshll.u32 %v4396_v5, 16  ;;  %v4517_v58 = vshll.u32 %v14832_v8, 16  ;;  %18216 = vst [vmem:[#allocation17_spill] sm:$0xff] %v14851_v39  ;;  %v14865_v49 = vpop.f32.mrf.mxu1 }
 0x148   : > { %12624 = vmatprep.mubr.bf16.mxu0 %v13335_v24  ;;  %v4500_v63 = vor.u32 %v4499_v17, %v4495_v10  ;;  %v4521_v19 = vshrl.u32 %v14832_v8, 16  ;;  %v4510_v25 = vrot.slane %v4508_v13, 4  ;;  %v4527_v23 = vshll.u32 %v14840_v44, 16  ;;  %v13338_v24 = vld [vmem:[#allocation2 + $0x30] sm:$0xff]  }
 0x149   : > { %12673 = vmatmul.mubr.bf16.vlgmr.msra.gmra.mxu1 %v11488_v9  ;;  %v4491_v15 = vrot.slane %v4490_v36, 4  ;;  %v4513_v33 = vrot.slane %v4511_v55, 5  ;;  %v4519_v18 = vrot.slane %v4517_v58, 5  ;;  %v14857_v51 = vadd.f32 %v14728_v52, %v14764_v54  ;;  %v12350_v52 = vpop.f32.mrf.mxu0  ;;  %v14877_v58 = vld [vmem:[#allocation2 + $0x5c] sm:$0x1] }
 0x14a   : > { %v4501_v57 = vrot.slane %v4500_v63, 4  ;;  %v4523_v60 = vrot.slane %v4521_v19, 4  ;;  %v4529_v27 = vrot.slane %v4527_v23, 5  ;;  %v14863_v5 = vadd.f32 %v14760_v32, %v14803_v3  ;;  %v13343_v32 = vld [vmem:[#allocation5 + $0x228] sm:$0xff]  }
 0x14b   : > { %v4496_v48 = vsel %vm13704_vm7, %v4491_v15, %v4495_v10  ;;  %v4514_v45 = vor.u32 %v4513_v33, %v4510_v25  ;;  %v4532_v4 = vshrl.u32 %v4399_v56, 16  ;;  %v4535_v46 = vshll.u32 %v4399_v56, 16  ;;  %v4402_v10 = vld [vmem:[#allocation2 + $0x54] sm:$0xf]  ;;  %v13339_v19 = vld [vmem:[#allocation2 + $0x3c] sm:$0xff]   ;;  %v14883_v25 = vpop.f32.mrf.mxu1 }
 0x14c   : > { %v4506_v30 = vsel %vm13704_vm7, %v4501_v57, %v4505_v59  ;;  %v4524_v16 = vor.u32 %v4523_v60, %v4519_v18  ;;  %v4541_v29 = vshll.u32 %v14844_v37, 16  ;;  %v4545_v9 = vshrl.u32 %v14844_v37, 16  ;;  %v14870_v59 = vld [vmem:[#allocation2 + $0x58] sm:$0xf]  ;;  %v13341_v57 = vld [vmem:[#allocation2 + $0x48] sm:$0xff]  }
 0x14d   : > { %v11489_v6 = vcombine.low %v4496_v48, %v4506_v30  ;;  %v4515_v54 = vrot.slane %v4514_v45, 4  ;;  %v4551_v36 = vshll.u32 %v14849_v2, 16  ;;  %v4534_v3 = vrot.slane %v4532_v4, 4  ;;  %v4405_v60 = vld [vmem:[#allocation2 + $0x60] sm:$0xf] }
 0x14e   : > { %v4525_v17 = vrot.slane %v4524_v16, 4  ;;  %v4537_v13 = vrot.slane %v4535_v46, 5  ;;  %v4543_v63 = vrot.slane %v4541_v29, 5  ;;  %v14875_v55 = vadd.f32 %v14784_v62, %v14818_v38  ;;  %v13346_v16 = vld [vmem:[#allocation5 + $0x220] sm:$0xff]  }
 0x14f   : > { %12625 = vmatmul.mubr.bf16.vlgmr.msra.gmra.mxu0 %v13336_v7  ;;  %12676 = vmatprep.mubr.bf16.mxu1 %v11489_v6  ;;  %v4520_v56 = vsel %vm13704_vm7, %v4515_v54, %v4519_v18  ;;  %v4547_v7 = vrot.slane %v4545_v9, 4  ;;  %v4553_v15 = vrot.slane %v4551_v36, 5  ;;  %v4556_v62 = vshrl.u32 %v4402_v10, 16  ;;  %v14890_v9 = vld [vmem:[#allocation2 + $0x64] sm:$0xf] }
 0x150   : > { %12705 = vmatpush3.bf16.msra.mxu0 %v14688_v11  ;;  %12628 = vmatprep.mubr.bf16.mxu0 %v13338_v24  ;;  %v4530_v11 = vsel %vm13704_vm7, %v4525_v17, %v4529_v27  ;;  %v4538_v33 = vor.u32 %v4537_v13, %v4534_v3  ;;  %v4559_v38 = vshll.u32 %v4402_v10, 16  ;;  %v1493_v24 = vpop.f32.mrf.mxu0  ;;  %v4565_v30 = vshll.u32 %v14870_v59, 16 }
 0x151   : > { %12706 = vmatprep.subr.bf16.mxu0 %v13340_v47  ;;  %v11490_v23 = vcombine.low %v4520_v56, %v4530_v11  ;;  %v4548_v48 = vor.u32 %v4547_v7, %v4543_v63  ;;  %v4569_v45 = vshrl.u32 %v14870_v59, 16  ;;  %v4575_v18 = vshll.u32 %v14877_v58, 16  ;;  %v14900_v11 = vld [vmem:[#allocation2 + $0x68] sm:$0x1] }
 0x152   : > { %v4539_v6 = vrot.slane %v4538_v33, 4  ;;  %v4558_v4 = vrot.slane %v4556_v62, 4  ;;  %v4561_v46 = vrot.slane %v4559_v38, 5  ;;  %v4567_v54 = vrot.slane %v4565_v30, 5  ;;  %v12351_v7 = vpop.f32.mrf.mxu0 }
 0x153   : > { %12677 = vmatmul.mubr.bf16.gmra.mxu1 %v11490_v23  ;;  %v4549_v10 = vrot.slane %v4548_v48, 4  ;;  %v4571_v17 = vrot.slane %v4569_v45, 4  ;;  %v4577_v56 = vrot.slane %v4575_v18, 5  ;;  %v14905_v62 = vadd.f32 %v14826_v34, %v12350_v52  ;;  %v13349_v45 = vld [vmem:[#allocation5 + $0x218] sm:$0xff]   ;;  %v14912_v52 = vld [vmem:[#allocation2 + $0x70] sm:$0xf] }
 0x154   : > { %12707 = vmatpush3.bf16.msra.mxu0 %v13340_v47  ;;  %v14892_v36 = vpop.f32.mrf.mxu1  ;;  %v4544_v3 = vsel %vm13704_vm7, %v4539_v6, %v4543_v63  ;;  %v4562_v13 = vor.u32 %v4561_v46, %v4558_v4  ;;  %v14898_v47 = vadd.f32 %v14798_v14, %v14834_v26  ;;  %v4580_v38 = vshrl.u32 %v4405_v60, 16  ;;  %v4408_v26 = vld [vmem:[#allocation2 + $0x6c] sm:$0xf]  ;;  %v14919_v46 = vld [vmem:[#allocation2 + $0x74] sm:$0x1] }
 0x155   : > { %12708 = vmatprep.subr.bf16.mxu0 %v13343_v32  ;;  %v4554_v23 = vsel %vm13704_vm7, %v4549_v10, %v4553_v15  ;;  %v4572_v33 = vor.u32 %v4571_v17, %v4567_v54  ;;  %18218 = vst [vmem:[#allocation19_spill] sm:$0xff] %v14905_v62  ;;  %v4583_v30 = vshll.u32 %v4405_v60, 16  ;;  %v4589_v14 = vshll.u32 %v14890_v9, 16  ;;  %v1496_v10 = vpop.f32.mrf.mxu0  ;;  %v13342_v17 = vld [vmem:[#allocation2 + $0x54] sm:$0xff]  }
 0x156   : > { %18217 = vst [vmem:[#allocation18_spill] sm:$0xff] %v14898_v47  ;;  %v11491_v63 = vcombine.low %v4544_v3, %v4554_v23  ;;  %v4563_v48 = vrot.slane %v4562_v13, 4  ;;  %v14908_v18 = vpop.f32.mrf.mxu1  ;;  %v4582_v6 = vrot.slane %v4580_v38, 4  ;;  %v4593_v15 = vshrl.u32 %v14890_v9, 16 }
 0x157   : > { %12629 = vmatmul.mubr.bf16.gmra.mxu0 %v13339_v19  ;;  %v4573_v19 = vrot.slane %v4572_v33, 4  ;;  %v4599_v34 = vshll.u32 %v14900_v11, 16  ;;  %v4591_v60 = vrot.slane %v4589_v14, 5  ;;  %v14917_v4 = vadd.f32 %v14846_v35, %v1493_v24 }
 0x158   : > { %12632 = vmatprep.mubr.bf16.mxu0 %v13341_v57  ;;  %12709 = vmatpush3.bf16.msra.mxu0 %v13343_v32  ;;  %v4568_v32 = vsel %vm13704_vm7, %v4563_v48, %v4567_v54  ;;  %v4585_v57 = vrot.slane %v4583_v30, 5  ;;  %v4595_v13 = vrot.slane %v4593_v15, 4  ;;  %v4604_v33 = vshrl.u32 %v4408_v26, 16  ;;  %v14924_v30 = vpop.f32.mrf.mxu1 }
 0x159   : > { %12710 = vmatprep.subr.bf16.mxu0 %v13346_v16  ;;  %12680 = vmatprep.mubr.bf16.mxu1 %v11491_v63  ;;  %18219 = vst [vmem:[#allocation20_spill] sm:$0xff] %v14917_v4  ;;  %v4578_v3 = vsel %vm13704_vm7, %v4573_v19, %v4577_v56  ;;  %v4601_v23 = vrot.slane %v4599_v34, 5  ;;  %v13344_v63 = vld [vmem:[#allocation2 + $0x60] sm:$0xff]   ;;  %v4607_v54 = vshll.u32 %v4408_v26, 16  ;;  %v4613_v48 = vshll.u32 %v14912_v52, 16 }
 0x15a   : > { %v11492_v38 = vcombine.low %v4568_v32, %v4578_v3  ;;  %v4586_v29 = vor.u32 %v4585_v57, %v4582_v6  ;;  %v4596_v35 = vor.u32 %v4595_v13, %v4591_v60  ;;  %v4606_v24 = vrot.slane %v4604_v33, 4  ;;  %v13352_v56 = vld [vmem:[#allocation5 + $0x210] sm:$0xff]   ;;  %v4411_v26 = vld [vmem:[#allocation2 + $0x78] sm:$0xf]  ;;  %v14932_v33 = vld [vmem:[#allocation2 + $0x7c] sm:$0xf] }
 0x15b   : > { %v4617_v14 = vshrl.u32 %v14912_v52, 16  ;;  %v4623_v27 = vshll.u32 %v14919_v46, 16  ;;  %v4609_v34 = vrot.slane %v4607_v54, 5  ;;  %v4615_v6 = vrot.slane %v4613_v48, 5 }
 0x15c   : > { %12711 = vmatpush3.bf16.msra.mxu0 %v13346_v16  ;;  %12681 = vmatmul.mubr.bf16.gmra.mxu1 %v11492_v38  ;;  %v4587_v15 = vrot.slane %v4586_v29, 4  ;;  %v12354_v16 = vpop.f32.mrf.mxu0  ;;  %v4597_v32 = vrot.slane %v4596_v35, 4  ;;  %v14930_v13 = vadd.f32 %v14865_v49, %v12351_v7  ;;  %v14937_v29 = vadd.f32 %v14883_v25, %v1496_v10  ;;  %v13345_v49 = vld [vmem:[#allocation2 + $0x6c] sm:$0xff]  }
 0x15d   : > { %12712 = vmatprep.subr.bf16.mxu0 %v13349_v45  ;;  %v4619_v57 = vrot.slane %v4617_v14, 4  ;;  %v4625_v3 = vrot.slane %v4623_v27, 5  ;;  %v4610_v19 = vor.u32 %v4609_v34, %v4606_v24  ;;  %v14940_v38 = vadd.f32 %v14892_v36, %v12354_v16  ;;  %v14944_v27 = vpop.f32.mrf.mxu1  ;;  %v14948_v24 = vld [vmem:[#allocation2 + $0x88] sm:$0xf]  ;;  %v13347_v36 = vld [vmem:[#allocation2 + $0x78] sm:$0xff]  }
 0x15e   : > { %18220 = vst [vmem:[#allocation21_spill] sm:$0xff] %v14930_v13  ;;  %v4592_v41 = vsel %vm13704_vm7, %v4587_v15, %v4591_v60  ;;  %18221 = vst [vmem:[#allocation22_spill] sm:$0xff] %v14937_v29  ;;  %v1509_v54 = vpop.f32.mrf.mxu0  ;;  %v4602_v7 = vsel %vm13704_vm7, %v4597_v32, %v4601_v23  ;;  %v4628_v48 = vshrl.u32 %v4411_v26, 16  ;;  %v4631_v35 = vshll.u32 %v4411_v26, 16  ;;  %v4414_v60 = vld [vmem:[#allocation2 + $0x84] sm:$0xf] }
 0x15f   : > { %12633 = vmatmul.mubr.bf16.gmra.mxu0 %v13342_v17  ;;  %18222 = vst [vmem:[#allocation23_spill] sm:$0xff] %v14940_v38  ;;  %v14942_v17 = vld [vmem:[#allocation2 + $0x80] sm:$0x1]  ;;  %18223 = vst [vmem:[#allocation24_spill] sm:$0xff] %v14944_v27  ;;  %v11493_v25 = vcombine.low %v4592_v41, %v4602_v7  ;;  %v4611_v10 = vrot.slane %v4610_v19, 4  ;;  %v4637_v14 = vshll.u32 %v14932_v33, 16  ;;  %v14958_v7 = vadd.f32 %v14908_v18, %v1509_v54  ;;  %v12406_v53 = vpop.f32.mrf.mxu1 }
 0x160   : > { %12636 = vmatprep.mubr.bf16.mxu0 %v13344_v63  ;;  %v4620_v63 = vor.u32 %v4619_v57, %v4615_v6  ;;  %12713 = vmatpush3.bf16.msra.mxu0 %v13349_v45  ;;  %v4641_v15 = vshrl.u32 %v14932_v33, 16  ;;  %v14952_v34 = vld [vmem:[#allocation2 + $0x8c] sm:$0x1]  ;;  %v12355_v16 = vpop.f32.mrf.mxu0  ;;  %v13355_v27 = vld [vmem:[#allocation5 + $0x208] sm:$0xff]   ;;  %v4630_v32 = vrot.slane %v4628_v48, 4  ;;  %v4633_v57 = vrot.slane %v4631_v35, 5 }
 0x161   : > { %12714 = vmatprep.subr.bf16.mxu0 %v13352_v56  ;;  %v4647_v45 = vshll.u32 %v14942_v17, 16  ;;  %12684 = vmatprep.mubr.bf16.mxu1 %v11493_v25  ;;  %v4616_v41 = vsel %vm13704_vm7, %v4611_v10, %v4615_v6  ;;  %v4639_v19 = vrot.slane %v4637_v14, 5  ;;  %18224 = vst [vmem:[#allocation25_spill] sm:$0xff] %v14958_v7  ;;  %v13358_v38 = vld [vmem:[#allocation5 + $0x200] sm:$0xff]   ;;  %v4652_v29 = vshrl.u32 %v4414_v60, 16 }
 0x162   : > { %v4621_v23 = vrot.slane %v4620_v63, 4  ;;  %v4643_v26 = vrot.slane %v4641_v15, 4  ;;  %v14960_v42 = vpop.f32.mrf.mxu0  ;;  %v4634_v48 = vor.u32 %v4633_v57, %v4630_v32  ;;  %v4417_v13 = vld [vmem:[#allocation2 + $0x90] sm:$0xf]  ;;  %v4655_v6 = vshll.u32 %v4414_v60, 16 }
 0x163   : > { %18225 = vst [vmem:[#allocation26_spill] sm:$0xff] %v14960_v42  ;;  %v4649_v35 = vrot.slane %v4647_v45, 5  ;;  %v4661_v10 = vshll.u32 %v14948_v24, 16  ;;  %v14965_v18 = vld [vmem:[#allocation2 + $0x94] sm:$0xf]  ;;  %v4654_v15 = vrot.slane %v4652_v29, 4  ;;  %v14972_v57 = vadd.f32 %v14924_v30, %v12355_v16  ;;  %v1830_v45 = vpop.f32.mrf.mxu1 }
 0x164   : > { %v4626_v63 = vsel %vm13704_vm7, %v4621_v23, %v4625_v3  ;;  %12715 = vmatpush3.bf16.msra.mxu0 %v13352_v56  ;;  %v4644_v4 = vor.u32 %v4643_v26, %v4639_v19  ;;  %v12358_v14 = vpop.f32.mrf.mxu0  ;;  %v4635_v54 = vrot.slane %v4634_v48, 4  ;;  %v4665_v42 = vshrl.u32 %v14948_v24, 16  ;;  %v14969_v23 = vld [vmem:[#allocation2 + $0x98] sm:$0x1]  ;;  %v14980_v30 = vld [vmem:[#allocation2 + $0xa0] sm:$0xf] }
 0x165   : > { %v11494_v25 = vcombine.low %v4616_v41, %v4626_v63  ;;  %12716 = vmatprep.subr.bf16.mxu0 %v13355_v27  ;;  %v4671_v3 = vshll.u32 %v14952_v34, 16  ;;  %18226 = vst [vmem:[#allocation27_spill] sm:$0xff] %v14969_v23  ;;  %v4657_v32 = vrot.slane %v4655_v6, 5  ;;  %v4663_v60 = vrot.slane %v4661_v10, 5  ;;  %18227 = vst [vmem:[#allocation28_spill] sm:$0xff] %v14972_v57  ;;  %v13348_v41 = vld [vmem:[#allocation2 + $0x84] sm:$0xff]  }
 0x166   : > { %v4645_v56 = vrot.slane %v4644_v4, 4  ;;  %v4667_v29 = vrot.slane %v4665_v42, 4  ;;  %v4420_v63 = vld [vmem:[#allocation2 + $0x9c] sm:$0xf]  ;;  %v14978_v4 = vadd.f32 %v12406_v53, %v12358_v14  ;;  %v4676_v6 = vshrl.u32 %v4417_v13, 16  ;;  %v1525_v10 = vpop.f32.mrf.mxu0  ;;  %v12407_v53 = vpop.f32.mrf.mxu1 }
 0x167   : > { %12637 = vmatmul.mubr.bf16.gmra.mxu0 %v13345_v49  ;;  %12685 = vmatmul.mubr.bf16.gmra.mxu1 %v11494_v25  ;;  %v4640_v49 = vsel %vm13704_vm7, %v4635_v54, %v4639_v19  ;;  %v4673_v26 = vrot.slane %v4671_v3, 5  ;;  %v4658_v25 = vor.u32 %v4657_v32, %v4654_v15  ;;  %v4679_v7 = vshll.u32 %v4417_v13, 16  ;;  %v14985_v15 = vld [vmem:[#allocation2 + $0xa4] sm:$0x1] }
 0x168   : > { %12640 = vmatprep.mubr.bf16.mxu0 %v13347_v36  ;;  %12717 = vmatpush3.bf16.msra.mxu0 %v13355_v27  ;;  %v4650_v48 = vsel %vm13704_vm7, %v4645_v56, %v4649_v35  ;;  %v13350_v36 = vld [vmem:[#allocation2 + $0x90] sm:$0xff]   ;;  %18228 = vst [vmem:[#allocation29_spill] sm:$0xff] %v14978_v4  ;;  %v4668_v57 = vor.u32 %v4667_v29, %v4663_v60  ;;  %v4685_v42 = vshll.u32 %v14965_v18, 16  ;;  %v4678_v54 = vrot.slane %v4676_v6, 4 }
 0x169   : > { %12718 = vmatprep.subr.bf16.mxu0 %v13358_v38  ;;  %v11495_v16 = vcombine.low %v4640_v49, %v4650_v48  ;;  %v4659_v19 = vrot.slane %v4658_v25, 4  ;;  %v4689_v27 = vshrl.u32 %v14965_v18, 16  ;;  %v4695_v35 = vshll.u32 %v14969_v23, 16  ;;  %18229 = vst [vmem:[#allocation30_spill] sm:$0xff] %v14985_v15  ;;  %v4423_v25 = vld [vmem:[#allocation2 + $0xa8] sm:$0xf] }
 0x16a   : > { %v4669_v14 = vrot.slane %v4668_v57, 4  ;;  %v4681_v3 = vrot.slane %v4679_v7, 5  ;;  %v4687_v56 = vrot.slane %v4685_v42, 5  ;;  %v14987_v32 = vadd.f32 %v1830_v45, %v1525_v10  ;;  %v12359_v7 = vpop.f32.mrf.mxu0  ;;  %v14997_v42 = vpop.f32.mrf.mxu1  ;;  %v4429_v23 = vld [vmem:[#allocation2 + $0xc0] sm:$0xf] }
 0x16b   : > { %12688 = vmatprep.mubr.bf16.mxu1 %v11495_v16  ;;  %v4664_v13 = vsel %vm13704_vm7, %v4659_v19, %v4663_v60  ;;  %v4691_v49 = vrot.slane %v4689_v27, 4  ;;  %v4697_v29 = vrot.slane %v4695_v35, 5  ;;  %v4700_v48 = vshrl.u32 %v4420_v63, 16  ;;  %v14994_v16 = vld [vmem:[#allocation2 + $0xac] sm:$0xf]  ;;  %18232 = vst [vmem:[#allocation33_spill] sm:$0xff] %v14997_v42 }
 0x16c   : > { %18230 = vst [vmem:[#allocation31_spill] sm:$0xff] %v14987_v32  ;;  %12719 = vmatpush3.bf16.msra.mxu0 %v13358_v38  ;;  %v4674_v6 = vsel %vm13704_vm7, %v4669_v14, %v4673_v26  ;;  %v4682_v4 = vor.u32 %v4681_v3, %v4678_v54  ;;  %v4703_v62 = vshll.u32 %v4420_v63, 16  ;;  %v4709_v57 = vshll.u32 %v14980_v30, 16  ;;  %18231 = vst [vmem:[#allocation32_spill] sm:$0xff] %v14994_v16  ;;  %v13351_v19 = vld [vmem:[#allocation2 + $0x9c] sm:$0xff]  }
 0x16d   : > { %v11496_v45 = vcombine.low %v4664_v13, %v4674_v6  ;;  %v4692_v38 = vor.u32 %v4691_v49, %v4687_v56  ;;  %v4702_v10 = vrot.slane %v4700_v48, 4  ;;  %v4713_v60 = vshrl.u32 %v14980_v30, 16  ;;  %v15000_v63 = vld [vmem:[#allocation2 + $0xb0] sm:$0x1]  ;;  %v4426_v13 = vld [vmem:[#allocation2 + $0xb4] sm:$0xf] }
 0x16e   : > { %v4705_v27 = vrot.slane %v4703_v62, 5  ;;  %v4711_v35 = vrot.slane %v4709_v57, 5  ;;  %v4719_v26 = vshll.u32 %v14985_v15, 16  ;;  %18233 = vst [vmem:[#allocation34_spill] sm:$0xff] %v15000_v63  ;;  %v15002_v3 = vadd.f32 %v12407_v53, %v12359_v7  ;;  %v15012_v15 = vld [vmem:[#allocation2 + $0xbc] sm:$0x1] }
 0x16f   : > { %12641 = vmatmul.mubr.bf16.gmra.mxu0 %v13348_v41  ;;  %v4683_v41 = vrot.slane %v4682_v4, 4  ;;  %12689 = vmatmul.mubr.bf16.gmra.mxu1 %v11496_v45  ;;  %v4693_v54 = vrot.slane %v4692_v38, 4  ;;  %v4715_v14 = vrot.slane %v4713_v60, 4  ;;  %v4724_v42 = vshrl.u32 %v4423_v25, 16  ;;  %v15006_v4 = vld [vmem:[#allocation2 + $0xb8] sm:$0xf] }
 0x170   : > { %12644 = vmatprep.mubr.bf16.mxu0 %v13350_v36  ;;  %18234 = vst [vmem:[#allocation35_spill] sm:$0xff] %v15002_v3  ;;  %v13353_v36 = vld [vmem:[#allocation2 + $0xa8] sm:$0xff]   ;;  %v4706_v48 = vor.u32 %v4705_v27, %v4702_v10  ;;  %v4721_v6 = vrot.slane %v4719_v26, 5  ;;  %18235 = vst [vmem:[#allocation36_spill] sm:$0xff] %v15006_v4  ;;  %v4727_v45 = vshll.u32 %v4423_v25, 16  ;;  %v4733_v38 = vshll.u32 %v14994_v16, 16 }
 0x171   : > { %v4688_v49 = vsel %vm13704_vm7, %v4683_v41, %v4687_v56  ;;  %v4698_v62 = vsel %vm13704_vm7, %v4693_v54, %v4697_v29  ;;  %v4716_v57 = vor.u32 %v4715_v14, %v4711_v35  ;;  %v4726_v60 = vrot.slane %v4724_v42, 4  ;;  %18236 = vst [vmem:[#allocation37_spill] sm:$0xff] %v15012_v15  ;;  %v15017_v42 = vld [vmem:[#allocation2 + $0xc4] sm:$0xf] }
 0x172   : > { %v11497_v53 = vcombine.low %v4688_v49, %v4698_v62  ;;  %v4707_v7 = vrot.slane %v4706_v48, 4  ;;  %v4737_v3 = vshrl.u32 %v14994_v16, 16  ;;  %v4729_v10 = vrot.slane %v4727_v45, 5 }
 0x173   : > { %v12410_v32 = vpop.f32.mrf.mxu1  ;;  %v4717_v56 = vrot.slane %v4716_v57, 4  ;;  %v4735_v41 = vrot.slane %v4733_v38, 5  ;;  %v4743_v27 = vshll.u32 %v15000_v63, 16  ;;  %v4748_v54 = vshrl.u32 %v4426_v13, 16 }
 0x174   : > { %12692 = vmatprep.mubr.bf16.mxu1 %v11497_v53  ;;  %v4712_v29 = vsel %vm13704_vm7, %v4707_v7, %v4711_v35  ;;  %v4739_v25 = vrot.slane %v4737_v3, 4  ;;  %v4751_v14 = vshll.u32 %v4426_v13, 16  ;;  %v4730_v48 = vor.u32 %v4729_v10, %v4726_v60 }
 0x175   : > { %v1846_v26 = vpop.f32.mrf.mxu1  ;;  %v4722_v49 = vsel %vm13704_vm7, %v4717_v56, %v4721_v6  ;;  %v4745_v62 = vrot.slane %v4743_v27, 5  ;;  %v4757_v57 = vshll.u32 %v15006_v4, 16  ;;  %v4750_v63 = vrot.slane %v4748_v54, 4  ;;  %v13354_v6 = vld [vmem:[#allocation2 + $0xb4] sm:$0xff]  }
 0x176   : > { %v11498_v38 = vcombine.low %v4712_v29, %v4722_v49  ;;  %v4740_v53 = vor.u32 %v4739_v25, %v4735_v41  ;;  %v4753_v35 = vrot.slane %v4751_v14, 5  ;;  %v4731_v3 = vrot.slane %v4730_v48, 4  ;;  %v4432_v29 = vld [vmem:[#allocation2 + $0xcc] sm:$0xf]  ;;  %v13356_v49 = vld [vmem:[#allocation2 + $0xc0] sm:$0xff]  }
 0x177   : > { %12645 = vmatmul.mubr.bf16.gmra.mxu0 %v13351_v19  ;;  %v12411_v45 = vpop.f32.mrf.mxu1  ;;  %v15022_v19 = vpop.f32.mrf.mxu0  ;;  %v4759_v7 = vrot.slane %v4757_v57, 5  ;;  %v4761_v13 = vshrl.u32 %v15006_v4, 16  ;;  %v4767_v16 = vshll.u32 %v15012_v15, 16  ;;  %v4772_v10 = vshrl.u32 %v4429_v23, 16  ;;  %v15033_v57 = vld [vmem:[#allocation2 + $0xd0] sm:$0xf] }
 0x178   : > { %12648 = vmatprep.mubr.bf16.mxu0 %v13353_v36  ;;  %18237 = vst [vmem:[#allocation38_spill] sm:$0xff] %v15022_v19  ;;  %v15028_v36 = vld [vmem:[#allocation2 + $0xc8] sm:$0x1]  ;;  %12693 = vmatmul.mubr.bf16.gmra.mxu1 %v11498_v38  ;;  %v4741_v60 = vrot.slane %v4740_v53, 4  ;;  %v4754_v56 = vor.u32 %v4753_v35, %v4750_v63  ;;  %v4775_v27 = vshll.u32 %v4429_v23, 16  ;;  %v4736_v25 = vsel %vm13704_vm7, %v4731_v3, %v4735_v41 }
 0x179   : > { %v15026_v47 = vpop.f32.mrf.mxu1  ;;  %18239 = vst [vmem:[#allocation40_spill] sm:$0xff] %v15028_v36  ;;  %v4763_v54 = vrot.slane %v4761_v13, 4  ;;  %v4769_v14 = vrot.slane %v4767_v16, 5  ;;  %v4781_v48 = vshll.u32 %v15017_v42, 16  ;;  %v4774_v53 = vrot.slane %v4772_v10, 4 }
 0x17a   : > { %18238 = vst [vmem:[#allocation39_spill] sm:$0xff] %v15026_v47  ;;  %v4746_v38 = vsel %vm13704_vm7, %v4741_v60, %v4745_v62  ;;  %v4755_v19 = vrot.slane %v4754_v56, 4  ;;  %v4777_v63 = vrot.slane %v4775_v27, 5  ;;  %v4785_v0 = vshrl.u32 %v15017_v42, 16  ;;  %v15043_v62 = vld [vmem:[#allocation2 + $0xd4] sm:$0x1] }
 0x17b   : > { %v11499_v23 = vcombine.low %v4736_v25, %v4746_v38  ;;  %v4764_v15 = vor.u32 %v4763_v54, %v4759_v7  ;;  %v4783_v41 = vrot.slane %v4781_v48, 5  ;;  %v4791_v39 = vshll.u32 %v15028_v36, 16  ;;  %v5142_v38 = vld [vmem:[#allocation2 + $0x24] sm:$0xe] }
 0x17c   : > { %v12362_v47 = vpop.f32.mrf.mxu0  ;;  %v4760_v3 = vsel %vm13704_vm7, %v4755_v19, %v4759_v7  ;;  %v4778_v13 = vor.u32 %v4777_v63, %v4774_v53  ;;  %v4796_v56 = vshrl.u32 %v4432_v29, 16  ;;  %v4799_v10 = vshll.u32 %v4432_v29, 16  ;;  %v13357_v19 = vld [vmem:[#allocation2 + $0xcc] sm:$0xff]  }
 0x17d   : > { %v15037_v35 = vadd.f32 %v12410_v32, %v12362_v47  ;;  %v12414_v4 = vpop.f32.mrf.mxu1  ;;  %12696 = vmatprep.mubr.bf16.mxu1 %v11499_v23  ;;  %v4765_v47 = vrot.slane %v4764_v15, 4  ;;  %v4787_v54 = vrot.slane %v4785_v0, 4  ;;  %v4805_v48 = vshll.u32 %v15033_v57, 16 }
 0x17e   : > { %v1541_v16 = vpop.f32.mrf.mxu0  ;;  %v4779_v7 = vrot.slane %v4778_v13, 4  ;;  %v4798_v15 = vrot.slane %v4796_v56, 4  ;;  %v4793_v27 = vrot.slane %v4791_v39, 5  ;;  %v4815_v36 = vshll.u32 %v15043_v62, 16 }
 0x17f   : > { %18240 = vst [vmem:[#allocation41_spill] sm:$0xff] %v15037_v35  ;;  %12649 = vmatmul.mubr.bf16.gmra.mxu0 %v13354_v6  ;;  %v15045_v60 = vadd.f32 %v1846_v26, %v1541_v16  ;;  %v1862_v32 = vpop.f32.mrf.mxu1  ;;  %v5141_v6 = vld [vmem:[#allocation2 + $0x18] sm:$0xe]  ;;  %v4770_v53 = vsel %vm13704_vm7, %v4765_v47, %v4769_v14  ;;  %v4788_v16 = vor.u32 %v4787_v54, %v4783_v41  ;;  %v4809_v35 = vshrl.u32 %v15033_v57, 16 }
 0x180   : > { %12652 = vmatprep.mubr.bf16.mxu0 %v13356_v49  ;;  %v12363_v25 = vpop.f32.mrf.mxu0  ;;  %v4801_v49 = vrot.slane %v4799_v10, 5  ;;  %v11500_v23 = vcombine.low %v4760_v3, %v4770_v53  ;;  %v4784_v0 = vsel %vm13704_vm7, %v4779_v7, %v4783_v41  ;;  %v11511_v56 = vrot.slane %v5141_v6, 9  ;;  %v13490_v3 = vld [vmem:[#allocation2 + $0x1c] sm:$0xf] }
 0x181   : > { %18241 = vst [vmem:[#allocation42_spill] sm:$0xff] %v15045_v60  ;;  %v15051_v26 = vadd.f32 %v12411_v45, %v12363_v25  ;;  %v12415_v63 = vpop.f32.mrf.mxu1  ;;  %v4807_v60 = vrot.slane %v4805_v48, 5  ;;  %v5143_v45 = vld [vmem:[#allocation2 + $0x30] sm:$0xe]  ;;  %v4789_v47 = vrot.slane %v4788_v16, 4  ;;  %v5207_v10 = vrot.slane %v13490_v3, 5 }
 0x182   : > { %v15053_v29 = vpop.f32.mrf.mxu0  ;;  %v4802_v13 = vor.u32 %v4801_v49, %v4798_v15  ;;  %12697 = vmatmul.mubr.bf16.gmra.mxu1 %v11500_v23  ;;  %v13491_v25 = vld [vmem:[#allocation2 + $0x20] sm:$0x1]  ;;  %v4811_v48 = vrot.slane %v4809_v35, 4  ;;  %v4817_v53 = vrot.slane %v4815_v36, 5  ;;  %v5144_v7 = vld [vmem:[#allocation2 + $0x3c] sm:$0xe] }
 0x183   : > { %18242 = vst [vmem:[#allocation43_spill] sm:$0xff] %v15053_v29  ;;  %v15059_v14 = vpop.f32.mrf.mxu1  ;;  %v5210_v54 = vrot.slane %v13491_v25, 5  ;;  %v11512_v29 = vrot.slane %v5142_v38, 9  ;;  %v4794_v49 = vsel %vm13704_vm7, %v4789_v47, %v4793_v27  ;;  %v5208_v23 = vsel %vm14007_vm13, %v11511_v56, %v5207_v10  ;;  %v5145_v25 = vld [vmem:[#allocation2 + $0x48] sm:$0xe] }
 0x184   : > { %18243 = vst [vmem:[#allocation44_spill] sm:$0xff] %v15059_v14  ;;  %v4803_v39 = vrot.slane %v4802_v13, 4  ;;  %v5209_v6 = vrot.slane %v5207_v10, 4  ;;  %v18244_v16 = vrot.slane %v14786_v61, 5  ;;  %v11501_v36 = vcombine.low %v4784_v0, %v4794_v49  ;;  %v13492_v61 = vld [vmem:[#allocation2 + $0x34] sm:$0xf] }
 0x185   : > { %v15061_v41 = vpop.f32.mrf.mxu1  ;;  %v12366_v15 = vpop.f32.mrf.mxu0  ;;  %v4812_v38 = vor.u32 %v4811_v48, %v4807_v60  ;;  %v18247_v10 = vrot.slane %v14796_v12, 5  ;;  %v11513_v0 = vrot.slane %v5143_v45, 9  ;;  %v5228_v12 = vrot.slane %v14832_v8, 5 }
 0x186   : > { %v5216_v3 = vrot.slane %v18244_v16, 4  ;;  %v15069_v13 = vadd.f32 %v12414_v4, %v12366_v15  ;;  %v4808_v35 = vsel %vm13704_vm7, %v4803_v39, %v4807_v60  ;;  %v5211_v27 = vsel %vm14007_vm13, %v5209_v6, %v5210_v54  ;;  %12700 = vmatprep.mubr.bf16.mxu1 %v11501_v36  ;;  %v5146_v54 = vld [vmem:[#allocation2 + $0x54] sm:$0xe] }
 0x187   : > { %12653 = vmatmul.mubr.bf16.gmra.mxu0 %v13357_v19  ;;  %v15073_v14 = vpop.f32.mrf.mxu1  ;;  %v1557_v19 = vpop.f32.mrf.mxu0  ;;  %v18246_v47 = vmov %v18244_v16  ;;  %v4813_v60 = vrot.slane %v4812_v38, 4  ;;  %v11527_v48 = vcombine.low %v5208_v23, %v5211_v27  ;;  %v5221_v16 = vrot.slane %v13492_v61, 5  ;;  %v5147_v38 = vld [vmem:[#allocation2 + $0x60] sm:$0xe] }
 0x188   : > { %18245 = vst [vmem:[#allocation45_spill] sm:$0xff] %v15069_v13  ;;  %v5215_v56 = vsel %vm14007_vm13, %v11512_v29, %v18246_v47  ;;  %v5218_v4 = vsel %vm14007_vm13, %v5216_v3, %v18247_v10  ;;  %v15085_v39 = vadd.f32 %v1862_v32, %v1557_v19  ;;  %v13493_v13 = vld [vmem:[#allocation2 + $0x38] sm:$0x1]  ;;  %v11514_v47 = vrot.slane %v5144_v7, 9 }
 0x189   : > { %v11528_v15 = vcombine.low %v5215_v56, %v5218_v4  ;;  %v15087_v49 = vpop.f32.mrf.mxu1  ;;  %v12367_v6 = vpop.f32.mrf.mxu0  ;;  %v5224_v29 = vrot.slane %v13493_v13, 5  ;;  %v4818_v45 = vsel %vm13704_vm7, %v4813_v60, %v4817_v53  ;;  %12720 = vmatprep.mubr.bf16.mxu0 %v11527_v48  ;;  %v11515_v23 = vrot.slane %v5145_v25, 9 }
 0x18a   : > { %v15092_v3 = vadd.f32 %v12415_v63, %v12367_v6  ;;  %v5235_v36 = vrot.slane %v14844_v37, 5  ;;  %v5259_v19 = vrot.slane %v14919_v46, 5  ;;  %v11502_v27 = vcombine.low %v4808_v35, %v4818_v45 }
 0x18b   : > { %v15094_v32 = vpop.f32.mrf.mxu1  ;;  %v15098_v56 = vpop.f32.mrf.mxu0  ;;  %v5222_v8 = vsel %vm14007_vm13, %v11513_v0, %v5221_v16  ;;  %v5223_v7 = vrot.slane %v5221_v16, 4  ;;  %v5230_v13 = vrot.slane %v5228_v12, 4  ;;  %v5238_v46 = vrot.slane %v14849_v2, 5  ;;  %v5148_v16 = vld [vmem:[#allocation2 + $0x6c] sm:$0xe] }
 0x18c   : > { %v5236_v63 = vsel %vm14007_vm13, %v11515_v23, %v5235_v36  ;;  %v5237_v10 = vrot.slane %v5235_v36, 4  ;;  %12701 = vmatmul.mubr.bf16.gmra.mxu1 %v11502_v27  ;;  %v11516_v35 = vrot.slane %v5146_v54, 9  ;;  %v5242_v4 = vrot.slane %v14870_v59, 5 }
 0x18d   : > { %v12486_v53 = vpop.f32.mrf.mxu1  ;;  %v12434_v25 = vpop.f32.mrf.mxu0  ;;  %v5225_v37 = vsel %vm14007_vm13, %v5223_v7, %v5224_v29  ;;  %v5229_v48 = vsel %vm14007_vm13, %v11514_v47, %v5228_v12  ;;  %v18248_v6 = vrot.slane %v14840_v44, 5  ;;  %v5249_v23 = vrot.slane %v14890_v9, 5 }
 0x18e   : > { %v2332_v0 = vadd.f32 %v12434_v25, %v14773_v22  ;;  %v11529_v60 = vcombine.low %v5222_v8, %v5225_v37  ;;  %v5239_v2 = vsel %vm14007_vm13, %v5237_v10, %v5238_v46  ;;  %v5243_v59 = vsel %vm14007_vm13, %v11516_v35, %v5242_v4 }
 0x18f   : > { %12721 = vmatmul.mubr.bf16.vlgmr.msra.gmra.mxu0 %v11528_v15  ;;  %v5232_v61 = vsel %vm14007_vm13, %v5230_v13, %v18248_v6  ;;  %v2605_v15 = vpop.f32.mrf.mxu1  ;;  %v2203_v45 = vpop.f32.mrf.mxu0  ;;  %v5244_v54 = vrot.slane %v5242_v4, 4  ;;  %v11517_v22 = vrot.slane %v5147_v38, 9  ;;  %v11531_v12 = vcombine.low %v5236_v63, %v5239_v2  ;;  %v5149_v4 = vld [vmem:[#allocation2 + $0x78] sm:$0xe] }
 0x190   : > { %v2330_v29 = vadd.f32 %v2203_v45, %v14794_v21  ;;  %v15121_v47 = vadd.f32 %v15061_v41, %v2332_v0  ;;  %12724 = vmatprep.mubr.bf16.mxu0 %v11529_v60  ;;  %v11530_v27 = vcombine.low %v5229_v48, %v5232_v61  ;;  %v18249_v8 = vrot.slane %v14877_v58, 5 }
 0x191   : > { %v12487_v44 = vpop.f32.mrf.mxu1  ;;  %v12435_v36 = vpop.f32.mrf.mxu0  ;;  %v11518_v13 = vrot.slane %v5148_v16, 9  ;;  %v5256_v38 = vrot.slane %v14912_v52, 5  ;;  %v5251_v9 = vrot.slane %v5249_v23, 4  ;;  %v5252_v37 = vrot.slane %v14900_v11, 5 }
 0x192   : > { %v5246_v7 = vsel %vm14007_vm13, %v5244_v54, %v18249_v8  ;;  %v2333_v21 = vadd.f32 %v12435_v36, %v14816_v20  ;;  %v15131_v41 = vadd.f32 %v15073_v14, %v2330_v29  ;;  %v5263_v61 = vrot.slane %v14932_v33, 5 }
 0x193   : > { %v15133_v10 = vpop.f32.mrf.mxu1  ;;  %v11532_v63 = vcombine.low %v5243_v59, %v5246_v7  ;;  %v15135_v25 = vpop.f32.mrf.mxu0  ;;  %v15140_v58 = vsel %vm14007_vm13, %v11518_v13, %v5256_v38  ;;  %v5258_v46 = vrot.slane %v5256_v38, 4  ;;  %v5253_v6 = vsel %vm14007_vm13, %v5251_v9, %v5252_v37  ;;  %v5151_v7 = vld [vmem:[#allocation2 + $0x90] sm:$0xe]  ;;  %v15181_v9 = vld [vmem:[#allocation2 + $0xa8] sm:$0xe] }
 0x194   : > { %v15143_v52 = vadd.f32 %v15087_v49, %v2333_v21  ;;  %v5250_v49 = vsel %vm14007_vm13, %v11517_v22, %v5249_v23  ;;  %v11519_v2 = vrot.slane %v5149_v4, 9  ;;  %v1770_v59 = vadd.f32 %v14752_v28, %v14788_v43 }
 0x195   : > { %v12490_v20 = vpop.f32.mrf.mxu1  ;;  %v15147_v14 = vsel %vm14007_vm13, %v5258_v46, %v5259_v19  ;;  %v11533_v22 = vcombine.low %v5250_v49, %v5253_v6  ;;  %v5265_v36 = vrot.slane %v5263_v61, 4  ;;  %v5266_v33 = vrot.slane %v14942_v17, 5  ;;  %v18252_v6 = vld [vmem:[#allocation18_spill] sm:$0xff] }
 0x196   : > { %v12438_v35 = vpop.f32.mrf.mxu0  ;;  %v11534_v60 = vcombine.low %v15140_v58, %v15147_v14  ;;  %v5270_v28 = vrot.slane %v14948_v24, 5  ;;  %v5264_v17 = vsel %vm14007_vm13, %v11519_v2, %v5263_v61  ;;  %v5277_v21 = vrot.slane %v14965_v18, 5  ;;  %v18253_v2 = vld [vmem:[#allocation27_spill] sm:$0xff] }
 0x197   : > { %12725 = vmatmul.mubr.bf16.gmra.mxu0 %v11530_v27  ;;  %v2336_v0 = vadd.f32 %v12438_v35, %v14824_v40  ;;  %v2621_v11 = vpop.f32.mrf.mxu1  ;;  %v5273_v35 = vrot.slane %v14952_v34, 5  ;;  %v11521_v14 = vrot.slane %v5151_v7, 9  ;;  %v5284_v4 = vrot.slane %v14980_v30, 5  ;;  %v18254_v34 = vld [vmem:[#allocation32_spill] sm:$0xff] }
 0x198   : > { %12728 = vmatprep.mubr.bf16.mxu0 %v11531_v12  ;;  %v2219_v48 = vpop.f32.mrf.mxu0  ;;  %v5272_v46 = vrot.slane %v5270_v28, 4  ;;  %vm720_vm14 = vcmask 1040384   ;;  %vm6125_vm1 = vcmask 1043456  }
 0x199   : > { %v2334_v19 = vadd.f32 %v2219_v48, %v14830_v50  ;;  %v15158_v16 = vadd.f32 %v12486_v53, %v2336_v0  ;;  %v12491_v45 = vpop.f32.mrf.mxu1  ;;  %v5150_v50 = vld [vmem:[#allocation2 + $0x84] sm:$0xe]  ;;  %v18251_v48 = vld [vmem:[#allocation16_spill] sm:$0xff]  ;;  %vm15323_vm15 = vmand %vm720_vm14, %vm271_vm3 }
 0x19a   : > { %v12439_v40 = vpop.f32.mrf.mxu0  ;;  %v11520_v37 = vrot.slane %v5150_v50, 9  ;;  %v18250_v0 = vld [vmem:[#allocation17_spill] sm:$0xff]  ;;  %vm15353_vm0 = vmand %vm720_vm14, %vm596_vm2 }
 0x19b   : > { %v2337_v54 = vadd.f32 %v12439_v40, %v14857_v51  ;;  %v15163_v29 = vadd.f32 %v2605_v15, %v2334_v19  ;;  %v15165_v12 = vpop.f32.mrf.mxu1  ;;  %v15174_v15 = vld [vmem:[#allocation2 + $0x9c] sm:$0xe]  ;;  %v1786_v49 = vadd.f32 %v18251_v48, %v18250_v0  ;;  %v5279_v40 = vrot.slane %v5277_v21, 4  ;;  %vm15822_vm3 = vmand %vm6125_vm1, %vm596_vm2 }
 0x19c   : > { %v2222_v23 = vpop.f32.mrf.mxu0  ;;  %v5278_v0 = vsel %vm14007_vm13, %v11521_v14, %v5277_v21  ;;  %v18258_v48 = vld [vmem:[#allocation36_spill] sm:$0xff]  ;;  %v18261_v14 = vld [vmem:[#allocation22_spill] sm:$0xff] }
 0x19d   : > { %v15168_v53 = vadd.f32 %v2222_v23, %v1770_v59  ;;  %v15170_v27 = vadd.f32 %v12487_v44, %v2337_v54  ;;  %v12494_v8 = vpop.f32.mrf.mxu1  ;;  %v5267_v44 = vsel %vm14007_vm13, %v5265_v36, %v5266_v33  ;;  %v5280_v59 = vrot.slane %v18253_v2, 5  ;;  %v18255_v33 = vld [vmem:[#allocation30_spill] sm:$0xff]  ;;  %v18260_v2 = vld [vmem:[#allocation21_spill] sm:$0xff] }
 0x19e   : > { %v12442_v13 = vpop.f32.mrf.mxu0  ;;  %v11535_v19 = vcombine.low %v5264_v17, %v5267_v44  ;;  %v11522_v54 = vrot.slane %v15174_v15, 9  ;;  %v5287_v50 = vrot.slane %v18255_v33, 5  ;;  %v18257_v17 = vld [vmem:[#allocation19_spill] sm:$0xff]  ;;  %v5271_v15 = vsel %vm14007_vm13, %v11520_v37, %v5270_v28 }
 0x19f   : > { %12729 = vmatmul.mubr.bf16.gmra.mxu0 %v11532_v63  ;;  %v2340_v43 = vadd.f32 %v12442_v13, %v14863_v5  ;;  %v2637_v51 = vpop.f32.mrf.mxu1  ;;  %v5286_v13 = vrot.slane %v5284_v4, 4 }
 0x1a0   : > { %12732 = vmatprep.mubr.bf16.mxu0 %v11533_v22  ;;  %v2235_v38 = vpop.f32.mrf.mxu0  ;;  %v5291_v22 = vrot.slane %v18254_v34, 5 }
 0x1a1   : > { %v2338_v63 = vadd.f32 %v2235_v38, %v14875_v55  ;;  %v15184_v24 = vadd.f32 %v12490_v20, %v2340_v43  ;;  %v12495_v5 = vpop.f32.mrf.mxu1  ;;  %v18256_v43 = vld [vmem:[#allocation34_spill] sm:$0xff] }
 0x1a2   : > { %v12443_v58 = vpop.f32.mrf.mxu0  ;;  %v5294_v38 = vrot.slane %v18256_v43, 5  ;;  %v5154_v43 = vld [vmem:[#allocation2 + $0xb4] sm:$0xe] }
 0x1a3   : > { %v2341_v18 = vadd.f32 %v12443_v58, %v18252_v6  ;;  %v15191_v61 = vadd.f32 %v2621_v11, %v2338_v63  ;;  %v15193_v55 = vpop.f32.mrf.mxu1  ;;  %v11523_v11 = vrot.slane %v15181_v9, 9  ;;  %v5293_v9 = vrot.slane %v5291_v22, 4  ;;  %v18259_v6 = vld [vmem:[#allocation20_spill] sm:$0xff] }
 0x1a4   : > { %v2238_v20 = vpop.f32.mrf.mxu0 }
 0x1a5   : > { %v15198_v23 = vadd.f32 %v2238_v20, %v1786_v49  ;;  %v15200_v30 = vadd.f32 %v12491_v45, %v2341_v18  ;;  %v12498_v36 = vpop.f32.mrf.mxu1  ;;  %v5274_v45 = vsel %vm14007_vm13, %v5272_v46, %v5273_v35  ;;  %v5298_v49 = vrot.slane %v18258_v48, 5  ;;  %v18263_v48 = vld [vmem:[#allocation25_spill] sm:$0xff] }
 0x1a6   : > { %v12446_v7 = vpop.f32.mrf.mxu0  ;;  %v11536_v37 = vcombine.low %v5271_v15, %v5274_v45  ;;  %v5288_v15 = vsel %vm14007_vm13, %v5286_v13, %v5287_v50  ;;  %v18264_v50 = vld [vmem:[#allocation37_spill] sm:$0xff] }
 0x1a7   : > { %12733 = vmatmul.mubr.bf16.gmra.mxu0 %v11534_v60  ;;  %v2344_v44 = vadd.f32 %v12446_v7, %v18257_v17  ;;  %v2653_v63 = vpop.f32.mrf.mxu1  ;;  %v5281_v60 = vsel %vm14007_vm13, %v5279_v40, %v5280_v59  ;;  %v18262_v17 = vld [vmem:[#allocation23_spill] sm:$0xff]  ;;  %v5301_v13 = vrot.slane %v18264_v50, 5 }
 0x1a8   : > { %12736 = vmatprep.mubr.bf16.mxu0 %v11535_v19  ;;  %v2251_v58 = vpop.f32.mrf.mxu0  ;;  %v11537_v34 = vcombine.low %v5278_v0, %v5281_v60  ;;  %v5292_v0 = vsel %vm14007_vm13, %v11523_v11, %v5291_v22  ;;  %v5305_v60 = vrot.slane %v15017_v42, 5 }
 0x1a9   : > { %v2342_v18 = vadd.f32 %v2251_v58, %v18259_v6  ;;  %v15216_v19 = vadd.f32 %v12494_v8, %v2344_v44  ;;  %v12499_v20 = vpop.f32.mrf.mxu1 }
 0x1aa   : > { %v12447_v28 = vpop.f32.mrf.mxu0 }
 0x1ab   : > { %v2345_v46 = vadd.f32 %v12447_v28, %v18260_v2  ;;  %v15219_v35 = vadd.f32 %v2637_v51, %v2342_v18  ;;  %v15221_v33 = vpop.f32.mrf.mxu1  ;;  %v5285_v51 = vsel %vm14007_vm13, %v11522_v54, %v5284_v4  ;;  %v11524_v2 = vrot.slane %v5154_v43, 9 }
 0x1ac   : > { %v2254_v21 = vpop.f32.mrf.mxu0  ;;  %v11538_v54 = vcombine.low %v5285_v51, %v5288_v15  ;;  %v18267_v51 = vld [vmem:[#allocation29_spill] sm:$0xff] }
 0x1ad   : > { %v15224_v40 = vadd.f32 %v2254_v21, %v18261_v14  ;;  %v15226_v59 = vadd.f32 %v12495_v5, %v2345_v46  ;;  %v12502_v7 = vpop.f32.mrf.mxu1  ;;  %v5295_v5 = vsel %vm14007_vm13, %v5293_v9, %v5294_v38  ;;  %v18265_v46 = vld [vmem:[#allocation28_spill] sm:$0xff]  ;;  %v5300_v38 = vrot.slane %v5298_v49, 4 }
 0x1ae   : > { %v12450_v8 = vpop.f32.mrf.mxu0  ;;  %v11539_v22 = vcombine.low %v5292_v0, %v5295_v5  ;;  %v18266_v14 = vld [vmem:[#allocation40_spill] sm:$0xff]  ;;  %v5156_v5 = vld [vmem:[#allocation2 + $0xcc] sm:$0xe] }
 0x1af   : > { %12737 = vmatmul.mubr.bf16.gmra.mxu0 %v11536_v37  ;;  %v2348_v44 = vadd.f32 %v12450_v8, %v18262_v17  ;;  %v2669_v45 = vpop.f32.mrf.mxu1  ;;  %v5155_v37 = vld [vmem:[#allocation2 + $0xc0] sm:$0xe]  ;;  %v5308_v8 = vrot.slane %v18266_v14, 5 }
 0x1b0   : > { %12740 = vmatprep.mubr.bf16.mxu0 %v11537_v34  ;;  %v2267_v58 = vpop.f32.mrf.mxu0  ;;  %v11525_v9 = vrot.slane %v5155_v37, 9 }
 0x1b1   : > { %v2346_v6 = vadd.f32 %v2267_v58, %v18263_v48  ;;  %v15239_v18 = vadd.f32 %v12498_v36, %v2348_v44  ;;  %v12503_v28 = vpop.f32.mrf.mxu1  ;;  %v5307_v36 = vrot.slane %v5305_v60, 4  ;;  %v5302_v58 = vsel %vm14007_vm13, %v5300_v38, %v5301_v13 }
 0x1b2   : > { %v12451_v4 = vpop.f32.mrf.mxu0  ;;  %v5312_v48 = vrot.slane %v15033_v57, 5  ;;  %v11526_v13 = vrot.slane %v5156_v5, 9  ;;  %v18269_v57 = vld [vmem:[#allocation35_spill] sm:$0xff] }
 0x1b3   : > { %v2349_v34 = vadd.f32 %v12451_v4, %v18265_v46  ;;  %v15243_v21 = vadd.f32 %v2653_v63, %v2346_v6  ;;  %v15245_v11 = vpop.f32.mrf.mxu1  ;;  %v5299_v63 = vsel %vm14007_vm13, %v11524_v2, %v5298_v49  ;;  %v5309_v37 = vsel %vm14007_vm13, %v5307_v36, %v5308_v8  ;;  %v13359_v4 = vld [vmem:[#allocation5 + $0x2b8] sm:$0xff]  }
 0x1b4   : > { %v15247_v42 = vpop.f32.mrf.mxu0  ;;  %12752 = vmatprep.subr.bf16.mxu1 %v13359_v4  ;;  %v5314_v36 = vrot.slane %v5312_v48, 4 }
 0x1b5   : > { %v15250_v17 = vadd.f32 %v12499_v20, %v2349_v34  ;;  %v12506_v44 = vpop.f32.mrf.mxu1  ;;  %v5306_v20 = vsel %vm14007_vm13, %v11525_v9, %v5305_v60  ;;  %v11540_v34 = vcombine.low %v5299_v63, %v5302_v58  ;;  %12753 = vmatpush3.bf16.msra.mxu1 %v13359_v4  ;;  %v13360_v4 = vld [vmem:[#allocation5 + $0x2b0] sm:$0xff]  }
 0x1b6   : > { %v12454_v43 = vpop.f32.mrf.mxu0  ;;  %v11541_v60 = vcombine.low %v5306_v20, %v5309_v37  ;;  %12754 = vmatprep.subr.bf16.mxu1 %v13360_v4 }
 0x1b7   : > { %12741 = vmatmul.mubr.bf16.gmra.mxu0 %v11538_v54  ;;  %v2352_v15 = vadd.f32 %v12454_v43, %v18267_v51  ;;  %v2685_v0 = vpop.f32.mrf.mxu1  ;;  %v18268_v54 = vld [vmem:[#allocation31_spill] sm:$0xff] }
 0x1b8   : > { %12744 = vmatprep.mubr.bf16.mxu0 %v11539_v22  ;;  %v2283_v6 = vpop.f32.mrf.mxu0  ;;  %v5315_v22 = vrot.slane %v15043_v62, 5  ;;  %v5313_v62 = vsel %vm14007_vm13, %v11526_v13, %v5312_v48 }
 0x1b9   : > { %v2350_v50 = vadd.f32 %v2283_v6, %v18268_v54  ;;  %v15263_v46 = vadd.f32 %v12502_v7, %v2352_v15  ;;  %v12507_v49 = vpop.f32.mrf.mxu1  ;;  %v18270_v15 = vld [vmem:[#allocation41_spill] sm:$0xff]  ;;  %v18271_v6 = vld [vmem:[#allocation42_spill] sm:$0xff]  ;;  %12755 = vmatpush3.bf16.msra.mxu1 %v13360_v4 }
 0x1ba   : > { %v12455_v2 = vpop.f32.mrf.mxu0 }
 0x1bb   : > { %v2353_v38 = vadd.f32 %v12455_v2, %v18269_v57  ;;  %v15267_v14 = vadd.f32 %v2669_v45, %v2350_v50  ;;  %v15269_v9 = vpop.f32.mrf.mxu1  ;;  %v5316_v45 = vsel %vm14007_vm13, %v5314_v36, %v5315_v22 }
 0x1bc   : > { %v15271_v8 = vpop.f32.mrf.mxu0  ;;  %v11542_v50 = vcombine.low %v5313_v62, %v5316_v45 }
 0x1bd   : > { %v15273_v7 = vadd.f32 %v12503_v28, %v2353_v38  ;;  %v12510_v43 = vpop.f32.mrf.mxu1  ;;  %v18274_v38 = vld [vmem:[#allocation45_spill] sm:$0xff] }
 0x1bf   : > { %v12458_v51 = vpop.f32.mrf.mxu0  ;;  %12745 = vmatmul.mubr.bf16.gmra.mxu0 %v11540_v34  ;;  %v2701_v58 = vpop.f32.mrf.mxu1 }
 0x1c0   : > { %v2356_v63 = vadd.f32 %v12458_v51, %v18270_v15  ;;  %12748 = vmatprep.mubr.bf16.mxu0 %v11541_v60 }
 0x1c1   : > { %v2299_v5 = vpop.f32.mrf.mxu0  ;;  %v12511_v28 = vpop.f32.mrf.mxu1 }
 0x1c2   : > { %v2354_v20 = vadd.f32 %v2299_v5, %v18271_v6  ;;  %v15281_v37 = vadd.f32 %v12506_v44, %v2356_v63  ;;  %v13361_v5 = vld [vmem:[#allocation5 + $0x2a8] sm:$0xff]  }
 0x1c3   : > { %v12459_v54 = vpop.f32.mrf.mxu0  ;;  %v15286_v57 = vpop.f32.mrf.mxu1  ;;  %12756 = vmatprep.subr.bf16.mxu1 %v13361_v5 }
 0x1c4   : > { %v2357_v2 = vadd.f32 %v12459_v54, %v15051_v26  ;;  %v15284_v34 = vadd.f32 %v2685_v0, %v2354_v20  ;;  %18272 = vst [vmem:[#allocation17_spill] sm:$0xff] %v15286_v57  ;;  %12757 = vmatpush3.bf16.msra.mxu1 %v13361_v5 }
 0x1c5   : > { %v15288_v48 = vpop.f32.mrf.mxu0  ;;  %v15292_v22 = vpop.f32.mrf.mxu1 }
 0x1c6   : > { %v15290_v13 = vadd.f32 %v12507_v49, %v2357_v2  ;;  %18273 = vst [vmem:[#allocation16_spill] sm:$0xff] %v15292_v22 }
 0x1c7   : > { %v12462_v44 = vpop.f32.mrf.mxu0  ;;  %12749 = vmatmul.mubr.bf16.gmra.mxu0 %v11542_v50  ;;  %v15295_v36 = vpop.f32.mrf.mxu1 }
 0x1c8   : > { %v2360_v60 = vadd.f32 %v12462_v44, %v18274_v38  ;;  %18275 = vst [vmem:[#allocation18_spill] sm:$0xff] %v15295_v36  ;;  %v13362_v44 = vld [vmem:[#allocation5 + $0x278] sm:$0xff]  }
 0x1c9   : > { %v2315_v51 = vpop.f32.mrf.mxu0  ;;  %v15300_v15 = vpop.f32.mrf.mxu1  ;;  %12800 = vmatprep.subr.bf16.mxu0 %v13362_v44 }
 0x1ca   : > { %v2358_v26 = vadd.f32 %v2315_v51, %v15085_v39  ;;  %v15298_v0 = vadd.f32 %v12510_v43, %v2360_v60  ;;  %18276 = vst [vmem:[#allocation27_spill] sm:$0xff] %v15300_v15  ;;  %12801 = vmatpush3.bf16.msra.mxu0 %v13362_v44 }
 0x1cb   : > { %v12463_v63 = vpop.f32.mrf.mxu0  ;;  %v15305_v45 = vpop.f32.mrf.mxu1 }
 0x1cc   : > { %v2361_v62 = vadd.f32 %v12463_v63, %v15092_v3  ;;  %v15303_v49 = vadd.f32 %v2701_v58, %v2358_v26  ;;  %18277 = vst [vmem:[#allocation32_spill] sm:$0xff] %v15305_v45 }
 0x1cd   : > { %v15307_v6 = vpop.f32.mrf.mxu0  ;;  %v15311_v4 = vpop.f32.mrf.mxu1 }
 0x1ce   : > { %v15309_v20 = vadd.f32 %v12511_v28, %v2361_v62  ;;  %18278 = vst [vmem:[#allocation30_spill] sm:$0xff] %v15311_v4  ;;  %v13364_v62 = vld [vmem:[#allocation5 + $0x270] sm:$0xff]  }
 0x1cf   : > { %v12530_v39 = vpop.f32.mrf.mxu0  ;;  %v15316_v54 = vpop.f32.mrf.mxu1  ;;  %12802 = vmatprep.subr.bf16.mxu0 %v13364_v62 }
 0x1d0   : > { %v15314_v43 = vadd.f32 %v12530_v39, %v15121_v47  ;;  %18280 = vst [vmem:[#allocation19_spill] sm:$0xff] %v15316_v54  ;;  %12803 = vmatpush3.bf16.msra.mxu0 %v13364_v62  ;;  %v13363_v62 = vld [vmem:[#allocation5 + $0x2a0] sm:$0xff]  }
 0x1d1   : > { %v3343_v3 = vpop.f32.mrf.mxu0  ;;  %v12583_v50 = vpop.f32.mrf.mxu1  ;;  %12758 = vmatprep.subr.bf16.mxu1 %v13363_v62 }
 0x1d2   : > { %18279 = vst [vmem:[#allocation34_spill] sm:$0xff] %v15314_v43  ;;  %v15319_v58 = vadd.f32 %v3343_v3, %v15131_v41  ;;  %v728_v41 = vld [vmem:[#allocation3 + $0x18] sm:$0x1]  ;;  %12759 = vmatpush3.bf16.msra.mxu1 %v13363_v62 }
 0x1d3   : > { %v12531_v2 = vpop.f32.mrf.mxu0  ;;  %v15330_v47 = vpop.f32.mrf.mxu1  ;;  %v729_v63 = vsel %vm15323_vm15, 0, %v728_v41  ;;  %v725_v41 = vld [vmem:[#allocation3 + $0xc] sm:$0x1] }
 0x1d4   : > { %18281 = vst [vmem:[#allocation36_spill] sm:$0xff] %v15319_v58  ;;  %v15328_v38 = vadd.f32 %v12531_v2, %v15143_v52  ;;  %18285 = vst [vmem:[#allocation21_spill] sm:$0xff] %v15330_v47  ;;  %v13365_v47 = vld [vmem:[#allocation5 + $0x268] sm:$0xff]  }
 0x1d5   : > { %v15332_v60 = vpop.f32.mrf.mxu0  ;;  %v12586_v51 = vpop.f32.mrf.mxu1  ;;  %730 = vst [vmem:[#allocation3 + $0x18] sm:$0x1] %v729_v63  ;;  %12804 = vmatprep.subr.bf16.mxu0 %v13365_v47 }
 0x1d6   : > { %18284 = vst [vmem:[#allocation20_spill] sm:$0xff] %v15328_v38  ;;  %12805 = vmatpush3.bf16.msra.mxu0 %v13365_v47 }
 0x1d7   : > { %v12534_v26 = vpop.f32.mrf.mxu0  ;;  %v3873_v39 = vpop.f32.mrf.mxu1 }
 0x1d8   : > { %v15337_v5 = vadd.f32 %v12534_v26, %v15158_v16  ;;  %v726_v16 = vsel %vm15323_vm15, 0, %v725_v41 }
 0x1d9   : > { %v3359_v52 = vpop.f32.mrf.mxu0  ;;  %v12587_v2 = vpop.f32.mrf.mxu1  ;;  %727 = vst [vmem:[#allocation3 + $0xc] sm:$0x1] %v726_v16 }
 0x1da   : > { %18286 = vst [vmem:[#allocation22_spill] sm:$0xff] %v15337_v5  ;;  %v15340_v3 = vadd.f32 %v3359_v52, %v15163_v29 }
 0x1db   : > { %v12535_v1 = vpop.f32.mrf.mxu0  ;;  %v15343_v54 = vpop.f32.mrf.mxu1 }
 0x1dc   : > { %18287 = vst [vmem:[#allocation23_spill] sm:$0xff] %v15340_v3  ;;  %v3477_v44 = vadd.f32 %v12535_v1, %v15170_v27  ;;  %18288 = vst [vmem:[#allocation25_spill] sm:$0xff] %v15343_v54  ;;  %v783_v1 = vld [vmem:[#allocation3 + $0x20] sm:$0x1]  ;;  %v13367_v54 = vld [vmem:[#allocation5 + $0x260] sm:$0xff]  }
 0x1dd   : > { %v15345_v4 = vpop.f32.mrf.mxu0  ;;  %v12590_v63 = vpop.f32.mrf.mxu1  ;;  %v784_v52 = vsel %vm15353_vm0, 0, %v783_v1  ;;  %12806 = vmatprep.subr.bf16.mxu0 %v13367_v54  ;;  %v734_v1 = vld [vmem:[#allocation3 + $0x30] sm:$0x1] }
 0x1de   : > { %v15349_v26 = vadd.f32 %v12583_v50, %v3477_v44  ;;  %785 = vst [vmem:[#allocation3 + $0x20] sm:$0x1] %v784_v52  ;;  %v780_v44 = vld [vmem:[#allocation3 + $0x14] sm:$0x1]  ;;  %12807 = vmatpush3.bf16.msra.mxu0 %v13367_v54 }
 0x1df   : > { %v12538_v27 = vpop.f32.mrf.mxu0  ;;  %v3889_v50 = vpop.f32.mrf.mxu1  ;;  %v781_v3 = vsel %vm15353_vm0, 0, %v780_v44 }
 0x1e0   : > { %v3480_v41 = vadd.f32 %v12538_v27, %v15184_v24  ;;  %782 = vst [vmem:[#allocation3 + $0x14] sm:$0x1] %v781_v3  ;;  %v735_v24 = vsel %vm15323_vm15, 0, %v734_v1  ;;  %v13368_v27 = vld [vmem:[#allocation5 + $0x258] sm:$0xff]  }
 0x1e1   : > { %v3375_v16 = vpop.f32.mrf.mxu0  ;;  %v12591_v45 = vpop.f32.mrf.mxu1  ;;  %736 = vst [vmem:[#allocation3 + $0x30] sm:$0x1] %v735_v24  ;;  %12808 = vmatprep.subr.bf16.mxu0 %v13368_v27  ;;  %v13366_v1 = vld [vmem:[#allocation5 + $0x298] sm:$0xff]   ;;  %v786_v24 = vld [vmem:[#allocation3 + $0x2c] sm:$0x1] }
 0x1e2   : > { %v3478_v5 = vadd.f32 %v3375_v16, %v15191_v61  ;;  %v15363_v47 = vadd.f32 %v12586_v51, %v3480_v41  ;;  %v731_v61 = vld [vmem:[#allocation3 + $0x24] sm:$0x1]  ;;  %v789_v41 = vld [vmem:[#allocation3 + $0x38] sm:$0x1]  ;;  %12809 = vmatpush3.bf16.msra.mxu0 %v13368_v27  ;;  %12760 = vmatprep.subr.bf16.mxu1 %v13366_v1 }
 0x1e3   : > { %v12539_v15 = vpop.f32.mrf.mxu0  ;;  %v15370_v44 = vpop.f32.mrf.mxu1  ;;  %v732_v3 = vsel %vm15323_vm15, 0, %v731_v61  ;;  %12761 = vmatpush3.bf16.msra.mxu1 %v13366_v1 }
 0x1e4   : > { %v3481_v52 = vadd.f32 %v12539_v15, %v15200_v30  ;;  %v15368_v38 = vadd.f32 %v3873_v39, %v3478_v5  ;;  %18291 = vst [vmem:[#allocation37_spill] sm:$0xff] %v15370_v44  ;;  %733 = vst [vmem:[#allocation3 + $0x24] sm:$0x1] %v732_v3  ;;  %v790_v30 = vsel %vm15353_vm0, 0, %v789_v41  ;;  %v13370_v15 = vld [vmem:[#allocation5 + $0x250] sm:$0xff]  }
 0x1e5   : > { %v15372_v51 = vpop.f32.mrf.mxu0  ;;  %v12594_v62 = vpop.f32.mrf.mxu1  ;;  %791 = vst [vmem:[#allocation3 + $0x38] sm:$0x1] %v790_v30  ;;  %12810 = vmatprep.subr.bf16.mxu0 %v13370_v15  ;;  %v740_v3 = vld [vmem:[#allocation3 + $0x48] sm:$0x1] }
 0x1e6   : > { %v15376_v54 = vadd.f32 %v12587_v2, %v3481_v52  ;;  %v787_v2 = vsel %vm15353_vm0, 0, %v786_v24  ;;  %12811 = vmatpush3.bf16.msra.mxu0 %v13370_v15 }
 0x1e7   : > { %v12542_v16 = vpop.f32.mrf.mxu0  ;;  %v3905_v39 = vpop.f32.mrf.mxu1  ;;  %788 = vst [vmem:[#allocation3 + $0x2c] sm:$0x1] %v787_v2 }
 0x1e8   : > { %v3484_v5 = vadd.f32 %v12542_v16, %v15216_v19  ;;  %v741_v19 = vsel %vm15323_vm15, 0, %v740_v3 }
 0x1e9   : > { %v3391_v44 = vpop.f32.mrf.mxu0  ;;  %v12595_v27 = vpop.f32.mrf.mxu1  ;;  %742 = vst [vmem:[#allocation3 + $0x48] sm:$0x1] %v741_v19 }
 0x1ea   : > { %v3482_v52 = vadd.f32 %v3391_v44, %v15219_v35  ;;  %v15384_v61 = vadd.f32 %v12590_v63, %v3484_v5  ;;  %v737_v35 = vld [vmem:[#allocation3 + $0x3c] sm:$0x1]  ;;  %v722_v63 = vld [vmem:[#allocation3] sm:$0x1] }
 0x1eb   : > { %v12543_v41 = vpop.f32.mrf.mxu0  ;;  %v15391_v24 = vpop.f32.mrf.mxu1  ;;  %v738_v5 = vsel %vm15323_vm15, 0, %v737_v35  ;;  %v723_v15 = vsel %vm15323_vm15, 0, %v722_v63  ;;  %v792_v35 = vld [vmem:[#allocation3 + $0x44] sm:$0x1] }
 0x1ec   : > { %v3485_v16 = vadd.f32 %v12543_v41, %v15226_v59  ;;  %v15389_v30 = vadd.f32 %v3889_v50, %v3482_v52  ;;  %18292 = vst [vmem:[#allocation28_spill] sm:$0xff] %v15391_v24  ;;  %739 = vst [vmem:[#allocation3 + $0x3c] sm:$0x1] %v738_v5  ;;  %v795_v59 = vld [vmem:[#allocation3 + $0x50] sm:$0x1]  ;;  %v13371_v50 = vld [vmem:[#allocation5 + $0x248] sm:$0xff]  }
 0x1ed   : > { %v15393_v44 = vpop.f32.mrf.mxu0  ;;  %v12598_v2 = vpop.f32.mrf.mxu1  ;;  %724 = vst [vmem:[#allocation3] sm:$0x1] %v723_v15  ;;  %v796_v3 = vsel %vm15353_vm0, 0, %v795_v59  ;;  %v13369_v24 = vld [vmem:[#allocation5 + $0x290] sm:$0xff]   ;;  %12812 = vmatprep.subr.bf16.mxu0 %v13371_v50  ;;  %v746_v15 = vld [vmem:[#allocation3 + $0x60] sm:$0x1] }
 0x1ee   : > { %18293 = vst [vmem:[#allocation40_spill] sm:$0xff] %v15393_v44  ;;  %v15399_v1 = vadd.f32 %v12591_v45, %v3485_v16  ;;  %797 = vst [vmem:[#allocation3 + $0x50] sm:$0x1] %v796_v3  ;;  %v793_v45 = vsel %vm15353_vm0, 0, %v792_v35  ;;  %12813 = vmatpush3.bf16.msra.mxu0 %v13371_v50  ;;  %12762 = vmatprep.subr.bf16.mxu1 %v13369_v24  ;;  %v13373_v59 = vld [vmem:[#allocation5 + $0x240] sm:$0xff]  }
 0x1ef   : > { %v12546_v52 = vpop.f32.mrf.mxu0  ;;  %v3921_v19 = vpop.f32.mrf.mxu1  ;;  %794 = vst [vmem:[#allocation3 + $0x44] sm:$0x1] %v793_v45  ;;  %12763 = vmatpush3.bf16.msra.mxu1 %v13369_v24  ;;  %12814 = vmatprep.subr.bf16.mxu0 %v13373_v59  ;;  %v13372_v45 = vld [vmem:[#allocation5 + $0x288] sm:$0xff]  }
 0x1f0   : > { %v3488_v41 = vadd.f32 %v12546_v52, %v15239_v18  ;;  %v747_v52 = vsel %vm15323_vm15, 0, %v746_v15  ;;  %v743_v15 = vld [vmem:[#allocation3 + $0x54] sm:$0x1]  ;;  %12764 = vmatprep.subr.bf16.mxu1 %v13372_v45 }
 0x1f1   : > { %v3407_v44 = vpop.f32.mrf.mxu0  ;;  %v12599_v5 = vpop.f32.mrf.mxu1  ;;  %748 = vst [vmem:[#allocation3 + $0x60] sm:$0x1] %v747_v52 }
 0x1f2   : > { %v3486_v16 = vadd.f32 %v3407_v44, %v15243_v21  ;;  %v15407_v63 = vadd.f32 %v12594_v62, %v3488_v41  ;;  %12815 = vmatpush3.bf16.msra.mxu0 %v13373_v59  ;;  %v15418_v44 = vld [vmem:[#allocation3 + $0x4] sm:$0xf]  ;;  %v801_v59 = vld [vmem:[#allocation3 + $0x68] sm:$0x1] }
 0x1f3   : > { %v12547_v18 = vpop.f32.mrf.mxu0  ;;  %v15414_v35 = vpop.f32.mrf.mxu1  ;;  %12765 = vmatpush3.bf16.msra.mxu1 %v13372_v45  ;;  %v752_v45 = vld [vmem:[#allocation3 + $0x78] sm:$0x1] }
 0x1f4   : > { %v3489_v3 = vadd.f32 %v12547_v18, %v15250_v17  ;;  %v15412_v36 = vadd.f32 %v3905_v39, %v3486_v16  ;;  %18294 = vst [vmem:[#allocation29_spill] sm:$0xff] %v15414_v35  ;;  %v6239_v62 = vld [vmem:[#allocation3] sm:$0xf]  ;;  %v744_v18 = vsel %vm15323_vm15, 0, %v743_v15 }
 0x1f5   : > { %v15416_v21 = vpop.f32.mrf.mxu0  ;;  %v12602_v24 = vpop.f32.mrf.mxu1  ;;  %v11608_v17 = vcombine.low %v6239_v62, %v15418_v44  ;;  %745 = vst [vmem:[#allocation3 + $0x54] sm:$0x1] %v744_v18 }
 0x1f6   : > { %18295 = vst [vmem:[#allocation31_spill] sm:$0xff] %v15416_v21  ;;  %v15420_v50 = vadd.f32 %v12595_v27, %v3489_v3  ;;  %v802_v21 = vsel %vm15353_vm0, 0, %v801_v59 }
 0x1f7   : > { %v12550_v41 = vpop.f32.mrf.mxu0  ;;  %v3937_v16 = vpop.f32.mrf.mxu1  ;;  %12816 = vmatprep.mubr.bf16.mxu0 %v11608_v17  ;;  %803 = vst [vmem:[#allocation3 + $0x68] sm:$0x1] %v802_v21  ;;  %v753_v21 = vsel %vm15323_vm15, 0, %v752_v45 }
 0x1f8   : > { %v3492_v39 = vadd.f32 %v12550_v41, %v15263_v46  ;;  %v798_v46 = vld [vmem:[#allocation3 + $0x5c] sm:$0x1]  ;;  %754 = vst [vmem:[#allocation3 + $0x78] sm:$0x1] %v753_v21  ;;  %v6318_v21 = vshrl.u32 %v15418_v44, 16 }
 0x1f9   : > { %v3423_v52 = vpop.f32.mrf.mxu0  ;;  %v12603_v35 = vpop.f32.mrf.mxu1  ;;  %v799_v17 = vsel %vm15353_vm0, 0, %v798_v46 }
 0x1fa   : > { %v3490_v27 = vadd.f32 %v3423_v52, %v15267_v14  ;;  %v15427_v3 = vadd.f32 %v12598_v2, %v3492_v39  ;;  %800 = vst [vmem:[#allocation3 + $0x5c] sm:$0x1] %v799_v17  ;;  %v777_v52 = vld [vmem:[#allocation3 + $0x8] sm:$0x1]  ;;  %v6305_v17 = vshrl.u32 %v6239_v62, 16 }
 0x1fb   : > { %v12551_v58 = vpop.f32.mrf.mxu0  ;;  %v15434_v22 = vpop.f32.mrf.mxu1 }
 0x1fc   : > { %v3493_v41 = vadd.f32 %v12551_v58, %v15273_v7  ;;  %v15432_v15 = vadd.f32 %v3921_v19, %v3490_v27  ;;  %18296 = vst [vmem:[#allocation35_spill] sm:$0xff] %v15434_v22  ;;  %v6308_v22 = vshll.u32 %v6239_v62, 16  ;;  %v6314_v62 = vshll.u32 %v15418_v44, 16 }
 0x1fd   : > { %v15438_v14 = vpop.f32.mrf.mxu0 }
 0x1fe   : > { %18297 = vst [vmem:[#allocation41_spill] sm:$0xff] %v15438_v14  ;;  %v15440_v2 = vadd.f32 %v12599_v5, %v3493_v41  ;;  %v12606_v18 = vpop.f32.mrf.mxu1  ;;  %v778_v5 = vsel %vm15353_vm0, 0, %v777_v52  ;;  %v13376_v14 = vld [vmem:[#allocation5 + $0x280] sm:$0xff]   ;;  %v6310_v52 = vrot.slane %v6308_v22, 5 }
 0x1ff   : > { %v12554_v39 = vpop.f32.mrf.mxu0  ;;  %779 = vst [vmem:[#allocation3 + $0x8] sm:$0x1] %v778_v5  ;;  %12766 = vmatprep.subr.bf16.mxu1 %v13376_v14 }
 0x200   : > { %v3496_v7 = vadd.f32 %v12554_v39, %v15281_v37  ;;  %v3953_v19 = vpop.f32.mrf.mxu1  ;;  %12767 = vmatpush3.bf16.msra.mxu1 %v13376_v14 }
 0x201   : > { %v3439_v58 = vpop.f32.mrf.mxu0 }
 0x202   : > { %v3494_v59 = vadd.f32 %v3439_v58, %v15284_v34  ;;  %v15446_v27 = vadd.f32 %v12602_v24, %v3496_v7  ;;  %v12607_v41 = vpop.f32.mrf.mxu1  ;;  %v6307_v58 = vrot.slane %v6305_v17, 4 }
 0x203   : > { %v12555_v46 = vpop.f32.mrf.mxu0 }
 0x204   : > { %v3497_v45 = vadd.f32 %v12555_v46, %v15290_v13  ;;  %v15451_v37 = vadd.f32 %v3937_v16, %v3494_v59  ;;  %v15458_v24 = vpop.f32.mrf.mxu1  ;;  %v749_v13 = vld [vmem:[#allocation3 + $0x6c] sm:$0x1]  ;;  %v6316_v46 = vrot.slane %v6314_v62, 5  ;;  %v6311_v17 = vor.u32 %v6310_v52, %v6307_v58 }
 0x205   : > { %v15453_v39 = vpop.f32.mrf.mxu0  ;;  %18299 = vst [vmem:[#allocation45_spill] sm:$0xff] %v15458_v24  ;;  %v750_v59 = vsel %vm15323_vm15, 0, %v749_v13 }
 0x206   : > { %18298 = vst [vmem:[#allocation42_spill] sm:$0xff] %v15453_v39  ;;  %v15456_v34 = vadd.f32 %v12603_v35, %v3497_v45  ;;  %v6320_v39 = vrot.slane %v6318_v21, 4  ;;  %751 = vst [vmem:[#allocation3 + $0x6c] sm:$0x1] %v750_v59  ;;  %v6288_v14 = vld [vmem:[#allocation3 + $0x8] sm:$0x1] }
 0x207   : > { %v12558_v7 = vpop.f32.mrf.mxu0  ;;  %v6324_v43 = vshll.u32 %v6288_v14, 16  ;;  %v6312_v21 = vrot.slane %v6311_v17, 4  ;;  %v807_v59 = vld [vmem:[#allocation3 + $0x80] sm:$0x1] }
 0x208   : > { %v3500_v5 = vadd.f32 %v12558_v7, %v15298_v0  ;;  %v6321_v44 = vor.u32 %v6320_v39, %v6316_v46 }
 0x209   : > { %v3455_v16 = vpop.f32.mrf.mxu0  ;;  %v15467_v24 = vpop.f32.mrf.mxu1  ;;  %v6317_v39 = vsel %vm13704_vm7, %v6312_v21, %v6316_v46 }
 0x20a   : > { %v3498_v35 = vadd.f32 %v3455_v16, %v15303_v49  ;;  %v15465_v45 = vadd.f32 %v12606_v18, %v3500_v5  ;;  %v6322_v49 = vrot.slane %v6321_v44, 4  ;;  %v6326_v18 = vrot.slane %v6324_v43, 5 }
 0x20b   : > { %v12559_v22 = vpop.f32.mrf.mxu0  ;;  %v15472_v57 = vpop.f32.mrf.mxu1 }
 0x20c   : > { %v3501_v0 = vadd.f32 %v12559_v22, %v15309_v20  ;;  %v15470_v7 = vadd.f32 %v3953_v19, %v3498_v35  ;;  %v6327_v20 = vsel %vm13704_vm7, %v6322_v49, %v6326_v18  ;;  %v804_v35 = vld [vmem:[#allocation3 + $0x74] sm:$0x1]  ;;  %v758_v22 = vld [vmem:[#allocation3 + $0x90] sm:$0x1] }
 0x20d   : > { %v15474_v62 = vpop.f32.mrf.mxu0  ;;  %v15478_v13 = vpop.f32.mrf.mxu1  ;;  %v11584_v58 = vcombine.low %v6317_v39, %v6327_v20  ;;  %v805_v46 = vsel %vm15353_vm0, 0, %v804_v35  ;;  %v759_v44 = vsel %vm15323_vm15, 0, %v758_v22  ;;  %v13380_v18 = vld [vmem:[#allocation5 + $0x2f8] sm:$0xff]   ;;  %v755_v39 = vld [vmem:[#allocation3 + $0x84] sm:$0x1] }
 0x20e   : > { %v15476_v5 = vadd.f32 %v12607_v41, %v3501_v0  ;;  %v808_v41 = vsel %vm15353_vm0, 0, %v807_v59  ;;  %806 = vst [vmem:[#allocation3 + $0x74] sm:$0x1] %v805_v46  ;;  %760 = vst [vmem:[#allocation3 + $0x90] sm:$0x1] %v759_v44  ;;  %12848 = vmatprep.subr.bf16.mxu1 %v13380_v18 }
 0x20f   : > { %v15480_v16 = vpop.f32.mrf.mxu0  ;;  %v15486_v19 = vpop.f32.mrf.mxu1  ;;  %12768 = vmatprep.mubr.bf16.mxu1 %v11584_v58  ;;  %809 = vst [vmem:[#allocation3 + $0x80] sm:$0x1] %v808_v41  ;;  %v756_v58 = vsel %vm15323_vm15, 0, %v755_v39 }
 0x210   : > { %757 = vst [vmem:[#allocation3 + $0x84] sm:$0x1] %v756_v58 }
 0x211   : > { %v15488_v52 = vpop.f32.mrf.mxu0 }
 0x213   : > { %v15490_v43 = vpop.f32.mrf.mxu0  ;;  %v15494_v14 = vpop.f32.mrf.mxu1 }
 0x215   : > { %v15498_v17 = vpop.f32.mrf.mxu0  ;;  %v15502_v0 = vpop.f32.mrf.mxu1 }
 0x216   : > { %18300 = vst [vmem:[#allocation46_spill] sm:$0xff] %v15502_v0 }
 0x217   : > { %v15504_v21 = vpop.f32.mrf.mxu0  ;;  %v15506_v49 = vpop.f32.mrf.mxu1 }
 0x218   : > { %18301 = vst [vmem:[#allocation47_spill] sm:$0xff] %v15506_v49 }
 0x219   : > { %v15508_v20 = vpop.f32.mrf.mxu0  ;;  %v15512_v59 = vpop.f32.mrf.mxu1 }
 0x21a   : > { %18302 = vst [vmem:[#allocation48_spill] sm:$0xff] %v15512_v59  ;;  %v813_v59 = vld [vmem:[#allocation3 + $0x98] sm:$0x1] }
 0x21b   : > { %v12631_v41 = vpop.f32.mrf.mxu0 }
 0x21c   : > { %v15515_v35 = vadd.f32 %v12631_v41, %v15349_v26  ;;  %v15519_v22 = vpop.f32.mrf.mxu1 }
 0x21d   : > { %v15517_v46 = vpop.f32.mrf.mxu0  ;;  %18303 = vst [vmem:[#allocation49_spill] sm:$0xff] %v15519_v22 }
 0x21e   : > { %v15524_v49 = vpop.f32.mrf.mxu1 }
 0x21f   : > { %v12634_v44 = vpop.f32.mrf.mxu0  ;;  %18305 = vst [vmem:[#allocation51_spill] sm:$0xff] %v15524_v49  ;;  %v810_v49 = vld [vmem:[#allocation3 + $0x8c] sm:$0x1] }
 0x220   : > { %v15522_v31 = vadd.f32 %v12634_v44, %v15363_v47  ;;  %v15529_v18 = vpop.f32.mrf.mxu1  ;;  %v814_v47 = vsel %vm15353_vm0, 0, %v813_v59 }
 0x221   : > { %v4260_v0 = vpop.f32.mrf.mxu0  ;;  %18306 = vst [vmem:[#allocation52_spill] sm:$0xff] %v15529_v18  ;;  %815 = vst [vmem:[#allocation3 + $0x98] sm:$0x1] %v814_v47 }
 0x222   : > { %18304 = vst [vmem:[#allocation50_spill] sm:$0xff] %v15522_v31  ;;  %v15527_v39 = vadd.f32 %v4260_v0, %v15368_v38  ;;  %v15534_v41 = vpop.f32.mrf.mxu1  ;;  %v764_v31 = vld [vmem:[#allocation3 + $0xa8] sm:$0x1] }
 0x223   : > { %v12635_v58 = vpop.f32.mrf.mxu0  ;;  %18307 = vst [vmem:[#allocation53_spill] sm:$0xff] %v15534_v41 }
 0x224   : > { %v15532_v26 = vadd.f32 %v12635_v58, %v15376_v54  ;;  %v811_v54 = vsel %vm15353_vm0, 0, %v810_v49  ;;  %v765_v58 = vsel %vm15323_vm15, 0, %v764_v31 }
 0x225   : > { %v15536_v22 = vpop.f32.mrf.mxu0  ;;  %812 = vst [vmem:[#allocation3 + $0x8c] sm:$0x1] %v811_v54  ;;  %766 = vst [vmem:[#allocation3 + $0xa8] sm:$0x1] %v765_v58 }
 0x227   : > { %v12638_v44 = vpop.f32.mrf.mxu0  ;;  %v15543_v0 = vpop.f32.mrf.mxu1 }
 0x228   : > { %v15541_v38 = vadd.f32 %v12638_v44, %v15384_v61  ;;  %18309 = vst [vmem:[#allocation55_spill] sm:$0xff] %v15543_v0  ;;  %v761_v0 = vld [vmem:[#allocation3 + $0x9c] sm:$0x1] }
 0x229   : > { %v4276_v41 = vpop.f32.mrf.mxu0  ;;  %v15552_v47 = vpop.f32.mrf.mxu1  ;;  %v762_v31 = vsel %vm15323_vm15, 0, %v761_v0 }
 0x22a   : > { %18308 = vst [vmem:[#allocation54_spill] sm:$0xff] %v15541_v38  ;;  %v15550_v59 = vadd.f32 %v4276_v41, %v15389_v30  ;;  %18310 = vst [vmem:[#allocation56_spill] sm:$0xff] %v15552_v47  ;;  %v819_v47 = vld [vmem:[#allocation3 + $0xb0] sm:$0x1] }
 0x22b   : > { %v12639_v18 = vpop.f32.mrf.mxu0  ;;  %v15557_v44 = vpop.f32.mrf.mxu1  ;;  %763 = vst [vmem:[#allocation3 + $0x9c] sm:$0x1] %v762_v31 }
 0x22c   : > { %v15555_v61 = vadd.f32 %v12639_v18, %v15399_v1  ;;  %18312 = vst [vmem:[#allocation58_spill] sm:$0xff] %v15557_v44 }
 0x22d   : > { %v15559_v38 = vpop.f32.mrf.mxu0  ;;  %v15563_v49 = vpop.f32.mrf.mxu1 }
 0x22e   : > { %18311 = vst [vmem:[#allocation57_spill] sm:$0xff] %v15555_v61  ;;  %18313 = vst [vmem:[#allocation59_spill] sm:$0xff] %v15563_v49 }
 0x22f   : > { %v12642_v54 = vpop.f32.mrf.mxu0  ;;  %v15571_v1 = vpop.f32.mrf.mxu1 }
 0x230   : > { %v15566_v30 = vadd.f32 %v12642_v54, %v15407_v63  ;;  %18316 = vst [vmem:[#allocation62_spill] sm:$0xff] %v15571_v1 }
 0x231   : > { %v4292_v41 = vpop.f32.mrf.mxu0  ;;  %v15576_v61 = vpop.f32.mrf.mxu1 }
 0x232   : > { %18314 = vst [vmem:[#allocation60_spill] sm:$0xff] %v15566_v30  ;;  %v15569_v58 = vadd.f32 %v4292_v41, %v15412_v36  ;;  %18318 = vst [vmem:[#allocation64_spill] sm:$0xff] %v15576_v61  ;;  %v820_v36 = vsel %vm15353_vm0, 0, %v819_v47 }
 0x233   : > { %v12643_v18 = vpop.f32.mrf.mxu0  ;;  %v15580_v49 = vpop.f32.mrf.mxu1  ;;  %821 = vst [vmem:[#allocation3 + $0xb0] sm:$0x1] %v820_v36 }
 0x234   : > { %18315 = vst [vmem:[#allocation61_spill] sm:$0xff] %v15569_v58  ;;  %v15574_v44 = vadd.f32 %v12643_v18, %v15420_v50  ;;  %18319 = vst [vmem:[#allocation65_spill] sm:$0xff] %v15580_v49  ;;  %v18322_v50 = vld [vmem:[#allocation15_spill] sm:$0xff]  ;;  %v18323_v18 = vld [vmem:[#allocation14_spill] sm:$0xff] }
 0x235   : > { %v15578_v0 = vpop.f32.mrf.mxu0  ;;  %v15585_v54 = vpop.f32.mrf.mxu1  ;;  %v816_v58 = vld [vmem:[#allocation3 + $0xa4] sm:$0x1] }
 0x236   : > { %18317 = vst [vmem:[#allocation63_spill] sm:$0xff] %v15574_v44  ;;  %18321 = vst [vmem:[#allocation67_spill] sm:$0xff] %v15585_v54  ;;  %v1754_v44 = vadd.f32 %v18323_v18, %v18322_v50  ;;  %v18327_v50 = vld [vmem:[#allocation26_spill] sm:$0xff] }
 0x237   : > { %v12646_v31 = vpop.f32.mrf.mxu0  ;;  %v18329_v18 = vld [vmem:[#allocation38_spill] sm:$0xff] }
 0x238   : > { %v15583_v63 = vadd.f32 %v12646_v31, %v15427_v3  ;;  %v15594_v49 = vpop.f32.mrf.mxu1  ;;  %v817_v3 = vsel %vm15353_vm0, 0, %v816_v58  ;;  %v770_v31 = vld [vmem:[#allocation3 + $0xc0] sm:$0x1]  ;;  %v18331_v58 = vld [vmem:[#allocation43_spill] sm:$0xff] }
 0x239   : > { %v4308_v41 = vpop.f32.mrf.mxu0  ;;  %18325 = vst [vmem:[#allocation14_spill] sm:$0xff] %v15594_v49  ;;  %818 = vst [vmem:[#allocation3 + $0xa4] sm:$0x1] %v817_v3  ;;  %v771_v36 = vsel %vm15323_vm15, 0, %v770_v31 }
 0x23a   : > { %18320 = vst [vmem:[#allocation66_spill] sm:$0xff] %v15583_v63  ;;  %v15592_v61 = vadd.f32 %v4308_v41, %v15432_v15  ;;  %v2331_v63 = vadd.f32 %v15135_v25, %v1754_v44  ;;  %v18328_v15 = vld [vmem:[#allocation24_spill] sm:$0xff]  ;;  %v15608_v54 = vpop.f32.mrf.mxu1  ;;  %772 = vst [vmem:[#allocation3 + $0xc0] sm:$0x1] %v771_v36  ;;  %v18332_v25 = vld [vmem:[#allocation39_spill] sm:$0xff] }
 0x23b   : > { %v12647_v1 = vpop.f32.mrf.mxu0  ;;  %v1818_v41 = vadd.f32 %v18328_v15, %v18327_v50  ;;  %v1850_v44 = vadd.f32 %v18332_v25, %v18331_v58  ;;  %v767_v15 = vld [vmem:[#allocation3 + $0xb4] sm:$0x1] }
 0x23c   : > { %18324 = vst [vmem:[#allocation15_spill] sm:$0xff] %v15592_v61  ;;  %v15600_v47 = vadd.f32 %v12647_v1, %v15440_v2  ;;  %v18330_v61 = vld [vmem:[#allocation33_spill] sm:$0xff]  ;;  %v18333_v2 = vld [vmem:[#allocation44_spill] sm:$0xff]  ;;  %v768_v58 = vsel %vm15323_vm15, 0, %v767_v15 }
 0x23d   : > { %v1834_v49 = vadd.f32 %v18330_v61, %v18329_v18  ;;  %v15610_v30 = vpop.f32.mrf.mxu0  ;;  %v1866_v1 = vadd.f32 %v18333_v2, %v15098_v56  ;;  %v2347_v3 = vadd.f32 %v15247_v42, %v1818_v41  ;;  %v2717_v61 = vadd.f32 %v15094_v32, %v2331_v63  ;;  %769 = vst [vmem:[#allocation3 + $0xb4] sm:$0x1] %v768_v58  ;;  %v18336_v2 = vld [vmem:[#allocation16_spill] sm:$0xff] }
 0x23e   : > { %18326 = vst [vmem:[#allocation68_spill] sm:$0xff] %v15600_v47  ;;  %v15618_v47 = vpop.f32.mrf.mxu1  ;;  %v2355_v18 = vadd.f32 %v15288_v48, %v1850_v44  ;;  %v2725_v32 = vadd.f32 %v15165_v12, %v15198_v23  ;;  %v18334_v23 = vld [vmem:[#allocation17_spill] sm:$0xff]  ;;  %v18342_v15 = vld [vmem:[#allocation32_spill] sm:$0xff] }
 0x23f   : > { %v2351_v31 = vadd.f32 %v15271_v8, %v1834_v49  ;;  %v12650_v50 = vpop.f32.mrf.mxu0  ;;  %v2359_v56 = vadd.f32 %v15307_v6, %v1866_v1  ;;  %v2721_v8 = vadd.f32 %v15133_v10, %v15168_v53  ;;  %v3471_v48 = vadd.f32 %v15332_v60, %v2717_v61  ;;  %v18343_v61 = vld [vmem:[#allocation22_spill] sm:$0xff] }
 0x240   : > { %v15623_v36 = vadd.f32 %v12650_v50, %v15446_v27  ;;  %v15628_v25 = vpop.f32.mrf.mxu1  ;;  %v2729_v49 = vadd.f32 %v15193_v55, %v15224_v40  ;;  %v2733_v6 = vadd.f32 %v15221_v33, %v2347_v3  ;;  %v2741_v44 = vadd.f32 %v15269_v9, %v2355_v18  ;;  %v18337_v55 = vld [vmem:[#allocation36_spill] sm:$0xff]  ;;  %v18338_v40 = vld [vmem:[#allocation18_spill] sm:$0xff]  ;;  %v18341_v50 = vld [vmem:[#allocation27_spill] sm:$0xff] }
 0x241   : > { %v4324_v42 = vpop.f32.mrf.mxu0  ;;  %v2737_v63 = vadd.f32 %v15245_v11, %v2351_v31  ;;  %v3475_v10 = vadd.f32 %v15345_v4, %v2721_v8  ;;  %v3479_v53 = vadd.f32 %v15372_v51, %v2725_v32  ;;  %v2745_v60 = vadd.f32 %v18334_v23, %v2359_v56  ;;  %v18339_v3 = vld [vmem:[#allocation40_spill] sm:$0xff]  ;;  %v18344_v18 = vld [vmem:[#allocation30_spill] sm:$0xff]  ;;  %v18345_v56 = vld [vmem:[#allocation23_spill] sm:$0xff] }
 0x242   : > { %v15636_v27 = vadd.f32 %v4324_v42, %v15451_v37  ;;  %v18335_v37 = vld [vmem:[#allocation34_spill] sm:$0xff]  ;;  %v3968_v33 = vadd.f32 %v18338_v40, %v18337_v55  ;;  %v3483_v11 = vadd.f32 %v18339_v3, %v2729_v49  ;;  %v15654_v31 = vpop.f32.mrf.mxu1  ;;  %v18340_v4 = vld [vmem:[#allocation20_spill] sm:$0xff]  ;;  %v3974_v58 = vadd.f32 %v18344_v18, %v18343_v61  ;;  %v18346_v42 = vld [vmem:[#allocation19_spill] sm:$0xff] }
 0x243   : > { %v12651_v41 = vpop.f32.mrf.mxu0  ;;  %v3970_v1 = vadd.f32 %v18336_v2, %v18335_v37  ;;  %v3971_v51 = vadd.f32 %v18341_v50, %v18340_v4  ;;  %v3972_v8 = vadd.f32 %v18346_v42, %v18345_v56  ;;  %v18347_v32 = vld [vmem:[#allocation31_spill] sm:$0xff]  ;;  %v18348_v23 = vld [vmem:[#allocation41_spill] sm:$0xff]  ;;  %v18349_v49 = vld [vmem:[#allocation42_spill] sm:$0xff]  ;;  %v3499_v55 = vadd.f32 %v15474_v62, %v2745_v60 }
 0x244   : > { %v15646_v12 = vadd.f32 %v12651_v41, %v15456_v34  ;;  %v3969_v34 = vadd.f32 %v18342_v15, %v3471_v48  ;;  %v3487_v41 = vadd.f32 %v18347_v32, %v2733_v6  ;;  %v3491_v37 = vadd.f32 %v18348_v23, %v2737_v63  ;;  %v15669_v40 = vpop.f32.mrf.mxu1  ;;  %v18350_v4 = vld [vmem:[#allocation21_spill] sm:$0xff] }
 0x245   : > { %v15656_v9 = vpop.f32.mrf.mxu0  ;;  %v3495_v2 = vadd.f32 %v18349_v49, %v2741_v44  ;;  %v3973_v50 = vadd.f32 %v18350_v4, %v3475_v10  ;;  %v18351_v48 = vld [vmem:[#allocation25_spill] sm:$0xff]  ;;  %v4357_v61 = vadd.f32 %v15480_v16, %v3970_v1  ;;  %v4355_v63 = vadd.f32 %v15488_v52, %v3968_v33  ;;  %v18353_v1 = vld [vmem:[#allocation28_spill] sm:$0xff]  ;;  %v18355_v33 = vld [vmem:[#allocation35_spill] sm:$0xff] }
 0x246   : > { %v3977_v15 = vadd.f32 %v18351_v48, %v3479_v53  ;;  %v18352_v56 = vld [vmem:[#allocation37_spill] sm:$0xff]  ;;  %v4358_v44 = vadd.f32 %v15490_v43, %v3971_v51  ;;  %v4356_v62 = vadd.f32 %v15498_v17, %v3969_v34  ;;  %v15681_v60 = vpop.f32.mrf.mxu1  ;;  %v4361_v10 = vadd.f32 %v15504_v21, %v3974_v58  ;;  %v18359_v4 = vld [vmem:[#allocation48_spill] sm:$0xff] }
 0x247   : > { %v12654_v3 = vpop.f32.mrf.mxu0  ;;  %v3981_v6 = vadd.f32 %v18352_v56, %v3483_v11  ;;  %v4359_v53 = vadd.f32 %v15508_v20, %v3972_v8  ;;  %v4360_v16 = vadd.f32 %v15517_v46, %v3973_v50  ;;  %v3985_v11 = vadd.f32 %v18353_v1, %v3487_v41  ;;  %v18354_v32 = vld [vmem:[#allocation29_spill] sm:$0xff]  ;;  %v18367_v1 = vld [vmem:[#allocation56_spill] sm:$0xff] }
 0x248   : > { %v15675_v18 = vadd.f32 %v12654_v3, %v15465_v45  ;;  %v3989_v52 = vadd.f32 %v18354_v32, %v3491_v37  ;;  %v3993_v43 = vadd.f32 %v18355_v33, %v3495_v2  ;;  %v18356_v51 = vld [vmem:[#allocation45_spill] sm:$0xff]  ;;  %v15693_v34 = vpop.f32.mrf.mxu1  ;;  %v5111_v21 = vadd.f32 %v15467_v24, %v4357_v61  ;;  %v18369_v33 = vld [vmem:[#allocation58_spill] sm:$0xff] }
 0x249   : > { %v4340_v42 = vpop.f32.mrf.mxu0  ;;  %v3997_v17 = vadd.f32 %v18356_v51, %v3499_v55  ;;  %v825_v49 = vld [vmem:[#allocation3 + $0xc8] sm:$0x1]  ;;  %v4364_v20 = vadd.f32 %v15536_v22, %v3977_v15  ;;  %v5109_v58 = vadd.f32 %v15472_v57, %v4355_v63  ;;  %v5112_v8 = vadd.f32 %v15478_v13, %v4358_v44  ;;  %v18357_v55 = vld [vmem:[#allocation46_spill] sm:$0xff]  ;;  %v822_v57 = vld [vmem:[#allocation3 + $0xbc] sm:$0x1] }
 0x24a   : > { %v15687_v45 = vadd.f32 %v4340_v42, %v15470_v7  ;;  %v826_v7 = vsel %vm15353_vm0, 0, %v825_v49  ;;  %v5110_v41 = vadd.f32 %v15486_v19, %v4356_v62  ;;  %v4368_v37 = vadd.f32 %v15559_v38, %v3981_v6  ;;  %v15717_v13 = vld [vmem:[#allocation5 + $0x338] sm:$0xff]   ;;  %v18361_v48 = vld [vmem:[#allocation49_spill] sm:$0xff]  ;;  %v18362_v15 = vld [vmem:[#allocation51_spill] sm:$0xff] }
 0x24b   : > { %v12655_v23 = vpop.f32.mrf.mxu0  ;;  %827 = vst [vmem:[#allocation3 + $0xc8] sm:$0x1] %v826_v7  ;;  %v5115_v24 = vadd.f32 %v15494_v14, %v4361_v10  ;;  %v15708_v22 = vadd.f32 %v18357_v55, %v4359_v53  ;;  %v15715_v50 = vadd.f32 %v18359_v4, %v4360_v16  ;;  %v18360_v19 = vld [vmem:[#allocation50_spill] sm:$0xff]  ;;  %v15725_v14 = vadd.f32 %v18362_v15, %v15527_v39  ;;  %v18363_v44 = vld [vmem:[#allocation52_spill] sm:$0xff]  ;;  %v18364_v42 = vld [vmem:[#allocation53_spill] sm:$0xff] }
 0x24c   : > { %v15698_v46 = vadd.f32 %v12655_v23, %v15476_v5  ;;  %v18358_v5 = vld [vmem:[#allocation47_spill] sm:$0xff]  ;;  %v15721_v38 = vadd.f32 %v18361_v48, %v18360_v19  ;;  %v4372_v61 = vadd.f32 %v15578_v0, %v3985_v11  ;;  %v12702_v56 = vpop.f32.mrf.mxu1  ;;  %v823_v63 = vsel %vm15353_vm0, 0, %v822_v57  ;;  %v18365_v39 = vld [vmem:[#allocation54_spill] sm:$0xff]  ;;  %12896 = vmatprep.subr.bf16.mxu0 %v15717_v13  ;;  %v18368_v32 = vld [vmem:[#allocation57_spill] sm:$0xff] }
 0x24d   : > { %v4343_v2 = vpop.f32.mrf.mxu0  ;;  %v15712_v3 = vadd.f32 %v18358_v5, %v15515_v35  ;;  %v15731_v35 = vld [vmem:[%s18166_s2] ss:$0 sm:$0xff]  ;;  %v15737_v62 = vadd.f32 %v18363_v44, %v15532_v26  ;;  %v15740_v10 = vadd.f32 %v18364_v42, %v4364_v20  ;;  %v18366_v53 = vld [vmem:[#allocation55_spill] sm:$0xff]  ;;  %824 = vst [vmem:[#allocation3 + $0xbc] sm:$0x1] %v823_v63  ;;  %v15749_v11 = vadd.f32 %v18367_v1, %v15550_v59  ;;  %v18372_v55 = vld [vmem:[#allocation62_spill] sm:$0xff] }
 0x24e   : > { %v15744_v0 = vadd.f32 %v18366_v53, %v18365_v39  ;;  %v15753_v26 = vadd.f32 %v18369_v33, %v18368_v32  ;;  %v18370_v51 = vld [vmem:[#allocation59_spill] sm:$0xff]  ;;  %v4376_v49 = vadd.f32 %v15610_v30, %v3989_v52  ;;  %v5094_v20 = vpop.f32.mrf.mxu1  ;;  %v18373_v4 = vld [vmem:[#allocation61_spill] sm:$0xff]  ;;  %v18374_v57 = vld [vmem:[#allocation64_spill] sm:$0xff]  ;;  %v4380_v39 = vadd.f32 %v15656_v9, %v3993_v43 }
 0x24f   : > { %v12722_v6 = vpop.f32.mrf.mxu0  ;;  %v15756_v23 = vadd.f32 %v18370_v51, %v4368_v37  ;;  %v15765_v19 = vadd.f32 %v18374_v57, %v18373_v4  ;;  %v18375_v15 = vld [vmem:[#allocation63_spill] sm:$0xff]  ;;  %v18378_v30 = vld [vmem:[#allocation66_spill] sm:$0xff]  ;;  %v15794_v9 = vadd.f32 %v15654_v31, %v15623_v36  ;;  %v4384_v43 = vadd.f32 %v4343_v2, %v3997_v17 }
 0x250   : > { %v5609_v16 = vadd.f32 %v12722_v6, %v5111_v21  ;;  %v18371_v21 = vld [vmem:[#allocation60_spill] sm:$0xff]  ;;  %v18376_v6 = vld [vmem:[#allocation65_spill] sm:$0xff]  ;;  %v18377_v37 = vld [vmem:[#allocation67_spill] sm:$0xff]  ;;  %v12703_v53 = vpop.f32.mrf.mxu1  ;;  %v15809_v36 = vadd.f32 %v12702_v56, %v15675_v18 }
 0x251   : > { %v5480_v7 = vpop.f32.mrf.mxu0  ;;  %v15761_v5 = vadd.f32 %v18372_v55, %v18371_v21  ;;  %v15770_v63 = vadd.f32 %v18376_v6, %v18375_v15  ;;  %v15773_v44 = vadd.f32 %v18377_v37, %v4372_v61  ;;  %v18379_v52 = vld [vmem:[#allocation14_spill] sm:$0xff]  ;;  %v18380_v32 = vld [vmem:[#allocation15_spill] sm:$0xff]  ;;  %v15790_v21 = vadd.f32 %v15628_v25, %v4376_v49 }
 0x252   : > { %v5646_v59 = vadd.f32 %v15731_v35, %v5609_v16  ;;  %v5607_v48 = vadd.f32 %v5480_v7, %v5109_v58  ;;  %v15777_v42 = vadd.f32 %v18379_v52, %v18378_v30  ;;  %v15782_v33 = vadd.f32 %v15608_v54, %v18380_v32  ;;  %v18381_v7 = vld [vmem:[#allocation68_spill] sm:$0xff]  ;;  %v5097_v4 = vpop.f32.mrf.mxu1 }
 0x253   : > { %v12723_v1 = vpop.f32.mrf.mxu0  ;;  %v15787_v61 = vadd.f32 %v15618_v47, %v18381_v7  ;;  %v15798_v54 = vadd.f32 %v15669_v40, %v15636_v27  ;;  %v15803_v47 = vadd.f32 %v15681_v60, %v15646_v12  ;;  %v15806_v25 = vadd.f32 %v15693_v34, %v4380_v39 }
 0x254   : > { %v5678_v58 = vmax.f32 %v5646_v59, 0.0  ;;  %v5644_v16 = vadd.f32 %v15731_v35, %v5607_v48  ;;  %v5610_v51 = vadd.f32 %v12723_v1, %v5112_v8  ;;  %v15812_v27 = vadd.f32 %v5094_v20, %v15687_v45  ;;  %v6134_v20 = vld [vmem:[#allocation3 + $0x18] sm:$0xf] }
 0x255   : > { %v5483_v55 = vpop.f32.mrf.mxu0  ;;  %v15815_v48 = vadd.f32 %v12703_v53, %v15698_v46  ;;  %v15817_v15 = vadd.f32 %v5097_v4, %v4384_v43 }
 0x256   : > { %v11857_v57 = vpack.c.bf16 %v5678_v58, %v5678_v58  ;;  %v5676_v8 = vmax.f32 %v5644_v16, 0.0  ;;  %v5647_v59 = vadd.f32 %v15731_v35, %v5610_v51  ;;  %v5608_v31 = vadd.f32 %v5483_v55, %v5110_v41  ;;  %v6127_v58 = vld [vmem:[#allocation3 + $0xc] sm:$0xf] }
 0x257   : > { %v12726_v17 = vpop.f32.mrf.mxu0 }
 0x258   : > { %v5822_v40 = vshrl.u32 %v11857_v57, 16  ;;  %v11855_v2 = vpack.c.bf16 %v5676_v8, %v5676_v8  ;;  %v5679_v49 = vmax.f32 %v5647_v59, 0.0  ;;  %v5645_v12 = vadd.f32 %v15731_v35, %v5608_v31 }
 0x259   : > { %v5613_v60 = vadd.f32 %v12726_v17, %v5115_v24  ;;  %v5496_v34 = vpop.f32.mrf.mxu0  ;;  %v5825_v18 = vshll.u32 %v11857_v57, 16 }
 0x25a   : > { %v5824_v6 = vrot.slane %v5822_v40, 7  ;;  %v5805_v56 = vshrl.u32 %v11855_v2, 16  ;;  %v11858_v41 = vpack.c.bf16 %v5679_v49, %v5679_v49  ;;  %v5808_v37 = vshll.u32 %v11855_v2, 16 }
 0x25b   : > { %v5677_v46 = vmax.f32 %v5645_v12, 0.0  ;;  %v5650_v30 = vadd.f32 %v15731_v35, %v5613_v60  ;;  %v5611_v52 = vadd.f32 %v5496_v34, %v15708_v22  ;;  %v12727_v39 = vpop.f32.mrf.mxu0  ;;  %v6138_v22 = vld [vmem:[#allocation3 + $0x20] sm:$0x1] }
 0x25c   : > { %v5827_v24 = vor.u32 %v5825_v18, %v5824_v6  ;;  %v5828_v53 = vrot.slane %v5824_v6, 4  ;;  %v5807_v1 = vrot.slane %v5805_v56, 7  ;;  %v5830_v32 = vshrl.u32 %v11858_v41, 16 }
 0x25d   : > { %v5833_v16 = vshll.u32 %v11858_v41, 16  ;;  %v11856_v51 = vpack.c.bf16 %v5677_v46, %v5677_v46  ;;  %v5682_v7 = vmax.f32 %v5650_v30, 0.0  ;;  %v5648_v43 = vadd.f32 %v15731_v35, %v5611_v52  ;;  %v5499_v55 = vpop.f32.mrf.mxu0 }
 0x25e   : > { %v6135_v4 = vsel %vm15822_vm3, %v5827_v24, %v6134_v20  ;;  %v5810_v57 = vor.u32 %v5808_v37, %v5807_v1  ;;  %v5811_v8 = vrot.slane %v5807_v1, 4  ;;  %v5832_v59 = vrot.slane %v5830_v32, 7  ;;  %v6131_v24 = vld [vmem:[#allocation3 + $0x14] sm:$0x1] }
 0x25f   : > { %6136 = vst [vmem:[#allocation3 + $0x18] sm:$0xf] %v6135_v4  ;;  %v5813_v31 = vshrl.u32 %v11856_v51, 16  ;;  %v5816_v17 = vshll.u32 %v11856_v51, 16  ;;  %v11861_v40 = vpack.c.bf16 %v5682_v7, %v5682_v7  ;;  %v5680_v2 = vmax.f32 %v5648_v43, 0.0  ;;  %v12730_v49 = vpop.f32.mrf.mxu0 }
 0x260   : > { %v6128_v12 = vsel %vm15822_vm3, %v5810_v57, %v6127_v58  ;;  %v5835_v60 = vor.u32 %v5833_v16, %v5832_v59  ;;  %v5837_v34 = vrot.slane %v5832_v59, 4  ;;  %v5614_v6 = vadd.f32 %v12727_v39, %v15712_v3  ;;  %v6148_v7 = vld [vmem:[#allocation3 + $0x30] sm:$0xf] }
 0x261   : > { %6129 = vst [vmem:[#allocation3 + $0xc] sm:$0xf] %v6128_v12  ;;  %v5815_v18 = vrot.slane %v5813_v31, 7  ;;  %v5856_v56 = vshrl.u32 %v11861_v40, 16  ;;  %v5859_v41 = vshll.u32 %v11861_v40, 16  ;;  %v11859_v20 = vpack.c.bf16 %v5680_v2, %v5680_v2  ;;  %v5512_v37 = vpop.f32.mrf.mxu0 }
 0x262   : > { %v5836_v30 = vsel %vm13716_vm9, %v5828_v53, %v5835_v60  ;;  %v6139_v52 = vsel %vm15323_vm15, %v5837_v34, %v6138_v22  ;;  %v5651_v1 = vadd.f32 %v15731_v35, %v5614_v6  ;;  %v5612_v32 = vadd.f32 %v5499_v55, %v15715_v50 }
 0x263   : > { %6137 = vst [vmem:[#allocation3 + $0x1c] sm:$0xf] %v5836_v30  ;;  %6140 = vst [vmem:[#allocation3 + $0x20] sm:$0x1] %v6139_v52  ;;  %v5818_v3 = vor.u32 %v5816_v17, %v5815_v18  ;;  %v5820_v39 = vrot.slane %v5815_v18, 4  ;;  %v5858_v58 = vrot.slane %v5856_v56, 7  ;;  %v12731_v51 = vpop.f32.mrf.mxu0  ;;  %v5617_v57 = vadd.f32 %v12730_v49, %v15721_v38 }
 0x264   : > { %v5839_v16 = vshrl.u32 %v11859_v20, 16  ;;  %v5842_v43 = vshll.u32 %v11859_v20, 16  ;;  %v5683_v4 = vmax.f32 %v5651_v1, 0.0  ;;  %v5649_v53 = vadd.f32 %v15731_v35, %v5612_v32  ;;  %v6141_v38 = vld [vmem:[#allocation3 + $0x24] sm:$0xf] }
 0x265   : > { %v5819_v59 = vsel %vm13716_vm9, %v5811_v8, %v5818_v3  ;;  %v6132_v50 = vsel %vm15323_vm15, %v5820_v39, %v6131_v24  ;;  %v5861_v55 = vor.u32 %v5859_v41, %v5858_v58  ;;  %v5862_v22 = vrot.slane %v5858_v58, 4  ;;  %v5515_v31 = vpop.f32.mrf.mxu0  ;;  %v6152_v3 = vld [vmem:[#allocation3 + $0x38] sm:$0x1] }
 0x266   : > { %6130 = vst [vmem:[#allocation3 + $0x10] sm:$0xf] %v5819_v59  ;;  %6133 = vst [vmem:[#allocation3 + $0x14] sm:$0x1] %v6132_v50  ;;  %v5841_v17 = vrot.slane %v5839_v16, 7  ;;  %v11862_v40 = vpack.c.bf16 %v5683_v4, %v5683_v4  ;;  %v5681_v2 = vmax.f32 %v5649_v53, 0.0  ;;  %v5654_v12 = vadd.f32 %v15731_v35, %v5617_v57 }
 0x267   : > { %v6149_v60 = vsel %vm15822_vm3, %v5861_v55, %v6148_v7  ;;  %v5615_v49 = vadd.f32 %v5512_v37, %v15725_v14  ;;  %v5618_v8 = vadd.f32 %v12731_v51, %v15737_v62  ;;  %v5616_v34 = vadd.f32 %v5515_v31, %v15740_v10  ;;  %v12734_v6 = vpop.f32.mrf.mxu0 }
 0x268   : > { %6150 = vst [vmem:[#allocation3 + $0x30] sm:$0xf] %v6149_v60  ;;  %v5844_v18 = vor.u32 %v5842_v43, %v5841_v17  ;;  %v5845_v56 = vrot.slane %v5841_v17, 4  ;;  %v5864_v41 = vshrl.u32 %v11862_v40, 16  ;;  %v5867_v20 = vshll.u32 %v11862_v40, 16 }
 0x269   : > { %v11860_v30 = vpack.c.bf16 %v5681_v2, %v5681_v2  ;;  %v5686_v52 = vmax.f32 %v5654_v12, 0.0  ;;  %v5652_v24 = vadd.f32 %v15731_v35, %v5615_v49  ;;  %v5655_v1 = vadd.f32 %v15731_v35, %v5618_v8  ;;  %v5528_v32 = vpop.f32.mrf.mxu0  ;;  %v6145_v40 = vld [vmem:[#allocation3 + $0x2c] sm:$0x1]  ;;  %v6162_v8 = vld [vmem:[#allocation3 + $0x48] sm:$0xf] }
 0x26a   : > { %v6142_v14 = vsel %vm15822_vm3, %v5844_v18, %v6141_v38  ;;  %v5866_v37 = vrot.slane %v5864_v41, 7  ;;  %v5653_v62 = vadd.f32 %v15731_v35, %v5616_v34  ;;  %v5621_v10 = vadd.f32 %v12734_v6, %v15744_v0 }
 0x26b   : > { %6143 = vst [vmem:[#allocation3 + $0x24] sm:$0xf] %v6142_v14  ;;  %v5847_v39 = vshrl.u32 %v11860_v30, 16  ;;  %v5850_v58 = vshll.u32 %v11860_v30, 16  ;;  %v11865_v16 = vpack.c.bf16 %v5686_v52, %v5686_v52  ;;  %v5684_v51 = vmax.f32 %v5652_v24, 0.0  ;;  %v12735_v7 = vpop.f32.mrf.mxu0 }
 0x26c   : > { %v5869_v43 = vor.u32 %v5867_v20, %v5866_v37  ;;  %v5871_v4 = vrot.slane %v5866_v37, 4  ;;  %v5687_v53 = vmax.f32 %v5655_v1, 0.0  ;;  %v5685_v57 = vmax.f32 %v5653_v62, 0.0  ;;  %v6155_v37 = vld [vmem:[#allocation3 + $0x3c] sm:$0xf] }
 0x26d   : > { %v5849_v59 = vrot.slane %v5847_v39, 7  ;;  %v5890_v50 = vshrl.u32 %v11865_v16, 16  ;;  %v5893_v55 = vshll.u32 %v11865_v16, 16  ;;  %v11863_v31 = vpack.c.bf16 %v5684_v51, %v5684_v51  ;;  %v5531_v6 = vpop.f32.mrf.mxu0  ;;  %v6166_v16 = vld [vmem:[#allocation3 + $0x50] sm:$0x1] }
 0x26e   : > { %v5870_v17 = vsel %vm13716_vm9, %v5862_v22, %v5869_v43  ;;  %v6153_v0 = vsel %vm15323_vm15, %v5871_v4, %v6152_v3  ;;  %v11866_v2 = vpack.c.bf16 %v5687_v53, %v5687_v53  ;;  %v11864_v12 = vpack.c.bf16 %v5685_v57, %v5685_v57  ;;  %v6159_v51 = vld [vmem:[#allocation3 + $0x44] sm:$0x1] }
 0x26f   : > { %6151 = vst [vmem:[#allocation3 + $0x34] sm:$0xf] %v5870_v17  ;;  %6154 = vst [vmem:[#allocation3 + $0x38] sm:$0x1] %v6153_v0  ;;  %v5852_v60 = vor.u32 %v5850_v58, %v5849_v59  ;;  %v5854_v38 = vrot.slane %v5849_v59, 4  ;;  %v5892_v49 = vrot.slane %v5890_v50, 7  ;;  %v5658_v43 = vadd.f32 %v15731_v35, %v5621_v10  ;;  %v12738_v53 = vpop.f32.mrf.mxu0 }
 0x270   : > { %v5873_v34 = vshrl.u32 %v11863_v31, 16  ;;  %v5876_v18 = vshll.u32 %v11863_v31, 16  ;;  %v5898_v41 = vshrl.u32 %v11866_v2, 16  ;;  %v5901_v20 = vshll.u32 %v11866_v2, 16  ;;  %v6241_v2 = vld [vmem:[#allocation3 + $0xc] sm:$0xf] }
 0x271   : > { %v5881_v30 = vshrl.u32 %v11864_v12, 16  ;;  %v5853_v22 = vsel %vm13716_vm9, %v5845_v56, %v5852_v60  ;;  %v6146_v52 = vsel %vm15323_vm15, %v5854_v38, %v6145_v40  ;;  %v5895_v24 = vor.u32 %v5893_v55, %v5892_v49 }
 0x272   : > { %v5896_v1 = vrot.slane %v5892_v49, 4  ;;  %6144 = vst [vmem:[#allocation3 + $0x28] sm:$0xf] %v5853_v22  ;;  %6147 = vst [vmem:[#allocation3 + $0x2c] sm:$0x1] %v6146_v52  ;;  %v5875_v14 = vrot.slane %v5873_v34, 7  ;;  %v5619_v56 = vadd.f32 %v5528_v32, %v15749_v11  ;;  %v5622_v4 = vadd.f32 %v12735_v7, %v15753_v26  ;;  %v15883_v49 = vpop.f32.mrf.mxu0 }
 0x273   : > { %v5900_v62 = vrot.slane %v5898_v41, 7  ;;  %v5883_v3 = vrot.slane %v5881_v30, 7  ;;  %v5884_v39 = vshll.u32 %v11864_v12, 16  ;;  %v6163_v58 = vsel %vm15822_vm3, %v5895_v24, %v6162_v8  ;;  %v6176_v24 = vld [vmem:[#allocation3 + $0x60] sm:$0xf] }
 0x274   : > { %6164 = vst [vmem:[#allocation3 + $0x48] sm:$0xf] %v6163_v58  ;;  %v5878_v57 = vor.u32 %v5876_v18, %v5875_v14  ;;  %v5879_v59 = vrot.slane %v5875_v14, 4  ;;  %v5690_v0 = vmax.f32 %v5658_v43, 0.0  ;;  %v5656_v40 = vadd.f32 %v15731_v35, %v5619_v56 }
 0x275   : > { %v5903_v50 = vor.u32 %v5901_v20, %v5900_v62  ;;  %v5905_v55 = vrot.slane %v5900_v62, 4  ;;  %v5886_v31 = vor.u32 %v5884_v39, %v5883_v3  ;;  %v5888_v17 = vrot.slane %v5883_v3, 4  ;;  %v15889_v62 = vld [vmem:[#allocation3 + $0x10] sm:$0xf] }
 0x276   : > { %v6156_v12 = vsel %vm15822_vm3, %v5878_v57, %v6155_v37  ;;  %v5659_v32 = vadd.f32 %v15731_v35, %v5622_v4  ;;  %v11869_v60 = vpack.c.bf16 %v5690_v0, %v5690_v0  ;;  %v5688_v38 = vmax.f32 %v5656_v40, 0.0 }
 0x277   : > { %v5904_v11 = vsel %vm13716_vm9, %v5896_v1, %v5903_v50  ;;  %v6167_v26 = vsel %vm15323_vm15, %v5905_v55, %v6166_v16  ;;  %6157 = vst [vmem:[#allocation3 + $0x3c] sm:$0xf] %v6156_v12  ;;  %v5887_v10 = vsel %vm13716_vm9, %v5879_v59, %v5886_v31  ;;  %v6160_v7 = vsel %vm15323_vm15, %v5888_v17, %v6159_v51  ;;  %v12739_v16 = vpop.f32.mrf.mxu0  ;;  %v6169_v55 = vld [vmem:[#allocation3 + $0x54] sm:$0xf]  ;;  %v13391_v12 = vld [vmem:[#allocation5 + $0x330] sm:$0xff]  }
 0x278   : > { %6165 = vst [vmem:[#allocation3 + $0x4c] sm:$0xf] %v5904_v11  ;;  %6168 = vst [vmem:[#allocation3 + $0x50] sm:$0x1] %v6167_v26  ;;  %v5691_v8 = vmax.f32 %v5659_v32, 0.0  ;;  %v5620_v34 = vadd.f32 %v5531_v6, %v15756_v23  ;;  %v5625_v18 = vadd.f32 %v12738_v53, %v15761_v5  ;;  %v6329_v41 = vshrl.u32 %v6241_v2, 16 }
 0x279   : > { %6158 = vst [vmem:[#allocation3 + $0x40] sm:$0xf] %v5887_v10  ;;  %6161 = vst [vmem:[#allocation3 + $0x44] sm:$0x1] %v6160_v7  ;;  %v5924_v20 = vshrl.u32 %v11869_v60, 16  ;;  %v5927_v30 = vshll.u32 %v11869_v60, 16  ;;  %v11867_v22 = vpack.c.bf16 %v5688_v38, %v5688_v38  ;;  %v11609_v40 = vcombine.low %v6241_v2, %v15889_v62  ;;  %v5547_v60 = vpop.f32.mrf.mxu0 }
 0x27a   : > { %v6332_v52 = vshll.u32 %v6241_v2, 16  ;;  %v11870_v1 = vpack.c.bf16 %v5691_v8, %v5691_v8  ;;  %v5657_v14 = vadd.f32 %v15731_v35, %v5620_v34  ;;  %v5662_v37 = vadd.f32 %v15731_v35, %v5625_v18  ;;  %v6243_v5 = vld [vmem:[#allocation3 + $0x18] sm:$0xf]  ;;  %v6180_v10 = vld [vmem:[#allocation3 + $0x68] sm:$0x1] }
 0x27b   : > { %v15891_v3 = vrot.slane %v6329_v41, 4  ;;  %v5926_v39 = vrot.slane %v5924_v20, 7  ;;  %v5907_v58 = vshrl.u32 %v11867_v22, 16  ;;  %v5910_v23 = vshll.u32 %v11867_v22, 16  ;;  %12817 = vmatmul.mubr.bf16.vlgmr.msra.gmra.mxu0 %v11609_v40  ;;  %v15899_v41 = vld [vmem:[#allocation3 + $0x1c] sm:$0xf] }
 0x27c   : > { %v15893_v6 = vrot.slane %v6332_v52, 5  ;;  %v5932_v51 = vshrl.u32 %v11870_v1, 16  ;;  %v5935_v43 = vshll.u32 %v11870_v1, 16  ;;  %v5689_v56 = vmax.f32 %v5657_v14, 0.0  ;;  %v6173_v20 = vld [vmem:[#allocation3 + $0x5c] sm:$0x1]  ;;  %12897 = vmatpush3.bf16.msra.mxu0 %v15717_v13 }
 0x27d   : > { %v5694_v4 = vmax.f32 %v5662_v37, 0.0  ;;  %v5929_v53 = vor.u32 %v5927_v30, %v5926_v39  ;;  %v5930_v57 = vrot.slane %v5926_v39, 4  ;;  %v5909_v59 = vrot.slane %v5907_v58, 7  ;;  %12898 = vmatprep.subr.bf16.mxu0 %v13391_v12  ;;  %v15923_v40 = vld [vmem:[#allocation3 + $0x28] sm:$0xf] }
 0x27e   : > { %v6342_v50 = vshrl.u32 %v15889_v62, 16  ;;  %v5934_v31 = vrot.slane %v5932_v51, 7  ;;  %v11868_v17 = vpack.c.bf16 %v5689_v56, %v5689_v56  ;;  %v6353_v7 = vshrl.u32 %v6243_v5, 16  ;;  %v12742_v56 = vpop.f32.mrf.mxu0 }
 0x27f   : > { %v11873_v0 = vpack.c.bf16 %v5694_v4, %v5694_v4  ;;  %v6177_v11 = vsel %vm15822_vm3, %v5929_v53, %v6176_v24  ;;  %v5912_v26 = vor.u32 %v5910_v23, %v5909_v59  ;;  %v5913_v32 = vrot.slane %v5909_v59, 4  ;;  %v13393_v24 = vld [vmem:[#allocation5 + $0x328] sm:$0xff]   ;;  %v6190_v23 = vld [vmem:[#allocation3 + $0x78] sm:$0xf] }
 0x280   : > { %6178 = vst [vmem:[#allocation3 + $0x60] sm:$0xf] %v6177_v11  ;;  %v5937_v38 = vor.u32 %v5935_v43, %v5934_v31  ;;  %v5939_v8 = vrot.slane %v5934_v31, 4  ;;  %v5915_v34 = vshrl.u32 %v11868_v17, 16  ;;  %v5918_v18 = vshll.u32 %v11868_v17, 16  ;;  %12899 = vmatpush3.bf16.msra.mxu0 %v13391_v12  ;;  %v13396_v11 = vld [vmem:[#allocation5 + $0x320] sm:$0xff]  }
 0x281   : > { %v6170_v2 = vsel %vm15822_vm3, %v5912_v26, %v6169_v55  ;;  %v5958_v30 = vshrl.u32 %v11873_v0, 16  ;;  %v5961_v22 = vshll.u32 %v11873_v0, 16  ;;  %v15903_v52 = vrot.slane %v6353_v7, 4  ;;  %v6245_v4 = vld [vmem:[#allocation3 + $0x24] sm:$0xf]  ;;  %12900 = vmatprep.subr.bf16.mxu0 %v13393_v24 }
 0x282   : > { %6171 = vst [vmem:[#allocation3 + $0x54] sm:$0xf] %v6170_v2  ;;  %v5938_v1 = vsel %vm13716_vm9, %v5930_v57, %v5937_v38  ;;  %v6181_v14 = vsel %vm15323_vm15, %v5939_v8, %v6180_v10  ;;  %v5917_v37 = vrot.slane %v5915_v34, 7  ;;  %v6356_v39 = vshll.u32 %v6243_v5, 16  ;;  %v15939_v2 = vpop.f32.mrf.mxu0 }
 0x283   : > { %6179 = vst [vmem:[#allocation3 + $0x64] sm:$0xf] %v5938_v1  ;;  %6182 = vst [vmem:[#allocation3 + $0x68] sm:$0x1] %v6181_v14  ;;  %v15910_v58 = vrot.slane %v5958_v30, 7  ;;  %v6366_v51 = vshrl.u32 %v15899_v41, 16  ;;  %v11610_v13 = vcombine.low %v6243_v5, %v15899_v41  ;;  %v5623_v43 = vadd.f32 %v15883_v49, %v15765_v19 }
 0x284   : > { %v5920_v53 = vor.u32 %v5918_v18, %v5917_v37  ;;  %v5922_v57 = vrot.slane %v5917_v37, 4  ;;  %v15916_v59 = vrot.slane %v6356_v39, 5  ;;  %v5626_v55 = vadd.f32 %v12739_v16, %v15770_v63  ;;  %12901 = vmatpush3.bf16.msra.mxu0 %v13393_v24  ;;  %v13398_v14 = vld [vmem:[#allocation5 + $0x318] sm:$0xff]  }
 0x285   : > { %v5963_v31 = vor.u32 %v5961_v22, %v15910_v58  ;;  %v5964_v17 = vrot.slane %v15910_v58, 4  ;;  %12820 = vmatprep.mubr.bf16.mxu0 %v11610_v13  ;;  %v5660_v0 = vadd.f32 %v15731_v35, %v5623_v43  ;;  %v5624_v5 = vadd.f32 %v5547_v60, %v15773_v44  ;;  %12902 = vmatprep.subr.bf16.mxu0 %v13396_v11  ;;  %v6183_v43 = vld [vmem:[#allocation3 + $0x6c] sm:$0xf] }
 0x286   : > { %v5921_v19 = vsel %vm13716_vm9, %v5913_v32, %v5920_v53  ;;  %v6174_v49 = vsel %vm15323_vm15, %v5922_v57, %v6173_v20  ;;  %v5663_v63 = vadd.f32 %v15731_v35, %v5626_v55  ;;  %v5629_v16 = vadd.f32 %v12742_v56, %v15777_v42  ;;  %v6194_v55 = vld [vmem:[#allocation3 + $0x80] sm:$0x1] }
 0x287   : > { %6172 = vst [vmem:[#allocation3 + $0x58] sm:$0xf] %v5921_v19  ;;  %6175 = vst [vmem:[#allocation3 + $0x5c] sm:$0x1] %v6174_v49  ;;  %v6191_v44 = vsel %vm15822_vm3, %v5963_v31, %v6190_v23  ;;  %v5692_v26 = vmax.f32 %v5660_v0, 0.0  ;;  %v5661_v12 = vadd.f32 %v15731_v35, %v5624_v5  ;;  %v6377_v10 = vshrl.u32 %v6245_v4, 16  ;;  %v15946_v19 = vpop.f32.mrf.mxu0 }
 0x288   : > { %6192 = vst [vmem:[#allocation3 + $0x78] sm:$0xf] %v6191_v44  ;;  %v5695_v32 = vmax.f32 %v5663_v63, 0.0  ;;  %v5666_v7 = vadd.f32 %v15731_v35, %v5629_v16  ;;  %v6380_v60 = vshll.u32 %v6245_v4, 16  ;;  %v6390_v38 = vshrl.u32 %v15923_v40, 16  ;;  %12903 = vmatpush3.bf16.msra.mxu0 %v13396_v11 }
 0x289   : > { %v11871_v8 = vpack.c.bf16 %v5692_v26, %v5692_v26  ;;  %v5693_v42 = vmax.f32 %v5661_v12, 0.0  ;;  %v15936_v34 = vrot.slane %v6377_v10, 4  ;;  %v11611_v18 = vcombine.low %v6245_v4, %v15923_v40  ;;  %v6289_v16 = vld [vmem:[#allocation3 + $0x14] sm:$0x1]  ;;  %12904 = vmatprep.subr.bf16.mxu0 %v13398_v14 }
 0x28a   : > { %v11874_v20 = vpack.c.bf16 %v5695_v32, %v5695_v32  ;;  %v5698_v30 = vmax.f32 %v5666_v7, 0.0  ;;  %v15941_v22 = vrot.slane %v6380_v60, 5  ;;  %v6335_v1 = vor.u32 %v15893_v6, %v15891_v3  ;;  %v13401_v3 = vld [vmem:[#allocation5 + $0x310] sm:$0xff]   ;;  %v6187_v32 = vld [vmem:[#allocation3 + $0x74] sm:$0x1] }
 0x28b   : > { %v5941_v37 = vshrl.u32 %v11871_v8, 16  ;;  %v5944_v39 = vshll.u32 %v11871_v8, 16  ;;  %v11872_v23 = vpack.c.bf16 %v5693_v42, %v5693_v42  ;;  %12821 = vmatmul.mubr.bf16.gmra.mxu0 %v11611_v18  ;;  %v6338_v13 = vshll.u32 %v15889_v62, 16  ;;  %v6204_v7 = vld [vmem:[#allocation3 + $0x90] sm:$0xf] }
 0x28c   : > { %v5966_v56 = vshrl.u32 %v11874_v20, 16  ;;  %v5969_v4 = vshll.u32 %v11874_v20, 16  ;;  %v11877_v53 = vpack.c.bf16 %v5698_v30, %v5698_v30  ;;  %v6336_v24 = vrot.slane %v6335_v1, 4  ;;  %v6247_v30 = vld [vmem:[#allocation3 + $0x30] sm:$0xf]  ;;  %12905 = vmatpush3.bf16.msra.mxu0 %v13398_v14 }
 0x28d   : > { %v5943_v57 = vrot.slane %v5941_v37, 7  ;;  %v5949_v31 = vshrl.u32 %v11872_v23, 16  ;;  %v5952_v0 = vshll.u32 %v11872_v23, 16  ;;  %v6340_v5 = vrot.slane %v6338_v13, 5  ;;  %v5563_v23 = vpop.f32.mrf.mxu0  ;;  %12906 = vmatprep.subr.bf16.mxu0 %v13401_v3 }
 0x28e   : > { %v5968_v6 = vrot.slane %v5966_v56, 7  ;;  %v5992_v49 = vshrl.u32 %v11877_v53, 16  ;;  %v5995_v63 = vshll.u32 %v11877_v53, 16  ;;  %v6344_v44 = vrot.slane %v6342_v50, 4  ;;  %v13403_v53 = vld [vmem:[#allocation5 + $0x308] sm:$0xff]  }
 0x28f   : > { %v5946_v26 = vor.u32 %v5944_v39, %v5943_v57  ;;  %v5947_v12 = vrot.slane %v5943_v57, 4  ;;  %v5951_v10 = vrot.slane %v5949_v31, 7  ;;  %v6341_v8 = vsel %vm13704_vm7, %v6336_v24, %v6340_v5  ;;  %v15956_v39 = vld [vmem:[#allocation3 + $0x34] sm:$0xf] }
 0x290   : > { %v5971_v42 = vor.u32 %v5969_v4, %v5968_v6  ;;  %v5973_v18 = vrot.slane %v5968_v6, 4  ;;  %v15952_v11 = vrot.slane %v5992_v49, 7  ;;  %v6345_v20 = vor.u32 %v6344_v44, %v6340_v5  ;;  %v12746_v44 = vpop.f32.mrf.mxu0  ;;  %12907 = vmatpush3.bf16.msra.mxu0 %v13401_v3 }
 0x291   : > { %v6184_v1 = vsel %vm15822_vm3, %v5946_v26, %v6183_v43  ;;  %v5954_v62 = vor.u32 %v5952_v0, %v5951_v10  ;;  %v5956_v50 = vrot.slane %v5951_v10, 4  ;;  %v6348_v37 = vshll.u32 %v6289_v16, 16  ;;  %v6249_v26 = vld [vmem:[#allocation3 + $0x3c] sm:$0xf]  ;;  %12908 = vmatprep.subr.bf16.mxu0 %v13403_v53 }
 0x292   : > { %6185 = vst [vmem:[#allocation3 + $0x6c] sm:$0xf] %v6184_v1  ;;  %v5972_v13 = vsel %vm13716_vm9, %v5964_v17, %v5971_v42  ;;  %v6195_v56 = vsel %vm15323_vm15, %v5973_v18, %v6194_v55  ;;  %v5997_v4 = vor.u32 %v5995_v63, %v15952_v11  ;;  %v5998_v43 = vrot.slane %v15952_v11, 4  ;;  %v6290_v17 = vld [vmem:[#allocation3 + $0x20] sm:$0x1]  ;;  %v13383_v42 = vld [vmem:[#allocation5 + $0x2f0] sm:$0xff]  }
 0x293   : > { %6193 = vst [vmem:[#allocation3 + $0x7c] sm:$0xf] %v5972_v13  ;;  %6196 = vst [vmem:[#allocation3 + $0x80] sm:$0x1] %v6195_v56  ;;  %v5955_v14 = vsel %vm13716_vm9, %v5947_v12, %v5954_v62  ;;  %v6188_v58 = vsel %vm15323_vm15, %v5956_v50, %v6187_v32  ;;  %v6346_v24 = vrot.slane %v6345_v20, 4  ;;  %v6350_v57 = vrot.slane %v6348_v37, 5 }
 0x294   : > { %6186 = vst [vmem:[#allocation3 + $0x70] sm:$0xf] %v5955_v14  ;;  %6189 = vst [vmem:[#allocation3 + $0x74] sm:$0x1] %v6188_v58  ;;  %v6205_v55 = vsel %vm15822_vm3, %v5997_v4, %v6204_v7  ;;  %v6401_v31 = vshrl.u32 %v6247_v30, 16  ;;  %v6404_v0 = vshll.u32 %v6247_v30, 16  ;;  %v11612_v49 = vcombine.low %v6247_v30, %v15956_v39  ;;  %12909 = vmatpush3.bf16.msra.mxu0 %v13403_v53 }
 0x295   : > { %v6414_v5 = vshrl.u32 %v15956_v39, 16  ;;  %6206 = vst [vmem:[#allocation3 + $0x90] sm:$0xf] %v6205_v55  ;;  %v6351_v6 = vsel %vm13704_vm7, %v6346_v24, %v6350_v57  ;;  %v5627_v63 = vadd.f32 %v15939_v2, %v15782_v33  ;;  %v6359_v16 = vor.u32 %v15916_v59, %v15903_v52  ;;  %v13406_v59 = vld [vmem:[#allocation5 + $0x300] sm:$0xff]   ;;  %v13494_v50 = vld [vmem:[#allocation5 + $0x2f8] sm:$0xff]  }
 0x296   : > { %v11585_v12 = vcombine.low %v6341_v8, %v6351_v6  ;;  %v15980_v10 = vrot.slane %v6401_v31, 4  ;;  %v15982_v32 = vrot.slane %v6404_v0, 5  ;;  %v6362_v7 = vshll.u32 %v15899_v41, 16  ;;  %12824 = vmatprep.mubr.bf16.mxu0 %v11612_v49  ;;  %v15992_v37 = vld [vmem:[#allocation3 + $0x40] sm:$0xf]  ;;  %12910 = vmatprep.subr.bf16.mxu0 %v13406_v59  ;;  %v16003_v58 = vld [vmem:[#allocation5 + $0x3b8] sm:$0xff]   ;;  %v16007_v49 = vpop.f32.mrf.mxu0 }
 0x297   : > { %v5664_v18 = vadd.f32 %v15731_v35, %v5627_v63  ;;  %v6360_v20 = vrot.slane %v6359_v16, 4  ;;  %v6368_v33 = vrot.slane %v6366_v51, 4  ;;  %v6372_v52 = vshll.u32 %v6290_v17, 16 }
 0x298   : > { %12769 = vmatmul.mubr.bf16.vlgmr.msra.gmra.mxu1 %v11585_v12  ;;  %v6364_v2 = vrot.slane %v6362_v7, 5  ;;  %v5630_v3 = vadd.f32 %v15946_v19, %v15787_v61  ;;  %v5628_v8 = vadd.f32 %v5563_v23, %v15790_v21  ;;  %v5633_v30 = vadd.f32 %v12746_v44, %v15794_v9  ;;  %v13386_v21 = vld [vmem:[#allocation5 + $0x2e8] sm:$0xff]   ;;  %12911 = vmatpush3.bf16.msra.mxu0 %v13406_v59  ;;  %v13390_v12 = vld [vmem:[#allocation5 + $0x2e0] sm:$0xff]  }
 0x299   : > { %v5696_v1 = vmax.f32 %v5664_v18, 0.0  ;;  %v6374_v62 = vrot.slane %v6372_v52, 5  ;;  %12849 = vmatpush3.bf16.msra.mxu1 %v13494_v50  ;;  %v6425_v13 = vshrl.u32 %v6249_v26, 16  ;;  %v6428_v41 = vshll.u32 %v6249_v26, 16  ;;  %v6197_v18 = vld [vmem:[#allocation3 + $0x84] sm:$0xf]  ;;  %12992 = vmatprep.subr.bf16.mxu0 %v16003_v58 }
 0x29a   : > { %v6365_v51 = vsel %vm13704_vm7, %v6360_v20, %v6364_v2  ;;  %v6369_v56 = vor.u32 %v6368_v33, %v6364_v2  ;;  %v5667_v4 = vadd.f32 %v15731_v35, %v5630_v3  ;;  %v5665_v61 = vadd.f32 %v15731_v35, %v5628_v8  ;;  %12850 = vmatprep.subr.bf16.mxu1 %v13383_v42  ;;  %v16015_v3 = vld [vmem:[#allocation3 + $0x2c] sm:$0x1] }
 0x29b   : > { %v11875_v9 = vpack.c.bf16 %v5696_v1, %v5696_v1  ;;  %v5670_v19 = vadd.f32 %v15731_v35, %v5633_v30  ;;  %v15999_v23 = vrot.slane %v6425_v13, 4  ;;  %v16001_v14 = vrot.slane %v6428_v41, 5 }
 0x29c   : > { %v6370_v53 = vrot.slane %v6369_v56, 4  ;;  %v5699_v24 = vmax.f32 %v5667_v4, 0.0  ;;  %v5697_v57 = vmax.f32 %v5665_v61, 0.0  ;;  %v6438_v17 = vshrl.u32 %v15992_v37, 16  ;;  %v13395_v56 = vld [vmem:[#allocation5 + $0x2d8] sm:$0xff]  }
 0x29d   : > { %v5975_v55 = vshrl.u32 %v11875_v9, 16  ;;  %v5978_v31 = vshll.u32 %v11875_v9, 16  ;;  %v5702_v0 = vmax.f32 %v5670_v19, 0.0  ;;  %v11613_v6 = vcombine.low %v6249_v26, %v15992_v37  ;;  %12851 = vmatpush3.bf16.msra.mxu1 %v13383_v42  ;;  %v6201_v61 = vld [vmem:[#allocation3 + $0x8c] sm:$0x1] }
 0x29e   : > { %v6375_v35 = vsel %vm13704_vm7, %v6370_v53, %v6374_v62  ;;  %v11878_v63 = vpack.c.bf16 %v5699_v24, %v5699_v24  ;;  %v11876_v16 = vpack.c.bf16 %v5697_v57, %v5697_v57  ;;  %v6383_v44 = vor.u32 %v15941_v22, %v15936_v34  ;;  %12852 = vmatprep.subr.bf16.mxu1 %v13386_v21  ;;  %v6208_v34 = vld [vmem:[#allocation3 + $0x98] sm:$0x1]  ;;  %v16017_v62 = vpop.f32.mrf.mxu0  ;;  %v6263_v46 = vld [vmem:[#allocation3 + $0x90] sm:$0xf] }
 0x29f   : > { %v5977_v7 = vrot.slane %v5975_v55, 7  ;;  %v11586_v20 = vcombine.low %v6365_v51, %v6375_v35  ;;  %v11881_v33 = vpack.c.bf16 %v5702_v0, %v5702_v0  ;;  %12825 = vmatmul.mubr.bf16.gmra.mxu0 %v11613_v6  ;;  %v6386_v26 = vshll.u32 %v15923_v40, 16  ;;  %v6251_v0 = vld [vmem:[#allocation3 + $0x48] sm:$0xf] }
 0x2a0   : > { %v6000_v42 = vshrl.u32 %v11878_v63, 16  ;;  %v6003_v52 = vshll.u32 %v11878_v63, 16  ;;  %v5983_v59 = vshrl.u32 %v11876_v16, 16  ;;  %v5986_v2 = vshll.u32 %v11876_v16, 16  ;;  %v5579_v40 = vpop.f32.mrf.mxu0 }
 0x2a1   : > { %v5980_v8 = vor.u32 %v5978_v31, %v5977_v7  ;;  %v5981_v30 = vrot.slane %v5977_v7, 4  ;;  %12772 = vmatprep.mubr.bf16.mxu1 %v11586_v20  ;;  %v6026_v22 = vshrl.u32 %v11881_v33, 16  ;;  %v6029_v1 = vshll.u32 %v11881_v33, 16  ;;  %12853 = vmatpush3.bf16.msra.mxu1 %v13386_v21  ;;  %v6218_v31 = vld [vmem:[#allocation3 + $0xa8] sm:$0xf] }
 0x2a2   : > { %v6002_v50 = vrot.slane %v6000_v42, 7  ;;  %v5985_v13 = vrot.slane %v5983_v59, 7  ;;  %v6384_v41 = vrot.slane %v6383_v44, 4  ;;  %v6388_v51 = vrot.slane %v6386_v26, 5  ;;  %12854 = vmatprep.subr.bf16.mxu1 %v13390_v12  ;;  %v16030_v44 = vld [vmem:[#allocation3 + $0x4c] sm:$0xf] }
 0x2a3   : > { %v6198_v4 = vsel %vm15822_vm3, %v5980_v8, %v6197_v18  ;;  %v16021_v9 = vrot.slane %v6026_v22, 7  ;;  %v6392_v19 = vrot.slane %v6390_v38, 4  ;;  %v6396_v53 = vshll.u32 %v16015_v3, 16  ;;  %v13400_v33 = vld [vmem:[#allocation5 + $0x2d0] sm:$0xff]   ;;  %v16048_v8 = vld [vmem:[#allocation3 + $0x38] sm:$0x1] }
 0x2a4   : > { %6199 = vst [vmem:[#allocation3 + $0x84] sm:$0xf] %v6198_v4  ;;  %v6005_v24 = vor.u32 %v6003_v52, %v6002_v50  ;;  %v6007_v21 = vrot.slane %v6002_v50, 4  ;;  %v5988_v57 = vor.u32 %v5986_v2, %v5985_v13  ;;  %v5990_v55 = vrot.slane %v5985_v13, 4  ;;  %v12750_v50 = vpop.f32.mrf.mxu0  ;;  %v6253_v13 = vld [vmem:[#allocation3 + $0x54] sm:$0xf] }
 0x2a5   : > { %v6031_v6 = vor.u32 %v6029_v1, %v16021_v9  ;;  %v6032_v35 = vrot.slane %v16021_v9, 4  ;;  %v6389_v63 = vsel %vm13704_vm7, %v6384_v41, %v6388_v51  ;;  %v6393_v16 = vor.u32 %v6392_v19, %v6388_v51  ;;  %12855 = vmatpush3.bf16.msra.mxu1 %v13390_v12 }
 0x2a6   : > { %v6006_v38 = vsel %vm13716_vm9, %v5998_v43, %v6005_v24  ;;  %v6209_v7 = vsel %vm15323_vm15, %v6007_v21, %v6208_v34  ;;  %v5989_v18 = vsel %vm13716_vm9, %v5981_v30, %v5988_v57  ;;  %v6202_v20 = vsel %vm15323_vm15, %v5990_v55, %v6201_v61  ;;  %12856 = vmatprep.subr.bf16.mxu1 %v13395_v56  ;;  %v16072_v57 = vld [vmem:[#allocation3 + $0x58] sm:$0xf] }
 0x2a7   : > { %6207 = vst [vmem:[#allocation3 + $0x94] sm:$0xf] %v6006_v38  ;;  %6210 = vst [vmem:[#allocation3 + $0x98] sm:$0x1] %v6209_v7  ;;  %v6219_v11 = vsel %vm15822_vm3, %v6031_v6, %v6218_v31  ;;  %v6394_v12 = vrot.slane %v6393_v16, 4  ;;  %v6398_v43 = vrot.slane %v6396_v53, 5  ;;  %v11614_v59 = vcombine.low %v6251_v0, %v16030_v44 }
 0x2a8   : > { %6200 = vst [vmem:[#allocation3 + $0x88] sm:$0xf] %v5989_v18  ;;  %6203 = vst [vmem:[#allocation3 + $0x8c] sm:$0x1] %v6202_v20  ;;  %v6449_v26 = vshrl.u32 %v6251_v0, 16  ;;  %v6452_v42 = vshll.u32 %v6251_v0, 16  ;;  %v5631_v2 = vadd.f32 %v16007_v49, %v15798_v54  ;;  %v6407_v22 = vor.u32 %v15982_v32, %v15980_v10 }
 0x2a9   : > { %6220 = vst [vmem:[#allocation3 + $0xa8] sm:$0xf] %v6219_v11  ;;  %v6462_v52 = vshrl.u32 %v16030_v44, 16  ;;  %v6399_v30 = vsel %vm13704_vm7, %v6394_v12, %v6398_v43  ;;  %v6410_v1 = vshll.u32 %v15956_v39, 16  ;;  %12857 = vmatpush3.bf16.msra.mxu1 %v13395_v56  ;;  %12828 = vmatprep.mubr.bf16.mxu0 %v11614_v59  ;;  %v16062_v54 = vld [vmem:[%s18166_s2] ss:$0 sm:$0xff]  ;;  %v5634_v19 = vadd.f32 %v16017_v62, %v15803_v47 }
 0x2aa   : > { %v16052_v34 = vrot.slane %v6449_v26, 4  ;;  %v11587_v41 = vcombine.low %v6389_v63, %v6399_v30  ;;  %v16057_v51 = vrot.slane %v6452_v42, 5  ;;  %v5668_v49 = vadd.f32 %v16062_v54, %v5631_v2  ;;  %12858 = vmatprep.subr.bf16.mxu1 %v13400_v33  ;;  %v13404_v10 = vld [vmem:[#allocation5 + $0x2c8] sm:$0xff]  }
 0x2ab   : > { %v6416_v4 = vrot.slane %v6414_v5, 4  ;;  %v6408_v32 = vrot.slane %v6407_v22, 4  ;;  %v6412_v61 = vrot.slane %v6410_v1, 5  ;;  %v6420_v56 = vshll.u32 %v16048_v8, 16  ;;  %v16087_v22 = vld [vmem:[#allocation5 + $0x378] sm:$0xff]  }
 0x2ac   : > { %12773 = vmatmul.mubr.bf16.gmra.mxu1 %v11587_v41  ;;  %v5700_v53 = vmax.f32 %v5668_v49, 0.0  ;;  %v5632_v24 = vadd.f32 %v5579_v40, %v15806_v25  ;;  %v5637_v21 = vadd.f32 %v12750_v50, %v15809_v36  ;;  %v6473_v55 = vshrl.u32 %v6253_v13, 16  ;;  %v13408_v25 = vld [vmem:[#allocation5 + $0x2c0] sm:$0xff]  }
 0x2ad   : > { %v6413_v39 = vsel %vm13704_vm7, %v6408_v32, %v6412_v61  ;;  %v6417_v5 = vor.u32 %v6416_v4, %v6412_v61  ;;  %v6422_v31 = vrot.slane %v6420_v56, 5  ;;  %v5671_v0 = vadd.f32 %v16062_v54, %v5634_v19  ;;  %12859 = vmatpush3.bf16.msra.mxu1 %v13400_v33  ;;  %v6211_v1 = vld [vmem:[#allocation3 + $0x9c] sm:$0xf]  ;;  %v16092_v56 = vld [vmem:[#allocation3 + $0x44] sm:$0x1]  ;;  %v5592_v19 = vpop.f32.mrf.mxu0 }
 0x2ae   : > { %v11879_v6 = vpack.c.bf16 %v5700_v53, %v5700_v53  ;;  %v5669_v47 = vadd.f32 %v16062_v54, %v5632_v24  ;;  %v5674_v62 = vadd.f32 %v16062_v54, %v5637_v21  ;;  %v16079_v63 = vrot.slane %v6473_v55, 4  ;;  %12860 = vmatprep.subr.bf16.mxu1 %v13404_v10  ;;  %v6222_v24 = vld [vmem:[#allocation3 + $0xb0] sm:$0x1] }
 0x2af   : > { %v6418_v36 = vrot.slane %v6417_v5, 4  ;;  %v5703_v16 = vmax.f32 %v5671_v0, 0.0  ;;  %v6476_v40 = vshll.u32 %v6253_v13, 16  ;;  %v6486_v38 = vshrl.u32 %v16072_v57, 16 }
 0x2b0   : > { %v6009_v7 = vshrl.u32 %v11879_v6, 16  ;;  %v6012_v18 = vshll.u32 %v11879_v6, 16  ;;  %v5701_v20 = vmax.f32 %v5669_v47, 0.0  ;;  %v5706_v11 = vmax.f32 %v5674_v62, 0.0 }
 0x2b1   : > { %v6423_v33 = vsel %vm13704_vm7, %v6418_v36, %v6422_v31  ;;  %v11882_v12 = vpack.c.bf16 %v5703_v16, %v5703_v16  ;;  %v16084_v43 = vrot.slane %v6476_v40, 5  ;;  %v11615_v26 = vcombine.low %v6253_v13, %v16072_v57  ;;  %12861 = vmatpush3.bf16.msra.mxu1 %v13404_v10  ;;  %v6232_v36 = vld [vmem:[#allocation3 + $0xc0] sm:$0xf] }
 0x2b2   : > { %v6011_v42 = vrot.slane %v6009_v7, 7  ;;  %v11588_v59 = vcombine.low %v6413_v39, %v6423_v33  ;;  %v11880_v2 = vpack.c.bf16 %v5701_v20, %v5701_v20  ;;  %v11885_v30 = vpack.c.bf16 %v5706_v11, %v5706_v11  ;;  %12862 = vmatprep.subr.bf16.mxu1 %v13408_v25  ;;  %v6255_v20 = vld [vmem:[#allocation3 + $0x60] sm:$0xf]  ;;  %v16104_v11 = vld [vmem:[#allocation3 + $0x64] sm:$0xf] }
 0x2b3   : > { %v6034_v50 = vshrl.u32 %v11882_v12, 16  ;;  %v6037_v41 = vshll.u32 %v11882_v12, 16  ;;  %12829 = vmatmul.mubr.bf16.gmra.mxu0 %v11615_v26  ;;  %v6431_v49 = vor.u32 %v16001_v14, %v15999_v23  ;;  %v6434_v4 = vshll.u32 %v15992_v37, 16  ;;  %v6215_v14 = vld [vmem:[#allocation3 + $0xa4] sm:$0x1]  ;;  %v12751_v37 = vpop.f32.mrf.mxu0 }
 0x2b4   : > { %v6014_v32 = vor.u32 %v6012_v18, %v6011_v42  ;;  %v6015_v61 = vrot.slane %v6011_v42, 4  ;;  %12776 = vmatprep.mubr.bf16.mxu1 %v11588_v59  ;;  %v6017_v13 = vshrl.u32 %v11880_v2, 16  ;;  %v6020_v10 = vshll.u32 %v11880_v2, 16 }
 0x2b5   : > { %v6036_v53 = vrot.slane %v6034_v50, 7  ;;  %v6060_v21 = vshrl.u32 %v11885_v30, 16  ;;  %v6063_v55 = vshll.u32 %v11885_v30, 16  ;;  %v6432_v39 = vrot.slane %v6431_v49, 4  ;;  %12863 = vmatpush3.bf16.msra.mxu1 %v13408_v25  ;;  %v16118_v30 = vld [vmem:[#allocation3 + $0x50] sm:$0x1] }
 0x2b6   : > { %v6212_v5 = vsel %vm15822_vm3, %v6014_v32, %v6211_v1  ;;  %v6019_v23 = vrot.slane %v6017_v13, 7  ;;  %v6436_v31 = vrot.slane %v6434_v4, 5  ;;  %v6440_v0 = vrot.slane %v6438_v17, 4  ;;  %12944 = vmatprep.subr.bf16.mxu1 %v16087_v22  ;;  %v6257_v49 = vld [vmem:[#allocation3 + $0x6c] sm:$0xf] }
 0x2b7   : > { %6213 = vst [vmem:[#allocation3 + $0x9c] sm:$0xf] %v6212_v5  ;;  %v6039_v6 = vor.u32 %v6037_v41, %v6036_v53  ;;  %v6041_v47 = vrot.slane %v6036_v53, 4  ;;  %v16099_v62 = vrot.slane %v6060_v21, 7  ;;  %v6444_v16 = vshll.u32 %v16092_v56, 16 }
 0x2b8   : > { %v6022_v25 = vor.u32 %v6020_v10, %v6019_v23  ;;  %v6024_v40 = vrot.slane %v6019_v23, 4  ;;  %v6437_v7 = vsel %vm13704_vm7, %v6432_v39, %v6436_v31  ;;  %v6441_v18 = vor.u32 %v6440_v0, %v6436_v31  ;;  %v5595_v10 = vpop.f32.mrf.mxu0  ;;  %v16129_v53 = vld [vmem:[#allocation3 + $0x70] sm:$0xf] }
 0x2b9   : > { %v6040_v17 = vsel %vm13716_vm9, %v6032_v35, %v6039_v6  ;;  %v6223_v33 = vsel %vm15323_vm15, %v6041_v47, %v6222_v24  ;;  %v6065_v12 = vor.u32 %v6063_v55, %v16099_v62  ;;  %v6066_v26 = vrot.slane %v16099_v62, 4 }
 0x2ba   : > { %6221 = vst [vmem:[#allocation3 + $0xac] sm:$0xf] %v6040_v17  ;;  %6224 = vst [vmem:[#allocation3 + $0xb0] sm:$0x1] %v6223_v33  ;;  %v6023_v42 = vsel %vm13716_vm9, %v6015_v61, %v6022_v25  ;;  %v6216_v59 = vsel %vm15323_vm15, %v6024_v40, %v6215_v14  ;;  %v6442_v2 = vrot.slane %v6441_v18, 4  ;;  %v6446_v9 = vrot.slane %v6444_v16, 5 }
 0x2bb   : > { %6214 = vst [vmem:[#allocation3 + $0xa0] sm:$0xf] %v6023_v42  ;;  %6217 = vst [vmem:[#allocation3 + $0xa4] sm:$0x1] %v6216_v59  ;;  %v6233_v35 = vsel %vm15822_vm3, %v6065_v12, %v6232_v36  ;;  %v6497_v1 = vshrl.u32 %v6255_v20, 16  ;;  %v6500_v50 = vshll.u32 %v6255_v20, 16  ;;  %v11616_v32 = vcombine.low %v6255_v20, %v16104_v11 }
 0x2bc   : > { %v6510_v41 = vshrl.u32 %v16104_v11, 16  ;;  %6234 = vst [vmem:[#allocation3 + $0xc0] sm:$0xf] %v6233_v35  ;;  %v6447_v4 = vsel %vm13704_vm7, %v6442_v2, %v6446_v9  ;;  %v5635_v61 = vadd.f32 %v5592_v19, %v15812_v27  ;;  %v6455_v13 = vor.u32 %v16057_v51, %v16052_v34  ;;  %v16152_v20 = vld [vmem:[#allocation3 + $0x5c] sm:$0x1] }
 0x2bd   : > { %v11589_v24 = vcombine.low %v6437_v7, %v6447_v4  ;;  %v16131_v21 = vrot.slane %v6497_v1, 4  ;;  %v16133_v55 = vrot.slane %v6500_v50, 5  ;;  %v6458_v39 = vshll.u32 %v16030_v44, 16  ;;  %12832 = vmatprep.mubr.bf16.mxu0 %v11616_v32  ;;  %v6225_v9 = vld [vmem:[#allocation3 + $0xb4] sm:$0xf] }
 0x2be   : > { %v5672_v5 = vadd.f32 %v16062_v54, %v5635_v61  ;;  %v6456_v23 = vrot.slane %v6455_v13, 4  ;;  %v6464_v27 = vrot.slane %v6462_v52, 4  ;;  %v6468_v19 = vshll.u32 %v16118_v30, 16 }
 0x2bf   : > { %12777 = vmatmul.mubr.bf16.gmra.mxu1 %v11589_v24  ;;  %v6460_v34 = vrot.slane %v6458_v39, 5  ;;  %v5638_v51 = vadd.f32 %v12751_v37, %v15815_v48  ;;  %v5636_v14 = vadd.f32 %v5595_v10, %v15817_v15  ;;  %v6521_v31 = vshrl.u32 %v6257_v49, 16 }
 0x2c0   : > { %v5704_v0 = vmax.f32 %v5672_v5, 0.0  ;;  %v6470_v6 = vrot.slane %v6468_v19, 5  ;;  %v6524_v47 = vshll.u32 %v6257_v49, 16  ;;  %v6534_v36 = vshrl.u32 %v16129_v53, 16  ;;  %v16162_v5 = vld [vmem:[#allocation3 + $0x7c] sm:$0xf] }
 0x2c1   : > { %v6461_v16 = vsel %vm13704_vm7, %v6456_v23, %v6460_v34  ;;  %v6465_v25 = vor.u32 %v6464_v27, %v6460_v34  ;;  %v5675_v52 = vadd.f32 %v16062_v54, %v5638_v51  ;;  %v5673_v40 = vadd.f32 %v16062_v54, %v5636_v14  ;;  %v6236_v51 = vld [vmem:[#allocation3 + $0xc8] sm:$0x1] }
 0x2c2   : > { %v11883_v7 = vpack.c.bf16 %v5704_v0, %v5704_v0  ;;  %v16147_v18 = vrot.slane %v6521_v31, 4  ;;  %v16149_v48 = vrot.slane %v6524_v47, 5  ;;  %v11617_v15 = vcombine.low %v6257_v49, %v16129_v53  ;;  %v6229_v47 = vld [vmem:[#allocation3 + $0xbc] sm:$0x1] }
 0x2c3   : > { %v6466_v37 = vrot.slane %v6465_v25, 4  ;;  %v5707_v17 = vmax.f32 %v5675_v52, 0.0  ;;  %v5705_v33 = vmax.f32 %v5673_v40, 0.0  ;;  %v6479_v12 = vor.u32 %v16084_v43, %v16079_v63  ;;  %v6259_v43 = vld [vmem:[#allocation3 + $0x78] sm:$0xf] }
 0x2c4   : > { %v6043_v42 = vshrl.u32 %v11883_v7, 16  ;;  %v6046_v59 = vshll.u32 %v11883_v7, 16  ;;  %12833 = vmatmul.mubr.bf16.gmra.mxu0 %v11617_v15  ;;  %v6482_v54 = vshll.u32 %v16072_v57, 16  ;;  %v6488_v2 = vrot.slane %v6486_v38, 4 }
 0x2c5   : > { %v6471_v35 = vsel %vm13704_vm7, %v6466_v37, %v6470_v6  ;;  %v11886_v1 = vpack.c.bf16 %v5707_v17, %v5707_v17  ;;  %v11884_v50 = vpack.c.bf16 %v5705_v33, %v5705_v33  ;;  %v6480_v49 = vrot.slane %v6479_v12, 4  ;;  %v16169_v17 = vld [vmem:[#allocation3 + $0x68] sm:$0x1] }
 0x2c6   : > { %v6045_v4 = vrot.slane %v6043_v42, 7  ;;  %v11590_v32 = vcombine.low %v6461_v16, %v6471_v35  ;;  %v6484_v61 = vrot.slane %v6482_v54, 5  ;;  %v6492_v63 = vshll.u32 %v16152_v20, 16  ;;  %v16174_v54 = vld [vmem:[#allocation3 + $0x88] sm:$0xf] }
 0x2c7   : > { %v6068_v13 = vshrl.u32 %v11886_v1, 16  ;;  %v6071_v10 = vshll.u32 %v11886_v1, 16  ;;  %v6051_v24 = vshrl.u32 %v11884_v50, 16  ;;  %v6054_v39 = vshll.u32 %v11884_v50, 16 }
 0x2c8   : > { %v6048_v38 = vor.u32 %v6046_v59, %v6045_v4  ;;  %v6049_v23 = vrot.slane %v6045_v4, 4  ;;  %12780 = vmatprep.mubr.bf16.mxu1 %v11590_v32  ;;  %v6485_v27 = vsel %vm13704_vm7, %v6480_v49, %v6484_v61  ;;  %v6489_v19 = vor.u32 %v6488_v2, %v6484_v61  ;;  %v6261_v59 = vld [vmem:[#allocation3 + $0x84] sm:$0xf]  ;;  %v16191_v4 = vld [vmem:[#allocation3 + $0x74] sm:$0x1] }
 0x2c9   : > { %v6070_v34 = vrot.slane %v6068_v13, 7  ;;  %v6053_v14 = vrot.slane %v6051_v24, 7  ;;  %v6494_v31 = vrot.slane %v6492_v63, 5  ;;  %v6545_v0 = vshrl.u32 %v6259_v43, 16  ;;  %v16195_v13 = vld [vmem:[#allocation3 + $0x94] sm:$0xf] }
 0x2ca   : > { %v6226_v6 = vsel %vm15822_vm3, %v6048_v38, %v6225_v9  ;;  %v6490_v16 = vrot.slane %v6489_v19, 4  ;;  %v6548_v25 = vshll.u32 %v6259_v43, 16  ;;  %v6558_v52 = vshrl.u32 %v16162_v5, 16 }
 0x2cb   : > { %6227 = vst [vmem:[#allocation3 + $0xb4] sm:$0xf] %v6226_v6  ;;  %v6073_v40 = vor.u32 %v6071_v10, %v6070_v34  ;;  %v6075_v7 = vrot.slane %v6070_v34, 4  ;;  %v6056_v15 = vor.u32 %v6054_v39, %v6053_v14  ;;  %v6058_v37 = vrot.slane %v6053_v14, 4 }
 0x2cc   : > { %v6495_v33 = vsel %vm13704_vm7, %v6490_v16, %v6494_v31  ;;  %v6547_v12 = vrot.slane %v6545_v0, 4  ;;  %v6550_v42 = vrot.slane %v6548_v25, 5  ;;  %v11618_v45 = vcombine.low %v6259_v43, %v16162_v5  ;;  %v16208_v16 = vld [vmem:[#allocation3 + $0x80] sm:$0x1] }
 0x2cd   : > { %v6074_v2 = vsel %vm13716_vm9, %v6066_v26, %v6073_v40  ;;  %v6237_v9 = vsel %vm15323_vm15, %v6075_v7, %v6236_v51  ;;  %v6057_v35 = vsel %vm13716_vm9, %v6049_v23, %v6056_v15  ;;  %v6230_v1 = vsel %vm15323_vm15, %v6058_v37, %v6229_v47 }
 0x2ce   : > { %6235 = vst [vmem:[#allocation3 + $0xc4] sm:$0xf] %v6074_v2  ;;  %6238 = vst [vmem:[#allocation3 + $0xc8] sm:$0x1] %v6237_v9  ;;  %v11591_v50 = vcombine.low %v6485_v27, %v6495_v33  ;;  %12836 = vmatprep.mubr.bf16.mxu0 %v11618_v45  ;;  %v6503_v62 = vor.u32 %v16133_v55, %v16131_v21  ;;  %v6506_v26 = vshll.u32 %v16104_v11, 16  ;;  %v6512_v49 = vrot.slane %v6510_v41, 4 }
 0x2cf   : > { %6228 = vst [vmem:[#allocation3 + $0xb8] sm:$0xf] %v6057_v35  ;;  %6231 = vst [vmem:[#allocation3 + $0xbc] sm:$0x1] %v6230_v1  ;;  %v6516_v32 = vshll.u32 %v16169_v17, 16  ;;  %v6569_v61 = vshrl.u32 %v6261_v59, 16  ;;  %v11619_v21 = vcombine.low %v6261_v59, %v16174_v54  ;;  %v6527_v55 = vor.u32 %v16149_v48, %v16147_v18 }
 0x2d0   : > { %v6572_v63 = vshll.u32 %v6261_v59, 16  ;;  %v6582_v43 = vshrl.u32 %v16174_v54, 16  ;;  %12781 = vmatmul.mubr.bf16.gmra.mxu1 %v11591_v50  ;;  %v6504_v10 = vrot.slane %v6503_v62, 4  ;;  %v6508_v24 = vrot.slane %v6506_v26, 5  ;;  %v16212_v33 = vld [vmem:[#allocation3 + $0xa0] sm:$0xf] }
 0x2d1   : > { %v6518_v41 = vrot.slane %v6516_v32, 5  ;;  %v6571_v39 = vrot.slane %v6569_v61, 4  ;;  %v6530_v23 = vshll.u32 %v16129_v53, 16  ;;  %12837 = vmatmul.mubr.bf16.gmra.mxu0 %v11619_v21  ;;  %v6528_v34 = vrot.slane %v6527_v55, 4 }
 0x2d2   : > { %v6574_v38 = vrot.slane %v6572_v63, 5  ;;  %v6509_v27 = vsel %vm13704_vm7, %v6504_v10, %v6508_v24  ;;  %v6513_v19 = vor.u32 %v6512_v49, %v6508_v24  ;;  %v6536_v51 = vrot.slane %v6534_v36, 4  ;;  %v6265_v36 = vld [vmem:[#allocation3 + $0x9c] sm:$0xf]  ;;  %v16224_v63 = vld [vmem:[#allocation3 + $0x8c] sm:$0x1] }
 0x2d3   : > { %v6532_v14 = vrot.slane %v6530_v23, 5  ;;  %v6540_v31 = vshll.u32 %v16191_v4, 16  ;;  %v6593_v0 = vshrl.u32 %v6263_v46, 16  ;;  %v6596_v6 = vshll.u32 %v6263_v46, 16  ;;  %v6267_v24 = vld [vmem:[#allocation3 + $0xa8] sm:$0xf] }
 0x2d4   : > { %v6514_v18 = vrot.slane %v6513_v19, 4  ;;  %v6606_v48 = vshrl.u32 %v16195_v13, 16  ;;  %v11620_v47 = vcombine.low %v6263_v46, %v16195_v13  ;;  %v6551_v25 = vor.u32 %v6550_v42, %v6547_v12  ;;  %v16228_v23 = vld [vmem:[#allocation3 + $0xac] sm:$0xf] }
 0x2d5   : > { %v6533_v40 = vsel %vm13704_vm7, %v6528_v34, %v6532_v14  ;;  %v6537_v7 = vor.u32 %v6536_v51, %v6532_v14  ;;  %v6542_v15 = vrot.slane %v6540_v31, 5  ;;  %v6595_v37 = vrot.slane %v6593_v0, 4  ;;  %v16231_v14 = vld [vmem:[#allocation3 + $0x98] sm:$0x1] }
 0x2d6   : > { %v6519_v45 = vsel %vm13704_vm7, %v6514_v18, %v6518_v41  ;;  %v6598_v59 = vrot.slane %v6596_v6, 5  ;;  %12840 = vmatprep.mubr.bf16.mxu0 %v11620_v47  ;;  %v6552_v2 = vrot.slane %v6551_v25, 4  ;;  %v6554_v9 = vshll.u32 %v16162_v5, 16  ;;  %v6269_v6 = vld [vmem:[#allocation3 + $0xb4] sm:$0xf] }
 0x2d7   : > { %v11592_v35 = vcombine.low %v6509_v27, %v6519_v45  ;;  %v6538_v1 = vrot.slane %v6537_v7, 4  ;;  %v6560_v12 = vrot.slane %v6558_v52, 4  ;;  %v6564_v42 = vshll.u32 %v16208_v16, 16  ;;  %v16238_v45 = vld [vmem:[#allocation3 + $0xb8] sm:$0xf] }
 0x2d8   : > { %v6556_v50 = vrot.slane %v6554_v9, 5  ;;  %v6617_v62 = vshrl.u32 %v6265_v36, 16  ;;  %v6620_v26 = vshll.u32 %v6265_v36, 16  ;;  %v6630_v49 = vshrl.u32 %v16212_v33, 16 }
 0x2d9   : > { %12784 = vmatprep.mubr.bf16.mxu1 %v11592_v35  ;;  %v6543_v46 = vsel %vm13704_vm7, %v6538_v1, %v6542_v15  ;;  %v6566_v32 = vrot.slane %v6564_v42, 5  ;;  %v11621_v61 = vcombine.low %v6265_v36, %v16212_v33  ;;  %v6575_v10 = vor.u32 %v6574_v38, %v6571_v39 }
 0x2da   : > { %v11593_v21 = vcombine.low %v6533_v40, %v6543_v46  ;;  %v6557_v52 = vsel %vm13704_vm7, %v6552_v2, %v6556_v50  ;;  %v6561_v55 = vor.u32 %v6560_v12, %v6556_v50  ;;  %v6619_v41 = vrot.slane %v6617_v62, 4 }
 0x2db   : > { %v6622_v27 = vrot.slane %v6620_v26, 5  ;;  %12841 = vmatmul.mubr.bf16.gmra.mxu0 %v11621_v61  ;;  %v6576_v19 = vrot.slane %v6575_v10, 4  ;;  %v6578_v34 = vshll.u32 %v16174_v54, 16  ;;  %v6584_v51 = vrot.slane %v6582_v43, 4 }
 0x2dc   : > { %12785 = vmatmul.mubr.bf16.gmra.mxu1 %v11593_v21  ;;  %v6562_v31 = vrot.slane %v6561_v55, 4  ;;  %v6588_v39 = vshll.u32 %v16224_v63, 16  ;;  %v6641_v38 = vshrl.u32 %v6267_v24, 16  ;;  %v6644_v0 = vshll.u32 %v6267_v24, 16 }
 0x2dd   : > { %v6580_v18 = vrot.slane %v6578_v34, 5  ;;  %v6654_v47 = vshrl.u32 %v16228_v23, 16  ;;  %v11622_v25 = vcombine.low %v6267_v24, %v16228_v23  ;;  %v6599_v40 = vor.u32 %v6598_v59, %v6595_v37  ;;  %v16246_v24 = vld [vmem:[#allocation3 + $0xa4] sm:$0x1] }
 0x2de   : > { %v6567_v7 = vsel %vm13704_vm7, %v6562_v31, %v6566_v32  ;;  %v6590_v15 = vrot.slane %v6588_v39, 5  ;;  %v6643_v43 = vrot.slane %v6641_v38, 4  ;;  %v6646_v36 = vrot.slane %v6644_v0, 5 }
 0x2df   : > { %v11594_v2 = vcombine.low %v6557_v52, %v6567_v7  ;;  %v6581_v9 = vsel %vm13704_vm7, %v6576_v19, %v6580_v18  ;;  %v6585_v35 = vor.u32 %v6584_v51, %v6580_v18  ;;  %12844 = vmatprep.mubr.bf16.mxu0 %v11622_v25  ;;  %v6600_v1 = vrot.slane %v6599_v40, 4  ;;  %v13405_v52 = vld [vmem:[#allocation3 + $0xc] sm:$0xff]  }
 0x2e0   : > { %v6602_v12 = vshll.u32 %v16195_v13, 16  ;;  %v6608_v42 = vrot.slane %v6606_v48, 4  ;;  %v6612_v37 = vshll.u32 %v16231_v14, 16  ;;  %v6665_v59 = vshrl.u32 %v6269_v6, 16  ;;  %v16251_v51 = vld [vmem:[#allocation3 + $0xb0] sm:$0x1] }
 0x2e1   : > { %12788 = vmatprep.mubr.bf16.mxu1 %v11594_v2  ;;  %v6586_v50 = vrot.slane %v6585_v35, 4  ;;  %v6668_v62 = vshll.u32 %v6269_v6, 16  ;;  %v6678_v26 = vshrl.u32 %v16238_v45, 16  ;;  %v11623_v46 = vcombine.low %v6269_v6, %v16238_v45 }
 0x2e2   : > { %v6604_v32 = vrot.slane %v6602_v12, 5  ;;  %v6614_v61 = vrot.slane %v6612_v37, 5  ;;  %v6667_v10 = vrot.slane %v6665_v59, 4  ;;  %v6623_v21 = vor.u32 %v6622_v27, %v6619_v41  ;;  %v7283_v12 = vld [vmem:[#allocation3] sm:$0xe] }
 0x2e3   : > { %v6591_v48 = vsel %vm13704_vm7, %v6586_v50, %v6590_v15  ;;  %v6670_v55 = vrot.slane %v6668_v62, 5  ;;  %12845 = vmatmul.mubr.bf16.gmra.mxu0 %v11623_v46  ;;  %v6626_v19 = vshll.u32 %v16212_v33, 16  ;;  %v6632_v34 = vrot.slane %v6630_v49, 4  ;;  %v13407_v62 = vld [vmem:[#allocation3 + $0x18] sm:$0xff]  }
 0x2e4   : > { %v11595_v31 = vcombine.low %v6581_v9, %v6591_v48  ;;  %v6605_v39 = vsel %vm13704_vm7, %v6600_v1, %v6604_v32  ;;  %v6609_v38 = vor.u32 %v6608_v42, %v6604_v32  ;;  %v6624_v0 = vrot.slane %v6623_v21, 4  ;;  %12912 = vmatprep.mubr.bf16.mxu0 %v13405_v52  ;;  %v16260_v1 = vld [vmem:[#allocation3 + $0xbc] sm:$0x1] }
 0x2e5   : > { %v6628_v6 = vrot.slane %v6626_v19, 5  ;;  %v6636_v41 = vshll.u32 %v16246_v24, 16  ;;  %v6647_v27 = vor.u32 %v6646_v36, %v6643_v43  ;;  %v6650_v18 = vshll.u32 %v16228_v23, 16 }
 0x2e6   : > { %12789 = vmatmul.mubr.bf16.gmra.mxu1 %v11595_v31  ;;  %v6610_v25 = vrot.slane %v6609_v38, 4  ;;  %v6656_v40 = vrot.slane %v6654_v47, 4  ;;  %v6660_v49 = vshll.u32 %v16251_v51, 16  ;;  %v6671_v7 = vor.u32 %v6670_v55, %v6667_v10  ;;  %v7284_v47 = vld [vmem:[#allocation3 + $0xc] sm:$0xe]  ;;  %v13409_v55 = vld [vmem:[#allocation3 + $0x24] sm:$0xff]  }
 0x2e7   : > { %v6629_v15 = vsel %vm13704_vm7, %v6624_v0, %v6628_v6  ;;  %v6633_v2 = vor.u32 %v6632_v34, %v6628_v6  ;;  %v6638_v9 = vrot.slane %v6636_v41, 5  ;;  %v6648_v35 = vrot.slane %v6647_v27, 4  ;;  %v13423_v10 = vld [vmem:[#allocation5 + $0x3b0] sm:$0xff]   ;;  %v13496_v31 = vld [vmem:[#allocation3 + $0x4] sm:$0xf] }
 0x2e8   : > { %v6615_v43 = vsel %vm13704_vm7, %v6610_v25, %v6614_v61  ;;  %v6652_v36 = vrot.slane %v6650_v18, 5  ;;  %v6662_v42 = vrot.slane %v6660_v49, 5  ;;  %v16264_v37 = vrot.slane %v6671_v7, 4  ;;  %v13497_v38 = vld [vmem:[#allocation3 + $0x8] sm:$0x1] }
 0x2e9   : > { %v11596_v59 = vcombine.low %v6605_v39, %v6615_v43  ;;  %v6634_v50 = vrot.slane %v6633_v2, 4  ;;  %v6674_v46 = vshll.u32 %v16238_v45, 16  ;;  %v6680_v32 = vrot.slane %v6678_v26, 4  ;;  %v7285_v26 = vld [vmem:[#allocation3 + $0x18] sm:$0xe] }
 0x2ea   : > { %v6653_v21 = vsel %vm13704_vm7, %v6648_v35, %v6652_v36  ;;  %v6657_v52 = vor.u32 %v6656_v40, %v6652_v36  ;;  %v6684_v48 = vshll.u32 %v16260_v1, 16  ;;  %v11632_v61 = vrot.slane %v7283_v12, 9  ;;  %v13498_v35 = vld [vmem:[#allocation3 + $0x10] sm:$0xf]  ;;  %v13499_v43 = vld [vmem:[#allocation3 + $0x14] sm:$0x1] }
 0x2eb   : > { %12792 = vmatprep.mubr.bf16.mxu1 %v11596_v59  ;;  %v6639_v19 = vsel %vm13704_vm7, %v6634_v50, %v6638_v9  ;;  %12913 = vmatmul.mubr.bf16.vlgmr.msra.gmra.mxu0 %v13407_v62  ;;  %v6676_v34 = vrot.slane %v6674_v46, 5  ;;  %v7333_v39 = vrot.slane %v13496_v31, 5  ;;  %v7336_v0 = vrot.slane %v13497_v38, 5  ;;  %v13425_v9 = vld [vmem:[#allocation5 + $0x3a8] sm:$0xff]   ;;  %v13500_v62 = vld [vmem:[#allocation3 + $0x1c] sm:$0xf] }
 0x2ec   : > { %v11597_v6 = vcombine.low %v6629_v15, %v6639_v19  ;;  %v6658_v41 = vrot.slane %v6657_v52, 4  ;;  %v6686_v27 = vrot.slane %v6684_v48, 5  ;;  %12916 = vmatprep.mubr.bf16.mxu0 %v13409_v55  ;;  %v11633_v18 = vrot.slane %v7284_v47, 9  ;;  %12993 = vmatpush3.bf16.msra.mxu0 %v16003_v58  ;;  %v7286_v47 = vld [vmem:[#allocation3 + $0x24] sm:$0xe]  ;;  %v13410_v19 = vld [vmem:[#allocation3 + $0x30] sm:$0xff]  }
 0x2ed   : > { %v6677_v25 = vsel %vm13704_vm7, %v16264_v37, %v6676_v34  ;;  %v6681_v40 = vor.u32 %v6680_v32, %v6676_v34  ;;  %v16278_v7 = vsel %vm14007_vm13, %v11632_v61, %v7333_v39  ;;  %v7335_v2 = vrot.slane %v7333_v39, 4  ;;  %12994 = vmatprep.subr.bf16.mxu0 %v13423_v10  ;;  %v13501_v48 = vld [vmem:[#allocation3 + $0x20] sm:$0x1]  ;;  %v7287_v61 = vld [vmem:[#allocation3 + $0x30] sm:$0xe]  ;;  %v13428_v38 = vld [vmem:[#allocation5 + $0x3a0] sm:$0xff]  }
 0x2ee   : > { %12793 = vmatmul.mubr.bf16.gmra.mxu1 %v11597_v6  ;;  %v6663_v15 = vsel %vm13704_vm7, %v6658_v41, %v6662_v42  ;;  %v7340_v12 = vrot.slane %v13498_v35, 5  ;;  %v7343_v58 = vrot.slane %v13499_v43, 5  ;;  %v11634_v36 = vrot.slane %v7285_v26, 9  ;;  %v13411_v6 = vld [vmem:[#allocation3 + $0x3c] sm:$0xff]   ;;  %v7289_v35 = vld [vmem:[#allocation3 + $0x48] sm:$0xe] }
 0x2ef   : > { %v11598_v59 = vcombine.low %v6653_v21, %v6663_v15  ;;  %v6682_v37 = vrot.slane %v6681_v40, 4  ;;  %v7337_v50 = vsel %vm14007_vm13, %v7335_v2, %v7336_v0  ;;  %v7347_v46 = vrot.slane %v13500_v62, 5  ;;  %v13430_v62 = vld [vmem:[#allocation5 + $0x398] sm:$0xff]  }
 0x2f0   : > { %v11648_v32 = vcombine.low %v16278_v7, %v7337_v50  ;;  %v16287_v52 = vsel %vm14007_vm13, %v11633_v18, %v7340_v12  ;;  %v7342_v42 = vrot.slane %v7340_v12, 4  ;;  %v7350_v55 = vrot.slane %v13501_v48, 5  ;;  %12995 = vmatpush3.bf16.msra.mxu0 %v13423_v10  ;;  %v13502_v10 = vld [vmem:[#allocation3 + $0x28] sm:$0xf] }
 0x2f1   : > { %12796 = vmatprep.mubr.bf16.mxu1 %v11598_v59  ;;  %v6687_v21 = vsel %vm13704_vm7, %v6682_v37, %v6686_v27  ;;  %v16293_v34 = vsel %vm14007_vm13, %v11634_v36, %v7347_v46  ;;  %v7349_v31 = vrot.slane %v7347_v46, 4  ;;  %v11635_v39 = vrot.slane %v7286_v47, 9  ;;  %12996 = vmatprep.subr.bf16.mxu0 %v13425_v9  ;;  %v7288_v27 = vld [vmem:[#allocation3 + $0x3c] sm:$0xe]  ;;  %v13504_v37 = vld [vmem:[#allocation3 + $0x40] sm:$0xf] }
 0x2f2   : > { %v11599_v0 = vcombine.low %v6677_v25, %v6687_v21  ;;  %v16297_v26 = vsel %vm14007_vm13, %v7342_v42, %v7343_v58  ;;  %v7354_v41 = vrot.slane %v13502_v10, 5  ;;  %v7357_v18 = vrot.slane %v16015_v3, 5  ;;  %v13503_v25 = vld [vmem:[#allocation3 + $0x34] sm:$0xf] }
 0x2f3   : > { %12917 = vmatmul.mubr.bf16.gmra.mxu0 %v13410_v19  ;;  %v11649_v40 = vcombine.low %v16287_v52, %v16297_v26  ;;  %v16304_v7 = vsel %vm14007_vm13, %v7349_v31, %v7350_v55  ;;  %v11636_v2 = vrot.slane %v7287_v61, 9  ;;  %v7361_v15 = vrot.slane %v13503_v25, 5  ;;  %v7291_v31 = vld [vmem:[#allocation3 + $0x60] sm:$0xe]  ;;  %v13414_v25 = vld [vmem:[#allocation3 + $0x54] sm:$0xff]  }
 0x2f4   : > { %12920 = vmatprep.mubr.bf16.mxu0 %v13411_v6  ;;  %v11650_v12 = vcombine.low %v16293_v34, %v16304_v7  ;;  %v16310_v3 = vsel %vm14007_vm13, %v11635_v39, %v7354_v41  ;;  %v7356_v43 = vrot.slane %v7354_v41, 4  ;;  %v7364_v58 = vrot.slane %v16048_v8, 5  ;;  %12997 = vmatpush3.bf16.msra.mxu0 %v13425_v9  ;;  %v7290_v9 = vld [vmem:[#allocation3 + $0x54] sm:$0xe]  ;;  %v13413_v39 = vld [vmem:[#allocation3 + $0x48] sm:$0xff]  }
 0x2f5   : > { %v16315_v36 = vsel %vm14007_vm13, %v11636_v2, %v7361_v15  ;;  %v7363_v47 = vrot.slane %v7361_v15, 4  ;;  %v11637_v59 = vrot.slane %v7288_v27, 9  ;;  %v7368_v50 = vrot.slane %v13504_v37, 5  ;;  %12998 = vmatprep.subr.bf16.mxu0 %v13428_v38  ;;  %v7292_v27 = vld [vmem:[#allocation3 + $0x6c] sm:$0xe] }
 0x2f6   : > { %12797 = vmatmul.mubr.bf16.gmra.mxu1 %v11599_v0  ;;  %v16319_v46 = vsel %vm14007_vm13, %v7356_v43, %v7357_v18  ;;  %v7371_v42 = vrot.slane %v16092_v56, 5  ;;  %v11638_v48 = vrot.slane %v7289_v35, 9  ;;  %v7375_v8 = vrot.slane %v16030_v44, 5  ;;  %v13433_v2 = vld [vmem:[#allocation5 + $0x390] sm:$0xff]   ;;  %v7293_v43 = vld [vmem:[#allocation3 + $0x78] sm:$0xe] }
 0x2f7   : > { %12864 = vmatprep.mubr.bf16.mxu1 %v11648_v32  ;;  %v11651_v55 = vcombine.low %v16310_v3, %v16319_v46  ;;  %v16327_v61 = vsel %vm14007_vm13, %v7363_v47, %v7364_v58  ;;  %v16331_v21 = vsel %vm14007_vm13, %v11637_v59, %v7368_v50  ;;  %v7370_v19 = vrot.slane %v7368_v50, 4  ;;  %v13415_v59 = vld [vmem:[#allocation5 + $0x370] sm:$0xff]  }
 0x2f8   : > { %v11652_v56 = vcombine.low %v16315_v36, %v16327_v61  ;;  %v16337_v44 = vsel %vm14007_vm13, %v11638_v48, %v7375_v8  ;;  %v7377_v32 = vrot.slane %v7375_v8, 4  ;;  %v7378_v0 = vrot.slane %v16118_v30, 5  ;;  %12999 = vmatpush3.bf16.msra.mxu0 %v13428_v38 }
 0x2f9   : > { %v16342_v6 = vsel %vm14007_vm13, %v7370_v19, %v7371_v42  ;;  %v11639_v10 = vrot.slane %v7290_v9, 9  ;;  %v7382_v41 = vrot.slane %v16072_v57, 5  ;;  %v7385_v18 = vrot.slane %v16152_v20, 5  ;;  %13000 = vmatprep.subr.bf16.mxu0 %v13430_v62  ;;  %v7294_v19 = vld [vmem:[#allocation3 + $0x84] sm:$0xe] }
 0x2fa   : > { %v11653_v15 = vcombine.low %v16331_v21, %v16342_v6  ;;  %v16350_v30 = vsel %vm14007_vm13, %v7377_v32, %v7378_v0  ;;  %v11640_v38 = vrot.slane %v7291_v31, 9  ;;  %v7389_v35 = vrot.slane %v16104_v11, 5  ;;  %v13435_v31 = vld [vmem:[#allocation5 + $0x388] sm:$0xff]   ;;  %v8905_v0 = vld [vmem:[#allocation3 + $0xc] sm:$0xe] }
 0x2fb   : > { %12921 = vmatmul.mubr.bf16.gmra.mxu0 %v13413_v39  ;;  %v11654_v57 = vcombine.low %v16337_v44, %v16350_v30  ;;  %v16357_v20 = vsel %vm14007_vm13, %v11639_v10, %v7382_v41  ;;  %v7384_v58 = vrot.slane %v7382_v41, 4  ;;  %v7392_v47 = vrot.slane %v16169_v17, 5  ;;  %v13418_v10 = vld [vmem:[#allocation5 + $0x368] sm:$0xff]  }
 0x2fc   : > { %12924 = vmatprep.mubr.bf16.mxu0 %v13414_v25  ;;  %v16362_v37 = vsel %vm14007_vm13, %v11640_v38, %v7389_v35  ;;  %v7391_v50 = vrot.slane %v7389_v35, 4  ;;  %v11641_v11 = vrot.slane %v7292_v27, 9  ;;  %v7396_v42 = vrot.slane %v16129_v53, 5  ;;  %13001 = vmatpush3.bf16.msra.mxu0 %v13430_v62  ;;  %v16408_v35 = vld [vmem:[#allocation3 + $0x10] sm:$0xf] }
 0x2fd   : > { %v16367_v48 = vsel %vm14007_vm13, %v7384_v58, %v7385_v18  ;;  %v7399_v8 = vrot.slane %v16191_v4, 5  ;;  %v11642_v9 = vrot.slane %v7293_v43, 9  ;;  %v7403_v17 = vrot.slane %v16162_v5, 5  ;;  %13002 = vmatprep.subr.bf16.mxu0 %v13433_v2  ;;  %v7295_v5 = vld [vmem:[#allocation3 + $0x90] sm:$0xe]  ;;  %v13416_v18 = vld [vmem:[#allocation3 + $0x60] sm:$0xff]  }
 0x2fe   : > { %12865 = vmatmul.mubr.bf16.vlgmr.msra.gmra.mxu1 %v11649_v40  ;;  %v11655_v53 = vcombine.low %v16357_v20, %v16367_v48  ;;  %v16378_v62 = vsel %vm14007_vm13, %v7391_v50, %v7392_v47  ;;  %v16382_v4 = vsel %vm14007_vm13, %v11641_v11, %v7396_v42  ;;  %v7398_v39 = vrot.slane %v7396_v42, 4  ;;  %v13417_v43 = vld [vmem:[#allocation3 + $0x6c] sm:$0xff]   ;;  %v16417_v47 = vld [vmem:[#allocation3 + $0x14] sm:$0x1]  ;;  %v13437_v50 = vld [vmem:[#allocation5 + $0x380] sm:$0xff]  }
 0x2ff   : > { %12868 = vmatprep.mubr.bf16.mxu1 %v11650_v12  ;;  %12945 = vmatpush3.bf16.msra.mxu1 %v16087_v22  ;;  %v11656_v52 = vcombine.low %v16362_v37, %v16378_v62  ;;  %v16392_v26 = vsel %vm14007_vm13, %v11642_v9, %v7403_v17  ;;  %v7405_v40 = vrot.slane %v7403_v17, 4  ;;  %v7406_v32 = vrot.slane %v16208_v16, 5  ;;  %v7296_v12 = vld [vmem:[#allocation3 + $0x9c] sm:$0xe]  ;;  %v8906_v9 = vld [vmem:[#allocation3 + $0x18] sm:$0xe] }
 0x300   : > { %12946 = vmatprep.subr.bf16.mxu1 %v13415_v59  ;;  %v16397_v41 = vsel %vm14007_vm13, %v7398_v39, %v7399_v8  ;;  %v11643_v34 = vrot.slane %v7294_v19, 9  ;;  %v7410_v22 = vrot.slane %v16174_v54, 5  ;;  %v7413_v7 = vrot.slane %v16224_v63, 5  ;;  %13003 = vmatpush3.bf16.msra.mxu0 %v13433_v2  ;;  %v13422_v17 = vld [vmem:[#allocation5 + $0x360] sm:$0xff]   ;;  %v13429_v37 = vld [vmem:[#allocation3 + $0xa8] sm:$0xff]  }
 0x301   : > { %v11657_v27 = vcombine.low %v16382_v4, %v16397_v41  ;;  %v16405_v16 = vsel %vm14007_vm13, %v7405_v40, %v7406_v32  ;;  %v11644_v25 = vrot.slane %v7295_v5, 9  ;;  %v7417_v38 = vrot.slane %v16195_v13, 5  ;;  %13004 = vmatprep.subr.bf16.mxu0 %v13435_v31  ;;  %v7297_v5 = vld [vmem:[#allocation3 + $0xa8] sm:$0xe] }
 0x302   : > { %v11658_v54 = vcombine.low %v16392_v26, %v16405_v16  ;;  %v16414_v63 = vsel %vm14007_vm13, %v11643_v34, %v7410_v22  ;;  %v7412_v2 = vrot.slane %v7410_v22, 4  ;;  %v7420_v58 = vrot.slane %v16231_v14, 5  ;;  %v16440_v22 = vld [vmem:[#allocation3 + $0x1c] sm:$0xf] }
 0x303   : > { %12947 = vmatpush3.bf16.msra.mxu1 %v13415_v59  ;;  %12925 = vmatmul.mubr.bf16.gmra.mxu0 %v13416_v18  ;;  %v16421_v13 = vsel %vm14007_vm13, %v11644_v25, %v7417_v38  ;;  %v7419_v11 = vrot.slane %v7417_v38, 4  ;;  %v11645_v42 = vrot.slane %v7296_v12, 9  ;;  %v7424_v8 = vrot.slane %v16212_v33, 5  ;;  %v16454_v25 = vld [vmem:[#allocation5 + $0x438] sm:$0xff]  }
 0x304   : > { %12928 = vmatprep.mubr.bf16.mxu0 %v13417_v43  ;;  %12948 = vmatprep.subr.bf16.mxu1 %v13418_v10  ;;  %v16426_v14 = vsel %vm14007_vm13, %v7412_v2, %v7413_v7  ;;  %v7427_v19 = vrot.slane %v16246_v24, 5  ;;  %v11720_v59 = vrot.slane %v8905_v0, 9  ;;  %v8971_v39 = vrot.slane %v16408_v35, 5  ;;  %v16442_v24 = vld [vmem:[#allocation3 + $0x20] sm:$0x1]  ;;  %v13427_v2 = vld [vmem:[#allocation5 + $0x358] sm:$0xff]  }
 0x305   : > { %v16434_v33 = vsel %vm14007_vm13, %v7419_v11, %v7420_v58  ;;  %v16438_v32 = vsel %vm14007_vm13, %v11645_v42, %v7424_v8  ;;  %v7426_v34 = vrot.slane %v7424_v8, 4  ;;  %13005 = vmatpush3.bf16.msra.mxu0 %v13435_v31  ;;  %v8974_v18 = vrot.slane %v16417_v47, 5  ;;  %v8907_v31 = vld [vmem:[#allocation3 + $0x24] sm:$0xe]  ;;  %v7298_v43 = vld [vmem:[#allocation3 + $0xb4] sm:$0xe] }
 0x306   : > { %12869 = vmatmul.mubr.bf16.gmra.mxu1 %v11651_v55  ;;  %v16451_v7 = vsel %vm14007_vm13, %v11720_v59, %v8971_v39  ;;  %v8973_v12 = vrot.slane %v8971_v39, 4  ;;  %13006 = vmatprep.subr.bf16.mxu0 %v13437_v50  ;;  %v11646_v46 = vrot.slane %v7297_v5, 9  ;;  %v7431_v55 = vrot.slane %v16228_v23, 5  ;;  %v13419_v11 = vld [vmem:[#allocation3 + $0x78] sm:$0xff]  }
 0x307   : > { %12872 = vmatprep.mubr.bf16.mxu1 %v11652_v56  ;;  %12949 = vmatpush3.bf16.msra.mxu1 %v13418_v10  ;;  %v16461_v3 = vsel %vm14007_vm13, %v7426_v34, %v7427_v19  ;;  %v7434_v38 = vrot.slane %v16251_v51, 5  ;;  %v11721_v61 = vrot.slane %v8906_v9, 9  ;;  %v8978_v56 = vrot.slane %v16440_v22, 5  ;;  %v16472_v10 = vld [vmem:[#allocation3 + $0x28] sm:$0xf] }
 0x308   : > { %12950 = vmatprep.subr.bf16.mxu1 %v13422_v17  ;;  %v16469_v36 = vsel %vm14007_vm13, %v8973_v12, %v8974_v18  ;;  %v16478_v51 = vsel %vm14007_vm13, %v11646_v46, %v7431_v55  ;;  %v7433_v42 = vrot.slane %v7431_v55, 4  ;;  %v8981_v8 = vrot.slane %v16442_v24, 5  ;;  %v13421_v19 = vld [vmem:[#allocation3 + $0x84] sm:$0xff]   ;;  %v16486_v34 = vld [vmem:[#allocation3 + $0x2c] sm:$0x1] }
 0x309   : > { %v11736_v23 = vcombine.low %v16451_v7, %v16469_v36  ;;  %13007 = vmatpush3.bf16.msra.mxu0 %v13437_v50  ;;  %v16483_v9 = vsel %vm14007_vm13, %v11721_v61, %v8978_v56  ;;  %v8980_v59 = vrot.slane %v8978_v56, 4  ;;  %v11647_v39 = vrot.slane %v7298_v43, 9  ;;  %v8151_v55 = vld [vmem:[#allocation3 + $0xc] sm:$0xf] }
 0x30a   : > { %v7438_v5 = vrot.slane %v16238_v45, 5  ;;  %13088 = vmatprep.subr.bf16.mxu0 %v16454_v25  ;;  %v16491_v50 = vsel %vm14007_vm13, %v7433_v42, %v7434_v38  ;;  %v7441_v12 = vrot.slane %v16260_v1, 5  ;;  %v11722_v18 = vrot.slane %v8907_v31, 9  ;;  %v13432_v43 = vld [vmem:[#allocation5 + $0x350] sm:$0xff]   ;;  %v8908_v42 = vld [vmem:[#allocation3 + $0x30] sm:$0xe] }
 0x30b   : > { %12929 = vmatmul.mubr.bf16.gmra.mxu0 %v13419_v11  ;;  %12951 = vmatpush3.bf16.msra.mxu1 %v13422_v17  ;;  %v8985_v46 = vrot.slane %v16472_v10, 5  ;;  %v16499_v61 = vsel %vm14007_vm13, %v8980_v59, %v8981_v8  ;;  %v8988_v11 = vrot.slane %v16486_v34, 5  ;;  %v8203_v59 = vshll.u32 %v8151_v55, 16 }
 0x30c   : > { %12932 = vmatprep.mubr.bf16.mxu0 %v13421_v19  ;;  %12952 = vmatprep.subr.bf16.mxu1 %v13427_v2  ;;  %v16503_v17 = vsel %vm14007_vm13, %v11647_v39, %v7438_v5  ;;  %v7440_v38 = vrot.slane %v7438_v5, 4  ;;  %v8200_v19 = vshrl.u32 %v8151_v55, 16  ;;  %v8209_v39 = vshll.u32 %v16408_v35, 16  ;;  %v16520_v5 = vld [vmem:[#allocation3 + $0x34] sm:$0xf]  ;;  %v13436_v55 = vld [vmem:[#allocation5 + $0x348] sm:$0xff]  }
 0x30d   : > { %v16509_v31 = vsel %vm14007_vm13, %v11722_v18, %v8985_v46  ;;  %v8987_v56 = vrot.slane %v8985_v46, 4  ;;  %v8213_v6 = vshrl.u32 %v16408_v35, 16  ;;  %v8154_v46 = vld [vmem:[#allocation3 + $0x18] sm:$0xf]  ;;  %v13426_v35 = vld [vmem:[#allocation3 + $0x9c] sm:$0xff]  }
 0x30e   : > { %12873 = vmatmul.mubr.bf16.gmra.mxu1 %v11653_v15  ;;  %v16517_v8 = vsel %vm14007_vm13, %v7440_v38, %v7441_v12  ;;  %v8219_v15 = vshll.u32 %v16417_v47, 16  ;;  %v16533_v12 = vld [vmem:[#allocation3 + $0x38] sm:$0x1]  ;;  %v8202_v30 = vrot.slane %v8200_v19, 4  ;;  %v13424_v38 = vld [vmem:[#allocation3 + $0x90] sm:$0xff]   ;;  %v8224_v1 = vshrl.u32 %v8154_v46, 16 }
 0x30f   : > { %12876 = vmatprep.mubr.bf16.mxu1 %v11654_v57  ;;  %12953 = vmatpush3.bf16.msra.mxu1 %v13427_v2  ;;  %v16529_v21 = vsel %vm14007_vm13, %v8987_v56, %v8988_v11  ;;  %v8205_v57 = vrot.slane %v8203_v59, 5  ;;  %v8211_v2 = vrot.slane %v8209_v39, 5  ;;  %v8215_v18 = vrot.slane %v8213_v6, 4  ;;  %v16544_v6 = vld [vmem:[#allocation3 + $0x40] sm:$0xf] }
 0x310   : > { %12954 = vmatprep.subr.bf16.mxu1 %v13432_v43  ;;  %v8221_v45 = vrot.slane %v8219_v15, 5  ;;  %v11723_v56 = vrot.slane %v8908_v42, 9  ;;  %v8992_v11 = vrot.slane %v16520_v5, 5  ;;  %v8995_v47 = vrot.slane %v16533_v12, 5  ;;  %v8909_v42 = vld [vmem:[#allocation3 + $0x3c] sm:$0xe] }
 0x311   : > { %v8206_v58 = vor.u32 %v8205_v57, %v8202_v30  ;;  %v8227_v0 = vshll.u32 %v8154_v46, 16  ;;  %v8216_v40 = vor.u32 %v8215_v18, %v8211_v2  ;;  %v8233_v39 = vshll.u32 %v16440_v22, 16  ;;  %v13438_v15 = vld [vmem:[#allocation5 + $0x340] sm:$0xff]  }
 0x312   : > { %v16541_v19 = vsel %vm14007_vm13, %v11723_v56, %v8992_v11  ;;  %v8994_v59 = vrot.slane %v8992_v11, 4  ;;  %v8226_v57 = vrot.slane %v8224_v1, 4  ;;  %v8237_v46 = vshrl.u32 %v16440_v22, 16  ;;  %v16552_v11 = vld [vmem:[#allocation3 + $0x44] sm:$0x1] }
 0x313   : > { %12933 = vmatmul.mubr.bf16.gmra.mxu0 %v13424_v38  ;;  %12955 = vmatpush3.bf16.msra.mxu1 %v13432_v43  ;;  %v8207_v30 = vrot.slane %v8206_v58, 4  ;;  %v8229_v44 = vrot.slane %v8227_v0, 5  ;;  %v8217_v43 = vrot.slane %v8216_v40, 4  ;;  %v8235_v38 = vrot.slane %v8233_v39, 5  ;;  %v8157_v1 = vld [vmem:[#allocation3 + $0x24] sm:$0xf] }
 0x314   : > { %12936 = vmatprep.mubr.bf16.mxu0 %v13426_v35  ;;  %12956 = vmatprep.subr.bf16.mxu1 %v13436_v55  ;;  %v16549_v18 = vsel %vm14007_vm13, %v8994_v59, %v8995_v47  ;;  %v8243_v56 = vshll.u32 %v16442_v24, 16  ;;  %v8239_v0 = vrot.slane %v8237_v46, 4  ;;  %v11724_v20 = vrot.slane %v8909_v42, 9  ;;  %v16570_v59 = vld [vmem:[#allocation5 + $0x3f8] sm:$0xff]   ;;  %v8910_v39 = vld [vmem:[#allocation3 + $0x48] sm:$0xe] }
 0x315   : > { %v8212_v58 = vsel %vm13704_vm7, %v8207_v30, %v8211_v2  ;;  %v11739_v22 = vcombine.low %v16541_v19, %v16549_v18  ;;  %v8230_v40 = vor.u32 %v8229_v44, %v8226_v57  ;;  %v8222_v24 = vsel %vm13704_vm7, %v8217_v43, %v8221_v45  ;;  %v8160_v42 = vld [vmem:[#allocation3 + $0x30] sm:$0xf]  ;;  %v13431_v30 = vld [vmem:[#allocation3 + $0xb4] sm:$0xff]  }
 0x316   : > { %12877 = vmatmul.mubr.bf16.gmra.mxu1 %v11655_v53  ;;  %v8245_v35 = vrot.slane %v8243_v56, 5  ;;  %v8999_v48 = vrot.slane %v16544_v6, 5  ;;  %v16567_v53 = vcombine.low %v8212_v58, %v8222_v24  ;;  %v8240_v47 = vor.u32 %v8239_v0, %v8235_v38  ;;  %v16580_v58 = vld [vmem:[#allocation3 + $0x4c] sm:$0xf] }
 0x317   : > { %12880 = vmatprep.mubr.bf16.mxu1 %v11656_v52  ;;  %12957 = vmatpush3.bf16.msra.mxu1 %v13436_v55  ;;  %v8231_v2 = vrot.slane %v8230_v40, 4  ;;  %v9002_v44 = vrot.slane %v16552_v11, 5  ;;  %v8248_v45 = vshrl.u32 %v8157_v1, 16  ;;  %v8251_v55 = vshll.u32 %v8157_v1, 16 }
 0x318   : > { %12958 = vmatprep.subr.bf16.mxu1 %v13438_v15  ;;  %v16574_v62 = vsel %vm14007_vm13, %v11724_v20, %v8999_v48  ;;  %v9001_v52 = vrot.slane %v8999_v48, 4  ;;  %v8241_v46 = vrot.slane %v8240_v47, 4  ;;  %v8257_v43 = vshll.u32 %v16472_v10, 16  ;;  %v16587_v20 = vld [vmem:[#allocation3 + $0x50] sm:$0x1] }
 0x319   : > { %v8236_v57 = vsel %vm13704_vm7, %v8231_v2, %v8235_v38  ;;  %v8261_v56 = vshrl.u32 %v16472_v10, 16  ;;  %v8250_v0 = vrot.slane %v8248_v45, 4  ;;  %v8253_v1 = vrot.slane %v8251_v55, 5 }
 0x31a   : > { %v16584_v40 = vsel %vm14007_vm13, %v9001_v52, %v9002_v44  ;;  %v8267_v24 = vshll.u32 %v16486_v34, 16  ;;  %v8246_v38 = vsel %vm13704_vm7, %v8241_v46, %v8245_v35  ;;  %v9006_v52 = vrot.slane %v16580_v58, 5  ;;  %v8911_v46 = vld [vmem:[#allocation3 + $0x54] sm:$0xe] }
 0x31b   : > { %12937 = vmatmul.mubr.bf16.gmra.mxu0 %v13429_v37  ;;  %12959 = vmatpush3.bf16.msra.mxu1 %v13438_v15  ;;  %v11740_v10 = vcombine.low %v16574_v62, %v16584_v40  ;;  %v8259_v15 = vrot.slane %v8257_v43, 5  ;;  %v8263_v48 = vrot.slane %v8261_v56, 4  ;;  %v16594_v2 = vcombine.low %v8236_v57, %v8246_v38  ;;  %v8163_v43 = vld [vmem:[#allocation3 + $0x3c] sm:$0xf]  ;;  %v13448_v62 = vld [vmem:[#allocation5 + $0x418] sm:$0xff]  }
 0x31c   : > { %12940 = vmatprep.mubr.bf16.mxu0 %v13431_v30  ;;  %13040 = vmatprep.subr.bf16.mxu1 %v16570_v59  ;;  %v8254_v47 = vor.u32 %v8253_v1, %v8250_v0  ;;  %v8269_v44 = vrot.slane %v8267_v24, 5  ;;  %v11725_v37 = vrot.slane %v8910_v39, 9  ;;  %v9009_v35 = vrot.slane %v16587_v20, 5  ;;  %v16610_v0 = vld [vmem:[#allocation3 + $0x58] sm:$0xf]  ;;  %v13434_v1 = vld [vmem:[#allocation3 + $0xc0] sm:$0xff]  }
 0x31d   : > { %v8264_v34 = vor.u32 %v8263_v48, %v8259_v15  ;;  %v8272_v45 = vshrl.u32 %v8160_v42, 16  ;;  %v8275_v30 = vshll.u32 %v8160_v42, 16  ;;  %v8281_v57 = vshll.u32 %v16520_v5, 16  ;;  %v16614_v24 = vld [vmem:[#allocation3 + $0x5c] sm:$0x1] }
 0x31e   : > { %12881 = vmatmul.mubr.bf16.gmra.mxu1 %v11657_v27  ;;  %v8255_v55 = vrot.slane %v8254_v47, 4  ;;  %v8285_v39 = vshrl.u32 %v16520_v5, 16  ;;  %v16608_v41 = vsel %vm14007_vm13, %v11725_v37, %v9006_v52  ;;  %v9008_v27 = vrot.slane %v9006_v52, 4 }
 0x31f   : > { %12884 = vmatprep.mubr.bf16.mxu1 %v11658_v54  ;;  %v8265_v4 = vrot.slane %v8264_v34, 4  ;;  %v8274_v56 = vrot.slane %v8272_v45, 4  ;;  %v8277_v16 = vrot.slane %v8275_v30, 5  ;;  %v8283_v54 = vrot.slane %v8281_v57, 5 }
 0x320   : > { %v8260_v26 = vsel %vm13704_vm7, %v8255_v55, %v8259_v15  ;;  %v8287_v42 = vrot.slane %v8285_v39, 4  ;;  %v16620_v38 = vsel %vm14007_vm13, %v9008_v27, %v9009_v35  ;;  %v8291_v48 = vshll.u32 %v16533_v12, 16 }
 0x321   : > { %v8270_v5 = vsel %vm13704_vm7, %v8265_v4, %v8269_v44  ;;  %v11726_v47 = vrot.slane %v8911_v46, 9  ;;  %v11741_v15 = vcombine.low %v16608_v41, %v16620_v38  ;;  %v8278_v34 = vor.u32 %v8277_v16, %v8274_v56  ;;  %v16633_v46 = vld [vmem:[#allocation3 + $0x64] sm:$0xf]  ;;  %v8912_v56 = vld [vmem:[#allocation3 + $0x60] sm:$0xe] }
 0x322   : > { %v16623_v37 = vcombine.low %v8260_v26, %v8270_v5  ;;  %v8288_v52 = vor.u32 %v8287_v42, %v8283_v54  ;;  %v8293_v44 = vrot.slane %v8291_v48, 5  ;;  %v9013_v45 = vrot.slane %v16610_v0, 5  ;;  %v16650_v16 = vld [vmem:[#allocation3 + $0x68] sm:$0x1] }
 0x323   : > { %12941 = vmatmul.mubr.bf16.gmra.mxu0 %v13434_v1  ;;  %v9016_v35 = vrot.slane %v16614_v24, 5  ;;  %v8296_v55 = vshrl.u32 %v8163_v43, 16  ;;  %v8279_v12 = vrot.slane %v8278_v34, 4  ;;  %v8299_v57 = vshll.u32 %v8163_v43, 16  ;;  %v8166_v42 = vld [vmem:[#allocation3 + $0x48] sm:$0xf] }
 0x324   : > { %13008 = vmatprep.mubr.bf16.mxu0 %v11736_v23  ;;  %v8289_v30 = vrot.slane %v8288_v52, 4  ;;  %v8305_v39 = vshll.u32 %v16544_v6, 16  ;;  %v18387_v4 = vcombine.low %v16414_v63, %v16426_v14  ;;  %v16640_v7 = vsel %vm14007_vm13, %v11726_v47, %v9013_v45  ;;  %v13444_v52 = vld [vmem:[#allocation5 + $0x430] sm:$0xff]  }
 0x325   : > { %v9015_v36 = vrot.slane %v9013_v45, 4  ;;  %v8298_v23 = vrot.slane %v8296_v55, 4  ;;  %v8309_v27 = vshrl.u32 %v16544_v6, 16  ;;  %v18388_v43 = vcombine.low %v16421_v13, %v16434_v33 }
 0x326   : > { %12885 = vmatmul.mubr.bf16.gmra.mxu1 %v18387_v4  ;;  %v8284_v1 = vsel %vm13704_vm7, %v8279_v12, %v8283_v54  ;;  %v8294_v63 = vsel %vm13704_vm7, %v8289_v30, %v8293_v44  ;;  %v8301_v14 = vrot.slane %v8299_v57, 5  ;;  %v8307_v26 = vrot.slane %v8305_v39, 5  ;;  %v8913_v4 = vld [vmem:[#allocation3 + $0x6c] sm:$0xe] }
 0x327   : > { %12888 = vmatprep.mubr.bf16.mxu1 %v18388_v43  ;;  %v16652_v5 = vcombine.low %v8284_v1, %v8294_v63  ;;  %v16656_v6 = vsel %vm14007_vm13, %v9015_v36, %v9016_v35  ;;  %v8311_v48 = vrot.slane %v8309_v27, 4  ;;  %v8315_v13 = vshll.u32 %v16552_v11, 16  ;;  %v8169_v36 = vld [vmem:[#allocation3 + $0x54] sm:$0xf] }
 0x328   : > { %v11742_v33 = vcombine.low %v16640_v7, %v16656_v6  ;;  %v8302_v54 = vor.u32 %v8301_v14, %v8298_v23  ;;  %v11727_v47 = vrot.slane %v8912_v56, 9  ;;  %v9020_v34 = vrot.slane %v16633_v46, 5 }
 0x329   : > { %v8312_v44 = vor.u32 %v8311_v48, %v8307_v26  ;;  %v8317_v45 = vrot.slane %v8315_v13, 5  ;;  %v9023_v55 = vrot.slane %v16650_v16, 5  ;;  %v8320_v12 = vshrl.u32 %v8166_v42, 16 }
 0x32a   : > { %v18389_v35 = vcombine.low %v16483_v9, %v16499_v61  ;;  %v8303_v30 = vrot.slane %v8302_v54, 4  ;;  %v16668_v11 = vsel %vm14007_vm13, %v11727_v47, %v9020_v34  ;;  %v9022_v57 = vrot.slane %v9020_v34, 4  ;;  %v16675_v61 = vld [vmem:[#allocation3 + $0x70] sm:$0xf] }
 0x32b   : > { %v8323_v39 = vshll.u32 %v8166_v42, 16  ;;  %v18390_v23 = vcombine.low %v16509_v31, %v16529_v21  ;;  %v8313_v27 = vrot.slane %v8312_v44, 4  ;;  %v8322_v56 = vrot.slane %v8320_v12, 4  ;;  %v16685_v21 = vld [vmem:[#allocation3 + $0x74] sm:$0x1]  ;;  %v13445_v42 = vld [vmem:[#allocation5 + $0x428] sm:$0xff]  }
 0x32c   : > { %13009 = vmatmul.mubr.bf16.vlgmr.msra.gmra.mxu0 %v18389_v35  ;;  %v8329_v43 = vshll.u32 %v16580_v58, 16  ;;  %v8333_v9 = vshrl.u32 %v16580_v58, 16  ;;  %v8308_v1 = vsel %vm13704_vm7, %v8303_v30, %v8307_v26  ;;  %v16682_v63 = vsel %vm14007_vm13, %v9022_v57, %v9023_v55  ;;  %v8914_v12 = vld [vmem:[#allocation3 + $0x78] sm:$0xe] }
 0x32d   : > { %13012 = vmatprep.mubr.bf16.mxu0 %v18390_v23  ;;  %13089 = vmatpush3.bf16.msra.mxu0 %v16454_v25  ;;  %v8325_v14 = vrot.slane %v8323_v39, 5  ;;  %v8339_v31 = vshll.u32 %v16587_v20, 16  ;;  %v18391_v58 = vcombine.low %v16438_v32, %v16461_v3  ;;  %v8318_v25 = vsel %vm13704_vm7, %v8313_v27, %v8317_v45  ;;  %v13447_v39 = vld [vmem:[#allocation5 + $0x420] sm:$0xff]  }
 0x32e   : > { %13090 = vmatprep.subr.bf16.mxu0 %v13444_v52  ;;  %v11743_v26 = vcombine.low %v16668_v11, %v16682_v63  ;;  %v8331_v48 = vrot.slane %v8329_v43, 5  ;;  %v8335_v13 = vrot.slane %v8333_v9, 4  ;;  %v18392_v54 = vcombine.low %v16478_v51, %v16491_v50  ;;  %v8172_v50 = vld [vmem:[#allocation3 + $0x60] sm:$0xf]  ;;  %v16707_v43 = vld [vmem:[#allocation3 + $0x7c] sm:$0xf] }
 0x32f   : > { %12889 = vmatmul.mubr.bf16.gmra.mxu1 %v18391_v58  ;;  %v16697_v20 = vcombine.low %v8308_v1, %v8318_v25  ;;  %v8326_v47 = vor.u32 %v8325_v14, %v8322_v56  ;;  %v8341_v34 = vrot.slane %v8339_v31, 5  ;;  %v11728_v44 = vrot.slane %v8913_v4, 9  ;;  %v16714_v1 = vld [vmem:[#allocation3 + $0x80] sm:$0x1] }
 0x330   : > { %12892 = vmatprep.mubr.bf16.mxu1 %v18392_v54  ;;  %v8336_v55 = vor.u32 %v8335_v13, %v8331_v48  ;;  %v9027_v32 = vrot.slane %v16675_v61, 5  ;;  %v9030_v3 = vrot.slane %v16685_v21, 5  ;;  %v8344_v45 = vshrl.u32 %v8169_v36, 16 }
 0x331   : > { %13091 = vmatpush3.bf16.msra.mxu0 %v13444_v52  ;;  %v8327_v35 = vrot.slane %v8326_v47, 4  ;;  %v8347_v30 = vshll.u32 %v8169_v36, 16  ;;  %v8353_v57 = vshll.u32 %v16610_v0, 16  ;;  %v8357_v51 = vshrl.u32 %v16610_v0, 16 }
 0x332   : > { %13092 = vmatprep.subr.bf16.mxu0 %v13445_v42  ;;  %v8337_v23 = vrot.slane %v8336_v55, 4  ;;  %v16705_v4 = vsel %vm14007_vm13, %v11728_v44, %v9027_v32  ;;  %v9029_v27 = vrot.slane %v9027_v32, 4  ;;  %v8346_v56 = vrot.slane %v8344_v45, 4  ;;  %v8175_v32 = vld [vmem:[#allocation3 + $0x6c] sm:$0xf] }
 0x333   : > { %v8332_v52 = vsel %vm13704_vm7, %v8327_v35, %v8331_v48  ;;  %v8349_v0 = vrot.slane %v8347_v30, 5  ;;  %v8355_v36 = vrot.slane %v8353_v57, 5  ;;  %v8359_v9 = vrot.slane %v8357_v51, 4  ;;  %v16748_v51 = vld [vmem:[#allocation3 + $0x8c] sm:$0x1] }
 0x334   : > { %13013 = vmatmul.mubr.bf16.gmra.mxu0 %v11739_v22  ;;  %v8342_v14 = vsel %vm13704_vm7, %v8337_v23, %v8341_v34  ;;  %v16723_v31 = vsel %vm14007_vm13, %v9029_v27, %v9030_v3  ;;  %v8363_v19 = vshll.u32 %v16614_v24, 16  ;;  %v11729_v18 = vrot.slane %v8914_v12, 9  ;;  %v16742_v12 = vld [vmem:[#allocation3 + $0x88] sm:$0xf] }
 0x335   : > { %13016 = vmatprep.mubr.bf16.mxu0 %v11740_v10  ;;  %13093 = vmatpush3.bf16.msra.mxu0 %v13445_v42  ;;  %v16726_v22 = vcombine.low %v8332_v52, %v8342_v14  ;;  %v11744_v58 = vcombine.low %v16705_v4, %v16723_v31  ;;  %v8350_v25 = vor.u32 %v8349_v0, %v8346_v56  ;;  %v9034_v13 = vrot.slane %v16707_v43, 5  ;;  %v8915_v42 = vld [vmem:[#allocation3 + $0x84] sm:$0xe]  ;;  %v16813_v31 = vld [vmem:[#allocation3 + $0xa4] sm:$0x1] }
 0x336   : > { %v8360_v48 = vor.u32 %v8359_v9, %v8355_v36  ;;  %13094 = vmatprep.subr.bf16.mxu0 %v13447_v39  ;;  %v18393_v40 = vcombine.low %v16503_v17, %v16517_v8  ;;  %v8365_v10 = vrot.slane %v8363_v19, 5  ;;  %v9037_v24 = vrot.slane %v16714_v1, 5  ;;  %v13440_v9 = vld [vmem:[#allocation5 + $0x3f0] sm:$0xff]  }
 0x337   : > { %v8368_v54 = vshrl.u32 %v8172_v50, 16  ;;  %v8351_v47 = vrot.slane %v8350_v25, 4  ;;  %v8371_v44 = vshll.u32 %v8172_v50, 16  ;;  %v8377_v55 = vshll.u32 %v16633_v46, 16  ;;  %v13450_v50 = vld [vmem:[#allocation5 + $0x410] sm:$0xff]  }
 0x338   : > { %12893 = vmatmul.mubr.bf16.gmra.mxu1 %v18393_v40  ;;  %v8361_v34 = vrot.slane %v8360_v48, 4  ;;  %v16739_v3 = vsel %vm14007_vm13, %v11729_v18, %v9034_v13  ;;  %v9036_v17 = vrot.slane %v9034_v13, 4  ;;  %v8381_v45 = vshrl.u32 %v16633_v46, 16  ;;  %v8916_v48 = vld [vmem:[#allocation3 + $0x90] sm:$0xe]  ;;  %v13451_v40 = vld [vmem:[#allocation5 + $0x408] sm:$0xff]  }
 0x339   : > { %12960 = vmatprep.mubr.bf16.mxu1 %v16567_v53  ;;  %v8370_v8 = vrot.slane %v8368_v54, 4  ;;  %13095 = vmatpush3.bf16.msra.mxu0 %v13447_v39  ;;  %v8356_v53 = vsel %vm13704_vm7, %v8351_v47, %v8355_v36  ;;  %v8373_v30 = vrot.slane %v8371_v44, 5  ;;  %v8379_v57 = vrot.slane %v8377_v55, 5  ;;  %v16774_v13 = vld [vmem:[#allocation3 + $0x94] sm:$0xf] }
 0x33a   : > { %v8366_v35 = vsel %vm13704_vm7, %v8361_v34, %v8365_v10  ;;  %13096 = vmatprep.subr.bf16.mxu0 %v13448_v62  ;;  %v16754_v46 = vsel %vm14007_vm13, %v9036_v17, %v9037_v24  ;;  %v8383_v27 = vrot.slane %v8381_v45, 4  ;;  %v8387_v39 = vshll.u32 %v16650_v16, 16  ;;  %v8178_v47 = vld [vmem:[#allocation3 + $0x78] sm:$0xf] }
 0x33b   : > { %v16750_v23 = vcombine.low %v8356_v53, %v8366_v35  ;;  %v11745_v56 = vcombine.low %v16739_v3, %v16754_v46  ;;  %v8374_v52 = vor.u32 %v8373_v30, %v8370_v8  ;;  %v11730_v0 = vrot.slane %v8915_v42, 9  ;;  %v16785_v42 = vld [vmem:[#allocation3 + $0x98] sm:$0x1] }
 0x33c   : > { %13017 = vmatmul.mubr.bf16.gmra.mxu0 %v11741_v15  ;;  %v9041_v36 = vrot.slane %v16742_v12, 5  ;;  %v8384_v14 = vor.u32 %v8383_v27, %v8379_v57  ;;  %v8389_v19 = vrot.slane %v8387_v39, 5  ;;  %v9044_v16 = vrot.slane %v16748_v51, 5  ;;  %v13453_v30 = vld [vmem:[#allocation5 + $0x400] sm:$0xff]  }
 0x33d   : > { %13020 = vmatprep.mubr.bf16.mxu0 %v11742_v33  ;;  %v8392_v18 = vshrl.u32 %v8175_v32, 16  ;;  %13097 = vmatpush3.bf16.msra.mxu0 %v13448_v62  ;;  %v8375_v41 = vrot.slane %v8374_v52, 4  ;;  %v8395_v25 = vshll.u32 %v8175_v32, 16  ;;  %v8401_v33 = vshll.u32 %v16675_v61, 16  ;;  %v8917_v52 = vld [vmem:[#allocation3 + $0x9c] sm:$0xe] }
 0x33e   : > { %v16769_v38 = vsel %vm14007_vm13, %v11730_v0, %v9041_v36  ;;  %v9043_v15 = vrot.slane %v9041_v36, 4  ;;  %13098 = vmatprep.subr.bf16.mxu0 %v13450_v50  ;;  %v8385_v7 = vrot.slane %v8384_v14, 4  ;;  %v8405_v10 = vshrl.u32 %v16675_v61, 16  ;;  %v13441_v61 = vld [vmem:[#allocation5 + $0x3e8] sm:$0xff]   ;;  %v13443_v36 = vld [vmem:[#allocation5 + $0x3e0] sm:$0xff]  }
 0x33f   : > { %v8394_v6 = vrot.slane %v8392_v18, 4  ;;  %v8380_v62 = vsel %vm13704_vm7, %v8375_v41, %v8379_v57  ;;  %v8411_v54 = vshll.u32 %v16685_v21, 16  ;;  %v8403_v34 = vrot.slane %v8401_v33, 5  ;;  %v8181_v0 = vld [vmem:[#allocation3 + $0x84] sm:$0xf] }
 0x340   : > { %12961 = vmatmul.mubr.bf16.vlgmr.msra.gmra.mxu1 %v16594_v2  ;;  %v16782_v24 = vsel %vm14007_vm13, %v9043_v15, %v9044_v16  ;;  %v8397_v2 = vrot.slane %v8395_v25, 5  ;;  %v8407_v44 = vrot.slane %v8405_v10, 4  ;;  %v11731_v8 = vrot.slane %v8916_v48, 9 }
 0x341   : > { %12964 = vmatprep.mubr.bf16.mxu1 %v16623_v37  ;;  %13041 = vmatpush3.bf16.msra.mxu1 %v16570_v59  ;;  %v8390_v37 = vsel %vm13704_vm7, %v8385_v7, %v8389_v19  ;;  %v11746_v59 = vcombine.low %v16769_v38, %v16782_v24  ;;  %v8413_v17 = vrot.slane %v8411_v54, 5  ;;  %v9048_v45 = vrot.slane %v16774_v13, 5  ;;  %v16809_v19 = vpop.f32.mrf.mxu0 }
 0x342   : > { %13042 = vmatprep.subr.bf16.mxu1 %v13440_v9  ;;  %13099 = vmatpush3.bf16.msra.mxu0 %v13450_v50  ;;  %v16791_v55 = vcombine.low %v8380_v62, %v8390_v37  ;;  %v8398_v32 = vor.u32 %v8397_v2, %v8394_v6  ;;  %v8408_v21 = vor.u32 %v8407_v44, %v8403_v34  ;;  %v9051_v53 = vrot.slane %v16785_v42, 5  ;;  %v13446_v62 = vld [vmem:[#allocation5 + $0x3d8] sm:$0xff]  }
 0x343   : > { %13100 = vmatprep.subr.bf16.mxu0 %v13451_v40  ;;  %v8416_v35 = vshrl.u32 %v8178_v47, 16  ;;  %v8419_v50 = vshll.u32 %v8178_v47, 16  ;;  %v8425_v27 = vshll.u32 %v16707_v43, 16  ;;  %v8429_v39 = vshrl.u32 %v16707_v43, 16  ;;  %v16830_v2 = vpop.f32.mrf.mxu0  ;;  %v8184_v37 = vld [vmem:[#allocation3 + $0x90] sm:$0xf] }
 0x344   : > { %13021 = vmatmul.mubr.bf16.gmra.mxu0 %v11743_v26  ;;  %v8399_v57 = vrot.slane %v8398_v32, 4  ;;  %v8409_v14 = vrot.slane %v8408_v21, 4  ;;  %v9050_v11 = vrot.slane %v9048_v45, 4  ;;  %v16807_v26 = vld [vmem:[#allocation3 + $0xa0] sm:$0xf]  ;;  %v8435_v15 = vshll.u32 %v16714_v1, 16 }
 0x345   : > { %13043 = vmatpush3.bf16.msra.mxu1 %v13440_v9  ;;  %13024 = vmatprep.mubr.bf16.mxu0 %v11744_v58  ;;  %v16805_v9 = vsel %vm14007_vm13, %v11731_v8, %v9048_v45  ;;  %v8418_v63 = vrot.slane %v8416_v35, 4  ;;  %v8421_v16 = vrot.slane %v8419_v50, 5  ;;  %v8427_v18 = vrot.slane %v8425_v27, 5  ;;  %v8918_v8 = vld [vmem:[#allocation3 + $0xa8] sm:$0xe]  ;;  %v16856_v27 = vpop.f32.mrf.mxu0 }
 0x346   : > { %13044 = vmatprep.subr.bf16.mxu1 %v13441_v61  ;;  %v8404_v43 = vsel %vm13704_vm7, %v8399_v57, %v8403_v34  ;;  %v8431_v4 = vrot.slane %v8429_v39, 4  ;;  %13101 = vmatpush3.bf16.msra.mxu0 %v13451_v40  ;;  %v8414_v58 = vsel %vm13704_vm7, %v8409_v14, %v8413_v17  ;;  %v16820_v41 = vsel %vm14007_vm13, %v9050_v11, %v9051_v53  ;;  %v16848_v57 = vld [vmem:[#allocation3 + $0xb0] sm:$0x1]  ;;  %v13449_v50 = vld [vmem:[#allocation5 + $0x3d0] sm:$0xff]  }
 0x347   : > { %v11732_v25 = vrot.slane %v8917_v52, 9  ;;  %13102 = vmatprep.subr.bf16.mxu0 %v13453_v30  ;;  %v16824_v48 = vcombine.low %v8404_v43, %v8414_v58  ;;  %v11747_v40 = vcombine.low %v16805_v9, %v16820_v41  ;;  %v9055_v7 = vrot.slane %v16807_v26, 5 }
 0x348   : > { %12965 = vmatmul.mubr.bf16.gmra.mxu1 %v16652_v5  ;;  %v8422_v5 = vor.u32 %v8421_v16, %v8418_v63  ;;  %v8432_v6 = vor.u32 %v8431_v4, %v8427_v18  ;;  %v8437_v33 = vrot.slane %v8435_v15, 5  ;;  %v9058_v10 = vrot.slane %v16813_v31, 5  ;;  %v8919_v16 = vld [vmem:[#allocation3 + $0xb4] sm:$0xe] }
 0x349   : > { %12968 = vmatprep.mubr.bf16.mxu1 %v16697_v20  ;;  %13045 = vmatpush3.bf16.msra.mxu1 %v13441_v61  ;;  %v8440_v1 = vshrl.u32 %v8181_v0, 16  ;;  %v16834_v20 = vsel %vm14007_vm13, %v11732_v25, %v9055_v7  ;;  %v9057_v47 = vrot.slane %v9055_v7, 4  ;;  %v8443_v61 = vshll.u32 %v8181_v0, 16  ;;  %v16870_v25 = vld [vmem:[#allocation3 + $0xb8] sm:$0xf] }
 0x34a   : > { %13046 = vmatprep.subr.bf16.mxu1 %v13443_v36  ;;  %v8423_v54 = vrot.slane %v8422_v5, 4  ;;  %13103 = vmatpush3.bf16.msra.mxu0 %v13453_v30  ;;  %v8433_v34 = vrot.slane %v8432_v6, 4  ;;  %v8449_v32 = vshll.u32 %v16742_v12, 16  ;;  %v8453_v17 = vshrl.u32 %v16742_v12, 16  ;;  %v16846_v30 = vld [vmem:[#allocation3 + $0xac] sm:$0xf] }
 0x34b   : > { %v8442_v44 = vrot.slane %v8440_v1, 4  ;;  %v9059_v45 = vsel %vm14007_vm13, %v9057_v47, %v9058_v10  ;;  %v8445_v53 = vrot.slane %v8443_v61, 5  ;;  %v8459_v35 = vshll.u32 %v16748_v51, 16  ;;  %v13452_v10 = vld [vmem:[#allocation5 + $0x3c8] sm:$0xff]  }
 0x34c   : > { %13025 = vmatmul.mubr.bf16.gmra.mxu0 %v11745_v56  ;;  %v8428_v21 = vsel %vm13704_vm7, %v8423_v54, %v8427_v18  ;;  %v8438_v3 = vsel %vm13704_vm7, %v8433_v34, %v8437_v33  ;;  %v11748_v12 = vcombine.low %v16834_v20, %v9059_v45  ;;  %v8451_v46 = vrot.slane %v8449_v32, 5  ;;  %v8187_v18 = vld [vmem:[#allocation3 + $0x9c] sm:$0xf] }
 0x34d   : > { %13047 = vmatpush3.bf16.msra.mxu1 %v13443_v36  ;;  %13028 = vmatprep.mubr.bf16.mxu0 %v11746_v59  ;;  %v8455_v56 = vrot.slane %v8453_v17, 4  ;;  %v16858_v51 = vcombine.low %v8428_v21, %v8438_v3  ;;  %v8446_v39 = vor.u32 %v8445_v53, %v8442_v44  ;;  %v8461_v52 = vrot.slane %v8459_v35, 5  ;;  %v16876_v33 = vld [vmem:[#allocation3 + $0xbc] sm:$0x1] }
 0x34e   : > { %13048 = vmatprep.subr.bf16.mxu1 %v13446_v62  ;;  %v11733_v0 = vrot.slane %v8918_v8, 9  ;;  %v9062_v24 = vrot.slane %v16846_v30, 5  ;;  %v9065_v59 = vrot.slane %v16848_v57, 5  ;;  %v8464_v36 = vshrl.u32 %v8184_v37, 16  ;;  %v13454_v53 = vld [vmem:[#allocation5 + $0x3c0] sm:$0xff]  }
 0x34f   : > { %v8456_v38 = vor.u32 %v8455_v56, %v8451_v46  ;;  %v8447_v14 = vrot.slane %v8446_v39, 4  ;;  %v8467_v11 = vshll.u32 %v8184_v37, 16  ;;  %v8473_v63 = vshll.u32 %v16774_v13, 16  ;;  %v16898_v56 = vld [vmem:[#allocation3 + $0xc4] sm:$0xf] }
 0x350   : > { %12969 = vmatmul.mubr.bf16.gmra.mxu1 %v16726_v22  ;;  %v8477_v43 = vshrl.u32 %v16774_v13, 16  ;;  %v16868_v22 = vsel %vm14007_vm13, %v11733_v0, %v9062_v24  ;;  %v9064_v58 = vrot.slane %v9062_v24, 4  ;;  %v8466_v15 = vrot.slane %v8464_v36, 4 }
 0x351   : > { %12972 = vmatprep.mubr.bf16.mxu1 %v16750_v23  ;;  %13049 = vmatpush3.bf16.msra.mxu1 %v13446_v62  ;;  %v8457_v4 = vrot.slane %v8456_v38, 4  ;;  %v16872_v23 = vpop.f32.mrf.mxu0  ;;  %v8452_v5 = vsel %vm13704_vm7, %v8447_v14, %v8451_v46  ;;  %v8469_v7 = vrot.slane %v8467_v11, 5  ;;  %v8475_v6 = vrot.slane %v8473_v63, 5  ;;  %v8190_v38 = vld [vmem:[#allocation3 + $0xa8] sm:$0xf] }
 0x352   : > { %13050 = vmatprep.subr.bf16.mxu1 %v13449_v50  ;;  %v8479_v13 = vrot.slane %v8477_v43, 4  ;;  %v9066_v1 = vsel %vm14007_vm13, %v9064_v58, %v9065_v59  ;;  %v8483_v54 = vshll.u32 %v16785_v42, 16  ;;  %v11734_v20 = vrot.slane %v8919_v16, 9  ;;  %v8920_v42 = vld [vmem:[#allocation3 + $0xc0] sm:$0xe]  ;;  %v16915_v16 = vld [vmem:[#allocation5 + $0x478] sm:$0xff]  }
 0x353   : > { %v8462_v62 = vsel %vm13704_vm7, %v8457_v4, %v8461_v52  ;;  %v11749_v61 = vcombine.low %v16868_v22, %v9066_v1  ;;  %v8470_v37 = vor.u32 %v8469_v7, %v8466_v15  ;;  %v9069_v32 = vrot.slane %v16870_v25, 5  ;;  %v16891_v21 = vpop.f32.mrf.mxu0  ;;  %v9790_v1 = vld [vmem:[#allocation3 + $0x18] sm:$0xf] }
 0x354   : > { %13029 = vmatmul.mubr.bf16.gmra.mxu0 %v11747_v40  ;;  %v16886_v47 = vcombine.low %v8452_v5, %v8462_v62  ;;  %v8480_v34 = vor.u32 %v8479_v13, %v8475_v6  ;;  %v8485_v44 = vrot.slane %v8483_v54, 5  ;;  %v9072_v17 = vrot.slane %v16876_v33, 5 }
 0x355   : > { %13032 = vmatprep.mubr.bf16.mxu0 %v11748_v12  ;;  %v8488_v8 = vshrl.u32 %v8187_v18, 16  ;;  %13051 = vmatpush3.bf16.msra.mxu1 %v13449_v50  ;;  %v8471_v45 = vrot.slane %v8470_v37, 4  ;;  %v8491_v41 = vshll.u32 %v8187_v18, 16  ;;  %v8497_v40 = vshll.u32 %v16807_v26, 16 }
 0x356   : > { %v8481_v9 = vrot.slane %v8480_v34, 4  ;;  %13052 = vmatprep.subr.bf16.mxu1 %v13452_v10  ;;  %v9070_v35 = vsel %vm14007_vm13, %v11734_v20, %v9069_v32  ;;  %v9071_v3 = vrot.slane %v9069_v32, 4  ;;  %v8501_v46 = vshrl.u32 %v16807_v26, 16 }
 0x357   : > { %v8490_v12 = vrot.slane %v8488_v8, 4  ;;  %v8476_v50 = vsel %vm13704_vm7, %v8471_v45, %v8475_v6  ;;  %v8493_v52 = vrot.slane %v8491_v41, 5  ;;  %v8499_v0 = vrot.slane %v8497_v40, 5  ;;  %v8193_v45 = vld [vmem:[#allocation3 + $0xb4] sm:$0xf] }
 0x358   : > { %12973 = vmatmul.mubr.bf16.gmra.mxu1 %v16791_v55  ;;  %v8486_v39 = vsel %vm13704_vm7, %v8481_v9, %v8485_v44  ;;  %v16905_v55 = vld [vmem:[#allocation3 + $0xc8] sm:$0x1]  ;;  %v9073_v26 = vsel %vm14007_vm13, %v9071_v3, %v9072_v17  ;;  %v8503_v59 = vrot.slane %v8501_v46, 4  ;;  %v8507_v36 = vshll.u32 %v16813_v31, 16  ;;  %v16929_v44 = vld [vmem:[#allocation3 + $0x1c] sm:$0xf] }
 0x359   : > { %12976 = vmatprep.mubr.bf16.mxu1 %v16824_v48  ;;  %v16907_v24 = vcombine.low %v8476_v50, %v8486_v39  ;;  %13053 = vmatpush3.bf16.msra.mxu1 %v13452_v10  ;;  %v16912_v48 = vpop.f32.mrf.mxu0  ;;  %v11750_v14 = vcombine.low %v9070_v35, %v9073_v26  ;;  %v8494_v11 = vor.u32 %v8493_v52, %v8490_v12  ;;  %v11735_v63 = vrot.slane %v8920_v42, 9  ;;  %v16935_v42 = vld [vmem:[#allocation3 + $0x20] sm:$0x1]  ;;  %v16940_v12 = vpop.f32.mrf.mxu1 }
 0x35a   : > { %v9076_v43 = vrot.slane %v16898_v56, 5  ;;  %13054 = vmatprep.subr.bf16.mxu1 %v13454_v53  ;;  %v8504_v18 = vor.u32 %v8503_v59, %v8499_v0  ;;  %v8509_v4 = vrot.slane %v8507_v36, 5  ;;  %v9079_v22 = vrot.slane %v16905_v55, 5 }
 0x35b   : > { %v8512_v58 = vshrl.u32 %v8190_v38, 16  ;;  %v8495_v15 = vrot.slane %v8494_v11, 4  ;;  %v8515_v7 = vshll.u32 %v8190_v38, 16  ;;  %v8521_v10 = vshll.u32 %v16846_v30, 16  ;;  %v16922_v54 = vpop.f32.mrf.mxu0 }
 0x35c   : > { %13033 = vmatmul.mubr.bf16.gmra.mxu0 %v11749_v61  ;;  %v9077_v31 = vsel %vm14007_vm13, %v11735_v63, %v9076_v43  ;;  %v9078_v5 = vrot.slane %v9076_v43, 4  ;;  %v8505_v6 = vrot.slane %v8504_v18, 4  ;;  %v8525_v62 = vshrl.u32 %v16846_v30, 16  ;;  %v9793_v43 = vld [vmem:[#allocation3 + $0x24] sm:$0xf] }
 0x35d   : > { %13036 = vmatprep.mubr.bf16.mxu0 %v11750_v14  ;;  %v8514_v13 = vrot.slane %v8512_v58, 4  ;;  %13055 = vmatpush3.bf16.msra.mxu1 %v13454_v53  ;;  %v8500_v20 = vsel %vm13704_vm7, %v8495_v15, %v8499_v0  ;;  %v8517_v37 = vrot.slane %v8515_v7, 5  ;;  %v8531_v34 = vshll.u32 %v16848_v57, 16  ;;  %v16942_v46 = vpop.f32.mrf.mxu0  ;;  %v16950_v15 = vpop.f32.mrf.mxu1 }
 0x35e   : > { %v9080_v61 = vsel %vm14007_vm13, %v9078_v5, %v9079_v22  ;;  %13136 = vmatprep.subr.bf16.mxu1 %v16915_v16  ;;  %v8510_v30 = vsel %vm13704_vm7, %v8505_v6, %v8509_v4  ;;  %v8523_v17 = vrot.slane %v8521_v10, 5  ;;  %v8527_v8 = vrot.slane %v8525_v62, 4  ;;  %v16956_v10 = vld [vmem:[#allocation3 + $0x28] sm:$0xf] }
 0x35f   : > { %v11751_v32 = vcombine.low %v9077_v31, %v9080_v61  ;;  %v11708_v9 = vcombine.low %v8500_v20, %v8510_v30  ;;  %v8518_v41 = vor.u32 %v8517_v37, %v8514_v13  ;;  %v8533_v57 = vrot.slane %v8531_v34, 5  ;;  %v16952_v31 = vpop.f32.mrf.mxu0  ;;  %v16959_v61 = vld [vmem:[#allocation3 + $0x2c] sm:$0x1] }
 0x360   : > { %12977 = vmatmul.mubr.bf16.gmra.mxu1 %v16858_v51  ;;  %v9839_v40 = vshrl.u32 %v9790_v1, 16  ;;  %v8528_v53 = vor.u32 %v8527_v8, %v8523_v17  ;;  %v9842_v35 = vshll.u32 %v9790_v1, 16  ;;  %v9848_v3 = vshll.u32 %v16929_v44, 16  ;;  %v8196_v8 = vld [vmem:[#allocation3 + $0xc0] sm:$0xf] }
 0x361   : > { %12980 = vmatprep.mubr.bf16.mxu1 %v16886_v47  ;;  %v9852_v51 = vshrl.u32 %v16929_v44, 16  ;;  %v8519_v50 = vrot.slane %v8518_v41, 4  ;;  %v9858_v52 = vshll.u32 %v16935_v42, 16  ;;  %v8536_v0 = vshrl.u32 %v8193_v45, 16  ;;  %v16966_v41 = vpop.f32.mrf.mxu1 }
 0x362   : > { %v9841_v39 = vrot.slane %v9839_v40, 4  ;;  %v8529_v47 = vrot.slane %v8528_v53, 4  ;;  %v9844_v38 = vrot.slane %v9842_v35, 5  ;;  %v9850_v26 = vrot.slane %v9848_v3, 5 }
 0x363   : > { %v9854_v59 = vrot.slane %v9852_v51, 4  ;;  %v8524_v36 = vsel %vm13704_vm7, %v8519_v50, %v8523_v17  ;;  %v9860_v14 = vrot.slane %v9858_v52, 5  ;;  %v8538_v11 = vrot.slane %v8536_v0, 4 }
 0x364   : > { %13037 = vmatmul.mubr.bf16.gmra.mxu0 %v11751_v32  ;;  %v8539_v63 = vshll.u32 %v8193_v45, 16  ;;  %v8534_v18 = vsel %vm13704_vm7, %v8529_v47, %v8533_v57  ;;  %v9845_v4 = vor.u32 %v9844_v38, %v9841_v39  ;;  %v8545_v58 = vshll.u32 %v16870_v25, 16  ;;  %v16968_v57 = vpop.f32.mrf.mxu0 }
 0x365   : > { %v9855_v22 = vor.u32 %v9854_v59, %v9850_v26  ;;  %v11709_v5 = vcombine.low %v8524_v36, %v8534_v18  ;;  %v8549_v6 = vshrl.u32 %v16870_v25, 16  ;;  %v8555_v13 = vshll.u32 %v16876_v33, 16 }
 0x366   : > { %v8541_v7 = vrot.slane %v8539_v63, 5  ;;  %v9846_v62 = vrot.slane %v9845_v4, 4  ;;  %v8547_v20 = vrot.slane %v8545_v58, 5  ;;  %v9863_v37 = vshrl.u32 %v9793_v43, 16  ;;  %v16975_v63 = vpop.f32.mrf.mxu1 }
 0x367   : > { %v9856_v1 = vrot.slane %v9855_v22, 4  ;;  %v8551_v30 = vrot.slane %v8549_v6, 4  ;;  %v8557_v32 = vrot.slane %v8555_v13, 5  ;;  %v9866_v17 = vshll.u32 %v9793_v43, 16  ;;  %v16977_v43 = vpop.f32.mrf.mxu0 }
 0x368   : > { %12981 = vmatmul.mubr.bf16.gmra.mxu1 %v16907_v24  ;;  %v8542_v34 = vor.u32 %v8541_v7, %v8538_v11  ;;  %v9851_v25 = vsel %vm13704_vm7, %v9846_v62, %v9850_v26  ;;  %v9865_v45 = vrot.slane %v9863_v37, 4  ;;  %v9872_v24 = vshll.u32 %v16956_v10, 16  ;;  %v9796_v11 = vld [vmem:[#allocation3 + $0x30] sm:$0xf]  ;;  %v16982_v7 = vld [vmem:[#allocation3 + $0x34] sm:$0xf] }
 0x369   : > { %12984 = vmatprep.mubr.bf16.mxu1 %v11708_v9  ;;  %v9861_v33 = vsel %vm13704_vm7, %v9856_v1, %v9860_v14  ;;  %v8552_v53 = vor.u32 %v8551_v30, %v8547_v20  ;;  %v9868_v35 = vrot.slane %v9866_v17, 5  ;;  %v9876_v51 = vshrl.u32 %v16956_v10, 16  ;;  %v16987_v30 = vld [vmem:[#allocation3 + $0x38] sm:$0x1] }
 0x36a   : > { %v11784_v40 = vcombine.low %v9851_v25, %v9861_v33  ;;  %v8543_v9 = vrot.slane %v8542_v34, 4  ;;  %v9874_v3 = vrot.slane %v9872_v24, 5  ;;  %v9882_v50 = vshll.u32 %v16959_v61, 16  ;;  %v16992_v33 = vpop.f32.mrf.mxu0 }
 0x36b   : > { %v8560_v39 = vshrl.u32 %v8196_v8, 16  ;;  %v8553_v0 = vrot.slane %v8552_v53, 4  ;;  %v9869_v47 = vor.u32 %v9868_v35, %v9865_v45  ;;  %v8563_v38 = vshll.u32 %v8196_v8, 16 }
 0x36c   : > { %13104 = vmatprep.mubr.bf16.mxu0 %v11784_v40  ;;  %v8548_v52 = vsel %vm13704_vm7, %v8543_v9, %v8547_v20  ;;  %v9878_v26 = vrot.slane %v9876_v51, 4  ;;  %v9884_v59 = vrot.slane %v9882_v50, 5  ;;  %v8569_v14 = vshll.u32 %v16898_v56, 16  ;;  %v9799_v9 = vld [vmem:[#allocation3 + $0x3c] sm:$0xf] }
 0x36d   : > { %v8562_v36 = vrot.slane %v8560_v39, 4  ;;  %v8558_v18 = vsel %vm13704_vm7, %v8553_v0, %v8557_v32  ;;  %v9870_v4 = vrot.slane %v9869_v47, 4  ;;  %v8565_v22 = vrot.slane %v8563_v38, 5  ;;  %v16998_v50 = vld [vmem:[#allocation3 + $0x40] sm:$0xf] }
 0x36e   : > { %v8573_v58 = vshrl.u32 %v16898_v56, 16  ;;  %v11710_v6 = vcombine.low %v8548_v52, %v8558_v18  ;;  %v9879_v13 = vor.u32 %v9878_v26, %v9874_v3  ;;  %v8571_v62 = vrot.slane %v8569_v14, 5 }
 0x36f   : > { %v8579_v1 = vshll.u32 %v16905_v55, 16  ;;  %v9875_v20 = vsel %vm13704_vm7, %v9870_v4, %v9874_v3  ;;  %v8566_v37 = vor.u32 %v8565_v22, %v8562_v36  ;;  %v9887_v32 = vshrl.u32 %v9796_v11, 16  ;;  %v17002_v36 = vld [vmem:[#allocation3 + $0x44] sm:$0x1] }
 0x370   : > { %12985 = vmatmul.mubr.bf16.gmra.mxu1 %v11709_v5  ;;  %v8575_v34 = vrot.slane %v8573_v58, 4  ;;  %v9880_v17 = vrot.slane %v9879_v13, 4  ;;  %v9890_v56 = vshll.u32 %v9796_v11, 16  ;;  %v9896_v25 = vshll.u32 %v16982_v7, 16  ;;  %v16990_v5 = vpop.f32.mrf.mxu1  ;;  %v9802_v13 = vld [vmem:[#allocation3 + $0x48] sm:$0xf] }
 0x371   : > { %12988 = vmatprep.mubr.bf16.mxu1 %v11710_v6  ;;  %v8581_v8 = vrot.slane %v8579_v1, 5  ;;  %v8567_v45 = vrot.slane %v8566_v37, 4  ;;  %v9889_v24 = vrot.slane %v9887_v32, 4  ;;  %v9900_v40 = vshrl.u32 %v16982_v7, 16 }
 0x372   : > { %v8576_v55 = vor.u32 %v8575_v34, %v8571_v62  ;;  %v9885_v53 = vsel %vm13704_vm7, %v9880_v17, %v9884_v59  ;;  %v9892_v35 = vrot.slane %v9890_v56, 5  ;;  %v9898_v3 = vrot.slane %v9896_v25, 5  ;;  %v17004_v18 = vpop.f32.mrf.mxu1 }
 0x373   : > { %v9906_v51 = vshll.u32 %v16987_v30, 16  ;;  %v11785_v39 = vcombine.low %v9875_v20, %v9885_v53  ;;  %v8572_v52 = vsel %vm13704_vm7, %v8567_v45, %v8571_v62  ;;  %v9902_v47 = vrot.slane %v9900_v40, 4  ;;  %v17006_v59 = vpop.f32.mrf.mxu0  ;;  %v13455_v20 = vld [vmem:[#allocation3 + $0x18] sm:$0xff]   ;;  %v17013_v45 = vld [vmem:[#allocation3 + $0x4c] sm:$0xf] }
 0x374   : > { %v8577_v0 = vrot.slane %v8576_v55, 4  ;;  %v9893_v38 = vor.u32 %v9892_v35, %v9889_v24  ;;  %v9911_v14 = vshrl.u32 %v9799_v9, 16  ;;  %v9914_v11 = vshll.u32 %v9799_v9, 16  ;;  %v17021_v40 = vld [vmem:[#allocation3 + $0x50] sm:$0x1]  ;;  %v17023_v53 = vpop.f32.mrf.mxu1 }
 0x375   : > { %v9908_v26 = vrot.slane %v9906_v51, 5  ;;  %13105 = vmatmul.mubr.bf16.vlgmr.msra.gmra.mxu0 %v11785_v39  ;;  %v9903_v22 = vor.u32 %v9902_v47, %v9898_v3  ;;  %v9920_v58 = vshll.u32 %v16998_v50, 16  ;;  %v9924_v6 = vshrl.u32 %v16998_v50, 16  ;;  %v17025_v35 = vpop.f32.mrf.mxu0 }
 0x376   : > { %v8582_v4 = vsel %vm13704_vm7, %v8577_v0, %v8581_v8  ;;  %v9894_v1 = vrot.slane %v9893_v38, 4  ;;  %v9913_v37 = vrot.slane %v9911_v14, 4  ;;  %v9916_v34 = vrot.slane %v9914_v11, 5 }
 0x377   : > { %v11711_v62 = vcombine.low %v8572_v52, %v8582_v4  ;;  %v9904_v32 = vrot.slane %v9903_v22, 4  ;;  %v9922_v17 = vrot.slane %v9920_v58, 5  ;;  %v9926_v56 = vrot.slane %v9924_v6, 4  ;;  %v9805_v22 = vld [vmem:[#allocation3 + $0x54] sm:$0xf] }
 0x378   : > { %v9930_v25 = vshll.u32 %v17002_v36, 16  ;;  %v9899_v8 = vsel %vm13704_vm7, %v9894_v1, %v9898_v3  ;;  %v9917_v55 = vor.u32 %v9916_v34, %v9913_v37  ;;  %v17019_v24 = vadd.f32 %v16809_v19, %v16940_v12  ;;  %v17044_v1 = vpop.f32.mrf.mxu0 }
 0x379   : > { %12989 = vmatmul.mubr.bf16.gmra.mxu1 %v11711_v62  ;;  %v9935_v9 = vshrl.u32 %v9802_v13, 16  ;;  %v9909_v51 = vsel %vm13704_vm7, %v9904_v32, %v9908_v26  ;;  %v9927_v39 = vor.u32 %v9926_v56, %v9922_v17  ;;  %v9938_v0 = vshll.u32 %v9802_v13, 16  ;;  %v17040_v13 = vld [vmem:[#allocation3 + $0x58] sm:$0xf]  ;;  %v17042_v62 = vpop.f32.mrf.mxu1  ;;  %v13456_v56 = vld [vmem:[#allocation3 + $0x24] sm:$0xff]  }
 0x37a   : > { %13056 = vmatprep.mubr.bf16.mxu1 %v13455_v20  ;;  %v9932_v52 = vrot.slane %v9930_v25, 5  ;;  %v11786_v3 = vcombine.low %v9899_v8, %v9909_v51  ;;  %v9918_v47 = vrot.slane %v9917_v55, 4  ;;  %v9944_v19 = vshll.u32 %v17013_v45, 16  ;;  %v13460_v8 = vld [vmem:[#allocation5 + $0x470] sm:$0xff]   ;;  %v13458_v51 = vld [vmem:[#allocation3 + $0x30] sm:$0xff]  }
 0x37b   : > { %v9937_v38 = vrot.slane %v9935_v9, 4  ;;  %v9928_v12 = vrot.slane %v9927_v39, 4  ;;  %v9940_v14 = vrot.slane %v9938_v0, 5  ;;  %v9948_v11 = vshrl.u32 %v17013_v45, 16  ;;  %v9808_v0 = vld [vmem:[#allocation3 + $0x60] sm:$0xf] }
 0x37c   : > { %v9954_v4 = vshll.u32 %v17021_v40, 16  ;;  %13108 = vmatprep.mubr.bf16.mxu0 %v11786_v3  ;;  %v9946_v58 = vrot.slane %v9944_v19, 5  ;;  %v17034_v26 = vadd.f32 %v16830_v2, %v16950_v15  ;;  %v17038_v6 = vadd.f32 %v16856_v27, %v16966_v41  ;;  %v17050_v2 = vld [vmem:[#allocation3 + $0x5c] sm:$0x1]  ;;  %v17059_v19 = vld [vmem:[#allocation3 + $0x64] sm:$0xf] }
 0x37d   : > { %v9923_v20 = vsel %vm13704_vm7, %v9918_v47, %v9922_v17  ;;  %v9933_v37 = vsel %vm13704_vm7, %v9928_v12, %v9932_v52  ;;  %v9941_v34 = vor.u32 %v9940_v14, %v9937_v38  ;;  %v9950_v32 = vrot.slane %v9948_v11, 4  ;;  %v17063_v14 = vpop.f32.mrf.mxu0 }
 0x37e   : > { %18394 = vst [vmem:[#allocation26_spill] sm:$0xff] %v17038_v6  ;;  %v11787_v15 = vcombine.low %v9923_v20, %v9933_v37  ;;  %v9956_v27 = vrot.slane %v9954_v4, 5  ;;  %v9959_v41 = vshrl.u32 %v9805_v22, 16  ;;  %v9962_v25 = vshll.u32 %v9805_v22, 16 }
 0x37f   : > { %v9942_v55 = vrot.slane %v9941_v34, 4  ;;  %v9951_v9 = vor.u32 %v9950_v32, %v9946_v58  ;;  %v9968_v39 = vshll.u32 %v17040_v13, 16  ;;  %v9972_v17 = vshrl.u32 %v17040_v13, 16  ;;  %v17061_v12 = vpop.f32.mrf.mxu1  ;;  %v17068_v32 = vld [vmem:[#allocation3 + $0x68] sm:$0x1] }
 0x380   : > { %13109 = vmatmul.mubr.bf16.gmra.mxu0 %v11787_v15  ;;  %v9961_v52 = vrot.slane %v9959_v41, 4  ;;  %v9964_v3 = vrot.slane %v9962_v25, 5  ;;  %v9978_v47 = vshll.u32 %v17050_v2, 16  ;;  %v17057_v38 = vadd.f32 %v16891_v21, %v16990_v5  ;;  %v13463_v25 = vld [vmem:[#allocation5 + $0x468] sm:$0xff]  }
 0x381   : > { %13057 = vmatmul.mubr.bf16.vlgmr.msra.gmra.mxu1 %v13456_v56  ;;  %v9947_v11 = vsel %vm13704_vm7, %v9942_v55, %v9946_v58  ;;  %v9952_v4 = vrot.slane %v9951_v9, 4  ;;  %v9970_v22 = vrot.slane %v9968_v39, 5  ;;  %v9974_v20 = vrot.slane %v9972_v17, 4  ;;  %v13459_v9 = vld [vmem:[#allocation3 + $0x3c] sm:$0xff]   ;;  %v17074_v17 = vpop.f32.mrf.mxu1 }
 0x382   : > { %18395 = vst [vmem:[#allocation24_spill] sm:$0xff] %v17057_v38  ;;  %13060 = vmatprep.mubr.bf16.mxu1 %v13458_v51  ;;  %13137 = vmatpush3.bf16.msra.mxu1 %v16915_v16  ;;  %v9965_v37 = vor.u32 %v9964_v3, %v9961_v52  ;;  %v9980_v34 = vrot.slane %v9978_v47, 5  ;;  %v9983_v21 = vshrl.u32 %v9808_v0, 16  ;;  %v9986_v5 = vshll.u32 %v9808_v0, 16 }
 0x383   : > { %13138 = vmatprep.subr.bf16.mxu1 %v13460_v8  ;;  %v9957_v15 = vsel %vm13704_vm7, %v9952_v4, %v9956_v27  ;;  %v9975_v56 = vor.u32 %v9974_v20, %v9970_v22  ;;  %v9992_v41 = vshll.u32 %v17059_v19, 16  ;;  %v9996_v58 = vshrl.u32 %v17059_v19, 16  ;;  %v9811_v4 = vld [vmem:[#allocation3 + $0x6c] sm:$0xf] }
 0x384   : > { %v11788_v55 = vcombine.low %v9947_v11, %v9957_v15  ;;  %v9966_v16 = vrot.slane %v9965_v37, 4  ;;  %v9985_v51 = vrot.slane %v9983_v21, 4  ;;  %v9988_v39 = vrot.slane %v9986_v5, 5  ;;  %v17076_v52 = vpop.f32.mrf.mxu0  ;;  %v17087_v21 = vld [vmem:[#allocation3 + $0x70] sm:$0xf]  ;;  %v13466_v15 = vld [vmem:[#allocation5 + $0x460] sm:$0xff]  }
 0x385   : > { %v9976_v0 = vrot.slane %v9975_v56, 4  ;;  %v9994_v3 = vrot.slane %v9992_v41, 5  ;;  %v9998_v47 = vrot.slane %v9996_v58, 4  ;;  %v10002_v27 = vshll.u32 %v17068_v32, 16  ;;  %18398 = vst [vmem:[#allocation43_spill] sm:$0xff] %v17087_v21 }
 0x386   : > { %13139 = vmatpush3.bf16.msra.mxu1 %v13460_v8  ;;  %13112 = vmatprep.mubr.bf16.mxu0 %v11788_v55  ;;  %v9989_v20 = vor.u32 %v9988_v39, %v9985_v51  ;;  %v17081_v11 = vadd.f32 %v16912_v48, %v17004_v18  ;;  %v17085_v37 = vadd.f32 %v16922_v54, %v17023_v53  ;;  %v17089_v5 = vld [vmem:[#allocation3 + $0x74] sm:$0x1]  ;;  %v17091_v56 = vpop.f32.mrf.mxu0  ;;  %v13461_v18 = vld [vmem:[#allocation3 + $0x48] sm:$0xff]   ;;  %v10007_v53 = vshrl.u32 %v9811_v4, 16  ;;  %v9814_v39 = vld [vmem:[#allocation3 + $0x78] sm:$0xf] }
 0x387   : > { %18399 = vst [vmem:[#allocation39_spill] sm:$0xff] %v17089_v5  ;;  %v9971_v8 = vsel %vm13704_vm7, %v9966_v16, %v9970_v22  ;;  %v9981_v41 = vsel %vm13704_vm7, %v9976_v0, %v9980_v34  ;;  %v9999_v58 = vor.u32 %v9998_v47, %v9994_v3  ;;  %v10004_v48 = vrot.slane %v10002_v27, 5  ;;  %13140 = vmatprep.subr.bf16.mxu1 %v13463_v25  ;;  %v17100_v34 = vld [vmem:[#allocation3 + $0x7c] sm:$0xf] }
 0x388   : > { %18396 = vst [vmem:[#allocation38_spill] sm:$0xff] %v17081_v11  ;;  %18397 = vst [vmem:[#allocation33_spill] sm:$0xff] %v17085_v37  ;;  %v11789_v55 = vcombine.low %v9971_v8, %v9981_v41  ;;  %v9990_v54 = vrot.slane %v9989_v20, 4  ;;  %v10010_v51 = vshll.u32 %v9811_v4, 16  ;;  %v12779_v37 = vpop.f32.mrf.mxu1  ;;  %v10016_v38 = vshll.u32 %v17087_v21, 16  ;;  %v17110_v20 = vpop.f32.mrf.mxu0  ;;  %v13469_v8 = vld [vmem:[#allocation5 + $0x458] sm:$0xff]  }
 0x389   : > { %13061 = vmatmul.mubr.bf16.gmra.mxu1 %v13459_v9  ;;  %v10000_v11 = vrot.slane %v9999_v58, 4  ;;  %v10020_v22 = vshrl.u32 %v17087_v21, 16  ;;  %v10026_v16 = vshll.u32 %v17089_v5, 16  ;;  %v10009_v0 = vrot.slane %v10007_v53, 4  ;;  %v17108_v4 = vld [vmem:[#allocation3 + $0x80] sm:$0x1] }
 0x38a   : > { %13064 = vmatprep.mubr.bf16.mxu1 %v13461_v18  ;;  %13141 = vmatpush3.bf16.msra.mxu1 %v13463_v25  ;;  %v9995_v9 = vsel %vm13704_vm7, %v9990_v54, %v9994_v3  ;;  %v10012_v47 = vrot.slane %v10010_v51, 5  ;;  %v17106_v27 = vadd.f32 %v16952_v31, %v17061_v12  ;;  %18401 = vst [vmem:[#allocation17_spill] sm:$0xff] %v17108_v4  ;;  %v10018_v25 = vrot.slane %v10016_v38, 5  ;;  %v6886_v51 = vpop.f32.mrf.mxu1  ;;  %v13462_v31 = vld [vmem:[#allocation3 + $0x54] sm:$0xff]   ;;  %v13464_v21 = vld [vmem:[#allocation3 + $0x60] sm:$0xff]  }
 0x38b   : > { %13113 = vmatmul.mubr.bf16.gmra.mxu0 %v11789_v55  ;;  %13142 = vmatprep.subr.bf16.mxu1 %v13466_v15  ;;  %v10005_v41 = vsel %vm13704_vm7, %v10000_v11, %v10004_v48  ;;  %v10022_v58 = vrot.slane %v10020_v22, 4  ;;  %v10028_v18 = vrot.slane %v10026_v16, 5  ;;  %v10031_v54 = vshrl.u32 %v9814_v39, 16  ;;  %v17121_v16 = vpop.f32.mrf.mxu0 }
 0x38c   : > { %18400 = vst [vmem:[#allocation44_spill] sm:$0xff] %v17106_v27  ;;  %v11790_v55 = vcombine.low %v9995_v9, %v10005_v41  ;;  %v10013_v3 = vor.u32 %v10012_v47, %v10009_v0  ;;  %v10034_v53 = vshll.u32 %v9814_v39, 16  ;;  %v10040_v12 = vshll.u32 %v17100_v34, 16  ;;  %v9817_v39 = vld [vmem:[#allocation3 + $0x84] sm:$0xf]  ;;  %v13472_v9 = vld [vmem:[#allocation5 + $0x450] sm:$0xff]  }
 0x38d   : > { %v10023_v5 = vor.u32 %v10022_v58, %v10018_v25  ;;  %v10044_v27 = vshrl.u32 %v17100_v34, 16  ;;  %v10050_v6 = vshll.u32 %v17108_v4, 16  ;;  %v10033_v38 = vrot.slane %v10031_v54, 4  ;;  %v17123_v4 = vld [vmem:[#allocation3 + $0x88] sm:$0xf] }
 0x38e   : > { %13143 = vmatpush3.bf16.msra.mxu1 %v13466_v15  ;;  %13116 = vmatprep.mubr.bf16.mxu0 %v11790_v55  ;;  %v10014_v11 = vrot.slane %v10013_v3, 4  ;;  %v10036_v48 = vrot.slane %v10034_v53, 5  ;;  %v17119_v22 = vadd.f32 %v16968_v57, %v17074_v17  ;;  %v10042_v47 = vrot.slane %v10040_v12, 5  ;;  %18403 = vst [vmem:[#allocation16_spill] sm:$0xff] %v17123_v4  ;;  %v17133_v17 = vld [vmem:[#allocation3 + $0x8c] sm:$0x1] }
 0x38f   : > { %13144 = vmatprep.subr.bf16.mxu1 %v13469_v8  ;;  %v10024_v0 = vrot.slane %v10023_v5, 4  ;;  %v10046_v41 = vrot.slane %v10044_v27, 4  ;;  %v10052_v58 = vrot.slane %v10050_v6, 5  ;;  %v17128_v3 = vadd.f32 %v16977_v43, %v12779_v37  ;;  %18406 = vst [vmem:[#allocation40_spill] sm:$0xff] %v17133_v17  ;;  %v9820_v37 = vld [vmem:[#allocation3 + $0x90] sm:$0xf] }
 0x390   : > { %18402 = vst [vmem:[#allocation34_spill] sm:$0xff] %v17119_v22  ;;  %v10019_v15 = vsel %vm13704_vm7, %v10014_v11, %v10018_v25  ;;  %v10037_v55 = vor.u32 %v10036_v48, %v10033_v38  ;;  %v17131_v57 = vadd.f32 %v16992_v33, %v6886_v51  ;;  %v12782_v54 = vpop.f32.mrf.mxu1  ;;  %v10055_v27 = vshrl.u32 %v9817_v39, 16  ;;  %v13475_v11 = vld [vmem:[#allocation5 + $0x448] sm:$0xff]  }
 0x391   : > { %13065 = vmatmul.mubr.bf16.gmra.mxu1 %v13462_v31  ;;  %18404 = vst [vmem:[#allocation36_spill] sm:$0xff] %v17128_v3  ;;  %v10029_v5 = vsel %vm13704_vm7, %v10024_v0, %v10028_v18  ;;  %v10047_v6 = vor.u32 %v10046_v41, %v10042_v47  ;;  %v10058_v53 = vshll.u32 %v9817_v39, 16  ;;  %v10064_v12 = vshll.u32 %v17123_v4, 16  ;;  %v17139_v51 = vpop.f32.mrf.mxu0  ;;  %v17142_v0 = vld [vmem:[#allocation3 + $0x94] sm:$0xf] }
 0x392   : > { %18405 = vst [vmem:[#allocation18_spill] sm:$0xff] %v17131_v57  ;;  %13068 = vmatprep.mubr.bf16.mxu1 %v13464_v21  ;;  %13145 = vmatpush3.bf16.msra.mxu1 %v13469_v8  ;;  %v11791_v25 = vcombine.low %v10019_v15, %v10029_v5  ;;  %v10038_v31 = vrot.slane %v10037_v55, 4  ;;  %v10068_v43 = vshrl.u32 %v17123_v4, 16  ;;  %v6899_v33 = vpop.f32.mrf.mxu1  ;;  %v10057_v48 = vrot.slane %v10055_v27, 4  ;;  %v17149_v55 = vld [vmem:[#allocation3 + $0x98] sm:$0x1] }
 0x393   : > { %13146 = vmatprep.subr.bf16.mxu1 %v13472_v9  ;;  %v10048_v38 = vrot.slane %v10047_v6, 4  ;;  %v10060_v18 = vrot.slane %v10058_v53, 5  ;;  %v10074_v21 = vshll.u32 %v17133_v17, 16  ;;  %v10066_v39 = vrot.slane %v10064_v12, 5  ;;  %18408 = vst [vmem:[#allocation27_spill] sm:$0xff] %v17149_v55  ;;  %v17151_v57 = vpop.f32.mrf.mxu0 }
 0x394   : > { %13117 = vmatmul.mubr.bf16.gmra.mxu0 %v11791_v25  ;;  %v10043_v8 = vsel %vm13704_vm7, %v10038_v31, %v10042_v47  ;;  %v10070_v41 = vrot.slane %v10068_v43, 4  ;;  %v17147_v15 = vadd.f32 %v17006_v59, %v12782_v54  ;;  %v12783_v5 = vpop.f32.mrf.mxu1  ;;  %v10079_v3 = vshrl.u32 %v9820_v37, 16  ;;  %v13465_v47 = vld [vmem:[#allocation3 + $0x6c] sm:$0xff]   ;;  %v13467_v59 = vld [vmem:[#allocation3 + $0x78] sm:$0xff]  }
 0x395   : > { %v10053_v6 = vsel %vm13704_vm7, %v10048_v38, %v10052_v58  ;;  %v10061_v27 = vor.u32 %v10060_v18, %v10057_v48  ;;  %v10076_v53 = vrot.slane %v10074_v21, 5  ;;  %v10082_v31 = vshll.u32 %v9820_v37, 16  ;;  %v17156_v54 = vpop.f32.mrf.mxu0  ;;  %v13478_v43 = vld [vmem:[#allocation5 + $0x440] sm:$0xff]  }
 0x396   : > { %18407 = vst [vmem:[#allocation20_spill] sm:$0xff] %v17147_v15  ;;  %13147 = vmatpush3.bf16.msra.mxu1 %v13472_v9  ;;  %v11792_v25 = vcombine.low %v10043_v8, %v10053_v6  ;;  %v10071_v22 = vor.u32 %v10070_v41, %v10066_v39  ;;  %v10088_v12 = vshll.u32 %v17142_v0, 16  ;;  %v10081_v17 = vrot.slane %v10079_v3, 4  ;;  %v6902_v38 = vpop.f32.mrf.mxu1  ;;  %v9823_v48 = vld [vmem:[#allocation3 + $0x9c] sm:$0xf] }
 0x397   : > { %13148 = vmatprep.subr.bf16.mxu1 %v13475_v11  ;;  %v10062_v15 = vrot.slane %v10061_v27, 4  ;;  %v10092_v4 = vshrl.u32 %v17142_v0, 16  ;;  %v10098_v58 = vshll.u32 %v17149_v55, 16  ;;  %v10084_v18 = vrot.slane %v10082_v31, 5  ;;  %v17163_v8 = vld [vmem:[#allocation3 + $0xa0] sm:$0xf]  ;;  %v17165_v41 = vpop.f32.mrf.mxu0 }
 0x398   : > { %13120 = vmatprep.mubr.bf16.mxu0 %v11792_v25  ;;  %v10072_v9 = vrot.slane %v10071_v22, 4  ;;  %v10090_v37 = vrot.slane %v10088_v12, 5  ;;  %v17161_v21 = vadd.f32 %v17025_v35, %v6899_v33  ;;  %18410 = vst [vmem:[#allocation22_spill] sm:$0xff] %v17163_v8  ;;  %v17170_v55 = vadd.f32 %v17044_v1, %v12783_v5  ;;  %v17172_v22 = vld [vmem:[#allocation3 + $0xa4] sm:$0x1] }
 0x399   : > { %13069 = vmatmul.mubr.bf16.gmra.mxu1 %v13465_v47  ;;  %v10067_v3 = vsel %vm13704_vm7, %v10062_v15, %v10066_v39  ;;  %v10094_v6 = vrot.slane %v10092_v4, 4  ;;  %v10100_v27 = vrot.slane %v10098_v58, 5  ;;  %18412 = vst [vmem:[#allocation23_spill] sm:$0xff] %v17172_v22  ;;  %v10085_v33 = vor.u32 %v10084_v18, %v10081_v17  ;;  %v9826_v12 = vld [vmem:[#allocation3 + $0xa8] sm:$0xf] }
 0x39a   : > { %18409 = vst [vmem:[#allocation32_spill] sm:$0xff] %v17161_v21  ;;  %13072 = vmatprep.mubr.bf16.mxu1 %v13467_v59  ;;  %18411 = vst [vmem:[#allocation30_spill] sm:$0xff] %v17170_v55  ;;  %13149 = vmatpush3.bf16.msra.mxu1 %v13475_v11  ;;  %v10077_v35 = vsel %vm13704_vm7, %v10072_v9, %v10076_v53  ;;  %v17177_v25 = vadd.f32 %v17063_v14, %v6902_v38  ;;  %v10103_v47 = vshrl.u32 %v9823_v48, 16  ;;  %v17184_v58 = vld [vmem:[#allocation3 + $0xac] sm:$0xf] }
 0x39b   : > { %13150 = vmatprep.subr.bf16.mxu1 %v13478_v43  ;;  %v11793_v31 = vcombine.low %v10067_v3, %v10077_v35  ;;  %v10095_v39 = vor.u32 %v10094_v6, %v10090_v37  ;;  %v10106_v4 = vshll.u32 %v9823_v48, 16  ;;  %v10112_v15 = vshll.u32 %v17163_v8, 16  ;;  %v17180_v1 = vpop.f32.mrf.mxu0 }
 0x39c   : > { %18413 = vst [vmem:[#allocation19_spill] sm:$0xff] %v17177_v25  ;;  %v10086_v5 = vrot.slane %v10085_v33, 4  ;;  %v10105_v59 = vrot.slane %v10103_v47, 4  ;;  %v10116_v11 = vshrl.u32 %v17163_v8, 16  ;;  %v10122_v53 = vshll.u32 %v17172_v22, 16  ;;  %v12786_v17 = vpop.f32.mrf.mxu1  ;;  %v13468_v33 = vld [vmem:[#allocation3 + $0x84] sm:$0xff]  }
 0x39d   : > { %13121 = vmatmul.mubr.bf16.gmra.mxu0 %v11793_v31  ;;  %v10096_v14 = vrot.slane %v10095_v39, 4  ;;  %v10108_v38 = vrot.slane %v10106_v4, 5  ;;  %v10114_v9 = vrot.slane %v10112_v15, 5  ;;  %v17187_v48 = vadd.f32 %v17076_v52, %v12786_v17  ;;  %v17189_v18 = vpop.f32.mrf.mxu0  ;;  %v17193_v47 = vld [vmem:[#allocation3 + $0xb0] sm:$0x1] }
 0x39e   : > { %13151 = vmatpush3.bf16.msra.mxu1 %v13478_v43  ;;  %v10091_v3 = vsel %vm13704_vm7, %v10086_v5, %v10090_v37  ;;  %v10118_v6 = vrot.slane %v10116_v11, 4  ;;  %v10124_v35 = vrot.slane %v10122_v53, 5  ;;  %18415 = vst [vmem:[#allocation41_spill] sm:$0xff] %v17193_v47  ;;  %v10127_v25 = vshrl.u32 %v9826_v12, 16  ;;  %v6915_v55 = vpop.f32.mrf.mxu1  ;;  %v13470_v15 = vld [vmem:[#allocation3 + $0x90] sm:$0xff]  }
 0x39f   : > { %18414 = vst [vmem:[#allocation31_spill] sm:$0xff] %v17187_v48  ;;  %v10101_v31 = vsel %vm13704_vm7, %v10096_v14, %v10100_v27  ;;  %v10109_v39 = vor.u32 %v10108_v38, %v10105_v59  ;;  %v10130_v4 = vshll.u32 %v9826_v12, 16  ;;  %v10136_v52 = vshll.u32 %v17184_v58, 16  ;;  %v17198_v17 = vpop.f32.mrf.mxu0  ;;  %v9829_v27 = vld [vmem:[#allocation3 + $0xb4] sm:$0xf] }
 0x3a0   : > { %v11794_v43 = vcombine.low %v10091_v3, %v10101_v31  ;;  %v10119_v48 = vor.u32 %v10118_v6, %v10114_v9  ;;  %v10129_v37 = vrot.slane %v10127_v25, 4  ;;  %v10140_v5 = vshrl.u32 %v17184_v58, 16  ;;  %v12787_v11 = vpop.f32.mrf.mxu1  ;;  %v17210_v6 = vld [vmem:[#allocation3 + $0xb8] sm:$0xf] }
 0x3a1   : > { %13073 = vmatmul.mubr.bf16.gmra.mxu1 %v13468_v33  ;;  %v10110_v53 = vrot.slane %v10109_v39, 4  ;;  %v10132_v21 = vrot.slane %v10130_v4, 5  ;;  %v10138_v22 = vrot.slane %v10136_v52, 5  ;;  %v10146_v8 = vshll.u32 %v17193_v47, 16  ;;  %v17202_v12 = vpop.f32.mrf.mxu0  ;;  %18418 = vst [vmem:[#allocation25_spill] sm:$0xff] %v17210_v6 }
 0x3a2   : > { %13076 = vmatprep.mubr.bf16.mxu1 %v13470_v15  ;;  %13124 = vmatprep.mubr.bf16.mxu0 %v11794_v43  ;;  %v10120_v59 = vrot.slane %v10119_v48, 4  ;;  %v10142_v14 = vrot.slane %v10140_v5, 4  ;;  %v17205_v38 = vadd.f32 %v17091_v56, %v6915_v55  ;;  %v17208_v25 = vadd.f32 %v17110_v20, %v12787_v11  ;;  %v6918_v3 = vpop.f32.mrf.mxu1  ;;  %v17217_v52 = vld [vmem:[#allocation3 + $0xbc] sm:$0x1] }
 0x3a3   : > { %v10115_v33 = vsel %vm13704_vm7, %v10110_v53, %v10114_v9  ;;  %v10133_v31 = vor.u32 %v10132_v21, %v10129_v37  ;;  %v10148_v39 = vrot.slane %v10146_v8, 5  ;;  %v17215_v4 = vadd.f32 %v17121_v16, %v6918_v3  ;;  %18420 = vst [vmem:[#allocation28_spill] sm:$0xff] %v17217_v52  ;;  %v17219_v48 = vpop.f32.mrf.mxu0  ;;  %v13471_v8 = vld [vmem:[#allocation3 + $0x9c] sm:$0xff]  }
 0x3a4   : > { %18416 = vst [vmem:[#allocation42_spill] sm:$0xff] %v17205_v38  ;;  %18417 = vst [vmem:[#allocation21_spill] sm:$0xff] %v17208_v25  ;;  %v10125_v56 = vsel %vm13704_vm7, %v10120_v59, %v10124_v35  ;;  %v10143_v20 = vor.u32 %v10142_v14, %v10138_v22  ;;  %v10151_v55 = vshrl.u32 %v9829_v27, 16  ;;  %v10154_v15 = vshll.u32 %v9829_v27, 16  ;;  %v9832_v9 = vld [vmem:[#allocation3 + $0xc0] sm:$0xf] }
 0x3a5   : > { %18419 = vst [vmem:[#allocation37_spill] sm:$0xff] %v17215_v4  ;;  %v11795_v43 = vcombine.low %v10115_v33, %v10125_v56  ;;  %v10134_v5 = vrot.slane %v10133_v31, 4  ;;  %v10160_v11 = vshll.u32 %v17210_v6, 16  ;;  %v10164_v21 = vshrl.u32 %v17210_v6, 16  ;;  %v17225_v16 = vpop.f32.mrf.mxu0  ;;  %v17228_v35 = vld [vmem:[#allocation3 + $0xc4] sm:$0xf] }
 0x3a6   : > { %v10144_v37 = vrot.slane %v10143_v20, 4  ;;  %v10153_v53 = vrot.slane %v10151_v55, 4  ;;  %v10156_v3 = vrot.slane %v10154_v15, 5  ;;  %v10170_v4 = vshll.u32 %v17217_v52, 16  ;;  %v12790_v25 = vpop.f32.mrf.mxu1  ;;  %v17235_v31 = vld [vmem:[#allocation3 + $0xc8] sm:$0x1] }
 0x3a7   : > { %13125 = vmatmul.mubr.bf16.gmra.mxu0 %v11795_v43  ;;  %v10139_v27 = vsel %vm13704_vm7, %v10134_v5, %v10138_v22  ;;  %v10162_v59 = vrot.slane %v10160_v11, 5  ;;  %v10166_v14 = vrot.slane %v10164_v21, 4  ;;  %v17233_v33 = vadd.f32 %v17139_v51, %v12790_v25  ;;  %v13473_v56 = vld [vmem:[#allocation3 + $0xa8] sm:$0xff]   ;;  %v17237_v20 = vpop.f32.mrf.mxu0 }
 0x3a8   : > { %v10149_v55 = vsel %vm13704_vm7, %v10144_v37, %v10148_v39  ;;  %v10157_v15 = vor.u32 %v10156_v3, %v10153_v53  ;;  %v10172_v38 = vrot.slane %v10170_v4, 5  ;;  %v10175_v43 = vshrl.u32 %v9832_v9, 16  ;;  %v6931_v52 = vpop.f32.mrf.mxu1  ;;  %v773_v37 = vld [vmem:[#allocation3 + $0xcc] sm:$0x1] }
 0x3a9   : > { %18421 = vst [vmem:[#allocation29_spill] sm:$0xff] %v17233_v33  ;;  %13077 = vmatmul.mubr.bf16.gmra.mxu1 %v13471_v8  ;;  %v11796_v6 = vcombine.low %v10139_v27, %v10149_v55  ;;  %v10167_v22 = vor.u32 %v10166_v14, %v10162_v59  ;;  %v10178_v5 = vshll.u32 %v9832_v9, 16  ;;  %v10184_v11 = vshll.u32 %v17228_v35, 16  ;;  %v17242_v51 = vpop.f32.mrf.mxu0 }
 0x3aa   : > { %13080 = vmatprep.mubr.bf16.mxu1 %v13473_v56  ;;  %v10158_v25 = vrot.slane %v10157_v15, 4  ;;  %v10177_v21 = vrot.slane %v10175_v43, 4  ;;  %v10188_v33 = vshrl.u32 %v17228_v35, 16  ;;  %v10194_v47 = vshll.u32 %v17235_v31, 16  ;;  %v12791_v39 = vpop.f32.mrf.mxu1  ;;  %v828_v15 = vld [vmem:[#allocation3 + $0xd4] sm:$0x1] }
 0x3ab   : > { %13128 = vmatprep.mubr.bf16.mxu0 %v11796_v6  ;;  %v10168_v4 = vrot.slane %v10167_v22, 4  ;;  %v10180_v8 = vrot.slane %v10178_v5, 5  ;;  %v10186_v53 = vrot.slane %v10184_v11, 5  ;;  %v17247_v3 = vadd.f32 %v17151_v57, %v6931_v52  ;;  %v17249_v9 = vpop.f32.mrf.mxu0  ;;  %v17265_v5 = vld [vmem:[#allocation3 + $0xd0] sm:$0xf] }
 0x3ac   : > { %v10163_v27 = vsel %vm13704_vm7, %v10158_v25, %v10162_v59  ;;  %v10190_v14 = vrot.slane %v10188_v33, 4  ;;  %v17254_v56 = vadd.f32 %v17156_v54, %v12791_v39  ;;  %v6934_v55 = vpop.f32.mrf.mxu1  ;;  %v774_v57 = vsel %vm15323_vm15, 0, %v773_v37  ;;  %v13474_v25 = vld [vmem:[#allocation3 + $0xb4] sm:$0xff]   ;;  %v13476_v37 = vld [vmem:[#allocation3 + $0xc0] sm:$0xff]  }
 0x3ad   : > { %v10173_v6 = vsel %vm13704_vm7, %v10168_v4, %v10172_v38  ;;  %v10181_v43 = vor.u32 %v10180_v8, %v10177_v21  ;;  %v17259_v22 = vadd.f32 %v17165_v41, %v6934_v55  ;;  %v17263_v52 = vpop.f32.mrf.mxu0  ;;  %v17269_v54 = vadd.f32 %v16872_v23, %v16975_v63  ;;  %775 = vst [vmem:[#allocation3 + $0xcc] sm:$0x1] %v774_v57  ;;  %v10544_v38 = vld [vmem:[#allocation3 + $0x18] sm:$0xe] }
 0x3ae   : > { %v11797_v59 = vcombine.low %v10163_v27, %v10173_v6  ;;  %v10191_v33 = vor.u32 %v10190_v14, %v10186_v53  ;;  %v12794_v11 = vpop.f32.mrf.mxu1  ;;  %v10610_v41 = vrot.slane %v16929_v44, 5  ;;  %v10196_v39 = vrot.slane %v10194_v47, 5  ;;  %v10545_v6 = vld [vmem:[#allocation3 + $0x24] sm:$0xe] }
 0x3af   : > { %18422 = vst [vmem:[#allocation35_spill] sm:$0xff] %v17259_v22  ;;  %v10182_v21 = vrot.slane %v10181_v43, 4  ;;  %v17273_v28 = vadd.f32 %v17180_v1, %v12794_v11  ;;  %v829_v4 = vsel %vm15353_vm0, 0, %v828_v15  ;;  %v17277_v8 = vpop.f32.mrf.mxu0  ;;  %v10613_v14 = vrot.slane %v16935_v42, 5 }
 0x3b0   : > { %13129 = vmatmul.mubr.bf16.gmra.mxu0 %v11797_v59  ;;  %v10192_v23 = vrot.slane %v10191_v33, 4  ;;  %v6947_v63 = vpop.f32.mrf.mxu1  ;;  %v10612_v27 = vrot.slane %v10610_v41, 4  ;;  %830 = vst [vmem:[#allocation3 + $0xd4] sm:$0x1] %v829_v4  ;;  %v10208_v44 = vshll.u32 %v17265_v5, 16  ;;  %v11808_v29 = vrot.slane %v10544_v38, 9 }
 0x3b1   : > { %18423 = vst [vmem:[#allocation45_spill] sm:$0xff] %v17273_v28  ;;  %13081 = vmatmul.mubr.bf16.gmra.mxu1 %v13474_v25  ;;  %v10187_v1 = vsel %vm13704_vm7, %v10182_v21, %v10186_v53  ;;  %v17284_v47 = vadd.f32 %v17189_v18, %v6947_v63  ;;  %v10212_v55 = vshrl.u32 %v17265_v5, 16  ;;  %v17287_v15 = vpop.f32.mrf.mxu0  ;;  %v10617_v53 = vrot.slane %v16956_v10, 5  ;;  %v10546_v10 = vld [vmem:[#allocation3 + $0x30] sm:$0xe]  ;;  %v18445_v28 = vld [vmem:[#allocation25_spill] sm:$0xff] }
 0x3b2   : > { %13084 = vmatprep.mubr.bf16.mxu1 %v13476_v37  ;;  %v10197_v43 = vsel %vm13704_vm7, %v10192_v23, %v10196_v39  ;;  %v12795_v42 = vpop.f32.mrf.mxu1  ;;  %v10614_v57 = vsel %vm14007_vm13, %v10612_v27, %v10613_v14  ;;  %v17293_v59 = vrot.slane %v10208_v44, 5  ;;  %v17298_v18 = vadd.f32 %v16942_v46, %v17042_v62 }
 0x3b3   : > { %18424 = vst [vmem:[#allocation46_spill] sm:$0xff] %v17284_v47  ;;  %v11798_v33 = vcombine.low %v10187_v1, %v10197_v43  ;;  %v17301_v11 = vadd.f32 %v17198_v17, %v12795_v42  ;;  %v10214_v25 = vrot.slane %v10212_v55, 4  ;;  %v17303_v38 = vpop.f32.mrf.mxu0  ;;  %v10611_v39 = vsel %vm14007_vm13, %v11808_v29, %v10610_v41 }
 0x3b4   : > { %v6950_v21 = vpop.f32.mrf.mxu1  ;;  %v11809_v37 = vrot.slane %v10545_v6, 9  ;;  %v10619_v4 = vrot.slane %v10617_v53, 4  ;;  %v10620_v23 = vrot.slane %v16959_v61, 5  ;;  %v13477_v62 = vld [vmem:[#allocation3 + $0xcc] sm:$0xff]   ;;  %v11824_v63 = vcombine.low %v10611_v39, %v10614_v57 }
 0x3b5   : > { %18425 = vst [vmem:[#allocation47_spill] sm:$0xff] %v17301_v11  ;;  %13132 = vmatprep.mubr.bf16.mxu0 %v11798_v33  ;;  %v17309_v46 = vadd.f32 %v17202_v12, %v6950_v21  ;;  %v9835_v17 = vld [vmem:[#allocation3 + $0xcc] sm:$0xf]  ;;  %v10215_v27 = vor.u32 %v10214_v25, %v17293_v59  ;;  %v17312_v14 = vpop.f32.mrf.mxu0  ;;  %v10624_v44 = vrot.slane %v16982_v7, 5  ;;  %v10547_v12 = vld [vmem:[#allocation3 + $0x3c] sm:$0xe] }
 0x3b6   : > { %v12798_v1 = vpop.f32.mrf.mxu1  ;;  %v10199_v41 = vshrl.u32 %v9835_v17, 16  ;;  %v10202_v29 = vshll.u32 %v9835_v17, 16  ;;  %v10618_v61 = vsel %vm14007_vm13, %v11809_v37, %v10617_v53  ;;  %v10621_v55 = vsel %vm14007_vm13, %v10619_v4, %v10620_v23  ;;  %v10548_v4 = vld [vmem:[#allocation3 + $0x48] sm:$0xe] }
 0x3b7   : > { %18426 = vst [vmem:[#allocation48_spill] sm:$0xff] %v17309_v46  ;;  %v17320_v6 = vadd.f32 %v17219_v48, %v12798_v1  ;;  %v17322_v43 = vld [vmem:[#allocation3 + $0xd4] sm:$0x1]  ;;  %v10216_v42 = vrot.slane %v10215_v27, 4  ;;  %v11810_v57 = vrot.slane %v10546_v10, 9  ;;  %v10627_v33 = vrot.slane %v16987_v30, 5  ;;  %v17325_v7 = vpop.f32.mrf.mxu0 }
 0x3b8   : > { %18428 = vst [vmem:[#allocation49_spill] sm:$0xff] %v17322_v43  ;;  %v6963_v25 = vpop.f32.mrf.mxu1  ;;  %v10201_v21 = vrot.slane %v10199_v41, 4  ;;  %v10204_v39 = vrot.slane %v10202_v29, 5  ;;  %v10218_v53 = vshll.u32 %v17322_v43, 16  ;;  %v10626_v37 = vrot.slane %v10624_v44, 4 }
 0x3b9   : > { %18427 = vst [vmem:[#allocation50_spill] sm:$0xff] %v17320_v6  ;;  %13085 = vmatmul.mubr.bf16.gmra.mxu1 %v13477_v62  ;;  %v17329_v48 = vadd.f32 %v17225_v16, %v6963_v25  ;;  %v11825_v23 = vcombine.low %v10618_v61, %v10621_v55  ;;  %v10625_v10 = vsel %vm14007_vm13, %v11810_v57, %v10624_v44  ;;  %v17333_v17 = vpop.f32.mrf.mxu0  ;;  %v10631_v30 = vrot.slane %v16998_v50, 5  ;;  %v10549_v57 = vld [vmem:[#allocation3 + $0x54] sm:$0xe] }
 0x3ba   : > { %13152 = vmatprep.mubr.bf16.mxu1 %v11824_v63  ;;  %v10205_v62 = vor.u32 %v10204_v39, %v10201_v21  ;;  %v10220_v27 = vrot.slane %v10218_v53, 5  ;;  %v12799_v1 = vpop.f32.mrf.mxu1  ;;  %v10628_v41 = vsel %vm14007_vm13, %v10626_v37, %v10627_v33  ;;  %v11811_v29 = vrot.slane %v10547_v12, 9 }
 0x3bb   : > { %18429 = vst [vmem:[#allocation51_spill] sm:$0xff] %v17329_v48  ;;  %v17339_v63 = vadd.f32 %v17237_v20, %v12799_v1  ;;  %v17341_v16 = vpop.f32.mrf.mxu0  ;;  %v10633_v61 = vrot.slane %v10631_v30, 4  ;;  %v10634_v55 = vrot.slane %v17002_v36, 5  ;;  %v11812_v44 = vrot.slane %v10548_v4, 9  ;;  %v18442_v48 = vld [vmem:[#allocation33_spill] sm:$0xff] }
 0x3bc   : > { %v10206_v25 = vrot.slane %v10205_v62, 4  ;;  %v10221_v50 = vsel %vm13704_vm7, %v10216_v42, %v10220_v27  ;;  %v6966_v21 = vpop.f32.mrf.mxu1  ;;  %v11826_v39 = vcombine.low %v10625_v10, %v10628_v41  ;;  %v10638_v53 = vrot.slane %v17013_v45, 5  ;;  %v10550_v62 = vld [vmem:[#allocation3 + $0x60] sm:$0xe] }
 0x3bd   : > { %18430 = vst [vmem:[#allocation52_spill] sm:$0xff] %v17339_v63  ;;  %v17348_v12 = vadd.f32 %v17242_v51, %v6966_v21  ;;  %v10632_v20 = vsel %vm14007_vm13, %v11811_v29, %v10631_v30  ;;  %v10635_v33 = vsel %vm14007_vm13, %v10633_v61, %v10634_v55  ;;  %v17354_v36 = vpop.f32.mrf.mxu0  ;;  %v10645_v37 = vrot.slane %v17040_v13, 5  ;;  %v10551_v55 = vld [vmem:[#allocation3 + $0x6c] sm:$0xe] }
 0x3be   : > { %v10211_v42 = vsel %vm13704_vm7, %v10206_v25, %v17293_v59  ;;  %v12866_v4 = vpop.f32.mrf.mxu1  ;;  %v10640_v10 = vrot.slane %v10638_v53, 4  ;;  %v10641_v45 = vrot.slane %v17021_v40, 5  ;;  %v11813_v51 = vrot.slane %v10549_v57, 9 }
 0x3bf   : > { %18431 = vst [vmem:[#allocation53_spill] sm:$0xff] %v17348_v12  ;;  %v11799_v27 = vcombine.low %v10211_v42, %v10221_v50  ;;  %v17362_v30 = vadd.f32 %v12866_v4, %v17019_v24  ;;  %v11827_v1 = vcombine.low %v10632_v20, %v10635_v33  ;;  %v17364_v41 = vpop.f32.mrf.mxu0  ;;  %v10647_v29 = vrot.slane %v10645_v37, 4  ;;  %v18433_v20 = vld [vmem:[#allocation26_spill] sm:$0xff] }
 0x3c0   : > { %v7606_v13 = vpop.f32.mrf.mxu1  ;;  %v10639_v60 = vsel %vm14007_vm13, %v11812_v44, %v10638_v53  ;;  %v10642_v59 = vsel %vm14007_vm13, %v10640_v10, %v10641_v45  ;;  %v10648_v40 = vrot.slane %v17050_v2, 5  ;;  %v10652_v61 = vrot.slane %v17059_v19, 5  ;;  %v18439_v12 = vld [vmem:[#allocation38_spill] sm:$0xff] }
 0x3c1   : > { %13153 = vmatmul.mubr.bf16.vlgmr.msra.gmra.mxu1 %v11825_v23  ;;  %13133 = vmatmul.mubr.bf16.gmra.mxu0 %v11799_v27  ;;  %v17373_v24 = vadd.f32 %v7606_v13, %v17034_v26  ;;  %v11828_v57 = vcombine.low %v10639_v60, %v10642_v59  ;;  %v17375_v25 = vpop.f32.mrf.mxu0  ;;  %v17379_v23 = vsel %vm14007_vm13, %v11813_v51, %v10645_v37  ;;  %v11814_v44 = vrot.slane %v10550_v62, 9  ;;  %v10552_v26 = vld [vmem:[#allocation3 + $0x78] sm:$0xe]  ;;  %v10553_v13 = vld [vmem:[#allocation3 + $0x84] sm:$0xe] }
 0x3c2   : > { %13156 = vmatprep.mubr.bf16.mxu1 %v11826_v39  ;;  %v12867_v50 = vpop.f32.mrf.mxu1  ;;  %v17383_v2 = vsel %vm14007_vm13, %v10647_v29, %v10648_v40  ;;  %v10654_v19 = vrot.slane %v10652_v61, 4  ;;  %v10655_v21 = vrot.slane %v17068_v32, 5  ;;  %v18432_v39 = vld [vmem:[#allocation43_spill] sm:$0xff]  ;;  %v11815_v10 = vrot.slane %v10551_v55, 9 }
 0x3c3   : > { %v10659_v53 = vrot.slane %v18432_v39, 5  ;;  %v17388_v33 = vadd.f32 %v12867_v50, %v18433_v20  ;;  %v17390_v42 = vpop.f32.mrf.mxu0  ;;  %v17396_v4 = vsel %vm14007_vm13, %v11814_v44, %v10652_v61  ;;  %v18434_v62 = vld [vmem:[#allocation39_spill] sm:$0xff]  ;;  %v10666_v29 = vrot.slane %v17100_v34, 5  ;;  %v10554_v20 = vld [vmem:[#allocation3 + $0x90] sm:$0xe] }
 0x3c4   : > { %v7609_v45 = vpop.f32.mrf.mxu1  ;;  %v17400_v32 = vsel %vm14007_vm13, %v10654_v19, %v10655_v21  ;;  %v10662_v27 = vrot.slane %v18434_v62, 5  ;;  %v11816_v55 = vrot.slane %v10552_v26, 9  ;;  %v18435_v19 = vld [vmem:[#allocation17_spill] sm:$0xff]  ;;  %v10555_v37 = vld [vmem:[#allocation3 + $0x9c] sm:$0xe] }
 0x3c5   : > { %v10661_v51 = vrot.slane %v10659_v53, 4  ;;  %v17405_v60 = vadd.f32 %v7609_v45, %v17269_v54  ;;  %v17407_v59 = vpop.f32.mrf.mxu0  ;;  %v17413_v61 = vsel %vm14007_vm13, %v11815_v10, %v10659_v53  ;;  %v10668_v34 = vrot.slane %v10666_v29, 4  ;;  %v18436_v54 = vld [vmem:[#allocation16_spill] sm:$0xff] }
 0x3c6   : > { %v12870_v44 = vpop.f32.mrf.mxu1  ;;  %v10669_v21 = vrot.slane %v18435_v19, 5  ;;  %v10673_v39 = vrot.slane %v18436_v54, 5  ;;  %v18437_v45 = vld [vmem:[#allocation24_spill] sm:$0xff]  ;;  %v17430_v26 = vsel %vm14007_vm13, %v11816_v55, %v10666_v29  ;;  %v11817_v10 = vrot.slane %v10553_v13, 9 }
 0x3c7   : > { %v17417_v50 = vsel %vm14007_vm13, %v10661_v51, %v10662_v27  ;;  %v17422_v62 = vadd.f32 %v12870_v44, %v18437_v45  ;;  %v17424_v40 = vpop.f32.mrf.mxu0  ;;  %v18438_v54 = vld [vmem:[#allocation40_spill] sm:$0xff]  ;;  %v10680_v45 = vrot.slane %v17142_v0, 5  ;;  %v11818_v13 = vrot.slane %v10554_v20, 9 }
 0x3c8   : > { %v7622_v51 = vpop.f32.mrf.mxu1  ;;  %v17434_v27 = vsel %vm14007_vm13, %v10668_v34, %v10669_v21  ;;  %v10675_v19 = vrot.slane %v10673_v39, 4  ;;  %v10676_v44 = vrot.slane %v18438_v54, 5  ;;  %v18440_v21 = vld [vmem:[#allocation27_spill] sm:$0xff]  ;;  %v18441_v54 = vld [vmem:[#allocation22_spill] sm:$0xff] }
 0x3c9   : > { %13157 = vmatmul.mubr.bf16.gmra.mxu1 %v11827_v1  ;;  %v7737_v53 = vadd.f32 %v7622_v51, %v18439_v12  ;;  %v17439_v63 = vpop.f32.mrf.mxu0  ;;  %v17445_v1 = vsel %vm14007_vm13, %v11817_v10, %v10673_v39  ;;  %v10682_v0 = vrot.slane %v10680_v45, 4  ;;  %v10687_v12 = vrot.slane %v18441_v54, 5  ;;  %v10556_v51 = vld [vmem:[#allocation3 + $0xa8] sm:$0xe]  ;;  %v18443_v54 = vld [vmem:[#allocation23_spill] sm:$0xff] }
 0x3ca   : > { %13160 = vmatprep.mubr.bf16.mxu1 %v11828_v57  ;;  %v12871_v55 = vpop.f32.mrf.mxu1  ;;  %v17449_v34 = vsel %vm14007_vm13, %v10675_v19, %v10676_v44  ;;  %v10683_v57 = vrot.slane %v18440_v21, 5  ;;  %v17460_v20 = vsel %vm14007_vm13, %v11818_v13, %v10680_v45  ;;  %v11819_v10 = vrot.slane %v10555_v37, 9 }
 0x3cb   : > { %v7740_v6 = vadd.f32 %v12871_v55, %v18442_v48  ;;  %v17454_v46 = vpop.f32.mrf.mxu0  ;;  %v10689_v21 = vrot.slane %v10687_v12, 4  ;;  %v10690_v29 = vrot.slane %v18443_v54, 5  ;;  %v10694_v48 = vrot.slane %v17184_v58, 5  ;;  %v10557_v55 = vld [vmem:[#allocation3 + $0xb4] sm:$0xe]  ;;  %v18444_v58 = vld [vmem:[#allocation41_spill] sm:$0xff] }
 0x3cc   : > { %v7625_v19 = vpop.f32.mrf.mxu1  ;;  %v17464_v44 = vsel %vm14007_vm13, %v10682_v0, %v10683_v57  ;;  %v17475_v37 = vsel %vm14007_vm13, %v11819_v10, %v10687_v12  ;;  %v11820_v13 = vrot.slane %v10556_v51, 9  ;;  %v10697_v39 = vrot.slane %v18444_v58, 5 }
 0x3cd   : > { %v7738_v11 = vadd.f32 %v7625_v19, %v17298_v18  ;;  %v17469_v47 = vpop.f32.mrf.mxu0  ;;  %v17479_v57 = vsel %vm14007_vm13, %v10689_v21, %v10690_v29  ;;  %v10696_v54 = vrot.slane %v10694_v48, 4  ;;  %v10701_v18 = vrot.slane %v18445_v28, 5  ;;  %v18446_v19 = vld [vmem:[#allocation44_spill] sm:$0xff] }
 0x3ce   : > { %v12874_v0 = vpop.f32.mrf.mxu1  ;;  %v11821_v12 = vrot.slane %v10557_v55, 9  ;;  %v18447_v51 = vcombine.low %v17379_v23, %v17383_v2  ;;  %v17493_v29 = vsel %vm14007_vm13, %v11820_v13, %v10694_v48  ;;  %v18450_v55 = vld [vmem:[#allocation34_spill] sm:$0xff]  ;;  %v18451_v13 = vld [vmem:[#allocation36_spill] sm:$0xff] }
 0x3cf   : > { %v7743_v43 = vadd.f32 %v12874_v0, %v18446_v19  ;;  %v17484_v22 = vpop.f32.mrf.mxu0  ;;  %v17497_v28 = vsel %vm14007_vm13, %v10696_v54, %v10697_v39  ;;  %v10703_v21 = vrot.slane %v10701_v18, 4  ;;  %v18448_v0 = vld [vmem:[#allocation28_spill] sm:$0xff]  ;;  %v18449_v19 = vcombine.low %v17396_v4, %v17400_v32 }
 0x3d0   : > { %v7638_v10 = vpop.f32.mrf.mxu1  ;;  %v10704_v58 = vrot.slane %v18448_v0, 5  ;;  %v11836_v2 = vcombine.low %v17493_v29, %v17497_v28  ;;  %v17508_v48 = vsel %vm14007_vm13, %v11821_v12, %v10701_v18  ;;  %v17521_v32 = vadd.f32 %v17249_v9, %v17362_v30  ;;  %v18452_v12 = vld [vmem:[#allocation18_spill] sm:$0xff] }
 0x3d1   : > { %13161 = vmatmul.mubr.bf16.gmra.mxu1 %v18447_v51  ;;  %v7741_v45 = vadd.f32 %v7638_v10, %v18450_v55  ;;  %v8059_v23 = vpop.f32.mrf.mxu0  ;;  %v17525_v18 = vadd.f32 %v17263_v52, %v17373_v24  ;;  %v17536_v55 = vadd.f32 %v17287_v15, %v17405_v60  ;;  %v17540_v9 = vadd.f32 %v17303_v38, %v17422_v62  ;;  %v18453_v24 = vld [vmem:[#allocation20_spill] sm:$0xff] }
 0x3d2   : > { %13164 = vmatprep.mubr.bf16.mxu1 %v18449_v19  ;;  %v12875_v51 = vpop.f32.mrf.mxu1  ;;  %v17512_v39 = vsel %vm14007_vm13, %v10703_v21, %v10704_v58  ;;  %v17532_v58 = vadd.f32 %v17277_v8, %v17388_v33  ;;  %v17543_v52 = vadd.f32 %v17312_v14, %v7737_v53  ;;  %v17546_v30 = vadd.f32 %v17325_v7, %v7740_v6  ;;  %v18458_v53 = vld [vmem:[#allocation19_spill] sm:$0xff] }
 0x3d3   : > { %v7744_v54 = vadd.f32 %v12875_v51, %v18451_v13  ;;  %v17515_v0 = vpop.f32.mrf.mxu0  ;;  %v11837_v4 = vcombine.low %v17508_v48, %v17512_v39  ;;  %v17552_v8 = vadd.f32 %v17333_v17, %v7738_v11  ;;  %v17555_v15 = vadd.f32 %v17341_v16, %v7743_v43  ;;  %v18456_v43 = vld [vmem:[#allocation32_spill] sm:$0xff] }
 0x3d4   : > { %v7641_v10 = vpop.f32.mrf.mxu1  ;;  %v18454_v38 = vcombine.low %v17413_v61, %v17417_v50  ;;  %v17561_v14 = vadd.f32 %v17354_v36, %v7741_v45  ;;  %v18455_v11 = vcombine.low %v17430_v26, %v17434_v27  ;;  %v18457_v50 = vld [vmem:[#allocation30_spill] sm:$0xff] }
 0x3d5   : > { %v7742_v19 = vadd.f32 %v7641_v10, %v18452_v12  ;;  %v17528_v21 = vpop.f32.mrf.mxu0  ;;  %v17564_v6 = vadd.f32 %v17364_v41, %v7744_v54  ;;  %v18459_v12 = vld [vmem:[#allocation31_spill] sm:$0xff] }
 0x3d6   : > { %v12878_v51 = vpop.f32.mrf.mxu1 }
 0x3d7   : > { %v7747_v13 = vadd.f32 %v12878_v51, %v18453_v24  ;;  %v17549_v10 = vpop.f32.mrf.mxu0  ;;  %v17567_v7 = vadd.f32 %v17375_v25, %v7742_v19 }
 0x3d8   : > { %v7654_v33 = vpop.f32.mrf.mxu1 }
 0x3d9   : > { %13165 = vmatmul.mubr.bf16.gmra.mxu1 %v18454_v38  ;;  %v7745_v17 = vadd.f32 %v7654_v33, %v18456_v43  ;;  %v8075_v16 = vpop.f32.mrf.mxu0  ;;  %v17574_v60 = vadd.f32 %v17390_v42, %v7747_v13  ;;  %v18461_v13 = vcombine.low %v17460_v20, %v17464_v44  ;;  %v18462_v38 = vld [vmem:[#allocation42_spill] sm:$0xff]  ;;  %v18464_v20 = vld [vmem:[#allocation37_spill] sm:$0xff] }
 0x3da   : > { %13168 = vmatprep.mubr.bf16.mxu1 %v18455_v11  ;;  %v12879_v61 = vpop.f32.mrf.mxu1 }
 0x3db   : > { %v7748_v36 = vadd.f32 %v12879_v61, %v18457_v50  ;;  %v17577_v62 = vpop.f32.mrf.mxu0  ;;  %v17580_v41 = vadd.f32 %v17407_v59, %v7745_v17  ;;  %v18460_v59 = vcombine.low %v17445_v1, %v17449_v34  ;;  %v18463_v17 = vld [vmem:[#allocation21_spill] sm:$0xff]  ;;  %v10708_v50 = vrot.slane %v17228_v35, 5 }
 0x3dc   : > { %v7657_v25 = vpop.f32.mrf.mxu1 }
 0x3dd   : > { %v7746_v45 = vadd.f32 %v7657_v25, %v18458_v53  ;;  %v17583_v54 = vpop.f32.mrf.mxu0  ;;  %v17586_v26 = vadd.f32 %v17424_v40, %v7748_v36  ;;  %v18465_v53 = vld [vmem:[#allocation29_spill] sm:$0xff]  ;;  %v10710_v35 = vrot.slane %v10708_v50, 4 }
 0x3de   : > { %v12882_v27 = vpop.f32.mrf.mxu1 }
 0x3df   : > { %v7751_v42 = vadd.f32 %v12882_v27, %v18459_v12  ;;  %v17589_v19 = vpop.f32.mrf.mxu0  ;;  %v17592_v51 = vadd.f32 %v17439_v63, %v7746_v45 }
 0x3e0   : > { %v7670_v24 = vpop.f32.mrf.mxu1 }
 0x3e1   : > { %13169 = vmatmul.mubr.bf16.gmra.mxu1 %v18460_v59  ;;  %v7749_v40 = vadd.f32 %v7670_v24, %v18462_v38  ;;  %v17601_v33 = vpop.f32.mrf.mxu0  ;;  %v17604_v11 = vadd.f32 %v17454_v46, %v7751_v42  ;;  %v10558_v59 = vld [vmem:[#allocation3 + $0xc0] sm:$0xe]  ;;  %v10715_v38 = vrot.slane %v17265_v5, 5  ;;  %v18467_v5 = vld [vmem:[#allocation35_spill] sm:$0xff] }
 0x3e2   : > { %13172 = vmatprep.mubr.bf16.mxu1 %v18461_v13  ;;  %v12883_v43 = vpop.f32.mrf.mxu1  ;;  %v10559_v13 = vld [vmem:[#allocation3 + $0xcc] sm:$0xe] }
 0x3e3   : > { %v7752_v63 = vadd.f32 %v12883_v43, %v18463_v17  ;;  %v17607_v61 = vpop.f32.mrf.mxu0  ;;  %v17610_v1 = vadd.f32 %v17469_v47, %v7749_v40  ;;  %v18466_v47 = vcombine.low %v17475_v37, %v17479_v57  ;;  %v10711_v37 = vrot.slane %v17235_v31, 5 }
 0x3e4   : > { %v7673_v34 = vpop.f32.mrf.mxu1  ;;  %v11823_v17 = vrot.slane %v10559_v13, 9 }
 0x3e5   : > { %v7750_v44 = vadd.f32 %v7673_v34, %v18464_v20  ;;  %v17614_v36 = vpop.f32.mrf.mxu0  ;;  %v17617_v25 = vadd.f32 %v17484_v22, %v7752_v63  ;;  %v18468_v34 = vld [vmem:[#allocation49_spill] sm:$0xff] }
 0x3e6   : > { %v12886_v46 = vpop.f32.mrf.mxu1  ;;  %v10718_v20 = vrot.slane %v18468_v34, 5  ;;  %v18474_v34 = vld [vmem:[#allocation51_spill] sm:$0xff] }
 0x3e7   : > { %v7755_v45 = vadd.f32 %v12886_v46, %v18465_v53  ;;  %v17620_v27 = vpop.f32.mrf.mxu0  ;;  %v17622_v12 = vadd.f32 %v8059_v23, %v7750_v44  ;;  %v18469_v46 = vld [vmem:[#allocation45_spill] sm:$0xff] }
 0x3e8   : > { %v7686_v42 = vpop.f32.mrf.mxu1 }
 0x3e9   : > { %13173 = vmatmul.mubr.bf16.gmra.mxu1 %v18466_v47  ;;  %v7753_v22 = vadd.f32 %v7686_v42, %v17247_v3  ;;  %v8107_v24 = vpop.f32.mrf.mxu0  ;;  %v17633_v23 = vadd.f32 %v17515_v0, %v7755_v45  ;;  %v11822_v3 = vrot.slane %v10558_v59, 9  ;;  %v10717_v0 = vrot.slane %v10715_v38, 4 }
 0x3ea   : > { %13176 = vmatprep.mubr.bf16.mxu1 %v11836_v2  ;;  %v12887_v40 = vpop.f32.mrf.mxu1  ;;  %v10712_v2 = vsel %vm14007_vm13, %v10710_v35, %v10711_v37  ;;  %v10716_v59 = vsel %vm14007_vm13, %v11823_v17, %v10715_v38  ;;  %v18471_v37 = vld [vmem:[#allocation47_spill] sm:$0xff] }
 0x3eb   : > { %v7756_v57 = vadd.f32 %v12887_v40, %v17254_v56  ;;  %v17640_v29 = vadd.f32 %v17528_v21, %v7753_v22  ;;  %v10709_v21 = vsel %vm14007_vm13, %v11822_v3, %v10708_v50  ;;  %v18470_v22 = vld [vmem:[#allocation46_spill] sm:$0xff]  ;;  %v10719_v50 = vsel %vm14007_vm13, %v10717_v0, %v10718_v20  ;;  %v18472_v3 = vld [vmem:[#allocation48_spill] sm:$0xff] }
 0x3ec   : > { %v17637_v43 = vpop.f32.mrf.mxu0  ;;  %v7689_v28 = vpop.f32.mrf.mxu1  ;;  %v11838_v45 = vcombine.low %v10709_v21, %v10712_v2 }
 0x3ed   : > { %v7754_v63 = vadd.f32 %v7689_v28, %v18467_v5  ;;  %v17649_v31 = vadd.f32 %v17549_v10, %v7756_v57  ;;  %v11839_v28 = vcombine.low %v10716_v59, %v10719_v50 }
 0x3ee   : > { %v17646_v44 = vpop.f32.mrf.mxu0 }
 0x3ef   : > { %v12890_v56 = vpop.f32.mrf.mxu1  ;;  %v17656_v42 = vadd.f32 %v8075_v16, %v7754_v63 }
 0x3f0   : > { %v7759_v53 = vadd.f32 %v12890_v56, %v18469_v46  ;;  %v17654_v47 = vpop.f32.mrf.mxu0 }
 0x3f1   : > { %13177 = vmatmul.mubr.bf16.gmra.mxu1 %v11837_v4  ;;  %v7702_v35 = vpop.f32.mrf.mxu1 }
 0x3f2   : > { %13180 = vmatprep.mubr.bf16.mxu1 %v11838_v45  ;;  %v7757_v10 = vadd.f32 %v7702_v35, %v18470_v22  ;;  %v17666_v13 = vpop.f32.mrf.mxu0  ;;  %v17669_v40 = vadd.f32 %v17577_v62, %v7759_v53  ;;  %v18473_v62 = vld [vmem:[#allocation50_spill] sm:$0xff] }
 0x3f3   : > { %v12891_v16 = vpop.f32.mrf.mxu1 }
 0x3f4   : > { %v7760_v57 = vadd.f32 %v12891_v16, %v18471_v37  ;;  %v17672_v48 = vpop.f32.mrf.mxu0  ;;  %v17675_v39 = vadd.f32 %v17583_v54, %v7757_v10 }
 0x3f5   : > { %v7705_v4 = vpop.f32.mrf.mxu1 }
 0x3f6   : > { %v7758_v38 = vadd.f32 %v7705_v4, %v18472_v3  ;;  %v17678_v2 = vpop.f32.mrf.mxu0  ;;  %v17681_v49 = vadd.f32 %v17589_v19, %v7760_v57  ;;  %v18475_v19 = vld [vmem:[#allocation52_spill] sm:$0xff] }
 0x3f8   : > { %v12894_v17 = vpop.f32.mrf.mxu1  ;;  %v17684_v63 = vpop.f32.mrf.mxu0  ;;  %v17687_v0 = vadd.f32 %v17601_v33, %v7758_v38  ;;  %v18476_v33 = vld [vmem:[#allocation53_spill] sm:$0xff] }
 0x3f9   : > { %v7763_v5 = vadd.f32 %v12894_v17, %v18473_v62  ;;  %13181 = vmatmul.mubr.bf16.gmra.mxu1 %v11839_v28 }
 0x3fa   : > { %v7718_v54 = vpop.f32.mrf.mxu1  ;;  %v17690_v56 = vpop.f32.mrf.mxu0 }
 0x3fb   : > { %v7761_v20 = vadd.f32 %v7718_v54, %v18474_v34  ;;  %v17693_v21 = vadd.f32 %v17607_v61, %v7763_v5 }
 0x3fc   : > { %v12895_v46 = vpop.f32.mrf.mxu1  ;;  %v17696_v45 = vpop.f32.mrf.mxu0 }
 0x3fd   : > { %v7764_v53 = vadd.f32 %v12895_v46, %v18475_v19  ;;  %v17699_v35 = vadd.f32 %v17614_v36, %v7761_v20 }
 0x3fe   : > { %v7721_v22 = vpop.f32.mrf.mxu1  ;;  %v17702_v59 = vpop.f32.mrf.mxu0 }
 0x3ff   : > { %v7762_v10 = vadd.f32 %v7721_v22, %v18476_v33  ;;  %v17705_v50 = vadd.f32 %v17620_v27, %v7764_v53 }
 0x400   : > { %v12962_v16 = vpop.f32.mrf.mxu1  ;;  %v17710_v37 = vpop.f32.mrf.mxu0 }
 0x401   : > { %v17708_v61 = vadd.f32 %v12962_v16, %v17521_v32  ;;  %v17712_v57 = vadd.f32 %v8107_v24, %v7762_v10 }
 0x402   : > { %v8746_v4 = vpop.f32.mrf.mxu1  ;;  %v17717_v28 = vpop.f32.mrf.mxu0 }
 0x403   : > { %v17715_v36 = vadd.f32 %v8746_v4, %v17525_v18 }
 0x404   : > { %v12963_v3 = vpop.f32.mrf.mxu1  ;;  %v17722_v27 = vpop.f32.mrf.mxu0 }
 0x405   : > { %v17720_v38 = vadd.f32 %v12963_v3, %v17532_v58 }
 0x406   : > { %v8749_v17 = vpop.f32.mrf.mxu1  ;;  %v17727_v62 = vpop.f32.mrf.mxu0 }
 0x407   : > { %v17725_v32 = vadd.f32 %v8749_v17, %v17536_v55 }
 0x408   : > { %v12966_v24 = vpop.f32.mrf.mxu1  ;;  %v17732_v18 = vpop.f32.mrf.mxu0 }
 0x409   : > { %v17730_v5 = vadd.f32 %v12966_v24, %v17540_v9  ;;  %18477 = vst [vmem:[#allocation54_spill] sm:$0xff] %v17732_v18 }
 0x40a   : > { %v8762_v54 = vpop.f32.mrf.mxu1  ;;  %v17737_v58 = vpop.f32.mrf.mxu0 }
 0x40b   : > { %v17735_v34 = vadd.f32 %v8762_v54, %v17543_v52  ;;  %18478 = vst [vmem:[#allocation55_spill] sm:$0xff] %v17737_v58 }
 0x40c   : > { %v12967_v20 = vpop.f32.mrf.mxu1  ;;  %v17742_v55 = vpop.f32.mrf.mxu0 }
 0x40d   : > { %v17740_v46 = vadd.f32 %v12967_v20, %v17546_v30  ;;  %18479 = vst [vmem:[#allocation56_spill] sm:$0xff] %v17742_v55 }
 0x40e   : > { %v8765_v19 = vpop.f32.mrf.mxu1  ;;  %v17747_v9 = vpop.f32.mrf.mxu0 }
 0x40f   : > { %v17745_v53 = vadd.f32 %v8765_v19, %v17552_v8  ;;  %18480 = vst [vmem:[#allocation57_spill] sm:$0xff] %v17747_v9 }
 0x410   : > { %v12970_v22 = vpop.f32.mrf.mxu1  ;;  %v17752_v52 = vpop.f32.mrf.mxu0 }
 0x411   : > { %v17750_v33 = vadd.f32 %v12970_v22, %v17555_v15  ;;  %18481 = vst [vmem:[#allocation58_spill] sm:$0xff] %v17752_v52 }
 0x412   : > { %v8778_v10 = vpop.f32.mrf.mxu1  ;;  %v17757_v30 = vpop.f32.mrf.mxu0 }
 0x413   : > { %v17755_v16 = vadd.f32 %v8778_v10, %v17561_v14  ;;  %18482 = vst [vmem:[#allocation59_spill] sm:$0xff] %v17757_v30 }
 0x414   : > { %v12971_v4 = vpop.f32.mrf.mxu1  ;;  %v17762_v8 = vpop.f32.mrf.mxu0 }
 0x415   : > { %v17760_v3 = vadd.f32 %v12971_v4, %v17564_v6  ;;  %18483 = vst [vmem:[#allocation60_spill] sm:$0xff] %v17762_v8 }
 0x416   : > { %v8781_v17 = vpop.f32.mrf.mxu1  ;;  %v17767_v15 = vpop.f32.mrf.mxu0 }
 0x417   : > { %v17765_v24 = vadd.f32 %v8781_v17, %v17567_v7  ;;  %18484 = vst [vmem:[#allocation62_spill] sm:$0xff] %v17767_v15 }
 0x418   : > { %v12974_v54 = vpop.f32.mrf.mxu1  ;;  %v17772_v19 = vpop.f32.mrf.mxu0 }
 0x419   : > { %v17770_v20 = vadd.f32 %v12974_v54, %v17574_v60  ;;  %18485 = vst [vmem:[#allocation61_spill] sm:$0xff] %v17772_v19 }
 0x41a   : > { %v8794_v14 = vpop.f32.mrf.mxu1  ;;  %v17780_v8 = vpop.f32.mrf.mxu0 }
 0x41b   : > { %v17775_v22 = vadd.f32 %v8794_v14, %v17580_v41  ;;  %18486 = vst [vmem:[#allocation64_spill] sm:$0xff] %v17780_v8 }
 0x41c   : > { %v12975_v6 = vpop.f32.mrf.mxu1  ;;  %v17788_v15 = vpop.f32.mrf.mxu0 }
 0x41d   : > { %v17778_v10 = vadd.f32 %v12975_v6, %v17586_v26  ;;  %18489 = vst [vmem:[#allocation67_spill] sm:$0xff] %v17788_v15 }
 0x41e   : > { %v8797_v4 = vpop.f32.mrf.mxu1  ;;  %v17796_v19 = vpop.f32.mrf.mxu0 }
 0x41f   : > { %v17783_v7 = vadd.f32 %v8797_v4, %v17592_v51  ;;  %18492 = vst [vmem:[#allocation15_spill] sm:$0xff] %v17796_v19 }
 0x420   : > { %v12978_v17 = vpop.f32.mrf.mxu1  ;;  %v17804_v8 = vpop.f32.mrf.mxu0 }
 0x421   : > { %18487 = vst [vmem:[#allocation63_spill] sm:$0xff] %v17783_v7  ;;  %v17786_v60 = vadd.f32 %v12978_v17, %v17604_v11  ;;  %18495 = vst [vmem:[#allocation11_spill] sm:$0xff] %v17804_v8 }
 0x422   : > { %v8810_v54 = vpop.f32.mrf.mxu1 }
 0x423   : > { %18488 = vst [vmem:[#allocation65_spill] sm:$0xff] %v17786_v60  ;;  %v17791_v41 = vadd.f32 %v8810_v54, %v17610_v1 }
 0x424   : > { %v12979_v14 = vpop.f32.mrf.mxu1 }
 0x425   : > { %18490 = vst [vmem:[#allocation66_spill] sm:$0xff] %v17791_v41  ;;  %v17794_v26 = vadd.f32 %v12979_v14, %v17617_v25  ;;  %v17812_v14 = vpop.f32.mrf.mxu0 }
 0x426   : > { %v8813_v6 = vpop.f32.mrf.mxu1  ;;  %18498 = vst [vmem:[#allocation26_spill] sm:$0xff] %v17812_v14 }
 0x427   : > { %18491 = vst [vmem:[#allocation14_spill] sm:$0xff] %v17794_v26  ;;  %v17799_v51 = vadd.f32 %v8813_v6, %v17622_v12 }
 0x428   : > { %v12982_v4 = vpop.f32.mrf.mxu1 }
 0x429   : > { %18493 = vst [vmem:[#allocation68_spill] sm:$0xff] %v17799_v51  ;;  %v17802_v11 = vadd.f32 %v12982_v4, %v17633_v23  ;;  %v17820_v4 = vpop.f32.mrf.mxu0 }
 0x42a   : > { %v8826_v17 = vpop.f32.mrf.mxu1  ;;  %18501 = vst [vmem:[#allocation16_spill] sm:$0xff] %v17820_v4 }
 0x42b   : > { %18494 = vst [vmem:[#allocation12_spill] sm:$0xff] %v17802_v11  ;;  %v17807_v1 = vadd.f32 %v8826_v17, %v17640_v29 }
 0x42c   : > { %v12983_v54 = vpop.f32.mrf.mxu1 }
 0x42d   : > { %18496 = vst [vmem:[#allocation13_spill] sm:$0xff] %v17807_v1  ;;  %v17810_v25 = vadd.f32 %v12983_v54, %v17649_v31  ;;  %v17828_v54 = vpop.f32.mrf.mxu0 }
 0x42e   : > { %v8829_v19 = vpop.f32.mrf.mxu1  ;;  %18504 = vst [vmem:[#allocation38_spill] sm:$0xff] %v17828_v54 }
 0x42f   : > { %18497 = vst [vmem:[#allocation43_spill] sm:$0xff] %v17810_v25  ;;  %v17815_v12 = vadd.f32 %v8829_v19, %v17656_v42  ;;  %v17833_v19 = vpop.f32.mrf.mxu0 }
 0x430   : > { %v12986_v6 = vpop.f32.mrf.mxu1  ;;  %18506 = vst [vmem:[#allocation22_spill] sm:$0xff] %v17833_v19 }
 0x431   : > { %18499 = vst [vmem:[#allocation39_spill] sm:$0xff] %v17815_v12  ;;  %v17818_v23 = vadd.f32 %v12986_v6, %v17669_v40 }
 0x432   : > { %v8842_v8 = vpop.f32.mrf.mxu1 }
 0x433   : > { %18500 = vst [vmem:[#allocation17_spill] sm:$0xff] %v17818_v23  ;;  %v17823_v29 = vadd.f32 %v8842_v8, %v17675_v39  ;;  %v17841_v8 = vpop.f32.mrf.mxu0 }
 0x434   : > { %v12987_v17 = vpop.f32.mrf.mxu1  ;;  %18509 = vst [vmem:[#allocation41_spill] sm:$0xff] %v17841_v8 }
 0x435   : > { %18502 = vst [vmem:[#allocation24_spill] sm:$0xff] %v17823_v29  ;;  %v17826_v31 = vadd.f32 %v12987_v17, %v17681_v49 }
 0x436   : > { %v8845_v14 = vpop.f32.mrf.mxu1 }
 0x437   : > { %18503 = vst [vmem:[#allocation40_spill] sm:$0xff] %v17826_v31  ;;  %v17831_v42 = vadd.f32 %v8845_v14, %v17687_v0  ;;  %v13106_v14 = vpop.f32.mrf.mxu0 }
 0x439   : > { %18505 = vst [vmem:[#allocation27_spill] sm:$0xff] %v17831_v42  ;;  %v12990_v40 = vpop.f32.mrf.mxu1  ;;  %v10385_v31 = vpop.f32.mrf.mxu0 }
 0x43a   : > { %v17836_v6 = vadd.f32 %v12990_v40, %v17693_v21 }
 0x43b   : > { %v8858_v4 = vpop.f32.mrf.mxu1 }
 0x43c   : > { %18507 = vst [vmem:[#allocation33_spill] sm:$0xff] %v17836_v6  ;;  %v17839_v39 = vadd.f32 %v8858_v4, %v17699_v35  ;;  %v13107_v6 = vpop.f32.mrf.mxu0 }
 0x43d   : > { %v12991_v49 = vpop.f32.mrf.mxu1 }
 0x43e   : > { %18508 = vst [vmem:[#allocation23_spill] sm:$0xff] %v17839_v39  ;;  %v17844_v17 = vadd.f32 %v12991_v49, %v17705_v50  ;;  %v17851_v4 = vpop.f32.mrf.mxu0 }
 0x43f   : > { %v8861_v54 = vpop.f32.mrf.mxu1 }
 0x440   : > { %18510 = vst [vmem:[#allocation25_spill] sm:$0xff] %v17844_v17  ;;  %v17847_v0 = vadd.f32 %v8861_v54, %v17712_v57  ;;  %v17857_v49 = vpop.f32.mrf.mxu0 }
 0x441   : > { %v13058_v19 = vpop.f32.mrf.mxu1 }
 0x442   : > { %18511 = vst [vmem:[#allocation44_spill] sm:$0xff] %v17847_v0  ;;  %v17863_v0 = vpop.f32.mrf.mxu0 }
 0x443   : > { %v9631_v42 = vpop.f32.mrf.mxu1 }
 0x444   : > { %v17869_v15 = vpop.f32.mrf.mxu0 }
 0x445   : > { %v13059_v21 = vpop.f32.mrf.mxu1 }
 0x446   : > { %v17875_v25 = vpop.f32.mrf.mxu0 }
 0x447   : > { %v9634_v40 = vpop.f32.mrf.mxu1 }
 0x449   : > { %v13062_v29 = vpop.f32.mrf.mxu1 }
 0x44b   : > { %v17849_v35 = vpop.f32.mrf.mxu1  ;;  %v17881_v30 = vpop.f32.mrf.mxu0 }
 0x44d   : > { %v17853_v8 = vpop.f32.mrf.mxu1  ;;  %v17887_v26 = vpop.f32.mrf.mxu0 }
 0x44f   : > { %v17855_v50 = vpop.f32.mrf.mxu1  ;;  %v17893_v55 = vpop.f32.mrf.mxu0 }
 0x451   : > { %v17859_v57 = vpop.f32.mrf.mxu1  ;;  %v17899_v7 = vpop.f32.mrf.mxu0 }
 0x453   : > { %v17861_v54 = vpop.f32.mrf.mxu1 }
 0x455   : > { %v17865_v17 = vpop.f32.mrf.mxu1 }
 0x457   : > { %v17867_v39 = vpop.f32.mrf.mxu1 }
 0x459   : > { %v17871_v23 = vpop.f32.mrf.mxu1 }
 0x45b   : > { %v17873_v12 = vpop.f32.mrf.mxu1 }
 0x45c   : > { %18512 = vst [vmem:[#allocation28_spill] sm:$0xff] %v17873_v12 }
 0x45d   : > { %v17877_v1 = vpop.f32.mrf.mxu1 }
 0x45e   : > { %18513 = vst [vmem:[#allocation34_spill] sm:$0xff] %v17877_v1 }
 0x45f   : > { %v17879_v11 = vpop.f32.mrf.mxu1 }
 0x460   : > { %18514 = vst [vmem:[#allocation36_spill] sm:$0xff] %v17879_v11 }
 0x461   : > { %v17883_v51 = vpop.f32.mrf.mxu1 }
 0x462   : > { %18515 = vst [vmem:[#allocation18_spill] sm:$0xff] %v17883_v51  ;;  %v17905_v51 = vpop.f32.mrf.mxu0 }
 0x463   : > { %v17885_v52 = vpop.f32.mrf.mxu1  ;;  %18523 = vst [vmem:[#allocation37_spill] sm:$0xff] %v17905_v51 }
 0x464   : > { %18516 = vst [vmem:[#allocation20_spill] sm:$0xff] %v17885_v52 }
 0x465   : > { %v17889_v9 = vpop.f32.mrf.mxu1 }
 0x466   : > { %18517 = vst [vmem:[#allocation32_spill] sm:$0xff] %v17889_v9  ;;  %v17911_v9 = vpop.f32.mrf.mxu0 }
 0x467   : > { %v17891_v41 = vpop.f32.mrf.mxu1  ;;  %18526 = vst [vmem:[#allocation49_spill] sm:$0xff] %v17911_v9 }
 0x468   : > { %18518 = vst [vmem:[#allocation30_spill] sm:$0xff] %v17891_v41 }
 0x469   : > { %v17895_v60 = vpop.f32.mrf.mxu1 }
 0x46a   : > { %18519 = vst [vmem:[#allocation19_spill] sm:$0xff] %v17895_v60  ;;  %v17917_v60 = vpop.f32.mrf.mxu0 }
 0x46b   : > { %v17897_v58 = vpop.f32.mrf.mxu1  ;;  %18529 = vst [vmem:[#allocation47_spill] sm:$0xff] %v17917_v60 }
 0x46c   : > { %18520 = vst [vmem:[#allocation31_spill] sm:$0xff] %v17897_v58 }
 0x46d   : > { %v17901_v11 = vpop.f32.mrf.mxu1 }
 0x46e   : > { %18521 = vst [vmem:[#allocation42_spill] sm:$0xff] %v17901_v11  ;;  %v9373_v11 = vadd.f32 %v17637_v43, %v17708_v61  ;;  %v9372_v43 = vadd.f32 %v17666_v13, %v17725_v32  ;;  %v9375_v13 = vadd.f32 %v17678_v2, %v17735_v34  ;;  %v9376_v2 = vadd.f32 %v17690_v56, %v17745_v53 }
 0x46f   : > { %v17903_v1 = vpop.f32.mrf.mxu1 }
 0x470   : > { %18522 = vst [vmem:[#allocation21_spill] sm:$0xff] %v17903_v1  ;;  %v9760_v51 = vadd.f32 %v13058_v19, %v9373_v11  ;;  %v9377_v11 = vadd.f32 %v17672_v48, %v17730_v5  ;;  %v9378_v5 = vadd.f32 %v17684_v63, %v17740_v46 }
 0x471   : > { %v17907_v52 = vpop.f32.mrf.mxu1 }
 0x472   : > { %18524 = vst [vmem:[#allocation29_spill] sm:$0xff] %v17907_v52  ;;  %v9371_v52 = vadd.f32 %v17646_v44, %v17715_v36  ;;  %v10514_v61 = vadd.f32 %v13106_v14, %v9760_v51  ;;  %v17944_v36 = vld [vmem:[%s18166_s2 + $0x1] ss:$0 sm:$0xff] }
 0x473   : > { %v17909_v12 = vpop.f32.mrf.mxu1 }
 0x474   : > { %18525 = vst [vmem:[#allocation35_spill] sm:$0xff] %v17909_v12  ;;  %v17927_v12 = vpop.f32.mrf.mxu0 }
 0x475   : > { %v17913_v41 = vpop.f32.mrf.mxu1 }
 0x476   : > { %18527 = vst [vmem:[#allocation45_spill] sm:$0xff] %v17913_v41  ;;  %v9758_v41 = vadd.f32 %v9631_v42, %v9371_v52  ;;  %v17939_v19 = vpop.f32.mrf.mxu0  ;;  %v9759_v52 = vadd.f32 %v9634_v40, %v9372_v43  ;;  %v9764_v42 = vadd.f32 %v13062_v29, %v9377_v11 }
 0x477   : > { %v17915_v18 = vpop.f32.mrf.mxu1 }
 0x478   : > { %18528 = vst [vmem:[#allocation46_spill] sm:$0xff] %v17915_v18  ;;  %v9374_v18 = vadd.f32 %v17654_v47, %v17720_v38  ;;  %v10512_v38 = vadd.f32 %v10385_v31, %v9758_v41  ;;  %v17951_v14 = vpop.f32.mrf.mxu0  ;;  %v10513_v29 = vadd.f32 %v17851_v4, %v9759_v52  ;;  %v9765_v31 = vadd.f32 %v17853_v8, %v9378_v5 }
 0x479   : > { %v17919_v58 = vpop.f32.mrf.mxu1  ;;  %v9379_v52 = vadd.f32 %v17702_v59, %v17755_v16 }
 0x47a   : > { %18530 = vst [vmem:[#allocation48_spill] sm:$0xff] %v17919_v58  ;;  %v9761_v58 = vadd.f32 %v13059_v21, %v9374_v18  ;;  %v17964_v11 = vpop.f32.mrf.mxu0 }
 0x47b   : > { %v17923_v1 = vpop.f32.mrf.mxu1 }
 0x47c   : > { %v10515_v48 = vadd.f32 %v13107_v6, %v9761_v58  ;;  %v10518_v58 = vadd.f32 %v17857_v49, %v9764_v42 }
 0x47d   : > { %v17929_v9 = vpop.f32.mrf.mxu1 }
 0x47f   : > { %v17933_v60 = vpop.f32.mrf.mxu1 }
 0x480   : > { %18531 = vst [vmem:[#allocation50_spill] sm:$0xff] %v17933_v60  ;;  %v9762_v60 = vadd.f32 %v17849_v35, %v9375_v13  ;;  %v9763_v35 = vadd.f32 %v17855_v50, %v9376_v2  ;;  %v10519_v50 = vadd.f32 %v17869_v15, %v9765_v31  ;;  %v17975_v13 = vpop.f32.mrf.mxu0  ;;  %v9383_v2 = vadd.f32 %v17727_v62, %v17775_v22  ;;  %v18533_v62 = vld [vmem:[#allocation28_spill] sm:$0xff] }
 0x481   : > { %v13154_v44 = vpop.f32.mrf.mxu1 }
 0x482   : > { %v11012_v47 = vadd.f32 %v13154_v44, %v10514_v61  ;;  %v9381_v61 = vadd.f32 %v17696_v45, %v17750_v33  ;;  %v10516_v53 = vadd.f32 %v17863_v0, %v9762_v60  ;;  %v10517_v0 = vadd.f32 %v17875_v25, %v9763_v35 }
 0x483   : > { %v10883_v18 = vpop.f32.mrf.mxu1  ;;  %v9770_v22 = vadd.f32 %v18533_v62, %v9383_v2 }
 0x484   : > { %v11049_v32 = vadd.f32 %v17944_v36, %v11012_v47  ;;  %v11010_v51 = vadd.f32 %v10883_v18, %v10512_v38  ;;  %v9768_v49 = vadd.f32 %v17859_v57, %v9381_v61  ;;  %v9382_v18 = vadd.f32 %v17710_v37, %v17760_v3 }
 0x485   : > { %v13155_v21 = vpop.f32.mrf.mxu1  ;;  %v9766_v57 = vadd.f32 %v17861_v54, %v9379_v52 }
 0x486   : > { %v11047_v40 = vadd.f32 %v17944_v36, %v11010_v51  ;;  %v11013_v41 = vadd.f32 %v13155_v21, %v10515_v48  ;;  %v11081_v6 = vmax.f32 %v11049_v32, 0.0  ;;  %v9769_v32 = vadd.f32 %v17865_v17, %v9382_v18  ;;  %v18538_v18 = vld [vmem:[#allocation36_spill] sm:$0xff] }
 0x487   : > { %v10886_v34 = vpop.f32.mrf.mxu1  ;;  %v9380_v51 = vadd.f32 %v17717_v28, %v17765_v24  ;;  %v10522_v37 = vadd.f32 %v17881_v30, %v9768_v49 }
 0x488   : > { %v11079_v63 = vmax.f32 %v11047_v40, 0.0  ;;  %v11050_v46 = vadd.f32 %v17944_v36, %v11013_v41  ;;  %v11011_v43 = vadd.f32 %v10886_v34, %v10513_v29  ;;  %v9385_v40 = vadd.f32 %v17722_v27, %v17770_v20  ;;  %v17988_v41 = vpop.f32.mrf.mxu0 }
 0x489   : > { %v13158_v4 = vpop.f32.mrf.mxu1  ;;  %v9767_v21 = vadd.f32 %v17867_v39, %v9380_v51  ;;  %v10520_v29 = vadd.f32 %v17887_v26, %v9766_v57  ;;  %v10523_v39 = vadd.f32 %v17893_v55, %v9769_v32  ;;  %v18540_v57 = vld [vmem:[#allocation56_spill] sm:$0xff] }
 0x48a   : > { %v11111_v8 = vmax.f32 %v11079_v63, %v11081_v6  ;;  %v11048_v44 = vadd.f32 %v17944_v36, %v11011_v43  ;;  %v11016_v56 = vadd.f32 %v13158_v4, %v10518_v58  ;;  %v11082_v38 = vmax.f32 %v11050_v46, 0.0  ;;  %v18532_v63 = vld [vmem:[#allocation54_spill] sm:$0xff]  ;;  %v18002_v26 = vpop.f32.mrf.mxu0 }
 0x48b   : > { %v10899_v47 = vpop.f32.mrf.mxu1  ;;  %v9772_v31 = vadd.f32 %v17871_v23, %v9385_v40  ;;  %v9386_v46 = vadd.f32 %v18532_v63, %v17778_v10  ;;  %v10521_v43 = vadd.f32 %v17899_v7, %v9767_v21  ;;  %v18534_v4 = vld [vmem:[#allocation34_spill] sm:$0xff]  ;;  %v18544_v21 = vld [vmem:[#allocation57_spill] sm:$0xff]  ;;  %v18548_v63 = vld [vmem:[#allocation20_spill] sm:$0xff] }
 0x48c   : > { %11127 = vst [vmem:[#allocation4] sm:$0xff] %v11111_v8  ;;  %v11080_v45 = vmax.f32 %v11048_v44, 0.0  ;;  %v11053_v33 = vadd.f32 %v17944_v36, %v11016_v56  ;;  %v11014_v42 = vadd.f32 %v10899_v47, %v10516_v53  ;;  %v18535_v44 = vld [vmem:[#allocation63_spill] sm:$0xff] }
 0x48d   : > { %v13159_v60 = vpop.f32.mrf.mxu1  ;;  %v9773_v8 = vadd.f32 %v18534_v4, %v9386_v46  ;;  %v18536_v56 = vld [vmem:[#allocation55_spill] sm:$0xff] }
 0x48e   : > { %v11112_v59 = vmax.f32 %v11080_v45, %v11082_v38  ;;  %v11051_v16 = vadd.f32 %v17944_v36, %v11014_v42  ;;  %v11017_v15 = vadd.f32 %v13159_v60, %v10519_v50  ;;  %v11085_v3 = vmax.f32 %v11053_v33, 0.0  ;;  %v18537_v50 = vld [vmem:[#allocation37_spill] sm:$0xff] }
 0x48f   : > { %v10902_v48 = vpop.f32.mrf.mxu1  ;;  %v9384_v53 = vadd.f32 %v18536_v56, %v18535_v44  ;;  %v10526_v38 = vadd.f32 %v18537_v50, %v9772_v31  ;;  %v18552_v50 = vld [vmem:[#allocation30_spill] sm:$0xff] }
 0x490   : > { %11128 = vst [vmem:[#allocation4 + $0x8] sm:$0xff] %v11112_v59  ;;  %v11083_v5 = vmax.f32 %v11051_v16, 0.0  ;;  %v11054_v25 = vadd.f32 %v17944_v36, %v11017_v15  ;;  %v11015_v54 = vadd.f32 %v10902_v48, %v10517_v0  ;;  %v18539_v0 = vld [vmem:[#allocation65_spill] sm:$0xff]  ;;  %v18015_v16 = vpop.f32.mrf.mxu0 }
 0x491   : > { %v13162_v17 = vpop.f32.mrf.mxu1  ;;  %v9771_v60 = vadd.f32 %v18538_v18, %v9384_v53  ;;  %v9389_v59 = vadd.f32 %v18540_v57, %v18539_v0 }
 0x492   : > { %v11113_v28 = vmax.f32 %v11083_v5, %v11085_v3  ;;  %v11052_v24 = vadd.f32 %v17944_v36, %v11015_v54  ;;  %v11020_v30 = vadd.f32 %v13162_v17, %v10522_v37  ;;  %v11086_v27 = vmax.f32 %v11054_v25, 0.0  ;;  %v18541_v37 = vld [vmem:[#allocation49_spill] sm:$0xff]  ;;  %v18542_v5 = vld [vmem:[#allocation18_spill] sm:$0xff] }
 0x493   : > { %v10915_v34 = vpop.f32.mrf.mxu1  ;;  %v10524_v3 = vadd.f32 %v18541_v37, %v9770_v22  ;;  %v9776_v25 = vadd.f32 %v18542_v5, %v9389_v59  ;;  %v18543_v54 = vld [vmem:[#allocation66_spill] sm:$0xff]  ;;  %v18549_v22 = vld [vmem:[#allocation32_spill] sm:$0xff]  ;;  %v18555_v59 = vld [vmem:[#allocation19_spill] sm:$0xff] }
 0x494   : > { %11129 = vst [vmem:[#allocation4 + $0x10] sm:$0xff] %v11113_v28  ;;  %v11084_v20 = vmax.f32 %v11052_v24, 0.0  ;;  %v11057_v58 = vadd.f32 %v17944_v36, %v11020_v30  ;;  %v11018_v6 = vadd.f32 %v10915_v34, %v10520_v29  ;;  %v9387_v40 = vadd.f32 %v18544_v21, %v18543_v54  ;;  %v18545_v28 = vld [vmem:[#allocation47_spill] sm:$0xff]  ;;  %v18546_v34 = vld [vmem:[#allocation14_spill] sm:$0xff] }
 0x495   : > { %v13163_v23 = vpop.f32.mrf.mxu1  ;;  %v10527_v24 = vadd.f32 %v18545_v28, %v9773_v8  ;;  %v18559_v28 = vld [vmem:[#allocation61_spill] sm:$0xff] }
 0x496   : > { %v11114_v35 = vmax.f32 %v11084_v20, %v11086_v27  ;;  %v11055_v55 = vadd.f32 %v17944_v36, %v11018_v6  ;;  %v11021_v61 = vadd.f32 %v13163_v23, %v10523_v39  ;;  %v11089_v47 = vmax.f32 %v11057_v58, 0.0  ;;  %v18547_v39 = vld [vmem:[#allocation58_spill] sm:$0xff]  ;;  %v18029_v20 = vpop.f32.mrf.mxu0 }
 0x497   : > { %v11143_v49 = vld [vmem:[#allocation4] ss:$2 sm:$0xff]  ;;  %v11159_v52 = vld [vmem:[#allocation4 + $0x1] ss:$2 sm:$0xff]  ;;  %v10918_v10 = vpop.f32.mrf.mxu1  ;;  %v9390_v27 = vadd.f32 %v18547_v39, %v18546_v34  ;;  %v10525_v6 = vadd.f32 %v17927_v12, %v9771_v60  ;;  %v9774_v46 = vadd.f32 %v18548_v63, %v9387_v40  ;;  %v18561_v39 = vld [vmem:[#allocation42_spill] sm:$0xff] }
 0x498   : > { %v11174_v45 = vmax.f32 %v11143_v49, %v11159_v52  ;;  %11130 = vst [vmem:[#allocation4 + $0x18] sm:$0xff] %v11114_v35  ;;  %v11087_v7 = vmax.f32 %v11055_v55, 0.0  ;;  %v11058_v33 = vadd.f32 %v17944_v36, %v11021_v61  ;;  %v11019_v42 = vadd.f32 %v10918_v10, %v10521_v43  ;;  %v18550_v55 = vld [vmem:[#allocation68_spill] sm:$0xff]  ;;  %v18551_v61 = vld [vmem:[#allocation59_spill] sm:$0xff] }
 0x499   : > { %v13166_v15 = vpop.f32.mrf.mxu1  ;;  %v9777_v35 = vadd.f32 %v18549_v22, %v9390_v27  ;;  %v9388_v4 = vadd.f32 %v18551_v61, %v18550_v55  ;;  %v10530_v49 = vadd.f32 %v17939_v19, %v9776_v25  ;;  %v10528_v19 = vadd.f32 %v17951_v14, %v9774_v46 }
 0x49a   : > { %11182 = vst [vmem:[%s18017_s27] sm:$0xff] %v11174_v45  ;;  %v11115_v32 = vmax.f32 %v11087_v7, %v11089_v47  ;;  %v11056_v51 = vadd.f32 %v17944_v36, %v11019_v42  ;;  %v11024_v48 = vadd.f32 %v13166_v15, %v10526_v38  ;;  %v11090_v30 = vmax.f32 %v11058_v33, 0.0  ;;  %v18040_v45 = vpop.f32.mrf.mxu0  ;;  %v18553_v7 = vld [vmem:[#allocation12_spill] sm:$0xff] }
 0x49b   : > { %v10931_v17 = vpop.f32.mrf.mxu1  ;;  %v9775_v38 = vadd.f32 %v18552_v50, %v9388_v4  ;;  %v18554_v33 = vld [vmem:[#allocation60_spill] sm:$0xff]  ;;  %v18567_v50 = vld [vmem:[#allocation29_spill] sm:$0xff] }
 0x49c   : > { %11131 = vst [vmem:[#allocation4 + $0x20] sm:$0xff] %v11115_v32  ;;  %v11088_v29 = vmax.f32 %v11056_v51, 0.0  ;;  %v11061_v31 = vadd.f32 %v17944_v36, %v11024_v48  ;;  %v11022_v2 = vadd.f32 %v10931_v17, %v10524_v3  ;;  %v9393_v42 = vadd.f32 %v18554_v33, %v18553_v7  ;;  %v18556_v32 = vld [vmem:[#allocation13_spill] sm:$0xff]  ;;  %v18557_v51 = vld [vmem:[#allocation62_spill] sm:$0xff]  ;;  %v18052_v40 = vpop.f32.mrf.mxu0  ;;  %v18558_v17 = vld [vmem:[#allocation43_spill] sm:$0xff] }
 0x49d   : > { %v13167_v58 = vpop.f32.mrf.mxu1  ;;  %v9391_v48 = vadd.f32 %v18557_v51, %v18556_v32  ;;  %v10531_v3 = vadd.f32 %v17964_v11, %v9777_v35  ;;  %v18568_v7 = vld [vmem:[#allocation24_spill] sm:$0xff]  ;;  %v18569_v33 = vld [vmem:[#allocation15_spill] sm:$0xff] }
 0x49e   : > { %v11116_v23 = vmax.f32 %v11088_v29, %v11090_v30  ;;  %v11059_v43 = vadd.f32 %v17944_v36, %v11022_v2  ;;  %v11025_v62 = vadd.f32 %v13167_v58, %v10527_v24  ;;  %v11093_v56 = vmax.f32 %v11061_v31, 0.0  ;;  %v18560_v29 = vld [vmem:[#allocation31_spill] sm:$0xff]  ;;  %v13131_v4 = vpop.f32.mrf.mxu0  ;;  %v18570_v32 = vld [vmem:[#allocation40_spill] sm:$0xff] }
 0x49f   : > { %v11145_v8 = vld [vmem:[#allocation4 + $0x10] ss:$2 sm:$0xff]  ;;  %v11161_v44 = vld [vmem:[#allocation4 + $0x11] ss:$2 sm:$0xff]  ;;  %v10934_v53 = vpop.f32.mrf.mxu1  ;;  %v9780_v15 = vadd.f32 %v18555_v59, %v9393_v42  ;;  %v9394_v24 = vadd.f32 %v18559_v28, %v18558_v17  ;;  %v10529_v30 = vadd.f32 %v17975_v13, %v9775_v38  ;;  %v9778_v31 = vadd.f32 %v18560_v29, %v9391_v48  ;;  %v18562_v58 = vld [vmem:[#allocation39_spill] sm:$0xff] }
 0x4a0   : > { %v11175_v52 = vmax.f32 %v11145_v8, %v11161_v44  ;;  %11132 = vst [vmem:[#allocation4 + $0x28] sm:$0xff] %v11116_v23  ;;  %v11091_v12 = vmax.f32 %v11059_v43, 0.0  ;;  %v11062_v47 = vadd.f32 %v17944_v36, %v11025_v62  ;;  %v11023_v10 = vadd.f32 %v10934_v53, %v10525_v6  ;;  %v18563_v6 = vld [vmem:[#allocation64_spill] sm:$0xff]  ;;  %v18564_v8 = vld [vmem:[#allocation21_spill] sm:$0xff]  ;;  %v18566_v53 = vld [vmem:[#allocation67_spill] sm:$0xff] }
 0x4a1   : > { %v13170_v18 = vpop.f32.mrf.mxu1  ;;  %v9781_v27 = vadd.f32 %v18561_v39, %v9394_v24  ;;  %v9392_v63 = vadd.f32 %v18563_v6, %v18562_v58  ;;  %v10534_v22 = vadd.f32 %v17988_v41, %v9780_v15  ;;  %v10532_v41 = vadd.f32 %v18002_v26, %v9778_v31  ;;  %v10484_v15 = vpop.f32.mrf.mxu0  ;;  %v18571_v51 = vld [vmem:[#allocation11_spill] sm:$0xff]  ;;  %v18575_v24 = vld [vmem:[#allocation26_spill] sm:$0xff] }
 0x4a2   : > { %11183 = vst [vmem:[%s18017_s27 + $0x8] sm:$0xff] %v11175_v52  ;;  %v11117_v60 = vmax.f32 %v11091_v12, %v11093_v56  ;;  %v11060_v0 = vadd.f32 %v17944_v36, %v11023_v10  ;;  %v11028_v57 = vadd.f32 %v13170_v18, %v10530_v49  ;;  %v11094_v5 = vmax.f32 %v11062_v47, 0.0  ;;  %v18565_v56 = vld [vmem:[#allocation17_spill] sm:$0xff]  ;;  %v18574_v28 = vld [vmem:[#allocation27_spill] sm:$0xff]  ;;  %v18576_v6 = vld [vmem:[#allocation46_spill] sm:$0xff] }
 0x4a3   : > { %v10947_v37 = vpop.f32.mrf.mxu1  ;;  %v9779_v44 = vadd.f32 %v18564_v8, %v9392_v63  ;;  %v9397_v49 = vadd.f32 %v18566_v53, %v18565_v56  ;;  %v9395_v42 = vadd.f32 %v18569_v33, %v18568_v7  ;;  %v9398_v48 = vadd.f32 %v18571_v51, %v18570_v32  ;;  %v18580_v8 = vld [vmem:[#allocation23_spill] sm:$0xff] }
 0x4a4   : > { %11133 = vst [vmem:[#allocation4 + $0x30] sm:$0xff] %v11117_v60  ;;  %v11092_v25 = vmax.f32 %v11060_v0, 0.0  ;;  %v11065_v54 = vadd.f32 %v17944_v36, %v11028_v57  ;;  %v11026_v21 = vadd.f32 %v10947_v37, %v10528_v19  ;;  %v10535_v60 = vadd.f32 %v18015_v16, %v9781_v27  ;;  %v18573_v16 = vld [vmem:[#allocation45_spill] sm:$0xff] }
 0x4a5   : > { %v13171_v14 = vpop.f32.mrf.mxu1  ;;  %v9784_v38 = vadd.f32 %v18567_v50, %v9397_v49  ;;  %v10533_v26 = vadd.f32 %v18029_v20, %v9779_v44  ;;  %v9785_v17 = vadd.f32 %v18573_v16, %v9398_v48  ;;  %v18581_v44 = vld [vmem:[#allocation38_spill] sm:$0xff]  ;;  %v18582_v50 = vld [vmem:[#allocation25_spill] sm:$0xff] }
 0x4a6   : > { %v11118_v2 = vmax.f32 %v11092_v25, %v11094_v5  ;;  %v11063_v34 = vadd.f32 %v17944_v36, %v11026_v21  ;;  %v11029_v11 = vadd.f32 %v13171_v14, %v10531_v3  ;;  %v11097_v43 = vmax.f32 %v11065_v54, 0.0  ;;  %v18572_v3 = vld [vmem:[#allocation35_spill] sm:$0xff] }
 0x4a7   : > { %v11147_v46 = vld [vmem:[#allocation4 + $0x20] ss:$2 sm:$0xff]  ;;  %v11163_v23 = vld [vmem:[#allocation4 + $0x21] ss:$2 sm:$0xff]  ;;  %v10950_v62 = vpop.f32.mrf.mxu1  ;;  %v9782_v5 = vadd.f32 %v18572_v3, %v9395_v42  ;;  %v9396_v14 = vadd.f32 %v18575_v24, %v18574_v28  ;;  %v9399_v56 = vadd.f32 %v18581_v44, %v18580_v8 }
 0x4a8   : > { %v11176_v35 = vmax.f32 %v11147_v46, %v11163_v23  ;;  %11134 = vst [vmem:[#allocation4 + $0x38] sm:$0xff] %v11118_v2  ;;  %v11095_v13 = vmax.f32 %v11063_v34, 0.0  ;;  %v11066_v55 = vadd.f32 %v17944_v36, %v11029_v11  ;;  %v11027_v61 = vadd.f32 %v10950_v62, %v10529_v30  ;;  %v13134_v30 = vpop.f32.mrf.mxu0  ;;  %v18577_v46 = vld [vmem:[#allocation33_spill] sm:$0xff]  ;;  %v18578_v23 = vld [vmem:[#allocation16_spill] sm:$0xff] }
 0x4a9   : > { %v13174_v52 = vpop.f32.mrf.mxu1  ;;  %v10538_v11 = vadd.f32 %v18040_v45, %v9784_v38  ;;  %v9783_v63 = vadd.f32 %v18576_v6, %v9396_v14  ;;  %v18579_v45 = vld [vmem:[#allocation48_spill] sm:$0xff]  ;;  %v18583_v38 = vld [vmem:[#allocation22_spill] sm:$0xff] }
 0x4aa   : > { %11184 = vst [vmem:[%s18017_s27 + $0x10] sm:$0xff] %v11176_v35  ;;  %v11119_v12 = vmax.f32 %v11095_v13, %v11097_v43  ;;  %v11064_v47 = vadd.f32 %v17944_v36, %v11027_v61  ;;  %v11032_v10 = vadd.f32 %v13174_v52, %v10534_v22  ;;  %v11098_v0 = vmax.f32 %v11066_v55, 0.0  ;;  %v10497_v53 = vpop.f32.mrf.mxu0 }
 0x4ab   : > { %v10963_v18 = vpop.f32.mrf.mxu1  ;;  %v9401_v43 = vadd.f32 %v18578_v23, %v18577_v46  ;;  %v10536_v55 = vadd.f32 %v18052_v40, %v9782_v5  ;;  %v10539_v52 = vadd.f32 %v13131_v4, %v9785_v17  ;;  %v9402_v7 = vadd.f32 %v18583_v38, %v18582_v50 }
 0x4ac   : > { %11135 = vst [vmem:[#allocation4 + $0x40] sm:$0xff] %v11119_v12  ;;  %v11096_v57 = vmax.f32 %v11064_v47, 0.0  ;;  %v11069_v19 = vadd.f32 %v17944_v36, %v11032_v10  ;;  %v11030_v59 = vadd.f32 %v10963_v18, %v10532_v41  ;;  %v10537_v42 = vadd.f32 %v10484_v15, %v9783_v63  ;;  %v13135_v51 = vpop.f32.mrf.mxu0 }
 0x4ad   : > { %v13175_v37 = vpop.f32.mrf.mxu1  ;;  %v9788_v61 = vadd.f32 %v18579_v45, %v9401_v43  ;;  %v9786_v40 = vadd.f32 %v17923_v1, %v9399_v56  ;;  %v9789_v4 = vadd.f32 %v17929_v9, %v9402_v7 }
 0x4ae   : > { %v11120_v25 = vmax.f32 %v11096_v57, %v11098_v0  ;;  %v11067_v54 = vadd.f32 %v17944_v36, %v11030_v59  ;;  %v11033_v21 = vadd.f32 %v13175_v37, %v10535_v60  ;;  %v11101_v2 = vmax.f32 %v11069_v19, 0.0  ;;  %v18584_v19 = vld [vmem:[#allocation44_spill] sm:$0xff]  ;;  %v18585_v59 = vld [vmem:[#allocation41_spill] sm:$0xff] }
 0x4af   : > { %v11149_v29 = vld [vmem:[#allocation4 + $0x30] ss:$2 sm:$0xff]  ;;  %v11165_v31 = vld [vmem:[#allocation4 + $0x31] ss:$2 sm:$0xff]  ;;  %v10966_v34 = vpop.f32.mrf.mxu1  ;;  %v10542_v57 = vadd.f32 %v13134_v30, %v9788_v61  ;;  %v9400_v32 = vadd.f32 %v18585_v59, %v18584_v19  ;;  %v10540_v17 = vadd.f32 %v10497_v53, %v9786_v40  ;;  %v10543_v14 = vadd.f32 %v13135_v51, %v9789_v4  ;;  %v10500_v30 = vpop.f32.mrf.mxu0 }
 0x4b0   : > { %v11177_v20 = vmax.f32 %v11149_v29, %v11165_v31  ;;  %11136 = vst [vmem:[#allocation4 + $0x48] sm:$0xff] %v11120_v25  ;;  %v11099_v39 = vmax.f32 %v11067_v54, 0.0  ;;  %v11070_v27 = vadd.f32 %v17944_v36, %v11033_v21  ;;  %v11031_v58 = vadd.f32 %v10966_v34, %v10533_v26  ;;  %v18586_v54 = vld [vmem:[#allocation50_spill] sm:$0xff] }
 0x4b1   : > { %v13178_v62 = vpop.f32.mrf.mxu1  ;;  %v9787_v21 = vadd.f32 %v18586_v54, %v9400_v32 }
 0x4b2   : > { %11185 = vst [vmem:[%s18017_s27 + $0x18] sm:$0xff] %v11177_v20  ;;  %v11121_v22 = vmax.f32 %v11099_v39, %v11101_v2  ;;  %v11068_v35 = vadd.f32 %v17944_v36, %v11031_v58  ;;  %v11036_v13 = vadd.f32 %v13178_v62, %v10538_v11  ;;  %v11102_v12 = vmax.f32 %v11070_v27, 0.0 }
 0x4b3   : > { %v10979_v49 = vpop.f32.mrf.mxu1  ;;  %v10541_v39 = vadd.f32 %v10500_v30, %v9787_v21 }
 0x4b4   : > { %11137 = vst [vmem:[#allocation4 + $0x50] sm:$0xff] %v11121_v22  ;;  %v11100_v47 = vmax.f32 %v11068_v35, 0.0  ;;  %v11073_v10 = vadd.f32 %v17944_v36, %v11036_v13  ;;  %v11034_v41 = vadd.f32 %v10979_v49, %v10536_v55 }
 0x4b5   : > { %v13179_v33 = vpop.f32.mrf.mxu1 }
 0x4b6   : > { %v11122_v18 = vmax.f32 %v11100_v47, %v11102_v12  ;;  %v11071_v60 = vadd.f32 %v17944_v36, %v11034_v41  ;;  %v11037_v0 = vadd.f32 %v13179_v33, %v10539_v52  ;;  %v11105_v26 = vmax.f32 %v11073_v10, 0.0 }
 0x4b7   : > { %v11151_v48 = vld [vmem:[#allocation4 + $0x40] ss:$2 sm:$0xff]  ;;  %v11167_v37 = vld [vmem:[#allocation4 + $0x41] ss:$2 sm:$0xff]  ;;  %v10982_v3 = vpop.f32.mrf.mxu1 }
 0x4b8   : > { %v11178_v5 = vmax.f32 %v11151_v48, %v11167_v37  ;;  %11138 = vst [vmem:[#allocation4 + $0x58] sm:$0xff] %v11122_v18  ;;  %v11103_v15 = vmax.f32 %v11071_v60, 0.0  ;;  %v11074_v1 = vadd.f32 %v17944_v36, %v11037_v0  ;;  %v11035_v25 = vadd.f32 %v10982_v3, %v10537_v42 }
 0x4b9   : > { %v13182_v16 = vpop.f32.mrf.mxu1 }
 0x4ba   : > { %11186 = vst [vmem:[%s18017_s27 + $0x20] sm:$0xff] %v11178_v5  ;;  %v11123_v9 = vmax.f32 %v11103_v15, %v11105_v26  ;;  %v11072_v28 = vadd.f32 %v17944_v36, %v11035_v25  ;;  %v11040_v24 = vadd.f32 %v13182_v16, %v10542_v57  ;;  %v11106_v31 = vmax.f32 %v11074_v1, 0.0 }
 0x4bb   : > { %v10995_v29 = vpop.f32.mrf.mxu1 }
 0x4bc   : > { %11139 = vst [vmem:[#allocation4 + $0x60] sm:$0xff] %v11123_v9  ;;  %v11104_v2 = vmax.f32 %v11072_v28, 0.0  ;;  %v11077_v34 = vadd.f32 %v17944_v36, %v11040_v24  ;;  %v11038_v11 = vadd.f32 %v10995_v29, %v10540_v17 }
 0x4bd   : > { %v13183_v20 = vpop.f32.mrf.mxu1 }
 0x4be   : > { %v11124_v27 = vmax.f32 %v11104_v2, %v11106_v31  ;;  %v11075_v58 = vadd.f32 %v17944_v36, %v11038_v11  ;;  %v11041_v6 = vadd.f32 %v13183_v20, %v10543_v14  ;;  %v11109_v23 = vmax.f32 %v11077_v34, 0.0 }
 0x4bf   : > { %v11153_v63 = vld [vmem:[#allocation4 + $0x50] ss:$2 sm:$0xff]  ;;  %v11169_v46 = vld [vmem:[#allocation4 + $0x51] ss:$2 sm:$0xff]  ;;  %v10998_v43 = vpop.f32.mrf.mxu1 }
 0x4c0   : > { %v11179_v62 = vmax.f32 %v11153_v63, %v11169_v46  ;;  %11140 = vst [vmem:[#allocation4 + $0x68] sm:$0xff] %v11124_v27  ;;  %v11107_v22 = vmax.f32 %v11075_v58, 0.0  ;;  %v11078_v35 = vadd.f32 %v17944_v36, %v11041_v6  ;;  %v11039_v13 = vadd.f32 %v10998_v43, %v10541_v39 }
 0x4c2   : > { %11187 = vst [vmem:[%s18017_s27 + $0x28] sm:$0xff] %v11179_v62  ;;  %v11125_v55 = vmax.f32 %v11107_v22, %v11109_v23  ;;  %v11076_v45 = vadd.f32 %v17944_v36, %v11039_v13  ;;  %v11110_v61 = vmax.f32 %v11078_v35, 0.0 }
 0x4c4   : > { %11141 = vst [vmem:[#allocation4 + $0x70] sm:$0xff] %v11125_v55  ;;  %v11108_v8 = vmax.f32 %v11076_v45, 0.0 }
 0x4c6   : > { %v11126_v44 = vmax.f32 %v11108_v8, %v11110_v61 }
 0x4c7   : > { %v11155_v56 = vld [vmem:[#allocation4 + $0x60] ss:$2 sm:$0xff]  ;;  %v11171_v53 = vld [vmem:[#allocation4 + $0x61] ss:$2 sm:$0xff] }
 0x4c8   : > { %v11180_v49 = vmax.f32 %v11155_v56, %v11171_v53  ;;  %11142 = vst [vmem:[#allocation4 + $0x78] sm:$0xff] %v11126_v44 }
 0x4ca   : > { %11188 = vst [vmem:[%s18017_s27 + $0x30] sm:$0xff] %v11180_v49 }
 0x4cf   : > { %v11157_v52 = vld [vmem:[#allocation4 + $0x70] ss:$2 sm:$0xff]  ;;  %v11173_v12 = vld [vmem:[#allocation4 + $0x71] ss:$2 sm:$0xff] }
 0x4d0   : > { %v11181_v36 = vmax.f32 %v11157_v52, %v11173_v12 }
 0x4d2   : > { %11189 = vst [vmem:[%s18017_s27 + $0x38] sm:$0xff] %v11181_v36 }
 0x4d3   : > { %13544 = shalt.err (!%p13541_p0)
}
 0x4d4   : > { %s13545_s10 = scalar_lea.hbm %s18117_s5, 1024  ;;  %s13549_s19 = scalar_lea.hbm %s18167_s3, 2048 }
 0x4d5   : > { %p13546_p1 = scmp.ne.s32.totalorder %s18117_s5, %s13545_s10  ;;  %p13550_p4 = scmp.lt.s32.totalorder %s18117_s5, %s18167_s3 }
 0x4d6   : > { %p13551_p7 = scmp.lt.s32.totalorder %s13549_s19, %s13545_s10 }
 0x4d7   : > { %p13547_p2 = pnand %p13546_p1, %p13662_p5 }
 0x4d8   : > { %p13552_p6 = por %p13551_p7, %p13550_p4 }
 0x4d9   : > { %p13548_p3 = pneg %p13547_p2 }
 0x4db   : > { %p13553_p8 = pnand %p13552_p6, %p13548_p3 }
 0x4dd   : > { %13556 = shalt.err (!%p13553_p8)
}
 0x4de   : > { %s13602_s25 = smov 128   ;;  %s13603_s26 = smov 8  }
 0x4df   : > { %13188 = dma.vmem_to_hbm [thread:$0]  (%p13662_p5), %s18119_s29, 1024, %s18117_s5, %s18124_s6, %s13602_s25, %s13602_s25, %s13603_s26  }
 0x4e0 PF: > { %p13200_p9 = scmp.ge.s32.totalorder %s13595_s15, 2  ;;  %s11219_s27 = sand.u32 1, %s13583_s12  }
 0x4e1   : > { %p18587_p10 = scmp.ne.s32.totalorder %s18194_s23, 0  ;;  %s11220_s28 = scalar_lea.sflag [#allocation7], %s11219_s27 }
 0x4e3   : > { %p13195_p11 = pnand %p13200_p9, %p18587_p10 }
 0x4e5   : > { %p13196_p12 = pneg %p13195_p11 }
 0x4e7   : > { %13578 = dma.done.wait (%p13196_p12), %s11220_s28, 1024  }
 0x4e8   : > { %13580 = vsyncadd (%p13196_p12), %s11220_s28, 4294966272  ;;  %p14_p13 = scmp.ge.s32.totalorder %s13649_s18, 4   ;;  %s18588_s12 = smov %s13587_s13 }
 0x4e9   : > { %s18589_s13 = smov %s13591_s14  ;;  %s18590_s14 = smov %s13660_s21 }
 0x4ea   : > { %s18591_s15 = smov %s13649_s18  ;;  %16 = sbr.rel (!%p14_p13) target bundleno = 4 (0x4), region = 109 }
 0x4ef   :  { %11225 = vsyncpa [#allocation6], 1 }
 0x4f0   :  { %11227 = vsyncpa [#allocation6 + $0x1], 1 }
 0x4f1   :  { %11228 = vsyncpa [#allocation7], 1 }
 0x4f2   :  { %11230 = vsyncpa [#allocation7 + $0x1], 1 }

</bundles_post_ra>
